<compile_context>
chip_gen: v6e
topology: v6e:2x2x1
jax: 0.10.0
libtpu: 0.0.40
codegen_flags: <defaults>
</compile_context>

<pallas_src>
import math

import jax
import jax.numpy as jnp
import numpy as np
from jax.experimental import pallas as pl
from jax.experimental.pallas import tpu as pltpu

N_HEAD = 8
LN_EPS = 1e-5
LANE = 128


def _round_up(x, m):
    return ((x + m - 1) // m) * m


# ----------------------------------------------------------------------------
# Parameter preparation (host side, once): transpose PyTorch Linear weights to
# x @ W form, fold the attention scale into Wq/bq, fuse [Wq|Wk|Wv], drop the
# (softmax-inert) K bias, zero-pad the channel dim to a lane-dense multiple of
# 128, cast matmul weights to bf16, and precompute the head-Gram matrix G.
# ----------------------------------------------------------------------------
def prepare_encode_params(in_w, in_b, out_w, out_b, l1_w, l1_b, l2_w, l2_b,
                          ln1_g, ln1_b, ln2_g, ln2_b, *, n_head=N_HEAD):
    C = out_w.shape[0]
    assert C % n_head == 0
    hd = C // n_head
    scale = 1.0 / math.sqrt(hd)
    Cp = max(LANE, _round_up(C, LANE))

    def pad_mat(w):  # (C, C) -> (Cp, Cp), zero padded
        return jnp.pad(w, ((0, Cp - C), (0, Cp - C)))

    def pad_vec(v):  # (C,) -> (Cp,)
        return jnp.pad(v, (0, Cp - C))

    Wq = pad_mat(in_w[:C].T * scale)          # attention scale folded into Wq/bq
    Wk = pad_mat(in_w[C:2 * C].T)
    Wv = pad_mat(in_w[2 * C:].T)
    wqkv = jnp.concatenate([Wq, Wk, Wv], axis=1).astype(jnp.bfloat16)  # (Cp,3Cp)
    w3 = jnp.stack([pad_mat(out_w.T), pad_mat(l1_w.T),
                    pad_mat(l2_w.T)]).astype(jnp.bfloat16)             # (3,Cp,Cp)

    bq = pad_vec(in_b[:C] * scale)
    bv = pad_vec(in_b[2 * C:])                # K bias dropped: softmax-inert
    cmask = (jnp.arange(Cp) < C).astype(jnp.float32)
    vec = jnp.stack([bq, pad_vec(out_b), pad_vec(l1_b), pad_vec(l2_b),
                     pad_vec(ln1_g), pad_vec(ln1_b), pad_vec(ln2_g),
                     pad_vec(ln2_b), cmask, bv]).astype(jnp.float32)   # (10,Cp)

    # Head-Gram matrix: G[c', c] = 1 iff c' and c are real channels of the
    # same head.  (qp*kp) @ G == per-head score broadcast over that head's
    # channels, so the softmax stats can be carried directly at (Pt, Cp).
    idx = np.arange(Cp)
    same_head = (idx[:, None] // hd) == (idx[None, :] // hd)
    real = (idx[:, None] < C) & (idx[None, :] < C)
    g = jnp.asarray((same_head & real).astype(np.float32)).astype(jnp.bfloat16)

    return dict(C=C, Cp=Cp, n_head=n_head, wqkv=wqkv, w3=w3, vec=vec, g=g)


# ----------------------------------------------------------------------------
# Pallas kernel: EncodeLayer (ego-query MHA over agents + LN + FFN + LN).
# One grid step = one (batch, position-tile) output block, lane-dense in Cp.
# ----------------------------------------------------------------------------
def _make_encode_kernel(L, Cp, C_real):
    inv_c = 1.0 / float(C_real)

    def layer_norm(x, cmask, g, b):
        # x is zero on padded lanes; mask the deviation so padded lanes do not
        # contribute to the variance, and divide by the real channel count.
        mu = jnp.sum(x, axis=-1, keepdims=True) * inv_c
        d = (x - mu) * cmask
        var = jnp.sum(d * d, axis=-1, keepdims=True) * inv_c
        return d * jax.lax.rsqrt(var + LN_EPS) * g + b

    def kernel(nvalid_ref, kv_ref, wqkv_ref, g_ref, w3_ref, vec_ref,
               o_ref, m_sc, l_sc, acc_sc):
        b = pl.program_id(0)
        nv = nvalid_ref[b]                    # valid agents for this batch

        bq = vec_ref[0:1]                     # (1, Cp)

        # --- ego agent: fused Q/K/V projection, one (Pt,Cp)@(Cp,3Cp) matmul
        qkv = jnp.dot(kv_ref[0, 0], wqkv_ref[...],
                      preferred_element_type=jnp.float32)
        qp = qkv[:, :Cp] + bq                 # 1/sqrt(hd) folded into Wq/bq
        kp = qkv[:, Cp:2 * Cp]                # K bias dropped (softmax-inert)
        vp = qkv[:, 2 * Cp:]                  # V bias added after the loop

        s0 = jnp.dot((qp * kp).astype(jnp.bfloat16), g_ref[...],
                     preferred_element_type=jnp.float32)      # (Pt, Cp)
        m_sc[...] = s0                        # running max (per head, bcast)
        l_sc[...] = jnp.ones_like(s0)         # running denominator
        acc_sc[...] = vp                      # running numerator

        # --- online softmax over agents; padded agents are skipped entirely
        for n in range(1, L):
            @pl.when(n < nv)
            def _():
                kvp = jnp.dot(kv_ref[0, n], wqkv_ref[:, pl.ds(Cp, 2 * Cp)],
                              preferred_element_type=jnp.float32)
                kp_n = kvp[:, :Cp]
                vp_n = kvp[:, Cp:]
                sn = jnp.dot((qp * kp_n).astype(jnp.bfloat16), g_ref[...],
                             preferred_element_type=jnp.float32)
                m_old = m_sc[...]
                m_new = jnp.maximum(m_old, sn)
                alpha = jnp.exp(m_old - m_new)
                p = jnp.exp(sn - m_new)
                l_sc[...] = alpha * l_sc[...] + p
                acc_sc[...] = alpha * acc_sc[...] + p * vp_n
                m_sc[...] = m_new

        bo, b1, b2 = vec_ref[1:2], vec_ref[2:3], vec_ref[3:4]
        g1, be1, g2, be2 = vec_ref[4:5], vec_ref[5:6], vec_ref[6:7], vec_ref[7:8]
        cmask, bv = vec_ref[8:9], vec_ref[9:10]

        # Exact normalization (no approx reciprocal).  Softmax weights sum to
        # one over agents, so the V bias is added once here.
        ctx = acc_sc[...] / l_sc[...] + bv
        ctx = jnp.dot(ctx.astype(jnp.bfloat16), w3_ref[0],
                      preferred_element_type=jnp.float32) + bo

        q_f32 = kv_ref[0, 0].astype(jnp.float32)   # residual, loaded late
        y1 = layer_norm(q_f32 + ctx, cmask, g1, be1)          # norm1(res+attn)
        h = jnp.maximum(jnp.dot(y1.astype(jnp.bfloat16), w3_ref[1],
                                preferred_element_type=jnp.float32) + b1, 0.0)
        ff = jnp.dot(h.astype(jnp.bfloat16), w3_ref[2],
                     preferred_element_type=jnp.float32) + b2
        y2 = layer_norm(y1 + ff, cmask, g2, be2)               # norm2(res+ffn)
        o_ref[0] = y2.astype(o_ref.dtype)

    return kernel


def _vmem_budget_bytes(L, p_tile, Cp):
    bf16, f32 = 2, 4
    kv_in = 2 * L * p_tile * Cp * bf16            # double-buffered input block
    out = 2 * p_tile * Cp * bf16                  # double-buffered output block
    wts = 2 * (7 * Cp * Cp * bf16 + 10 * Cp * f32)  # wqkv + G + w3 + vec
    scratch = 3 * p_tile * Cp * f32               # m / l / acc
    temps = 16 * p_tile * Cp * f32                # qp/kp/vp/sn/... f32 temps
    est = kv_in + out + wts + scratch + temps + (8 << 20)
    # floor at the default scoped limit, cap well inside v7x's 64 MiB VMEM
    return int(min(max(est, 32 << 20), 56 << 20))


def encode_layer_fused(kv_pad, nvalid, params, *, p_tile=512):
    """kv_pad: (B, L, P_pad, Cp) bf16; nvalid: (B,) int32 -> (B, P_pad, Cp) bf16."""
    B, L, P_pad, Cp = kv_pad.shape
    p_tile = min(p_tile, P_pad)
    assert P_pad % p_tile == 0 and Cp % LANE == 0
    kernel = _make_encode_kernel(L, Cp, params["C"])
    return pl.pallas_call(
        kernel,
        out_shape=jax.ShapeDtypeStruct((B, P_pad, Cp), jnp.bfloat16),
        grid_spec=pltpu.PrefetchScalarGridSpec(
            num_scalar_prefetch=1,                       # nvalid -> SMEM
            grid=(B, P_pad // p_tile),
            in_specs=[
                pl.BlockSpec((1, L, p_tile, Cp), lambda b, p, nv: (b, 0, p, 0)),
                pl.BlockSpec((Cp, 3 * Cp), lambda b, p, nv: (0, 0)),
                pl.BlockSpec((Cp, Cp), lambda b, p, nv: (0, 0)),
                pl.BlockSpec((3, Cp, Cp), lambda b, p, nv: (0, 0, 0)),
                pl.BlockSpec((10, Cp), lambda b, p, nv: (0, 0)),
            ],
            out_specs=pl.BlockSpec((1, p_tile, Cp), lambda b, p, nv: (b, p, 0)),
            scratch_shapes=[pltpu.VMEM((p_tile, Cp), jnp.float32)] * 3,
        ),
        compiler_params=pltpu.CompilerParams(
            dimension_semantics=("parallel", "parallel"),
            vmem_limit_bytes=_vmem_budget_bytes(L, p_tile, Cp),
        ),
    )(nvalid, kv_pad, params["wqkv"], params["g"], params["w3"], params["vec"])


# ----------------------------------------------------------------------------
# warp_affine_simple glue (plain JAX): affine_grid + bilinear grid_sample,
# align_corners=False, padding_mode='zeros' (PyTorch semantics).
# ----------------------------------------------------------------------------
def affine_grid(theta, H, W):
    xs = (2.0 * jnp.arange(W, dtype=jnp.float32) + 1.0) / W - 1.0
    ys = (2.0 * jnp.arange(H, dtype=jnp.float32) + 1.0) / H - 1.0
    gx, gy = jnp.meshgrid(xs, ys)                           # (H, W) each
    base = jnp.stack([gx, gy, jnp.ones_like(gx)], axis=-1)  # (H, W, 3)
    return jnp.einsum("nij,hwj->nhwi", theta, base)         # (N, H, W, 2)


def grid_sample_bilinear(src, grid):
    N, C, H, W = src.shape
    x = grid[..., 0]
    y = grid[..., 1]
    ix = (x + 1.0) * (W * 0.5) - 0.5
    iy = (y + 1.0) * (H * 0.5) - 0.5
    ix0 = jnp.floor(ix)
    iy0 = jnp.floor(iy)
    ix1 = ix0 + 1.0
    iy1 = iy0 + 1.0
    wx1 = ix - ix0
    wx0 = 1.0 - wx1
    wy1 = iy - iy0
    wy0 = 1.0 - wy1
    bidx = jnp.arange(N)[:, None, None]

    def corner(iy_, ix_, wgt):
        valid = (ix_ >= 0) & (ix_ <= W - 1) & (iy_ >= 0) & (iy_ <= H - 1)
        ic = jnp.clip(ix_, 0, W - 1).astype(jnp.int32)
        jc = jnp.clip(iy_, 0, H - 1).astype(jnp.int32)
        v = src[bidx, :, jc, ic]                            # (N, H, W, C)
        v = jnp.where(valid[..., None], v, 0.0)
        return v * wgt[..., None]

    out = (corner(iy0, ix0, wy0 * wx0) + corner(iy0, ix1, wy0 * wx1)
           + corner(iy1, ix0, wy1 * wx0) + corner(iy1, ix1, wy1 * wx1))
    return jnp.transpose(out, (0, 3, 1, 2))                 # (N, C, H, W)


# ----------------------------------------------------------------------------
# Device-side input prep: regroup by record_len, pad agent dim to L, warp all
# agents of all batches in one vectorized call, pad P and C, cast to bf16.
# ----------------------------------------------------------------------------
def prepare_batched_kv(x, record_len, affine_matrix, params, *, p_tile=512):
    _, C, H, W = x.shape
    B, L = affine_matrix.shape[:2]
    Cp = params["Cp"]
    lens = [int(n) for n in record_len]

    # Device-side regroup (record_len is static Python metadata):
    # (sum N, C, H, W) -> (B, L, C, H, W), zero-padded agents.
    feats = jnp.zeros((B, L, C, H, W), jnp.float32)
    off = 0
    for b, n in enumerate(lens):
        feats = feats.at[b, :n].set(x[off:off + n].astype(jnp.float32))
        off += n
    nvalid = jnp.asarray([min(max(n, 1), L) for n in lens], jnp.int32)

    # Ego-row thetas; identity for padded agents (whose features are zero).
    ident = jnp.array([[1.0, 0.0, 0.0], [0.0, 1.0, 0.0]], jnp.float32)
    valid = (jnp.arange(L) < nvalid[:, None])[..., None, None]      # (B,L,1,1)
    thetas = jnp.where(valid, affine_matrix[:, 0].astype(jnp.float32), ident)

    # TODO(synk): the bilinear warp stays on the XLA gather path; a DMA-gather
    # Pallas prologue would avoid the extra HBM round trip for large maps.
    warped = grid_sample_bilinear(feats.reshape(B * L, C, H, W),
                                  affine_grid(thetas.reshape(B * L, 2, 3), H, W))

    P = H * W
    kv = jnp.transpose(warped.reshape(B, L, C, H, W), (0, 1, 3, 4, 2))
    kv = kv.reshape(B, L, P, C)

    p_tile = min(p_tile, _round_up(P, LANE))
    P_pad = _round_up(P, p_tile)
    kv = jnp.pad(kv, ((0, 0), (0, 0), (0, P_pad - P), (0, Cp - C)))
    return kv.astype(jnp.bfloat16), nvalid, P_pad, p_tile


def where2comm_fusion(x, record_len, affine_matrix, params, *, p_tile=512):
    """x: (sum(n_cav), C, H, W) -> fused (B, C, H, W) float32."""
    _, C, H, W = x.shape
    B = affine_matrix.shape[0]
    kv, nvalid, _, p_tile = prepare_batched_kv(x, record_len, affine_matrix,
                                               params, p_tile=p_tile)
    fused = encode_layer_fused(kv, nvalid, params, p_tile=p_tile)  # bf16
    fused = fused[:, :H * W, :C].astype(jnp.float32).reshape(B, H, W, C)
    return jnp.transpose(fused, (0, 3, 1, 2))


# ----------------------------------------------------------------------------
# Pure-JAX reference (same prepared bf16/padded operands) for correctness.
# ----------------------------------------------------------------------------
def encode_layer_ref(kv_b, nv, params):
    C, Cp = params["C"], params["Cp"]
    wqkv, w3, vec, G = params["wqkv"], params["w3"], params["vec"], params["g"]
    (bq, bo, b1, b2, g1, be1, g2, be2, cmask, bv) = [vec[i] for i in range(10)]
    Wo, W1, W2 = w3[0], w3[1], w3[2]

    kvs = kv_b[:nv]                                           # (nv, P, Cp) bf16
    q = kvs[0].astype(jnp.float32)
    qp = jnp.dot(kvs[0], wqkv[:, :Cp], preferred_element_type=jnp.float32) + bq
    kvp = jnp.einsum("npc,cd->npd", kvs, wqkv[:, Cp:],
                     preferred_element_type=jnp.float32)
    kp, vp = kvp[..., :Cp], kvp[..., Cp:]
    s = jnp.einsum("npc,cd->npd", (qp[None] * kp).astype(jnp.bfloat16), G,
                   preferred_element_type=jnp.float32)        # (nv, P, Cp)
    a = jax.nn.softmax(s, axis=0)
    ctx = (a * vp).sum(0) + bv
    ctx = jnp.dot(ctx.astype(jnp.bfloat16), Wo,
                  preferred_element_type=jnp.float32) + bo

    def ln(xx, g, bb):
        mu = jnp.sum(xx, axis=-1, keepdims=True) / C
        d = (xx - mu) * cmask
        var = jnp.sum(d * d, axis=-1, keepdims=True) / C
        return d / jnp.sqrt(var + LN_EPS) * g + bb

    y1 = ln(q + ctx, g1, be1)
    h = jnp.maximum(jnp.dot(y1.astype(jnp.bfloat16), W1,
                            preferred_element_type=jnp.float32) + b1, 0.0)
    y2 = ln(y1 + jnp.dot(h.astype(jnp.bfloat16), W2,
                         preferred_element_type=jnp.float32) + b2, g2, be2)
    return y2                                                 # (P_pad, Cp)


if __name__ == "__main__":
    key = jax.random.PRNGKey(0)
    B, L = 2, 3
    C, H, W = 32, 16, 16
    record_len = [2, 3]
    total = sum(record_len)

    ks = jax.random.split(key, 16)

    def init(k, shape, s=0.1):
        return (s * jax.random.normal(k, shape)).astype(jnp.float32)

    # Deterministic synthetic parameters for EncodeLayer(feature_dims=C):
    in_w = init(ks[0], (3 * C, C))            # MHA in_proj_weight
    in_b = init(ks[1], (3 * C,))              # MHA in_proj_bias
    out_w = init(ks[2], (C, C))               # MHA out_proj
    out_b = init(ks[3], (C,))
    l1_w = init(ks[4], (C, C))                # linear1
    l1_b = init(ks[5], (C,))
    l2_w = init(ks[6], (C, C))                # linear2
    l2_b = init(ks[7], (C,))
    ln1_g = 1.0 + init(ks[8], (C,))
    ln1_b = init(ks[9], (C,))
    ln2_g = 1.0 + init(ks[10], (C,))
    ln2_b = init(ks[11], (C,))

    params = prepare_encode_params(in_w, in_b, out_w, out_b, l1_w, l1_b,
                                   l2_w, l2_b, ln1_g, ln1_b, ln2_g, ln2_b,
                                   n_head=N_HEAD)

    x = init(ks[12], (total, C, H, W), s=1.0)
    aff = jnp.tile(jnp.array([[1.0, 0.0, 0.0], [0.0, 1.0, 0.0]], jnp.float32),
                   (B, L, L, 1, 1))
    aff = aff.at[..., 2].add(0.05 * jax.random.normal(ks[13], (B, L, L, 2)))
    aff = aff.astype(jnp.float32)

    out = where2comm_fusion(x, record_len, aff, params)
    out = jax.block_until_ready(out)
    assert out.shape == (B, C, H, W), out.shape

    # Validate the Pallas hot path against a pure-JAX reference computed on the
    # same prepared (bf16, channel/position padded) operands.
    kv, nvalid, _, _ = prepare_batched_kv(x, record_len, aff, params)
    refs = []
    for b in range(B):
        r = encode_layer_ref(kv[b], int(record_len[b]), params)
        r = r[:H * W, :C].reshape(H, W, C)
        refs.append(jnp.transpose(r, (2, 0, 1)))
    ref = jnp.stack(refs).astype(jnp.bfloat16).astype(jnp.float32)
    np.testing.assert_allclose(np.asarray(out), np.asarray(ref),
                               rtol=5e-3, atol=5e-3)

    print("KERNEL_OK")
</pallas_src>

<mosaic_0001>
module attributes {stable_mosaic.version = 11 : i64} {
  func.func @kernel(%arg0: i32, %arg1: i32, %arg2: memref<2xi32, #tpu.memory_space<smem>>, %arg3: memref<1x3x256x128xbf16, #tpu.memory_space<vmem>>, %arg4: memref<128x384xbf16, #tpu.memory_space<vmem>>, %arg5: memref<128x128xbf16, #tpu.memory_space<vmem>>, %arg6: memref<3x128x128xbf16, #tpu.memory_space<vmem>>, %arg7: memref<10x128xf32, #tpu.memory_space<vmem>>, %arg8: memref<1x256x128xbf16, #tpu.memory_space<vmem>>, %arg9: memref<256x128xf32, #tpu.memory_space<vmem>>, %arg10: memref<256x128xf32, #tpu.memory_space<vmem>>, %arg11: memref<256x128xf32, #tpu.memory_space<vmem>>) attributes {dimension_semantics = [#tpu.dimension_semantics<parallel>, #tpu.dimension_semantics<parallel>], iteration_bounds = array<i64: 2, 1>, scalar_prefetch = 1 : i64, scratch_operands = 3 : i64, tpu.core_type = #tpu.core_type<tc>, window_params = [{transform_indices = @transform_0, window_bounds = array<i64: 1, 3, 256, 128>}, {pipeline_mode = #tpu.pipeline_mode<synchronous>, transform_indices = @transform_1, window_bounds = array<i64: 128, 384>}, {pipeline_mode = #tpu.pipeline_mode<synchronous>, transform_indices = @transform_2, window_bounds = array<i64: 128, 128>}, {pipeline_mode = #tpu.pipeline_mode<synchronous>, transform_indices = @transform_3, window_bounds = array<i64: 3, 128, 128>}, {pipeline_mode = #tpu.pipeline_mode<synchronous>, transform_indices = @transform_4, window_bounds = array<i64: 10, 128>}, {transform_indices = @transform_5, window_bounds = array<i64: 1, 256, 128>}]} {
    %0 = arith.index_cast %arg0 : i32 to index
    %1 = memref.load %arg2[%0] : memref<2xi32, #tpu.memory_space<smem>>
    %c0 = arith.constant 0 : index
    %c0_0 = arith.constant 0 : index
    %2 = vector.load %arg7[%c0, %c0_0] : memref<10x128xf32, #tpu.memory_space<vmem>>, vector<1x128xf32>
    %c0_1 = arith.constant 0 : index
    %c0_2 = arith.constant 0 : index
    %c0_3 = arith.constant 0 : index
    %c0_4 = arith.constant 0 : index
    %3 = vector.load %arg3[%c0_1, %c0_2, %c0_3, %c0_4] : memref<1x3x256x128xbf16, #tpu.memory_space<vmem>>, vector<1x1x256x128xbf16>
    %4 = vector.shape_cast %3 : vector<1x1x256x128xbf16> to vector<256x128xbf16>
    %c0_5 = arith.constant 0 : index
    %c0_6 = arith.constant 0 : index
    %5 = vector.load %arg4[%c0_5, %c0_6] : memref<128x384xbf16, #tpu.memory_space<vmem>>, vector<128x384xbf16>
    %cst = arith.constant dense<0.000000e+00> : vector<256x384xf32>
    %6 = tpu.matmul %4, %5, %cst {dimension_numbers = #tpu.dot_dimension_numbers<[1], [0], [0], [1], [0, 0, 1, 1], [], []>} : vector<256x128xbf16>, vector<128x384xbf16>, vector<256x384xf32> -> vector<256x384xf32>
    %7 = vector.extract_strided_slice %6 {offsets = [0, 0], sizes = [256, 128], strides = [1, 1]} : vector<256x384xf32> to vector<256x128xf32>
    %8 = vector.broadcast %2 : vector<1x128xf32> to vector<256x128xf32>
    %9 = arith.addf %7, %8 : vector<256x128xf32>
    %10 = vector.extract_strided_slice %6 {offsets = [0, 128], sizes = [256, 128], strides = [1, 1]} : vector<256x384xf32> to vector<256x128xf32>
    %11 = vector.extract_strided_slice %6 {offsets = [0, 256], sizes = [256, 128], strides = [1, 1]} : vector<256x384xf32> to vector<256x128xf32>
    %12 = arith.mulf %9, %10 : vector<256x128xf32>
    %13 = arith.truncf %12 : vector<256x128xf32> to vector<256x128xbf16>
    %c0_7 = arith.constant 0 : index
    %c0_8 = arith.constant 0 : index
    %14 = vector.load %arg5[%c0_7, %c0_8] : memref<128x128xbf16, #tpu.memory_space<vmem>>, vector<128x128xbf16>
    %cst_9 = arith.constant dense<0.000000e+00> : vector<256x128xf32>
    %15 = tpu.matmul %13, %14, %cst_9 {dimension_numbers = #tpu.dot_dimension_numbers<[1], [0], [0], [1], [0, 0, 1, 1], [], []>} : vector<256x128xbf16>, vector<128x128xbf16>, vector<256x128xf32> -> vector<256x128xf32>
    %c0_10 = arith.constant 0 : index
    %c0_11 = arith.constant 0 : index
    %16 = vector.load %arg9[%c0_10, %c0_11] : memref<256x128xf32, #tpu.memory_space<vmem>>, vector<256x128xf32>
    tpu.vector_store %arg9[%c0_10, %c0_11], %15 {strides = array<i32>} : memref<256x128xf32, #tpu.memory_space<vmem>>, vector<256x128xf32>,
    %cst_12 = arith.constant 1.000000e+00 : f32
    %17 = vector.broadcast %cst_12 : f32 to vector<256x128xf32>
    %c0_13 = arith.constant 0 : index
    %c0_14 = arith.constant 0 : index
    %18 = vector.load %arg10[%c0_13, %c0_14] : memref<256x128xf32, #tpu.memory_space<vmem>>, vector<256x128xf32>
    tpu.vector_store %arg10[%c0_13, %c0_14], %17 {strides = array<i32>} : memref<256x128xf32, #tpu.memory_space<vmem>>, vector<256x128xf32>,
    %c0_15 = arith.constant 0 : index
    %c0_16 = arith.constant 0 : index
    %19 = vector.load %arg11[%c0_15, %c0_16] : memref<256x128xf32, #tpu.memory_space<vmem>>, vector<256x128xf32>
    tpu.vector_store %arg11[%c0_15, %c0_16], %11 {strides = array<i32>} : memref<256x128xf32, #tpu.memory_space<vmem>>, vector<256x128xf32>,
    %c1_i32 = arith.constant 1 : i32
    %20 = arith.cmpi sgt, %1, %c1_i32 : i32
    %21 = arith.extui %20 : i1 to i32
    %c0_i32 = arith.constant 0 : i32
    %22 = arith.cmpi ne, %21, %c0_i32 : i32
    scf.if %22 {
      %c0_61 = arith.constant 0 : index
      %c1_62 = arith.constant 1 : index
      %c0_63 = arith.constant 0 : index
      %c0_64 = arith.constant 0 : index
      %113 = vector.load %arg3[%c0_61, %c1_62, %c0_63, %c0_64] : memref<1x3x256x128xbf16, #tpu.memory_space<vmem>>, vector<1x1x256x128xbf16>
      %114 = vector.shape_cast %113 : vector<1x1x256x128xbf16> to vector<256x128xbf16>
      %c0_65 = arith.constant 0 : index
      %c128 = arith.constant 128 : index
      %115 = vector.load %arg4[%c0_65, %c128] : memref<128x384xbf16, #tpu.memory_space<vmem>>, vector<128x256xbf16>
      %cst_66 = arith.constant dense<0.000000e+00> : vector<256x256xf32>
      %116 = tpu.matmul %114, %115, %cst_66 {dimension_numbers = #tpu.dot_dimension_numbers<[1], [0], [0], [1], [0, 0, 1, 1], [], []>} : vector<256x128xbf16>, vector<128x256xbf16>, vector<256x256xf32> -> vector<256x256xf32>
      %117 = vector.extract_strided_slice %116 {offsets = [0, 0], sizes = [256, 128], strides = [1, 1]} : vector<256x256xf32> to vector<256x128xf32>
      %118 = vector.extract_strided_slice %116 {offsets = [0, 128], sizes = [256, 128], strides = [1, 1]} : vector<256x256xf32> to vector<256x128xf32>
      %119 = arith.mulf %9, %117 : vector<256x128xf32>
      %120 = arith.truncf %119 : vector<256x128xf32> to vector<256x128xbf16>
      %c0_67 = arith.constant 0 : index
      %c0_68 = arith.constant 0 : index
      %121 = vector.load %arg5[%c0_67, %c0_68] : memref<128x128xbf16, #tpu.memory_space<vmem>>, vector<128x128xbf16>
      %cst_69 = arith.constant dense<0.000000e+00> : vector<256x128xf32>
      %122 = tpu.matmul %120, %121, %cst_69 {dimension_numbers = #tpu.dot_dimension_numbers<[1], [0], [0], [1], [0, 0, 1, 1], [], []>} : vector<256x128xbf16>, vector<128x128xbf16>, vector<256x128xf32> -> vector<256x128xf32>
      %c0_70 = arith.constant 0 : index
      %c0_71 = arith.constant 0 : index
      %123 = vector.load %arg9[%c0_70, %c0_71] : memref<256x128xf32, #tpu.memory_space<vmem>>, vector<256x128xf32>
      %124 = arith.maximumf %123, %122 : vector<256x128xf32>
      %125 = arith.subf %123, %124 : vector<256x128xf32>
      %126 = math.exp %125 : vector<256x128xf32>
      %127 = arith.subf %122, %124 : vector<256x128xf32>
      %128 = math.exp %127 : vector<256x128xf32>
      %c0_72 = arith.constant 0 : index
      %c0_73 = arith.constant 0 : index
      %129 = vector.load %arg10[%c0_72, %c0_73] : memref<256x128xf32, #tpu.memory_space<vmem>>, vector<256x128xf32>
      %130 = arith.mulf %126, %129 : vector<256x128xf32>
      %131 = arith.addf %130, %128 : vector<256x128xf32>
      %c0_74 = arith.constant 0 : index
      %c0_75 = arith.constant 0 : index
      %132 = vector.load %arg10[%c0_74, %c0_75] : memref<256x128xf32, #tpu.memory_space<vmem>>, vector<256x128xf32>
      tpu.vector_store %arg10[%c0_74, %c0_75], %131 {strides = array<i32>} : memref<256x128xf32, #tpu.memory_space<vmem>>, vector<256x128xf32>,
      %c0_76 = arith.constant 0 : index
      %c0_77 = arith.constant 0 : index
      %133 = vector.load %arg11[%c0_76, %c0_77] : memref<256x128xf32, #tpu.memory_space<vmem>>, vector<256x128xf32>
      %134 = arith.mulf %126, %133 : vector<256x128xf32>
      %135 = arith.mulf %128, %118 : vector<256x128xf32>
      %136 = arith.addf %134, %135 : vector<256x128xf32>
      %c0_78 = arith.constant 0 : index
      %c0_79 = arith.constant 0 : index
      %137 = vector.load %arg11[%c0_78, %c0_79] : memref<256x128xf32, #tpu.memory_space<vmem>>, vector<256x128xf32>
      tpu.vector_store %arg11[%c0_78, %c0_79], %136 {strides = array<i32>} : memref<256x128xf32, #tpu.memory_space<vmem>>, vector<256x128xf32>,
      %c0_80 = arith.constant 0 : index
      %c0_81 = arith.constant 0 : index
      %138 = vector.load %arg9[%c0_80, %c0_81] : memref<256x128xf32, #tpu.memory_space<vmem>>, vector<256x128xf32>
      tpu.vector_store %arg9[%c0_80, %c0_81], %124 {strides = array<i32>} : memref<256x128xf32, #tpu.memory_space<vmem>>, vector<256x128xf32>,
    } else {
    }
    %c2_i32 = arith.constant 2 : i32
    %23 = arith.cmpi sgt, %1, %c2_i32 : i32
    %24 = arith.extui %23 : i1 to i32
    %c0_i32_17 = arith.constant 0 : i32
    %25 = arith.cmpi ne, %24, %c0_i32_17 : i32
    scf.if %25 {
      %c0_61 = arith.constant 0 : index
      %c2_62 = arith.constant 2 : index
      %c0_63 = arith.constant 0 : index
      %c0_64 = arith.constant 0 : index
      %113 = vector.load %arg3[%c0_61, %c2_62, %c0_63, %c0_64] : memref<1x3x256x128xbf16, #tpu.memory_space<vmem>>, vector<1x1x256x128xbf16>
      %114 = vector.shape_cast %113 : vector<1x1x256x128xbf16> to vector<256x128xbf16>
      %c0_65 = arith.constant 0 : index
      %c128 = arith.constant 128 : index
      %115 = vector.load %arg4[%c0_65, %c128] : memref<128x384xbf16, #tpu.memory_space<vmem>>, vector<128x256xbf16>
      %cst_66 = arith.constant dense<0.000000e+00> : vector<256x256xf32>
      %116 = tpu.matmul %114, %115, %cst_66 {dimension_numbers = #tpu.dot_dimension_numbers<[1], [0], [0], [1], [0, 0, 1, 1], [], []>} : vector<256x128xbf16>, vector<128x256xbf16>, vector<256x256xf32> -> vector<256x256xf32>
      %117 = vector.extract_strided_slice %116 {offsets = [0, 0], sizes = [256, 128], strides = [1, 1]} : vector<256x256xf32> to vector<256x128xf32>
      %118 = vector.extract_strided_slice %116 {offsets = [0, 128], sizes = [256, 128], strides = [1, 1]} : vector<256x256xf32> to vector<256x128xf32>
      %119 = arith.mulf %9, %117 : vector<256x128xf32>
      %120 = arith.truncf %119 : vector<256x128xf32> to vector<256x128xbf16>
      %c0_67 = arith.constant 0 : index
      %c0_68 = arith.constant 0 : index
      %121 = vector.load %arg5[%c0_67, %c0_68] : memref<128x128xbf16, #tpu.memory_space<vmem>>, vector<128x128xbf16>
      %cst_69 = arith.constant dense<0.000000e+00> : vector<256x128xf32>
      %122 = tpu.matmul %120, %121, %cst_69 {dimension_numbers = #tpu.dot_dimension_numbers<[1], [0], [0], [1], [0, 0, 1, 1], [], []>} : vector<256x128xbf16>, vector<128x128xbf16>, vector<256x128xf32> -> vector<256x128xf32>
      %c0_70 = arith.constant 0 : index
      %c0_71 = arith.constant 0 : index
      %123 = vector.load %arg9[%c0_70, %c0_71] : memref<256x128xf32, #tpu.memory_space<vmem>>, vector<256x128xf32>
      %124 = arith.maximumf %123, %122 : vector<256x128xf32>
      %125 = arith.subf %123, %124 : vector<256x128xf32>
      %126 = math.exp %125 : vector<256x128xf32>
      %127 = arith.subf %122, %124 : vector<256x128xf32>
      %128 = math.exp %127 : vector<256x128xf32>
      %c0_72 = arith.constant 0 : index
      %c0_73 = arith.constant 0 : index
      %129 = vector.load %arg10[%c0_72, %c0_73] : memref<256x128xf32, #tpu.memory_space<vmem>>, vector<256x128xf32>
      %130 = arith.mulf %126, %129 : vector<256x128xf32>
      %131 = arith.addf %130, %128 : vector<256x128xf32>
      %c0_74 = arith.constant 0 : index
      %c0_75 = arith.constant 0 : index
      %132 = vector.load %arg10[%c0_74, %c0_75] : memref<256x128xf32, #tpu.memory_space<vmem>>, vector<256x128xf32>
      tpu.vector_store %arg10[%c0_74, %c0_75], %131 {strides = array<i32>} : memref<256x128xf32, #tpu.memory_space<vmem>>, vector<256x128xf32>,
      %c0_76 = arith.constant 0 : index
      %c0_77 = arith.constant 0 : index
      %133 = vector.load %arg11[%c0_76, %c0_77] : memref<256x128xf32, #tpu.memory_space<vmem>>, vector<256x128xf32>
      %134 = arith.mulf %126, %133 : vector<256x128xf32>
      %135 = arith.mulf %128, %118 : vector<256x128xf32>
      %136 = arith.addf %134, %135 : vector<256x128xf32>
      %c0_78 = arith.constant 0 : index
      %c0_79 = arith.constant 0 : index
      %137 = vector.load %arg11[%c0_78, %c0_79] : memref<256x128xf32, #tpu.memory_space<vmem>>, vector<256x128xf32>
      tpu.vector_store %arg11[%c0_78, %c0_79], %136 {strides = array<i32>} : memref<256x128xf32, #tpu.memory_space<vmem>>, vector<256x128xf32>,
      %c0_80 = arith.constant 0 : index
      %c0_81 = arith.constant 0 : index
      %138 = vector.load %arg9[%c0_80, %c0_81] : memref<256x128xf32, #tpu.memory_space<vmem>>, vector<256x128xf32>
      tpu.vector_store %arg9[%c0_80, %c0_81], %124 {strides = array<i32>} : memref<256x128xf32, #tpu.memory_space<vmem>>, vector<256x128xf32>,
    } else {
    }
    %c1 = arith.constant 1 : index
    %c0_18 = arith.constant 0 : index
    %26 = vector.load %arg7[%c1, %c0_18] : memref<10x128xf32, #tpu.memory_space<vmem>>, vector<1x128xf32>
    %c2 = arith.constant 2 : index
    %c0_19 = arith.constant 0 : index
    %27 = vector.load %arg7[%c2, %c0_19] : memref<10x128xf32, #tpu.memory_space<vmem>>, vector<1x128xf32>
    %c3 = arith.constant 3 : index
    %c0_20 = arith.constant 0 : index
    %28 = vector.load %arg7[%c3, %c0_20] : memref<10x128xf32, #tpu.memory_space<vmem>>, vector<1x128xf32>
    %c4 = arith.constant 4 : index
    %c0_21 = arith.constant 0 : index
    %29 = vector.load %arg7[%c4, %c0_21] : memref<10x128xf32, #tpu.memory_space<vmem>>, vector<1x128xf32>
    %c5 = arith.constant 5 : index
    %c0_22 = arith.constant 0 : index
    %30 = vector.load %arg7[%c5, %c0_22] : memref<10x128xf32, #tpu.memory_space<vmem>>, vector<1x128xf32>
    %c6 = arith.constant 6 : index
    %c0_23 = arith.constant 0 : index
    %31 = vector.load %arg7[%c6, %c0_23] : memref<10x128xf32, #tpu.memory_space<vmem>>, vector<1x128xf32>
    %c7 = arith.constant 7 : index
    %c0_24 = arith.constant 0 : index
    %32 = vector.load %arg7[%c7, %c0_24] : memref<10x128xf32, #tpu.memory_space<vmem>>, vector<1x128xf32>
    %c8 = arith.constant 8 : index
    %c0_25 = arith.constant 0 : index
    %33 = vector.load %arg7[%c8, %c0_25] : memref<10x128xf32, #tpu.memory_space<vmem>>, vector<1x128xf32>
    %c9 = arith.constant 9 : index
    %c0_26 = arith.constant 0 : index
    %34 = vector.load %arg7[%c9, %c0_26] : memref<10x128xf32, #tpu.memory_space<vmem>>, vector<1x128xf32>
    %c0_27 = arith.constant 0 : index
    %c0_28 = arith.constant 0 : index
    %35 = vector.load %arg11[%c0_27, %c0_28] : memref<256x128xf32, #tpu.memory_space<vmem>>, vector<256x128xf32>
    %c0_29 = arith.constant 0 : index
    %c0_30 = arith.constant 0 : index
    %36 = vector.load %arg10[%c0_29, %c0_30] : memref<256x128xf32, #tpu.memory_space<vmem>>, vector<256x128xf32>
    %37 = arith.divf %35, %36 : vector<256x128xf32>
    %38 = vector.broadcast %34 : vector<1x128xf32> to vector<256x128xf32>
    %39 = arith.addf %37, %38 : vector<256x128xf32>
    %40 = arith.truncf %39 : vector<256x128xf32> to vector<256x128xbf16>
    %c0_31 = arith.constant 0 : index
    %c0_32 = arith.constant 0 : index
    %c0_33 = arith.constant 0 : index
    %41 = vector.load %arg6[%c0_31, %c0_32, %c0_33] : memref<3x128x128xbf16, #tpu.memory_space<vmem>>, vector<1x128x128xbf16>
    %42 = vector.shape_cast %41 : vector<1x128x128xbf16> to vector<128x128xbf16>
    %cst_34 = arith.constant dense<0.000000e+00> : vector<256x128xf32>
    %43 = tpu.matmul %40, %42, %cst_34 {dimension_numbers = #tpu.dot_dimension_numbers<[1], [0], [0], [1], [0, 0, 1, 1], [], []>} : vector<256x128xbf16>, vector<128x128xbf16>, vector<256x128xf32> -> vector<256x128xf32>
    %44 = vector.broadcast %26 : vector<1x128xf32> to vector<256x128xf32>
    %45 = arith.addf %43, %44 : vector<256x128xf32>
    %c0_35 = arith.constant 0 : index
    %c0_36 = arith.constant 0 : index
    %c0_37 = arith.constant 0 : index
    %c0_38 = arith.constant 0 : index
    %46 = vector.load %arg3[%c0_35, %c0_36, %c0_37, %c0_38] : memref<1x3x256x128xbf16, #tpu.memory_space<vmem>>, vector<1x1x256x128xbf16>
    %47 = vector.shape_cast %46 : vector<1x1x256x128xbf16> to vector<256x128xbf16>
    %48 = arith.extf %47 : vector<256x128xbf16> to vector<256x128xf32>
    %49 = arith.addf %48, %45 : vector<256x128xf32>
    %cst_39 = arith.constant dense<0.000000e+00> : vector<256xf32>
    %50 = vector.multi_reduction <add>, %49, %cst_39 [1] : vector<256x128xf32> to vector<256xf32>
    %51 = vector.shape_cast %50 : vector<256xf32> to vector<256x1xf32>
    %cst_40 = arith.constant 3.125000e-02 : f32
    %52 = vector.broadcast %cst_40 : f32 to vector<256x1xf32>
    %53 = arith.mulf %51, %52 : vector<256x1xf32>
    %54 = vector.broadcast %53 : vector<256x1xf32> to vector<256x128xf32>
    %55 = arith.subf %49, %54 : vector<256x128xf32>
    %56 = vector.broadcast %33 : vector<1x128xf32> to vector<256x128xf32>
    %57 = arith.mulf %55, %56 : vector<256x128xf32>
    %58 = arith.mulf %57, %57 : vector<256x128xf32>
    %cst_41 = arith.constant dense<0.000000e+00> : vector<256xf32>
    %59 = vector.multi_reduction <add>, %58, %cst_41 [1] : vector<256x128xf32> to vector<256xf32>
    %60 = vector.shape_cast %59 : vector<256xf32> to vector<256x1xf32>
    %cst_42 = arith.constant 3.125000e-02 : f32
    %61 = vector.broadcast %cst_42 : f32 to vector<256x1xf32>
    %62 = arith.mulf %60, %61 : vector<256x1xf32>
    %cst_43 = arith.constant 9.99999974E-6 : f32
    %63 = vector.broadcast %cst_43 : f32 to vector<256x1xf32>
    %64 = arith.addf %62, %63 : vector<256x1xf32>
    %65 = math.rsqrt %64 : vector<256x1xf32>
    %66 = vector.broadcast %65 : vector<256x1xf32> to vector<256x128xf32>
    %67 = arith.mulf %57, %66 : vector<256x128xf32>
    %68 = vector.broadcast %29 : vector<1x128xf32> to vector<256x128xf32>
    %69 = arith.mulf %67, %68 : vector<256x128xf32>
    %70 = vector.broadcast %30 : vector<1x128xf32> to vector<256x128xf32>
    %71 = arith.addf %69, %70 : vector<256x128xf32>
    %72 = arith.truncf %71 : vector<256x128xf32> to vector<256x128xbf16>
    %c1_44 = arith.constant 1 : index
    %c0_45 = arith.constant 0 : index
    %c0_46 = arith.constant 0 : index
    %73 = vector.load %arg6[%c1_44, %c0_45, %c0_46] : memref<3x128x128xbf16, #tpu.memory_space<vmem>>, vector<1x128x128xbf16>
    %74 = vector.shape_cast %73 : vector<1x128x128xbf16> to vector<128x128xbf16>
    %cst_47 = arith.constant dense<0.000000e+00> : vector<256x128xf32>
    %75 = tpu.matmul %72, %74, %cst_47 {dimension_numbers = #tpu.dot_dimension_numbers<[1], [0], [0], [1], [0, 0, 1, 1], [], []>} : vector<256x128xbf16>, vector<128x128xbf16>, vector<256x128xf32> -> vector<256x128xf32>
    %76 = vector.broadcast %27 : vector<1x128xf32> to vector<256x128xf32>
    %77 = arith.addf %75, %76 : vector<256x128xf32>
    %cst_48 = arith.constant 0.000000e+00 : f32
    %78 = vector.broadcast %cst_48 : f32 to vector<256x128xf32>
    %79 = arith.maximumf %77, %78 : vector<256x128xf32>
    %80 = arith.truncf %79 : vector<256x128xf32> to vector<256x128xbf16>
    %c2_49 = arith.constant 2 : index
    %c0_50 = arith.constant 0 : index
    %c0_51 = arith.constant 0 : index
    %81 = vector.load %arg6[%c2_49, %c0_50, %c0_51] : memref<3x128x128xbf16, #tpu.memory_space<vmem>>, vector<1x128x128xbf16>
    %82 = vector.shape_cast %81 : vector<1x128x128xbf16> to vector<128x128xbf16>
    %cst_52 = arith.constant dense<0.000000e+00> : vector<256x128xf32>
    %83 = tpu.matmul %80, %82, %cst_52 {dimension_numbers = #tpu.dot_dimension_numbers<[1], [0], [0], [1], [0, 0, 1, 1], [], []>} : vector<256x128xbf16>, vector<128x128xbf16>, vector<256x128xf32> -> vector<256x128xf32>
    %84 = vector.broadcast %28 : vector<1x128xf32> to vector<256x128xf32>
    %85 = arith.addf %83, %84 : vector<256x128xf32>
    %86 = arith.addf %71, %85 : vector<256x128xf32>
    %cst_53 = arith.constant dense<0.000000e+00> : vector<256xf32>
    %87 = vector.multi_reduction <add>, %86, %cst_53 [1] : vector<256x128xf32> to vector<256xf32>
    %88 = vector.shape_cast %87 : vector<256xf32> to vector<256x1xf32>
    %cst_54 = arith.constant 3.125000e-02 : f32
    %89 = vector.broadcast %cst_54 : f32 to vector<256x1xf32>
    %90 = arith.mulf %88, %89 : vector<256x1xf32>
    %91 = vector.broadcast %90 : vector<256x1xf32> to vector<256x128xf32>
    %92 = arith.subf %86, %91 : vector<256x128xf32>
    %93 = vector.broadcast %33 : vector<1x128xf32> to vector<256x128xf32>
    %94 = arith.mulf %92, %93 : vector<256x128xf32>
    %95 = arith.mulf %94, %94 : vector<256x128xf32>
    %cst_55 = arith.constant dense<0.000000e+00> : vector<256xf32>
    %96 = vector.multi_reduction <add>, %95, %cst_55 [1] : vector<256x128xf32> to vector<256xf32>
    %97 = vector.shape_cast %96 : vector<256xf32> to vector<256x1xf32>
    %cst_56 = arith.constant 3.125000e-02 : f32
    %98 = vector.broadcast %cst_56 : f32 to vector<256x1xf32>
    %99 = arith.mulf %97, %98 : vector<256x1xf32>
    %cst_57 = arith.constant 9.99999974E-6 : f32
    %100 = vector.broadcast %cst_57 : f32 to vector<256x1xf32>
    %101 = arith.addf %99, %100 : vector<256x1xf32>
    %102 = math.rsqrt %101 : vector<256x1xf32>
    %103 = vector.broadcast %102 : vector<256x1xf32> to vector<256x128xf32>
    %104 = arith.mulf %94, %103 : vector<256x128xf32>
    %105 = vector.broadcast %31 : vector<1x128xf32> to vector<256x128xf32>
    %106 = arith.mulf %104, %105 : vector<256x128xf32>
    %107 = vector.broadcast %32 : vector<1x128xf32> to vector<256x128xf32>
    %108 = arith.addf %106, %107 : vector<256x128xf32>
    %109 = arith.truncf %108 : vector<256x128xf32> to vector<256x128xbf16>
    %c0_58 = arith.constant 0 : index
    %c0_59 = arith.constant 0 : index
    %c0_60 = arith.constant 0 : index
    %110 = vector.load %arg8[%c0_58, %c0_59, %c0_60] : memref<1x256x128xbf16, #tpu.memory_space<vmem>>, vector<1x256x128xbf16>
    %111 = vector.shape_cast %110 : vector<1x256x128xbf16> to vector<256x128xbf16>
    %112 = vector.shape_cast %109 : vector<256x128xbf16> to vector<1x256x128xbf16>
    tpu.vector_store %arg8[%c0_58, %c0_59, %c0_60], %112 {strides = array<i32>} : memref<1x256x128xbf16, #tpu.memory_space<vmem>>, vector<1x256x128xbf16>,
    return
  }
  func.func @transform_0(%arg0: i32, %arg1: i32, %arg2: memref<2xi32, #tpu.memory_space<smem>>) -> (i32, i32, i32, i32) {
    %c0_i32 = arith.constant 0 : i32
    %c0_i32_0 = arith.constant 0 : i32
    %c0_i32_1 = arith.constant 0 : i32
    return %arg0, %c0_i32, %arg1, %c0_i32_0 : i32, i32, i32, i32
  }
  func.func @transform_1(%arg0: i32, %arg1: i32, %arg2: memref<2xi32, #tpu.memory_space<smem>>) -> (i32, i32) {
    %c0_i32 = arith.constant 0 : i32
    %c0_i32_0 = arith.constant 0 : i32
    %c0_i32_1 = arith.constant 0 : i32
    return %c0_i32, %c0_i32_0 : i32, i32
  }
  func.func @transform_2(%arg0: i32, %arg1: i32, %arg2: memref<2xi32, #tpu.memory_space<smem>>) -> (i32, i32) {
    %c0_i32 = arith.constant 0 : i32
    %c0_i32_0 = arith.constant 0 : i32
    %c0_i32_1 = arith.constant 0 : i32
    return %c0_i32, %c0_i32_0 : i32, i32
  }
  func.func @transform_3(%arg0: i32, %arg1: i32, %arg2: memref<2xi32, #tpu.memory_space<smem>>) -> (i32, i32, i32) {
    %c0_i32 = arith.constant 0 : i32
    %c0_i32_0 = arith.constant 0 : i32
    %c0_i32_1 = arith.constant 0 : i32
    %c0_i32_2 = arith.constant 0 : i32
    return %c0_i32, %c0_i32_0, %c0_i32_1 : i32, i32, i32
  }
  func.func @transform_4(%arg0: i32, %arg1: i32, %arg2: memref<2xi32, #tpu.memory_space<smem>>) -> (i32, i32) {
    %c0_i32 = arith.constant 0 : i32
    %c0_i32_0 = arith.constant 0 : i32
    %c0_i32_1 = arith.constant 0 : i32
    return %c0_i32, %c0_i32_0 : i32, i32
  }
  func.func @transform_5(%arg0: i32, %arg1: i32, %arg2: memref<2xi32, #tpu.memory_space<smem>>) -> (i32, i32, i32) {
    %c0_i32 = arith.constant 0 : i32
    %c0_i32_0 = arith.constant 0 : i32
    return %arg0, %arg1, %c0_i32 : i32, i32, i32
  }
}

</mosaic_0001>

<bundles_post_ra>
// kernel: tpu_custom_call.1
= control target key start
LH: loop header
LB: loop body
LE: loop exit
PB: predicated region body
PF: predicated region fallthrough
CT: control target
= control target key end

     0   :  { %s8220_s21 = smov [#allocation6]   ;;  %s10108_s0 = inlined_call_operand.hbm [shape: s32[2], index: 0, kind: input, shape index: {}]   ;;  %s10109_s1 = inlined_call_operand.hbm [shape: bf16[2,3,256,128], index: 1, kind: input, shape index: {}]   ;;  %s10110_s2 = inlined_call_operand.hbm [shape: bf16[128,384], index: 2, kind: input, shape index: {}]   ;;  %s10111_s3 = inlined_call_operand.hbm [shape: bf16[128,128], index: 3, kind: input, shape index: {}]   ;;  %s10112_s4 = inlined_call_operand.hbm [shape: bf16[3,128,128], index: 4, kind: input, shape index: {}]   ;;  %s10113_s5 = inlined_call_operand.hbm [shape: f32[10,128], index: 5, kind: input, shape index: {}]   ;;  %s10114_s6 = inlined_call_operand.hbm [shape: bf16[2,256,128], index: 6, kind: output, shape index: {}]  }
   0x1   :  { %10145 = sst [smem:[#allocation50_spill]] %s10110_s2 }
   0x2   :  { %10146 = sst [smem:[#allocation51_spill]] %s10111_s3 }
   0x3   :  { %12 = dma.hbm_to_smem %s10108_s0, 16, %s8220_s21, [#allocation5] }
   0x4   :  { %8178 = dma.done.wait [#allocation5], 16 }
   0x5   :  { %8179 = vsyncadd [#allocation5], 4294967280 }
   0x6   :  { %14 = sfence }
   0x7   :  { %15 = vsyncpa [#allocation8], 0 }
   0x8   :  { %17 = vsyncpa [#allocation8 + $0x1], 0 }
   0x9   :  { %18 = vsyncpa [#allocation11], 0 }
   0xa   :  { %19 = vsyncpa [#allocation14], 0 }
   0xb   :  { %20 = vsyncpa [#allocation9], 0 }
   0xc   :  { %22 = vsyncpa [#allocation9 + $0x1], 0  ;;  %s8277_s24 = smov 0   ;;  %s8279_s25 = smov 0  }
   0xd   :  { %s8281_s26 = smov 0   ;;  %s8283_s27 = smov 0  }
   0xe   :  { %s8285_s28 = smov 0   ;;  %s8287_s0 = smov 0  }
   0xf LB: > { %s6205_s29 = sadd.s32 4294967295, %s8218_s0   ;;  %s6206_s30 = sadd.s32 4294967294, %s8218_s0   ;;  %s8218_s0 = sphi %s8287_s0, %s28_s0   ;;  %s8214_s28 = sphi %s8285_s28, %s10221_s28   ;;  %s8210_s27 = sphi %s8283_s27, %s10220_s27   ;;  %s8206_s26 = sphi %s8281_s26, %s10219_s26   ;;  %s8202_s25 = sphi %s8279_s25, %s10218_s25   ;;  %s8198_s24 = sphi %s8277_s24, %s10217_s24  }
  0x10   : > { %p62_p0 = scmp.ne.s32.totalorder %s8202_s25, %s8198_s24  ;;  %p8311_p1 = scmp.eq.s32.totalorder %s6205_s29, 0 }
  0x11   : > { %p8315_p2 = scmp.eq.s32.totalorder %s6205_s29, 1  ;;  %p178_p3 = scmp.eq.s32.totalorder %s6206_s30, 1 }
  0x12   : > { %p8321_p4 = por %p8311_p1, %p62_p0  ;;  %p6207_p5 = scmp.ge.s32.totalorder %s8218_s0, 1 }
  0x13   : > { %p8326_p6 = por %p178_p3, %p62_p0  ;;  %p185_p7 = scmp.lt.s32.totalorder %s8218_s0, 3 }
  0x14   : > { %s8221_s12 = smov [#allocation10]   ;;  %s8222_s15 = smov [#allocation13]  }
  0x15   : > { %s10150_s10 = scalar_select %p8326_p6, 1, 0 }
  0x16   : > { %p8331_p8 = pnand %p6207_p5, %p185_p7  ;;  %s197_s13 = sshll.u32 %s8221_s12, 4  ;;  %s198_s13 = int_to_ptr.vmem [resolvable:$true] %s197_s13 }
  0x17   : > { %s223_s16 = sshll.u32 %s8222_s15, 4  ;;  %s8007_s17 = scalar_lea.vmem %s198_s13, 3072  ;;  %s224_s16 = int_to_ptr.vmem [resolvable:$true] %s223_s16 }
  0x18   : > { %p7267_p9 = pneg %p8331_p8  ;;  %p8008_p13 = scmp.ne.s32.totalorder %s198_s13, %s8007_s17 }
  0x19   : > { %p8015_p5 = scmp.lt.s32.totalorder %s198_s13, %s198_s13  ;;  %p8016_p7 = scmp.lt.s32.totalorder %s8007_s17, %s8007_s17 }
  0x1a   : > { %p8340_p11 = pnand %p7267_p9, %p8311_p1 }
  0x1b   : > { %p8017_p10 = por %p8016_p7, %p8015_p5 }
  0x1c   : > { %p7998_p12 = pneg %p8340_p11 }
  0x1e   : > { %p8010_p0 = pnand %p8008_p13, %p7998_p12 }
  0x20   : > { %p8011_p3 = pneg %p8010_p0 }
  0x22   : > { %p8018_p6 = pnand %p8017_p10, %p8011_p3 }
  0x24   : > { %8021 = shalt.err (!%p8018_p6)
}
  0x25   : > { %s8223_s18 = smov 192   ;;  %s8224_s19 = smov 12  }
  0x26   : > { %s10153_s2 = sld [smem:[#allocation50_spill]]  ;;  %s8225_s22 = smov [#allocation12]  }
  0x27   : > { %s210_s23 = sshll.u32 %s8225_s22, 4  ;;  %s8033_s29 = scalar_lea.vmem %s224_s16, 3072  ;;  %s211_s23 = int_to_ptr.vmem [resolvable:$true] %s210_s23 }
  0x28   : > { %p8034_p9 = scmp.ne.s32.totalorder %s224_s16, %s8033_s29  ;;  %p8041_p10 = scmp.lt.s32.totalorder %s224_s16, %s224_s16 }
  0x29   : > { %p8042_p6 = scmp.lt.s32.totalorder %s8033_s29, %s8033_s29 }
  0x2a   : > { %p8036_p13 = pnand %p8034_p9, %p7998_p12 }
  0x2b   : > { %p8043_p3 = por %p8042_p6, %p8041_p10 }
  0x2c   : > { %7270 = dma.hbm_to_vmem [thread:$0]  (!%p8340_p11), %s10153_s2, 3072, %s198_s13, [#allocation11], %s8223_s18, %s8223_s18, %s8224_s19  }
  0x2d   : > { %p8037_p0 = pneg %p8036_p13 }
  0x2f   : > { %p8044_p5 = pnand %p8043_p3, %p8037_p0 }
  0x31   : > { %8047 = shalt.err (!%p8044_p5)
}
  0x32   : > { %s10115_s30 = smov 64   ;;  %s10116_s12 = smov 4  }
  0x33   : > { %7276 = dma.hbm_to_vmem [thread:$0]  (!%p8340_p11), %s10112_s4, 3072, %s224_s16, [#allocation14], %s10115_s30, %s10115_s30, %s10116_s12  }
  0x34   : > { %s8059_s17 = scalar_lea.vmem %s211_s23, 1024  ;;  %p8067_p0 = scmp.lt.s32.totalorder %s211_s23, %s211_s23 }
  0x35   : > { %p8060_p7 = scmp.ne.s32.totalorder %s211_s23, %s8059_s17  ;;  %p8068_p10 = scmp.lt.s32.totalorder %s8059_s17, %s8059_s17 }
  0x37   : > { %p8062_p9 = pnand %p8060_p7, %p7998_p12  ;;  %p8069_p6 = por %p8068_p10, %p8067_p0 }
  0x39   : > { %p8063_p13 = pneg %p8062_p9 }
  0x3b   : > { %p8070_p3 = pnand %p8069_p6, %p8063_p13 }
  0x3d   : > { %8073 = shalt.err (!%p8070_p3)
}
  0x3e   : > { %s10154_s3 = sld [smem:[#allocation51_spill]]  ;;  %s8228_s16 = smov [#allocation15]  }
  0x3f   : > { %s236_s20 = sshll.u32 %s8228_s16, 4  ;;  %s237_s20 = int_to_ptr.vmem [resolvable:$true] %s236_s20 }
  0x40   : > { %s8085_s21 = scalar_lea.vmem %s237_s20, 256  ;;  %p8093_p13 = scmp.lt.s32.totalorder %s237_s20, %s237_s20 }
  0x41   : > { %p8086_p5 = scmp.ne.s32.totalorder %s237_s20, %s8085_s21  ;;  %p8094_p0 = scmp.lt.s32.totalorder %s8085_s21, %s8085_s21 }
  0x43   : > { %p8088_p7 = pnand %p8086_p5, %p7998_p12  ;;  %p8095_p10 = por %p8094_p0, %p8093_p13 }
  0x44   : > { %7273 = dma.hbm_to_vmem [thread:$0]  (!%p8340_p11), %s10154_s3, 1024, %s211_s23, [#allocation11], %s10115_s30, %s10115_s30, %s10116_s12  }
  0x45   : > { %p8089_p9 = pneg %p8088_p7 }
  0x47   : > { %p8096_p6 = pnand %p8095_p10, %p8089_p9 }
  0x49   : > { %8099 = shalt.err (!%p8096_p6)
}
  0x4a   : > { %s8229_s22 = smov 128   ;;  %s8230_s23 = smov 8  }
  0x4b   : > { %7279 = dma.hbm_to_vmem [thread:$0]  (!%p8340_p11), %s10113_s5, 256, %s237_s20, [#allocation14], %s8229_s22, %s8229_s22, %s8230_s23  }
  0x4c   : > { %s40_s15 = sadd.s32 1, %s8214_s28  ;;  %s49_s17 = sadd.s32 1, %s8206_s26 }
  0x4d   : > { %p42_p12 = scmp.ge.s32.totalorder %s40_s15, 2  ;;  %p56_p3 = scmp.ne.s32.totalorder %s8206_s26, %s8202_s25 }
  0x4e   : > { %p57_p5 = scmp.eq.s32.totalorder %s8218_s0, 0  ;;  %p7292_p7 = scmp.lt.s32.totalorder %s8218_s0, 2 }
  0x4f   : > { %s10223_s15 = smov (%p42_p12, %s40_s15), 0  ;;  %p8394_p13 = por %p8315_p2, %p56_p3 }
  0x50   : > { %p58_p9 = por %p57_p5, %p56_p3  ;;  %s44_s14 = ssub.s32 %s8214_s28, %s10223_s15 }
  0x51   : > { %s250_s19 = sand.u32 1, %s8206_s26   ;;  %p47_p0 = scmp.eq.s32.totalorder %s44_s14, 0 }
  0x52   : > { %s7244_s16 = smul.u32 384, %s250_s19  ;;  %p8401_p11 = pnand %p7292_p7, %p58_p9 }
  0x53   : > { %s8406_s21 = scalar_select %p47_p0, %s8206_s26, %s49_s17  }
  0x54   : > { %s7245_s22 = smul.u32 6144, %s8214_s28  ;;  %s254_s23 = scalar_lea.vmem [#allocation7], %s7244_s16 }
  0x55   : > { %s263_s29 = sshll.u32 %s254_s23, 4  ;;  %s251_s12 = scalar_lea.sflag [#allocation8], %s250_s19  ;;  %s264_s29 = int_to_ptr.vmem [resolvable:$true] %s263_s29 }
  0x56   : > { %s262_s30 = scalar_lea.hbm %s10109_s1, %s7245_s22  ;;  %p8102_p2 = pneg %p8401_p11 }
  0x57   : > { %s8113_s14 = scalar_lea.vmem %s264_s29, 6144  ;;  %s8231_s2 = smov [#allocation7]  }
  0x58   : > { %p8114_p10 = scmp.ne.s32.totalorder %s264_s29, %s8113_s14  ;;  %s8118_s3 = sshll.u32 %s8231_s2, 4  ;;  %s8119_s3 = int_to_ptr.vmem [resolvable:$false] %s8118_s3 }
  0x59   : > { %s8120_s17 = scalar_lea.vmem %s8119_s3, 12288  ;;  %p8121_p3 = scmp.lt.s32.totalorder %s264_s29, %s8119_s3 }
  0x5a   : > { %p8116_p6 = pnand %p8114_p10, %p8102_p2  ;;  %p8122_p5 = scmp.lt.s32.totalorder %s8120_s17, %s8113_s14 }
  0x5c   : > { %p8117_p12 = pneg %p8116_p6  ;;  %p8123_p7 = por %p8122_p5, %p8121_p3 }
  0x5e   : > { %p8124_p9 = pnand %p8123_p7, %p8117_p12 }
  0x60   : > { %8127 = shalt.err (!%p8124_p9)
}
  0x61   : > { %s10157_s16 = smov 4   ;;  %s10158_s22 = smov 64  }
  0x62   : > { %7283 = dma.hbm_to_vmem [thread:$0]  (!%p8401_p11), %s262_s30, 6144, %s264_s29, %s251_s12, %s10158_s22, %s10158_s22, %s10157_s16  }
  0x63   : > { %275 = sbr.rel (%p8331_p8) target bundleno = 3169 (0xc61), region = 40 }
  0x68   : > { %s8422_s19 = sand.u32 1, %s8202_s25  }
  0x69   : > { %s7246_s2 = smul.u32 384, %s8422_s19  ;;  %s278_s3 = scalar_lea.sflag [#allocation8], %s8422_s19 }
  0x6b   : > { %s8426_s23 = scalar_lea.vmem [#allocation7], %s7246_s2 }
  0x6c   : > { %8181 = dma.done.wait (%p8321_p4), %s278_s3, 6144  }
  0x6d   : > { %8183 = vsyncadd (%p8321_p4), %s278_s3, 4294961152 }
  0x6e   : > { %8185 = dma.done.wait (%p8311_p1), [#allocation11], 4096  }
  0x6f   : > { %8187 = vsyncadd (%p8311_p1), [#allocation11], 4294963200 }
  0x70   : > { %8189 = dma.done.wait (%p8311_p1), [#allocation14], 3328  }
  0x71   : > { %8191 = vsyncadd (%p8311_p1), [#allocation14], 4294963968  ;;  %s6219_s11 = sshll.u32 %s8422_s19, 7  ;;  %s8442_s30 = sld [smem:[#allocation6 + %s8210_s27]]  ;;  %v8232_v0 = vmov 1.0   ;;  %v8233_v1 = vmov 0  }
  0x72   : > { %1312 = vst [vmem:[#allocation3 + $0x80] sm:$0xff] %v8232_v0  ;;  %1313 = vst [vmem:[#allocation3 + $0xc8] sm:$0xff] %v8232_v0  ;;  %649 = vmatprep.mubr.bf16.mxu0 %v8233_v1  ;;  %v7363_v2 = vld [vmem:[#allocation10 + $0xac] ss:$12 sps:$4 sm:$0xff]   ;;  %v7365_v3 = vld [vmem:[#allocation10 + $0xa8] ss:$12 sps:$4 sm:$0xff]  }
  0x73   : > { %1314 = vst [vmem:[#allocation3 + $0xe8] sm:$0xff] %v8232_v0  ;;  %1315 = vst [vmem:[#allocation3 + $0x78] sm:$0xff] %v8232_v0  ;;  %617 = vmatprep.subr.bf16.mxu0 %v7363_v2  ;;  %v7366_v4 = vld [vmem:[#allocation10 + $0x94] ss:$12 sps:$4 sm:$0xff]   ;;  %v7368_v5 = vld [vmem:[#allocation10 + $0x90] ss:$12 sps:$4 sm:$0xff]  }
  0x74   : > { %1316 = vst [vmem:[#allocation3 + $0x8] sm:$0xff] %v8232_v0  ;;  %1317 = vst [vmem:[#allocation3 + $0x90] sm:$0xff] %v8232_v0  ;;  %618 = vmatpush1.bf16.msra.mxu0 %v7365_v3  ;;  %v7369_v6 = vld [vmem:[#allocation10 + $0x7c] ss:$12 sps:$4 sm:$0xff]   ;;  %v7371_v7 = vld [vmem:[#allocation10 + $0x78] ss:$12 sps:$4 sm:$0xff]  }
  0x75   : > { %1318 = vst [vmem:[#allocation3 + $0x58] sm:$0xff] %v8232_v0  ;;  %1319 = vst [vmem:[#allocation3 + $0xa8] sm:$0xff] %v8232_v0  ;;  %619 = vmatprep.subr.bf16.mxu0 %v7366_v4  ;;  %v7372_v8 = vld [vmem:[#allocation10 + $0x64] ss:$12 sps:$4 sm:$0xff]   ;;  %v7374_v9 = vld [vmem:[#allocation10 + $0x60] ss:$12 sps:$4 sm:$0xff]  }
  0x76   : > { %1320 = vst [vmem:[#allocation3 + $0xd0] sm:$0xff] %v8232_v0  ;;  %1321 = vst [vmem:[#allocation3 + $0xb0] sm:$0xff] %v8232_v0  ;;  %v7387_v10 = vld [vmem:[%s8426_s23] sm:$0xff]   ;;  %v7375_v11 = vld [vmem:[#allocation10 + $0x4c] ss:$12 sps:$4 sm:$0xff]   ;;  %s8608_s7 = scalar_lea.vmem [#allocation16], %s6219_s11 }
  0x77   : > { %1322 = vst [vmem:[#allocation3 + $0x38] sm:$0xff] %v8232_v0  ;;  %1323 = vst [vmem:[#allocation3 + $0x40] sm:$0xff] %v8232_v0  ;;  %6876 = vmatprep.mubr.bf16.mxu1 %v7387_v10  ;;  %v7377_v12 = vld [vmem:[#allocation10 + $0x48] ss:$12 sps:$4 sm:$0xff]   ;;  %v7380_v14 = vld [vmem:[#allocation10 + $0x30] ss:$12 sps:$4 sm:$0xff]  }
  0x78   : > { %1324 = vst [vmem:[#allocation3 + $0xe0] sm:$0xff] %v8232_v0  ;;  %1325 = vst [vmem:[#allocation3 + $0x60] sm:$0xff] %v8232_v0  ;;  %620 = vmatpush1.bf16.msra.mxu0 %v7368_v5  ;;  %v7378_v13 = vld [vmem:[#allocation10 + $0x34] ss:$12 sps:$4 sm:$0xff]   ;;  %v7381_v15 = vld [vmem:[#allocation10 + $0x1c] ss:$12 sps:$4 sm:$0xff]  }
  0x79   : > { %1326 = vst [vmem:[#allocation3 + $0x18] sm:$0xff] %v8232_v0  ;;  %1327 = vst [vmem:[#allocation3 + $0x68] sm:$0xff] %v8232_v0  ;;  %621 = vmatprep.subr.bf16.mxu0 %v7369_v6  ;;  %v7383_v16 = vld [vmem:[#allocation10 + $0x18] ss:$12 sps:$4 sm:$0xff]   ;;  %v7386_v18 = vld [vmem:[#allocation10] ss:$12 sps:$4 sm:$0xff]  }
  0x7a   : > { %1328 = vst [vmem:[#allocation3 + $0x10] sm:$0xff] %v8232_v0  ;;  %1329 = vst [vmem:[#allocation3 + $0x70] sm:$0xff] %v8232_v0  ;;  %v7384_v17 = vld [vmem:[#allocation10 + $0x4] ss:$12 sps:$4 sm:$0xff]   ;;  %v7405_v21 = vld [vmem:[#allocation10 + $0x80] ss:$12 sps:$4 sm:$0xff]  }
  0x7b   : > { %1330 = vst [vmem:[#allocation3 + $0x50] sm:$0xff] %v8232_v0  ;;  %1331 = vst [vmem:[#allocation3 + $0xa0] sm:$0xff] %v8232_v0  ;;  %v7402_v19 = vld [vmem:[#allocation10 + $0xb0] ss:$12 sps:$4 sm:$0xff]   ;;  %v7403_v20 = vld [vmem:[#allocation10 + $0x98] ss:$12 sps:$4 sm:$0xff]  }
  0x7c   : > { %1332 = vst [vmem:[#allocation3 + $0xd8] sm:$0xff] %v8232_v0  ;;  %1333 = vst [vmem:[#allocation3 + $0x30] sm:$0xff] %v8232_v0  ;;  %622 = vmatpush1.bf16.msra.mxu0 %v7371_v7  ;;  %6860 = vmatprep.subr.bf16.mxu1 %v7402_v19  ;;  %v7406_v22 = vld [vmem:[#allocation10 + $0x68] ss:$12 sps:$4 sm:$0xff]   ;;  %v7407_v24 = vld [vmem:[#allocation10 + $0x50] ss:$12 sps:$4 sm:$0xff]  }
  0x7d   : > { %1334 = vst [vmem:[#allocation3 + $0x20] sm:$0xff] %v8232_v0  ;;  %1335 = vst [vmem:[#allocation3 + $0xf0] sm:$0xff] %v8232_v0  ;;  %623 = vmatprep.subr.bf16.mxu0 %v7372_v8  ;;  %6861 = vmatpush3.bf16.msra.mxu1 %v7402_v19  ;;  %v7388_v23 = vld [vmem:[%s8426_s23 + $0x8] sm:$0xff]   ;;  %v7408_v25 = vld [vmem:[#allocation10 + $0x38] ss:$12 sps:$4 sm:$0xff]   ;;  %p6269_p1 = scmp.le.s32.totalorder %s8442_s30, 1 }
  0x7e   : > { %1336 = vst [vmem:[#allocation3 + $0x88] sm:$0xff] %v8232_v0  ;;  %1337 = vst [vmem:[#allocation3 + $0x48] sm:$0xff] %v8232_v0  ;;  %6862 = vmatprep.subr.bf16.mxu1 %v7403_v20  ;;  %v7389_v26 = vld [vmem:[%s8426_s23 + $0x10] sm:$0xff]   ;;  %v7409_v27 = vld [vmem:[#allocation10 + $0x20] ss:$12 sps:$4 sm:$0xff]  }
  0x7f   : > { %1338 = vst [vmem:[#allocation3 + $0xf8] sm:$0xff] %v8232_v0  ;;  %1339 = vst [vmem:[#allocation3 + $0xc0] sm:$0xff] %v8232_v0  ;;  %v7410_v28 = vld [vmem:[#allocation10 + $0x8] ss:$12 sps:$4 sm:$0xff]   ;;  %v7390_v29 = vld [vmem:[%s8426_s23 + $0x18] sm:$0xff]  }
  0x80   : > { %1340 = vst [vmem:[#allocation3 + $0xb8] sm:$0xff] %v8232_v0  ;;  %1341 = vst [vmem:[#allocation3] sm:$0xff] %v8232_v0  ;;  %624 = vmatpush1.bf16.msra.mxu0 %v7374_v9  ;;  %v7411_v30 = vld [vmem:[#allocation12 + $0x38] sm:$0xff]   ;;  %v7412_v31 = vld [vmem:[#allocation12 + $0x30] sm:$0xff]  }
  0x81   : > { %1342 = vst [vmem:[#allocation3 + $0x28] sm:$0xff] %v8232_v0  ;;  %1343 = vst [vmem:[#allocation3 + $0x98] sm:$0xff] %v8232_v0  ;;  %625 = vmatprep.subr.bf16.mxu0 %v7375_v11  ;;  %6863 = vmatpush3.bf16.msra.mxu1 %v7403_v20  ;;  %v7391_v32 = vld [vmem:[%s8426_s23 + $0x20] sm:$0xff]   ;;  %v7413_v33 = vld [vmem:[#allocation12 + $0x28] sm:$0xff]  }
  0x82   : > { %6864 = vmatprep.subr.bf16.mxu1 %v7405_v21  ;;  %v7414_v34 = vld [vmem:[#allocation12 + $0x20] sm:$0xff]   ;;  %v7392_v35 = vld [vmem:[%s8426_s23 + $0x28] sm:$0xff]   ;;  %v7393_v36 = vld [vmem:[%s8426_s23 + $0x30] sm:$0xff]  }
  0x83   : > { %v7394_v37 = vld [vmem:[%s8426_s23 + $0x38] sm:$0xff]   ;;  %v7395_v38 = vld [vmem:[%s8426_s23 + $0x40] sm:$0xff]   ;;  %v7396_v39 = vld [vmem:[%s8426_s23 + $0x48] sm:$0xff]  }
  0x84   : > { %626 = vmatpush1.bf16.msra.mxu0 %v7377_v12  ;;  %v7397_v40 = vld [vmem:[%s8426_s23 + $0x50] sm:$0xff]   ;;  %v7398_v41 = vld [vmem:[%s8426_s23 + $0x58] sm:$0xff]   ;;  %v7399_v42 = vld [vmem:[%s8426_s23 + $0x60] sm:$0xff]  }
  0x85   : > { %627 = vmatprep.subr.bf16.mxu0 %v7378_v13  ;;  %6865 = vmatpush3.bf16.msra.mxu1 %v7405_v21  ;;  %v7415_v43 = vld [vmem:[#allocation12 + $0x18] sm:$0xff]   ;;  %v7416_v44 = vld [vmem:[#allocation12 + $0x10] sm:$0xff]   ;;  %v7400_v45 = vld [vmem:[%s8426_s23 + $0x68] sm:$0xff]  }
  0x86   : > { %6866 = vmatprep.subr.bf16.mxu1 %v7406_v22  ;;  %v7401_v46 = vld [vmem:[%s8426_s23 + $0x70] sm:$0xff]   ;;  %v7417_v47 = vld [vmem:[#allocation12 + $0x8] sm:$0xff]   ;;  %v7418_v48 = vld [vmem:[#allocation12] sm:$0xff]  }
  0x87   : > { %v7404_v49 = vld [vmem:[%s8426_s23 + $0x78] sm:$0xff]   ;;  %v8476_v50 = vld [vmem:[#allocation15] ss:$0 sm:$0xff] }
  0x88   : > { %628 = vmatpush1.bf16.msra.mxu0 %v7380_v14 }
  0x89   : > { %629 = vmatprep.subr.bf16.mxu0 %v7381_v15  ;;  %6867 = vmatpush3.bf16.msra.mxu1 %v7406_v22 }
  0x8a   : > { %6868 = vmatprep.subr.bf16.mxu1 %v7407_v24 }
  0x8c   : > { %630 = vmatpush1.bf16.msra.mxu0 %v7383_v16 }
  0x8d   : > { %631 = vmatprep.subr.bf16.mxu0 %v7384_v17  ;;  %6869 = vmatpush3.bf16.msra.mxu1 %v7407_v24 }
  0x8e   : > { %6870 = vmatprep.subr.bf16.mxu1 %v7408_v25 }
  0x90   : > { %632 = vmatpush1.bf16.msra.mxu0 %v7386_v18 }
  0x91   : > { %6871 = vmatpush3.bf16.msra.mxu1 %v7408_v25 }
  0x92   : > { %6872 = vmatprep.subr.bf16.mxu1 %v7409_v27 }
  0x93   : > { %650 = vmatmul.mubr.bf16.vlgmr.msra.gmra.mxu0 %v7387_v10 }
  0x94   : > { %659 = vmatprep.mubr.bf16.mxu0 %v8233_v1 }
  0x95   : > { %6873 = vmatpush3.bf16.msra.mxu1 %v7409_v27 }
  0x96   : > { %6874 = vmatprep.subr.bf16.mxu1 %v7410_v28 }
  0x99   : > { %6875 = vmatpush3.bf16.msra.mxu1 %v7410_v28 }
  0x9a   : > { %6908 = vmatprep.subr.bf16.mxu1 %v7411_v30 }
  0x9b   : > { %660 = vmatmul.mubr.bf16.gmra.mxu0 %v7388_v23 }
  0x9c   : > { %669 = vmatprep.mubr.bf16.mxu0 %v8233_v1  ;;  %6877 = vmatmul.mubr.bf16.vlgmr.msra.gmra.mxu1 %v7388_v23 }
  0x9d   : > { %6880 = vmatprep.mubr.bf16.mxu1 %v7389_v26  ;;  %6909 = vmatpush3.bf16.msra.mxu1 %v7411_v30 }
  0x9e   : > { %6910 = vmatprep.subr.bf16.mxu1 %v7412_v31 }
  0xa1   : > { %6911 = vmatpush3.bf16.msra.mxu1 %v7412_v31 }
  0xa2   : > { %6912 = vmatprep.subr.bf16.mxu1 %v7413_v33 }
  0xa3   : > { %670 = vmatmul.mubr.bf16.gmra.mxu0 %v7389_v26 }
  0xa4   : > { %679 = vmatprep.mubr.bf16.mxu0 %v8233_v1  ;;  %6881 = vmatmul.mubr.bf16.gmra.mxu1 %v7390_v29 }
  0xa5   : > { %6884 = vmatprep.mubr.bf16.mxu1 %v7391_v32  ;;  %6913 = vmatpush3.bf16.msra.mxu1 %v7413_v33 }
  0xa6   : > { %6914 = vmatprep.subr.bf16.mxu1 %v7414_v34 }
  0xa9   : > { %6915 = vmatpush3.bf16.msra.mxu1 %v7414_v34 }
  0xaa   : > { %6916 = vmatprep.subr.bf16.mxu1 %v7415_v43 }
  0xab   : > { %680 = vmatmul.mubr.bf16.gmra.mxu0 %v7390_v29 }
  0xac   : > { %689 = vmatprep.mubr.bf16.mxu0 %v8233_v1  ;;  %6885 = vmatmul.mubr.bf16.gmra.mxu1 %v7392_v35 }
  0xad   : > { %6888 = vmatprep.mubr.bf16.mxu1 %v7393_v36  ;;  %6917 = vmatpush3.bf16.msra.mxu1 %v7415_v43 }
  0xae   : > { %6918 = vmatprep.subr.bf16.mxu1 %v7416_v44 }
  0xb1   : > { %6919 = vmatpush3.bf16.msra.mxu1 %v7416_v44 }
  0xb2   : > { %6920 = vmatprep.subr.bf16.mxu1 %v7417_v47 }
  0xb3   : > { %690 = vmatmul.mubr.bf16.gmra.mxu0 %v7391_v32 }
  0xb4   : > { %699 = vmatprep.mubr.bf16.mxu0 %v8233_v1  ;;  %6889 = vmatmul.mubr.bf16.gmra.mxu1 %v7394_v37 }
  0xb5   : > { %6892 = vmatprep.mubr.bf16.mxu1 %v7395_v38  ;;  %6921 = vmatpush3.bf16.msra.mxu1 %v7417_v47 }
  0xb6   : > { %6922 = vmatprep.subr.bf16.mxu1 %v7418_v48 }
  0xb9   : > { %6923 = vmatpush3.bf16.msra.mxu1 %v7418_v48 }
  0xbb   : > { %700 = vmatmul.mubr.bf16.gmra.mxu0 %v7392_v35 }
  0xbc   : > { %709 = vmatprep.mubr.bf16.mxu0 %v8233_v1  ;;  %6893 = vmatmul.mubr.bf16.gmra.mxu1 %v7396_v39 }
  0xbd   : > { %6896 = vmatprep.mubr.bf16.mxu1 %v7397_v40 }
  0xc3   : > { %710 = vmatmul.mubr.bf16.gmra.mxu0 %v7393_v36 }
  0xc4   : > { %719 = vmatprep.mubr.bf16.mxu0 %v8233_v1  ;;  %6897 = vmatmul.mubr.bf16.gmra.mxu1 %v7398_v41 }
  0xc5   : > { %6900 = vmatprep.mubr.bf16.mxu1 %v7399_v42 }
  0xcb   : > { %720 = vmatmul.mubr.bf16.gmra.mxu0 %v7394_v37 }
  0xcc   : > { %729 = vmatprep.mubr.bf16.mxu0 %v8233_v1  ;;  %6901 = vmatmul.mubr.bf16.gmra.mxu1 %v7400_v45 }
  0xcd   : > { %6904 = vmatprep.mubr.bf16.mxu1 %v7401_v46 }
  0xd3   : > { %730 = vmatmul.mubr.bf16.gmra.mxu0 %v7395_v38 }
  0xd4   : > { %739 = vmatprep.mubr.bf16.mxu0 %v8233_v1  ;;  %6905 = vmatmul.mubr.bf16.gmra.mxu1 %v7404_v49 }
  0xdb   : > { %740 = vmatmul.mubr.bf16.gmra.mxu0 %v7396_v39 }
  0xdc   : > { %749 = vmatprep.mubr.bf16.mxu0 %v8233_v1 }
  0xe3   : > { %750 = vmatmul.mubr.bf16.gmra.mxu0 %v7397_v40 }
  0xe4   : > { %759 = vmatprep.mubr.bf16.mxu0 %v8233_v1 }
  0xeb   : > { %760 = vmatmul.mubr.bf16.gmra.mxu0 %v7398_v41 }
  0xec   : > { %769 = vmatprep.mubr.bf16.mxu0 %v8233_v1 }
  0xf3   : > { %770 = vmatmul.mubr.bf16.gmra.mxu0 %v7399_v42 }
  0xf4   : > { %779 = vmatprep.mubr.bf16.mxu0 %v8233_v1 }
  0xfb   : > { %780 = vmatmul.mubr.bf16.gmra.mxu0 %v7400_v45 }
  0xfc   : > { %789 = vmatprep.mubr.bf16.mxu0 %v8233_v1 }
 0x103   : > { %790 = vmatmul.mubr.bf16.gmra.mxu0 %v7401_v46 }
 0x104   : > { %799 = vmatprep.mubr.bf16.mxu0 %v8233_v1 }
 0x10b   : > { %800 = vmatmul.mubr.bf16.gmra.mxu0 %v7404_v49 }
 0x153   : > { %v651_v51 = vpop.f32.mrf.mxu0 }
 0x154   : > { %v8479_v53 = vadd.f32 %v8476_v50, %v651_v51 }
 0x155   : > { %v653_v52 = vpop.f32.mrf.mxu0 }
 0x156   : > { %v1007_v57 = vmul.f32 %v8479_v53, %v653_v52 }
 0x157   : > { %v655_v54 = vpop.f32.mrf.mxu0 }
 0x158   : > { %v8482_v55 = vadd.f32 %v8476_v50, %v655_v54 }
 0x159   : > { %v657_v56 = vpop.f32.mrf.mxu0 }
 0x15a   : > { %v1008_v58 = vmul.f32 %v8482_v55, %v657_v56 }
 0x15b   : > { %v661_v59 = vpop.f32.mrf.mxu0 }
 0x15c   : > { %v1039_v60 = vpack.c.bf16 %v1008_v58, %v1007_v57  ;;  %v8487_v62 = vadd.f32 %v8476_v50, %v661_v59  ;;  %v6878_v16 = vpop.f32.mrf.mxu1 }
 0x15d   : > { %v663_v61 = vpop.f32.mrf.mxu0  ;;  %1346 = vst [vmem:[#allocation4 + $0xc0] sm:$0xff] %v6878_v16 }
 0x15e   : > { %6924 = vmatprep.mubr.bf16.mxu1 %v1039_v60  ;;  %v1009_v2 = vmul.f32 %v8487_v62, %v663_v61  ;;  %v844_v19 = vpop.f32.mrf.mxu1 }
 0x15f   : > { %v665_v63 = vpop.f32.mrf.mxu0  ;;  %1344 = vst [vmem:[#allocation4 + $0xb0] sm:$0xff] %v844_v19 }
 0x160   : > { %v8490_v0 = vadd.f32 %v8476_v50, %v665_v63  ;;  %v6879_v22 = vpop.f32.mrf.mxu1 }
 0x161   : > { %v667_v1 = vpop.f32.mrf.mxu0  ;;  %1347 = vst [vmem:[#allocation4 + $0x10] sm:$0xff] %v6879_v22 }
 0x162   : > { %v1010_v3 = vmul.f32 %v8490_v0, %v667_v1  ;;  %v847_v26 = vpop.f32.mrf.mxu1 }
 0x163   : > { %v671_v4 = vpop.f32.mrf.mxu0  ;;  %1345 = vst [vmem:[#allocation4 + $0xb8] sm:$0xff] %v847_v26 }
 0x164   : > { %v1040_v5 = vpack.c.bf16 %v1010_v3, %v1009_v2  ;;  %v8495_v7 = vadd.f32 %v8476_v50, %v671_v4  ;;  %v6882_v29 = vpop.f32.mrf.mxu1 }
 0x165   : > { %v673_v6 = vpop.f32.mrf.mxu0  ;;  %1350 = vst [vmem:[#allocation4 + $0xd0] sm:$0xff] %v6882_v29 }
 0x166   : > { %10159 = vst [vmem:[#allocation22_spill] sm:$0xff] %v8495_v7  ;;  %6925 = vmatmul.mubr.bf16.vlgmr.msra.gmra.mxu1 %v1040_v5  ;;  %v1011_v11 = vmul.f32 %v8495_v7, %v673_v6  ;;  %v860_v32 = vpop.f32.mrf.mxu1 }
 0x167   : > { %v675_v8 = vpop.f32.mrf.mxu0  ;;  %1348 = vst [vmem:[#allocation4 + $0x28] sm:$0xff] %v860_v32 }
 0x168   : > { %v8498_v9 = vadd.f32 %v8476_v50, %v675_v8  ;;  %v6883_v35 = vpop.f32.mrf.mxu1 }
 0x169   : > { %v677_v10 = vpop.f32.mrf.mxu0  ;;  %1351 = vst [vmem:[#allocation4 + $0x68] sm:$0xff] %v6883_v35 }
 0x16a   : > { %10160 = vst [vmem:[#allocation23_spill] sm:$0xff] %v8498_v9  ;;  %v1012_v12 = vmul.f32 %v8498_v9, %v677_v10  ;;  %v863_v39 = vpop.f32.mrf.mxu1 }
 0x16b   : > { %v681_v13 = vpop.f32.mrf.mxu0  ;;  %1349 = vst [vmem:[#allocation4 + $0x30] sm:$0xff] %v863_v39 }
 0x16c   : > { %v1041_v14 = vpack.c.bf16 %v1012_v12, %v1011_v11  ;;  %v8503_v17 = vadd.f32 %v8476_v50, %v681_v13  ;;  %v6886_v42 = vpop.f32.mrf.mxu1 }
 0x16d   : > { %v683_v15 = vpop.f32.mrf.mxu0  ;;  %1354 = vst [vmem:[#allocation4 + $0x48] sm:$0xff] %v6886_v42 }
 0x16e   : > { %10161 = vst [vmem:[#allocation24_spill] sm:$0xff] %v8503_v17  ;;  %6928 = vmatprep.mubr.bf16.mxu1 %v1041_v14  ;;  %v1013_v23 = vmul.f32 %v8503_v17, %v683_v15  ;;  %v876_v45 = vpop.f32.mrf.mxu1 }
 0x16f   : > { %v685_v18 = vpop.f32.mrf.mxu0  ;;  %1352 = vst [vmem:[#allocation4 + $0x58] sm:$0xff] %v876_v45 }
 0x170   : > { %v8506_v20 = vadd.f32 %v8476_v50, %v685_v18  ;;  %v6887_v48 = vpop.f32.mrf.mxu1 }
 0x171   : > { %v687_v21 = vpop.f32.mrf.mxu0  ;;  %1355 = vst [vmem:[#allocation4 + $0x40] sm:$0xff] %v6887_v48 }
 0x172   : > { %10162 = vst [vmem:[#allocation25_spill] sm:$0xff] %v8506_v20  ;;  %v1014_v24 = vmul.f32 %v8506_v20, %v687_v21  ;;  %v879_v54 = vpop.f32.mrf.mxu1 }
 0x173   : > { %v691_v25 = vpop.f32.mrf.mxu0  ;;  %1353 = vst [vmem:[#allocation4] sm:$0xff] %v879_v54 }
 0x174   : > { %v1042_v27 = vpack.c.bf16 %v1014_v24, %v1013_v23  ;;  %v8511_v30 = vadd.f32 %v8476_v50, %v691_v25  ;;  %v6890_v58 = vpop.f32.mrf.mxu1 }
 0x175   : > { %v693_v28 = vpop.f32.mrf.mxu0  ;;  %1358 = vst [vmem:[#allocation4 + $0xe0] sm:$0xff] %v6890_v58 }
 0x176   : > { %10163 = vst [vmem:[#allocation26_spill] sm:$0xff] %v8511_v30  ;;  %6929 = vmatmul.mubr.bf16.gmra.mxu1 %v1042_v27  ;;  %v1015_v36 = vmul.f32 %v8511_v30, %v693_v28  ;;  %v892_v61 = vpop.f32.mrf.mxu1 }
 0x177   : > { %v695_v31 = vpop.f32.mrf.mxu0  ;;  %1356 = vst [vmem:[#allocation4 + $0x78] sm:$0xff] %v892_v61 }
 0x178   : > { %v8514_v33 = vadd.f32 %v8476_v50, %v695_v31  ;;  %v6891_v2 = vpop.f32.mrf.mxu1 }
 0x179   : > { %v697_v34 = vpop.f32.mrf.mxu0  ;;  %1359 = vst [vmem:[#allocation4 + $0x80] sm:$0xff] %v6891_v2 }
 0x17a   : > { %10164 = vst [vmem:[#allocation27_spill] sm:$0xff] %v8514_v33  ;;  %v1016_v37 = vmul.f32 %v8514_v33, %v697_v34  ;;  %v895_v6 = vpop.f32.mrf.mxu1 }
 0x17b   : > { %v701_v38 = vpop.f32.mrf.mxu0  ;;  %1357 = vst [vmem:[#allocation4 + $0xd8] sm:$0xff] %v895_v6 }
 0x17c   : > { %v1043_v40 = vpack.c.bf16 %v1016_v37, %v1015_v36  ;;  %v8519_v43 = vadd.f32 %v8476_v50, %v701_v38  ;;  %v6894_v11 = vpop.f32.mrf.mxu1 }
 0x17d   : > { %v703_v41 = vpop.f32.mrf.mxu0  ;;  %1362 = vst [vmem:[#allocation4 + $0xf8] sm:$0xff] %v6894_v11 }
 0x17e   : > { %10165 = vst [vmem:[#allocation28_spill] sm:$0xff] %v8519_v43  ;;  %6932 = vmatprep.mubr.bf16.mxu1 %v1043_v40  ;;  %v1017_v49 = vmul.f32 %v8519_v43, %v703_v41  ;;  %v908_v14 = vpop.f32.mrf.mxu1 }
 0x17f   : > { %v705_v44 = vpop.f32.mrf.mxu0  ;;  %1360 = vst [vmem:[#allocation4 + $0xa0] sm:$0xff] %v908_v14 }
 0x180   : > { %v8522_v46 = vadd.f32 %v8476_v50, %v705_v44  ;;  %v6895_v18 = vpop.f32.mrf.mxu1 }
 0x181   : > { %v707_v47 = vpop.f32.mrf.mxu0  ;;  %1363 = vst [vmem:[#allocation4 + $0xe8] sm:$0xff] %v6895_v18 }
 0x182   : > { %10166 = vst [vmem:[#allocation29_spill] sm:$0xff] %v8522_v46  ;;  %v1018_v51 = vmul.f32 %v8522_v46, %v707_v47  ;;  %v911_v23 = vpop.f32.mrf.mxu1 }
 0x183   : > { %v711_v52 = vpop.f32.mrf.mxu0  ;;  %1361 = vst [vmem:[#allocation4 + $0x18] sm:$0xff] %v911_v23 }
 0x184   : > { %v1044_v56 = vpack.c.bf16 %v1018_v51, %v1017_v49  ;;  %v8527_v59 = vadd.f32 %v8476_v50, %v711_v52  ;;  %v6898_v26 = vpop.f32.mrf.mxu1 }
 0x185   : > { %v713_v57 = vpop.f32.mrf.mxu0  ;;  %1366 = vst [vmem:[#allocation4 + $0x38] sm:$0xff] %v6898_v26 }
 0x186   : > { %10167 = vst [vmem:[#allocation30_spill] sm:$0xff] %v8527_v59  ;;  %6933 = vmatmul.mubr.bf16.gmra.mxu1 %v1044_v56  ;;  %v1019_v3 = vmul.f32 %v8527_v59, %v713_v57  ;;  %v924_v29 = vpop.f32.mrf.mxu1 }
 0x187   : > { %v715_v60 = vpop.f32.mrf.mxu0  ;;  %1364 = vst [vmem:[#allocation4 + $0x90] sm:$0xff] %v924_v29 }
 0x188   : > { %v8530_v63 = vadd.f32 %v8476_v50, %v715_v60  ;;  %v6899_v34 = vpop.f32.mrf.mxu1 }
 0x189   : > { %v717_v1 = vpop.f32.mrf.mxu0  ;;  %1367 = vst [vmem:[#allocation4 + $0x70] sm:$0xff] %v6899_v34 }
 0x18a   : > { %10168 = vst [vmem:[#allocation31_spill] sm:$0xff] %v8530_v63  ;;  %v1020_v4 = vmul.f32 %v8530_v63, %v717_v1  ;;  %v927_v38 = vpop.f32.mrf.mxu1 }
 0x18b   : > { %v721_v5 = vpop.f32.mrf.mxu0  ;;  %1365 = vst [vmem:[#allocation4 + $0x20] sm:$0xff] %v927_v38 }
 0x18c   : > { %v1045_v8 = vpack.c.bf16 %v1020_v4, %v1019_v3  ;;  %v8535_v12 = vadd.f32 %v8476_v50, %v721_v5  ;;  %v6902_v41 = vpop.f32.mrf.mxu1 }
 0x18d   : > { %v723_v10 = vpop.f32.mrf.mxu0  ;;  %1370 = vst [vmem:[#allocation4 + $0x50] sm:$0xff] %v6902_v41 }
 0x18e   : > { %10169 = vst [vmem:[#allocation32_spill] sm:$0xff] %v8535_v12  ;;  %6936 = vmatprep.mubr.bf16.mxu1 %v1045_v8  ;;  %v1021_v19 = vmul.f32 %v8535_v12, %v723_v10  ;;  %v940_v45 = vpop.f32.mrf.mxu1 }
 0x18f   : > { %v725_v13 = vpop.f32.mrf.mxu0  ;;  %1368 = vst [vmem:[#allocation4 + $0xa8] sm:$0xff] %v940_v45 }
 0x190   : > { %v8538_v15 = vadd.f32 %v8476_v50, %v725_v13  ;;  %v6903_v49 = vpop.f32.mrf.mxu1 }
 0x191   : > { %v727_v16 = vpop.f32.mrf.mxu0  ;;  %1371 = vst [vmem:[#allocation4 + $0x88] sm:$0xff] %v6903_v49 }
 0x192   : > { %10170 = vst [vmem:[#allocation33_spill] sm:$0xff] %v8538_v15  ;;  %v1022_v21 = vmul.f32 %v8538_v15, %v727_v16  ;;  %v943_v56 = vpop.f32.mrf.mxu1 }
 0x193   : > { %v731_v22 = vpop.f32.mrf.mxu0  ;;  %1369 = vst [vmem:[#allocation4 + $0xf0] sm:$0xff] %v943_v56 }
 0x194   : > { %v1046_v24 = vpack.c.bf16 %v1022_v21, %v1021_v19  ;;  %v8543_v27 = vadd.f32 %v8476_v50, %v731_v22  ;;  %v6906_v60 = vpop.f32.mrf.mxu1 }
 0x195   : > { %v733_v25 = vpop.f32.mrf.mxu0  ;;  %1374 = vst [vmem:[#allocation4 + $0x60] sm:$0xff] %v6906_v60 }
 0x196   : > { %10171 = vst [vmem:[#allocation34_spill] sm:$0xff] %v8543_v27  ;;  %6937 = vmatmul.mubr.bf16.gmra.mxu1 %v1046_v24  ;;  %v1023_v35 = vmul.f32 %v8543_v27, %v733_v25  ;;  %v956_v2 = vpop.f32.mrf.mxu1 }
 0x197   : > { %v735_v28 = vpop.f32.mrf.mxu0  ;;  %1372 = vst [vmem:[#allocation4 + $0xc8] sm:$0xff] %v956_v2 }
 0x198   : > { %v8546_v31 = vadd.f32 %v8476_v50, %v735_v28  ;;  %v6907_v5 = vpop.f32.mrf.mxu1 }
 0x199   : > { %v737_v32 = vpop.f32.mrf.mxu0  ;;  %1375 = vst [vmem:[#allocation4 + $0x8] sm:$0xff] %v6907_v5 }
 0x19a   : > { %10172 = vst [vmem:[#allocation35_spill] sm:$0xff] %v8546_v31  ;;  %v1024_v36 = vmul.f32 %v8546_v31, %v737_v32  ;;  %v959_v11 = vpop.f32.mrf.mxu1 }
 0x19b   : > { %v741_v37 = vpop.f32.mrf.mxu0  ;;  %1373 = vst [vmem:[#allocation4 + $0x98] sm:$0xff] %v959_v11 }
 0x19c   : > { %v1047_v39 = vpack.c.bf16 %v1024_v36, %v1023_v35  ;;  %v8551_v42 = vadd.f32 %v8476_v50, %v741_v37 }
 0x19d   : > { %v743_v40 = vpop.f32.mrf.mxu0 }
 0x19e   : > { %10173 = vst [vmem:[#allocation36_spill] sm:$0xff] %v8551_v42  ;;  %6940 = vmatprep.mubr.bf16.mxu1 %v1047_v39  ;;  %v1025_v51 = vmul.f32 %v8551_v42, %v743_v40 }
 0x19f   : > { %v745_v44 = vpop.f32.mrf.mxu0 }
 0x1a0   : > { %v8554_v47 = vadd.f32 %v8476_v50, %v745_v44 }
 0x1a1   : > { %v747_v48 = vpop.f32.mrf.mxu0 }
 0x1a2   : > { %10174 = vst [vmem:[#allocation37_spill] sm:$0xff] %v8554_v47  ;;  %v1026_v52 = vmul.f32 %v8554_v47, %v747_v48 }
 0x1a3   : > { %v751_v54 = vpop.f32.mrf.mxu0 }
 0x1a4   : > { %v1048_v57 = vpack.c.bf16 %v1026_v52, %v1025_v51  ;;  %v8559_v61 = vadd.f32 %v8476_v50, %v751_v54 }
 0x1a5   : > { %v753_v58 = vpop.f32.mrf.mxu0 }
 0x1a6   : > { %10175 = vst [vmem:[#allocation38_spill] sm:$0xff] %v8559_v61  ;;  %6941 = vmatmul.mubr.bf16.gmra.mxu1 %v1048_v57  ;;  %v1027_v6 = vmul.f32 %v8559_v61, %v753_v58 }
 0x1a7   : > { %v755_v1 = vpop.f32.mrf.mxu0 }
 0x1a8   : > { %v8562_v3 = vadd.f32 %v8476_v50, %v755_v1 }
 0x1a9   : > { %v757_v4 = vpop.f32.mrf.mxu0 }
 0x1aa   : > { %10176 = vst [vmem:[#allocation39_spill] sm:$0xff] %v8562_v3  ;;  %v1028_v8 = vmul.f32 %v8562_v3, %v757_v4 }
 0x1ab   : > { %v761_v10 = vpop.f32.mrf.mxu0 }
 0x1ac   : > { %v1049_v13 = vpack.c.bf16 %v1028_v8, %v1027_v6  ;;  %v8567_v16 = vadd.f32 %v8476_v50, %v761_v10 }
 0x1ad   : > { %v763_v14 = vpop.f32.mrf.mxu0 }
 0x1ae   : > { %10177 = vst [vmem:[#allocation40_spill] sm:$0xff] %v8567_v16  ;;  %6944 = vmatprep.mubr.bf16.mxu1 %v1049_v13  ;;  %v1029_v22 = vmul.f32 %v8567_v16, %v763_v14 }
 0x1af   : > { %v765_v18 = vpop.f32.mrf.mxu0 }
 0x1b0   : > { %v8570_v19 = vadd.f32 %v8476_v50, %v765_v18 }
 0x1b1   : > { %v767_v21 = vpop.f32.mrf.mxu0 }
 0x1b2   : > { %10178 = vst [vmem:[#allocation41_spill] sm:$0xff] %v8570_v19  ;;  %v1030_v23 = vmul.f32 %v8570_v19, %v767_v21 }
 0x1b3   : > { %v771_v24 = vpop.f32.mrf.mxu0 }
 0x1b4   : > { %v1050_v25 = vpack.c.bf16 %v1030_v23, %v1029_v22  ;;  %v8575_v28 = vadd.f32 %v8476_v50, %v771_v24 }
 0x1b5   : > { %v773_v26 = vpop.f32.mrf.mxu0 }
 0x1b6   : > { %10179 = vst [vmem:[#allocation42_spill] sm:$0xff] %v8575_v28  ;;  %6945 = vmatmul.mubr.bf16.gmra.mxu1 %v1050_v25  ;;  %v1031_v35 = vmul.f32 %v8575_v28, %v773_v26 }
 0x1b7   : > { %v775_v29 = vpop.f32.mrf.mxu0 }
 0x1b8   : > { %v8578_v32 = vadd.f32 %v8476_v50, %v775_v29 }
 0x1b9   : > { %v777_v34 = vpop.f32.mrf.mxu0 }
 0x1ba   : > { %10180 = vst [vmem:[#allocation43_spill] sm:$0xff] %v8578_v32  ;;  %v1032_v36 = vmul.f32 %v8578_v32, %v777_v34 }
 0x1bb   : > { %v781_v37 = vpop.f32.mrf.mxu0 }
 0x1bc   : > { %v1051_v38 = vpack.c.bf16 %v1032_v36, %v1031_v35  ;;  %v8583_v40 = vadd.f32 %v8476_v50, %v781_v37 }
 0x1bd   : > { %v783_v39 = vpop.f32.mrf.mxu0 }
 0x1be   : > { %10181 = vst [vmem:[#allocation44_spill] sm:$0xff] %v8583_v40  ;;  %6948 = vmatprep.mubr.bf16.mxu1 %v1051_v38  ;;  %v1033_v48 = vmul.f32 %v8583_v40, %v783_v39 }
 0x1bf   : > { %v785_v41 = vpop.f32.mrf.mxu0 }
 0x1c0   : > { %v8586_v44 = vadd.f32 %v8476_v50, %v785_v41 }
 0x1c1   : > { %v787_v45 = vpop.f32.mrf.mxu0 }
 0x1c2   : > { %10182 = vst [vmem:[#allocation45_spill] sm:$0xff] %v8586_v44  ;;  %v1034_v49 = vmul.f32 %v8586_v44, %v787_v45 }
 0x1c3   : > { %v791_v51 = vpop.f32.mrf.mxu0 }
 0x1c4   : > { %v1052_v52 = vpack.c.bf16 %v1034_v49, %v1033_v48  ;;  %v8591_v56 = vadd.f32 %v8476_v50, %v791_v51 }
 0x1c5   : > { %v793_v54 = vpop.f32.mrf.mxu0 }
 0x1c6   : > { %10183 = vst [vmem:[#allocation46_spill] sm:$0xff] %v8591_v56  ;;  %6949 = vmatmul.mubr.bf16.gmra.mxu1 %v1052_v52  ;;  %v1035_v1 = vmul.f32 %v8591_v56, %v793_v54 }
 0x1c7   : > { %v795_v57 = vpop.f32.mrf.mxu0 }
 0x1c8   : > { %v8594_v58 = vadd.f32 %v8476_v50, %v795_v57 }
 0x1c9   : > { %v797_v60 = vpop.f32.mrf.mxu0 }
 0x1ca   : > { %10184 = vst [vmem:[#allocation47_spill] sm:$0xff] %v8594_v58  ;;  %v1036_v2 = vmul.f32 %v8594_v58, %v797_v60 }
 0x1cb   : > { %v801_v4 = vpop.f32.mrf.mxu0 }
 0x1cc   : > { %v1053_v5 = vpack.c.bf16 %v1036_v2, %v1035_v1  ;;  %v8599_v8 = vadd.f32 %v8476_v50, %v801_v4 }
 0x1cd   : > { %v803_v6 = vpop.f32.mrf.mxu0 }
 0x1ce   : > { %10185 = vst [vmem:[#allocation48_spill] sm:$0xff] %v8599_v8  ;;  %6952 = vmatprep.mubr.bf16.mxu1 %v1053_v5  ;;  %v1037_v14 = vmul.f32 %v8599_v8, %v803_v6 }
 0x1cf   : > { %v805_v10 = vpop.f32.mrf.mxu0 }
 0x1d0   : > { %v8602_v11 = vadd.f32 %v8476_v50, %v805_v10 }
 0x1d1   : > { %v807_v13 = vpop.f32.mrf.mxu0 }
 0x1d2   : > { %10186 = vst [vmem:[#allocation49_spill] sm:$0xff] %v8602_v11  ;;  %v1038_v18 = vmul.f32 %v8602_v11, %v807_v13 }
 0x1d4   : > { %v1054_v21 = vpack.c.bf16 %v1038_v18, %v1037_v14 }
 0x1d6   : > { %6953 = vmatmul.mubr.bf16.gmra.mxu1 %v1054_v21 }
 0x226   : > { %v6926_v22 = vpop.f32.mrf.mxu1 }
 0x227   : > { %1282 = vst [vmem:[#allocation2 + $0xd8] sm:$0xff] %v6926_v22 }
 0x228   : > { %v1153_v23 = vpop.f32.mrf.mxu1 }
 0x229   : > { %1280 = vst [vmem:[#allocation2 + $0xb0] sm:$0xff] %v1153_v23 }
 0x22a   : > { %v6927_v24 = vpop.f32.mrf.mxu1 }
 0x22b   : > { %1283 = vst [vmem:[#allocation2 + $0x18] sm:$0xff] %v6927_v24 }
 0x22c   : > { %v1156_v25 = vpop.f32.mrf.mxu1 }
 0x22d   : > { %1281 = vst [vmem:[#allocation2] sm:$0xff] %v1156_v25 }
 0x236   : > { %v6930_v26 = vpop.f32.mrf.mxu1 }
 0x237   : > { %1286 = vst [vmem:[#allocation2 + $0x30] sm:$0xff] %v6930_v26 }
 0x238   : > { %v1169_v29 = vpop.f32.mrf.mxu1 }
 0x239   : > { %1284 = vst [vmem:[#allocation2 + $0x50] sm:$0xff] %v1169_v29 }
 0x23a   : > { %v6931_v50 = vpop.f32.mrf.mxu1 }
 0x23b   : > { %1287 = vst [vmem:[#allocation2 + $0x48] sm:$0xff] %v6931_v50 }
 0x23c   : > { %v1172_v34 = vpop.f32.mrf.mxu1 }
 0x23d   : > { %1285 = vst [vmem:[#allocation2 + $0x68] sm:$0xff] %v1172_v34 }
 0x246   : > { %v6934_v35 = vpop.f32.mrf.mxu1 }
 0x247   : > { %1290 = vst [vmem:[#allocation2 + $0xe8] sm:$0xff] %v6934_v35 }
 0x248   : > { %v1185_v36 = vpop.f32.mrf.mxu1 }
 0x249   : > { %1288 = vst [vmem:[#allocation2 + $0x80] sm:$0xff] %v1185_v36 }
 0x24a   : > { %v6935_v37 = vpop.f32.mrf.mxu1 }
 0x24b   : > { %1291 = vst [vmem:[#allocation2 + $0xb8] sm:$0xff] %v6935_v37 }
 0x24c   : > { %v1188_v38 = vpop.f32.mrf.mxu1 }
 0x24d   : > { %1289 = vst [vmem:[#allocation2 + $0x88] sm:$0xff] %v1188_v38 }
 0x256   : > { %v6938_v39 = vpop.f32.mrf.mxu1 }
 0x257   : > { %1294 = vst [vmem:[#allocation2 + $0x8] sm:$0xff] %v6938_v39 }
 0x258   : > { %v1201_v41 = vpop.f32.mrf.mxu1 }
 0x259   : > { %1292 = vst [vmem:[#allocation2 + $0x60] sm:$0xff] %v1201_v41 }
 0x25a   : > { %v6939_v45 = vpop.f32.mrf.mxu1 }
 0x25b   : > { %1295 = vst [vmem:[#allocation2 + $0x78] sm:$0xff] %v6939_v45 }
 0x25c   : > { %v1204_v48 = vpop.f32.mrf.mxu1 }
 0x25d   : > { %1293 = vst [vmem:[#allocation2 + $0xf0] sm:$0xff] %v1204_v48 }
 0x266   : > { %v6942_v49 = vpop.f32.mrf.mxu1 }
 0x267   : > { %1298 = vst [vmem:[#allocation2 + $0x40] sm:$0xff] %v6942_v49 }
 0x268   : > { %v1217_v51 = vpop.f32.mrf.mxu1 }
 0x269   : > { %1296 = vst [vmem:[#allocation2 + $0x38] sm:$0xff] %v1217_v51 }
 0x26a   : > { %v6943_v52 = vpop.f32.mrf.mxu1 }
 0x26b   : > { %1299 = vst [vmem:[#allocation2 + $0xc8] sm:$0xff] %v6943_v52 }
 0x26c   : > { %v1220_v54 = vpop.f32.mrf.mxu1 }
 0x26d   : > { %1297 = vst [vmem:[#allocation2 + $0x58] sm:$0xff] %v1220_v54 }
 0x276   : > { %v6946_v57 = vpop.f32.mrf.mxu1 }
 0x277   : > { %1302 = vst [vmem:[#allocation2 + $0x70] sm:$0xff] %v6946_v57 }
 0x278   : > { %v1233_v60 = vpop.f32.mrf.mxu1 }
 0x279   : > { %1300 = vst [vmem:[#allocation2 + $0xe0] sm:$0xff] %v1233_v60 }
 0x27a   : > { %v6947_v1 = vpop.f32.mrf.mxu1 }
 0x27b   : > { %1303 = vst [vmem:[#allocation2 + $0xc0] sm:$0xff] %v6947_v1 }
 0x27c   : > { %v1236_v2 = vpop.f32.mrf.mxu1 }
 0x27d   : > { %1301 = vst [vmem:[#allocation2 + $0x90] sm:$0xff] %v1236_v2 }
 0x286   : > { %v6950_v4 = vpop.f32.mrf.mxu1 }
 0x287   : > { %1306 = vst [vmem:[#allocation2 + $0x10] sm:$0xff] %v6950_v4 }
 0x288   : > { %v1249_v5 = vpop.f32.mrf.mxu1 }
 0x289   : > { %1304 = vst [vmem:[#allocation2 + $0xa8] sm:$0xff] %v1249_v5 }
 0x28a   : > { %v6951_v6 = vpop.f32.mrf.mxu1 }
 0x28b   : > { %1307 = vst [vmem:[#allocation2 + $0x28] sm:$0xff] %v6951_v6 }
 0x28c   : > { %v1252_v10 = vpop.f32.mrf.mxu1 }
 0x28d   : > { %1305 = vst [vmem:[#allocation2 + $0xd0] sm:$0xff] %v1252_v10 }
 0x296   : > { %v6954_v13 = vpop.f32.mrf.mxu1 }
 0x297   : > { %1310 = vst [vmem:[#allocation2 + $0x20] sm:$0xff] %v6954_v13 }
 0x298   : > { %v1265_v14 = vpop.f32.mrf.mxu1 }
 0x299   : > { %1308 = vst [vmem:[#allocation2 + $0xa0] sm:$0xff] %v1265_v14  ;;  %1379 = sbr.rel (%p6269_p1) target bundleno = 1244 (0x4dc), region = 64 }
 0x29a   : > { %v6955_v18 = vpop.f32.mrf.mxu1 }
 0x29b   : > { %1311 = vst [vmem:[#allocation2 + $0x98] sm:$0xff] %v6955_v18 }
 0x29c   : > { %v1268_v21 = vpop.f32.mrf.mxu1 }
 0x29d   : > { %1309 = vst [vmem:[#allocation2 + $0xf8] sm:$0xff] %v1268_v21 }
 0x29e   : > { %v7419_v22 = vld [vmem:[#allocation10 + $0xb0] ss:$12 sps:$4 sm:$0xff]   ;;  %v7421_v23 = vld [vmem:[#allocation10 + $0xac] ss:$12 sps:$4 sm:$0xff]   ;;  %v8234_v24 = vmov 0   ;;  %v7443_v52 = vld [vmem:[%s8426_s23 + $0x80] sm:$0xff]  }
 0x29f   : > { %1637 = vmatprep.mubr.bf16.mxu0 %v8234_v24  ;;  %1757 = vmatprep.mubr.bf16.mxu1 %v8234_v24  ;;  %v7422_v25 = vld [vmem:[#allocation10 + $0x98] ss:$12 sps:$4 sm:$0xff]   ;;  %v7424_v26 = vld [vmem:[#allocation10 + $0x94] ss:$12 sps:$4 sm:$0xff]   ;;  %v7427_v50 = vld [vmem:[#allocation10 + $0x7c] ss:$12 sps:$4 sm:$0xff]  }
 0x2a0   : > { %1605 = vmatprep.subr.bf16.mxu0 %v7419_v22  ;;  %7196 = vmatprep.subr.bf16.mxu1 %v7419_v22  ;;  %v7425_v29 = vld [vmem:[#allocation10 + $0x80] ss:$12 sps:$4 sm:$0xff]   ;;  %v7428_v34 = vld [vmem:[#allocation10 + $0x68] ss:$12 sps:$4 sm:$0xff]   ;;  %v7430_v35 = vld [vmem:[#allocation10 + $0x64] ss:$12 sps:$4 sm:$0xff]  }
 0x2a1   : > { %1606 = vmatpush1.bf16.msra.mxu0 %v7421_v23  ;;  %7204 = vmatpush1.bf16.msra.mxu1 %v7421_v23  ;;  %v7431_v36 = vld [vmem:[#allocation10 + $0x50] ss:$12 sps:$4 sm:$0xff]   ;;  %v7433_v37 = vld [vmem:[#allocation10 + $0x4c] ss:$12 sps:$4 sm:$0xff]   ;;  %v7436_v39 = vld [vmem:[#allocation10 + $0x34] ss:$12 sps:$4 sm:$0xff]  }
 0x2a2   : > { %1607 = vmatprep.subr.bf16.mxu0 %v7422_v25  ;;  %7197 = vmatprep.subr.bf16.mxu1 %v7422_v25  ;;  %v7434_v38 = vld [vmem:[#allocation10 + $0x38] ss:$12 sps:$4 sm:$0xff]   ;;  %v7437_v41 = vld [vmem:[#allocation10 + $0x20] ss:$12 sps:$4 sm:$0xff]   ;;  %v7439_v45 = vld [vmem:[#allocation10 + $0x1c] ss:$12 sps:$4 sm:$0xff]  }
 0x2a3   : > { %v7440_v48 = vld [vmem:[#allocation10 + $0x8] ss:$12 sps:$4 sm:$0xff]   ;;  %v7442_v49 = vld [vmem:[#allocation10 + $0x4] ss:$12 sps:$4 sm:$0xff]   ;;  %v7459_v51 = vld [vmem:[#allocation12 + $0x38] sm:$0xff]  }
 0x2a4   : > { %v7453_v54 = vld [vmem:[%s8426_s23 + $0xe0] sm:$0xff]   ;;  %v7460_v57 = vld [vmem:[#allocation12 + $0x30] sm:$0xff]   ;;  %v7461_v60 = vld [vmem:[#allocation12 + $0x28] sm:$0xff]  }
 0x2a5   : > { %1608 = vmatpush1.bf16.msra.mxu0 %v7424_v26  ;;  %7205 = vmatpush1.bf16.msra.mxu1 %v7424_v26  ;;  %v7444_v1 = vld [vmem:[%s8426_s23 + $0x88] sm:$0xff]   ;;  %v7462_v4 = vld [vmem:[#allocation12 + $0x20] sm:$0xff]   ;;  %v7445_v5 = vld [vmem:[%s8426_s23 + $0x90] sm:$0xff]  }
 0x2a6   : > { %1609 = vmatprep.subr.bf16.mxu0 %v7425_v29  ;;  %7198 = vmatprep.subr.bf16.mxu1 %v7425_v29  ;;  %v7455_v2 = vld [vmem:[%s8426_s23 + $0xe8] sm:$0xff]   ;;  %v7457_v6 = vld [vmem:[%s8426_s23 + $0xf0] sm:$0xff]   ;;  %v7446_v10 = vld [vmem:[%s8426_s23 + $0x98] sm:$0xff]  }
 0x2a7   : > { %v7458_v13 = vld [vmem:[%s8426_s23 + $0xf8] sm:$0xff]   ;;  %v7447_v14 = vld [vmem:[%s8426_s23 + $0xa0] sm:$0xff]   ;;  %v7448_v18 = vld [vmem:[%s8426_s23 + $0xa8] sm:$0xff]  }
 0x2a8   : > { %v7449_v21 = vld [vmem:[%s8426_s23 + $0xb0] sm:$0xff]   ;;  %v7450_v22 = vld [vmem:[%s8426_s23 + $0xb8] sm:$0xff]   ;;  %v7451_v23 = vld [vmem:[%s8426_s23 + $0xc0] sm:$0xff]  }
 0x2a9   : > { %1610 = vmatpush1.bf16.msra.mxu0 %v7427_v50  ;;  %7206 = vmatpush1.bf16.msra.mxu1 %v7427_v50  ;;  %v7463_v25 = vld [vmem:[#allocation12 + $0x18] sm:$0xff]   ;;  %v7464_v26 = vld [vmem:[#allocation12 + $0x10] sm:$0xff]   ;;  %v7452_v29 = vld [vmem:[%s8426_s23 + $0xc8] sm:$0xff]  }
 0x2aa   : > { %1611 = vmatprep.subr.bf16.mxu0 %v7428_v34  ;;  %7199 = vmatprep.subr.bf16.mxu1 %v7428_v34  ;;  %v7465_v50 = vld [vmem:[#allocation12 + $0x8] sm:$0xff]   ;;  %v7466_v34 = vld [vmem:[#allocation12] sm:$0xff]  }
 0x2ad   : > { %1612 = vmatpush1.bf16.msra.mxu0 %v7430_v35  ;;  %7207 = vmatpush1.bf16.msra.mxu1 %v7430_v35  ;;  %v7454_v35 = vld [vmem:[%s8426_s23 + $0xd0] sm:$0xff]  }
 0x2ae   : > { %1613 = vmatprep.subr.bf16.mxu0 %v7431_v36  ;;  %7200 = vmatprep.subr.bf16.mxu1 %v7431_v36  ;;  %v7456_v36 = vld [vmem:[%s8426_s23 + $0xd8] sm:$0xff]  }
 0x2b1   : > { %1614 = vmatpush1.bf16.msra.mxu0 %v7433_v37  ;;  %7208 = vmatpush1.bf16.msra.mxu1 %v7433_v37 }
 0x2b2   : > { %1615 = vmatprep.subr.bf16.mxu0 %v7434_v38  ;;  %7201 = vmatprep.subr.bf16.mxu1 %v7434_v38 }
 0x2b5   : > { %1616 = vmatpush1.bf16.msra.mxu0 %v7436_v39  ;;  %7209 = vmatpush1.bf16.msra.mxu1 %v7436_v39 }
 0x2b6   : > { %1617 = vmatprep.subr.bf16.mxu0 %v7437_v41  ;;  %7202 = vmatprep.subr.bf16.mxu1 %v7437_v41 }
 0x2b9   : > { %1618 = vmatpush1.bf16.msra.mxu0 %v7439_v45  ;;  %7210 = vmatpush1.bf16.msra.mxu1 %v7439_v45 }
 0x2ba   : > { %1619 = vmatprep.subr.bf16.mxu0 %v7440_v48  ;;  %7203 = vmatprep.subr.bf16.mxu1 %v7440_v48 }
 0x2bd   : > { %1620 = vmatpush1.bf16.msra.mxu0 %v7442_v49  ;;  %7211 = vmatpush1.bf16.msra.mxu1 %v7442_v49 }
 0x2be   : > { %6956 = vmatprep.subr.bf16.mxu1 %v7459_v51 }
 0x2c0   : > { %1638 = vmatmul.mubr.bf16.vlgmr.msra.gmra.mxu0 %v7443_v52  ;;  %1758 = vmatmul.mubr.bf16.vlgmr.msra.gmra.mxu1 %v7453_v54 }
 0x2c1   : > { %1647 = vmatprep.mubr.bf16.mxu0 %v8234_v24  ;;  %1767 = vmatprep.mubr.bf16.mxu1 %v8234_v24 }
 0x2c2   : > { %6957 = vmatpush3.bf16.msra.mxu1 %v7459_v51 }
 0x2c3   : > { %6958 = vmatprep.subr.bf16.mxu1 %v7460_v57 }
 0x2c6   : > { %6959 = vmatpush3.bf16.msra.mxu1 %v7460_v57 }
 0x2c7   : > { %6960 = vmatprep.subr.bf16.mxu1 %v7461_v60 }
 0x2c8   : > { %1648 = vmatmul.mubr.bf16.gmra.mxu0 %v7444_v1  ;;  %1768 = vmatmul.mubr.bf16.gmra.mxu1 %v7455_v2 }
 0x2c9   : > { %1657 = vmatprep.mubr.bf16.mxu0 %v8234_v24  ;;  %1777 = vmatprep.mubr.bf16.mxu1 %v8234_v24 }
 0x2ca   : > { %6961 = vmatpush3.bf16.msra.mxu1 %v7461_v60 }
 0x2cb   : > { %6962 = vmatprep.subr.bf16.mxu1 %v7462_v4 }
 0x2ce   : > { %6963 = vmatpush3.bf16.msra.mxu1 %v7462_v4 }
 0x2cf   : > { %6964 = vmatprep.subr.bf16.mxu1 %v7463_v25 }
 0x2d0   : > { %1658 = vmatmul.mubr.bf16.gmra.mxu0 %v7445_v5  ;;  %1778 = vmatmul.mubr.bf16.gmra.mxu1 %v7457_v6 }
 0x2d1   : > { %1667 = vmatprep.mubr.bf16.mxu0 %v8234_v24  ;;  %1787 = vmatprep.mubr.bf16.mxu1 %v8234_v24 }
 0x2d2   : > { %6965 = vmatpush3.bf16.msra.mxu1 %v7463_v25 }
 0x2d3   : > { %6966 = vmatprep.subr.bf16.mxu1 %v7464_v26 }
 0x2d6   : > { %6967 = vmatpush3.bf16.msra.mxu1 %v7464_v26 }
 0x2d7   : > { %6968 = vmatprep.subr.bf16.mxu1 %v7465_v50 }
 0x2d8   : > { %1668 = vmatmul.mubr.bf16.gmra.mxu0 %v7446_v10  ;;  %1788 = vmatmul.mubr.bf16.gmra.mxu1 %v7458_v13 }
 0x2d9   : > { %1677 = vmatprep.mubr.bf16.mxu0 %v8234_v24 }
 0x2da   : > { %6969 = vmatpush3.bf16.msra.mxu1 %v7465_v50 }
 0x2db   : > { %6970 = vmatprep.subr.bf16.mxu1 %v7466_v34 }
 0x2de   : > { %6971 = vmatpush3.bf16.msra.mxu1 %v7466_v34 }
 0x2e0   : > { %1678 = vmatmul.mubr.bf16.gmra.mxu0 %v7447_v14 }
 0x2e1   : > { %1687 = vmatprep.mubr.bf16.mxu0 %v8234_v24 }
 0x2e8   : > { %1688 = vmatmul.mubr.bf16.gmra.mxu0 %v7448_v18 }
 0x2e9   : > { %1697 = vmatprep.mubr.bf16.mxu0 %v8234_v24 }
 0x2f0   : > { %1698 = vmatmul.mubr.bf16.gmra.mxu0 %v7449_v21 }
 0x2f1   : > { %1707 = vmatprep.mubr.bf16.mxu0 %v8234_v24 }
 0x2f8   : > { %1708 = vmatmul.mubr.bf16.gmra.mxu0 %v7450_v22 }
 0x2f9   : > { %1717 = vmatprep.mubr.bf16.mxu0 %v8234_v24 }
 0x300   : > { %1718 = vmatmul.mubr.bf16.gmra.mxu0 %v7451_v23 }
 0x301   : > { %1727 = vmatprep.mubr.bf16.mxu0 %v8234_v24 }
 0x308   : > { %1728 = vmatmul.mubr.bf16.gmra.mxu0 %v7452_v29 }
 0x309   : > { %1737 = vmatprep.mubr.bf16.mxu0 %v8234_v24 }
 0x310   : > { %1738 = vmatmul.mubr.bf16.gmra.mxu0 %v7454_v35 }
 0x311   : > { %1747 = vmatprep.mubr.bf16.mxu0 %v8234_v24 }
 0x318   : > { %1748 = vmatmul.mubr.bf16.gmra.mxu0 %v7456_v36 }
 0x380   : > { %v1639_v37 = vpop.f32.mrf.mxu0 }
 0x381   : > { %v1798_v41 = vmul.f32 %v1639_v37, %v8479_v53 }
 0x382   : > { %v8643_v38 = vpop.f32.mrf.mxu0 }
 0x384   : > { %v1643_v39 = vpop.f32.mrf.mxu0 }
 0x385   : > { %v1799_v45 = vmul.f32 %v1643_v39, %v8482_v55 }
 0x386   : > { %v8647_v48 = vpop.f32.mrf.mxu0 }
 0x387   : > { %v1830_v49 = vpack.c.bf16 %v1799_v45, %v1798_v41 }
 0x388   : > { %v1649_v51 = vpop.f32.mrf.mxu0 }
 0x389   : > { %6972 = vmatprep.mubr.bf16.mxu1 %v1830_v49  ;;  %v1800_v24 = vmul.f32 %v1649_v51, %v8487_v62 }
 0x38a   : > { %v8649_v52 = vpop.f32.mrf.mxu0 }
 0x38c   : > { %v1653_v54 = vpop.f32.mrf.mxu0 }
 0x38d   : > { %v1801_v57 = vmul.f32 %v1653_v54, %v8490_v0 }
 0x38e   : > { %v8653_v60 = vpop.f32.mrf.mxu0 }
 0x38f   : > { %v1831_v1 = vpack.c.bf16 %v1801_v57, %v1800_v24 }
 0x390   : > { %v1659_v2 = vpop.f32.mrf.mxu0 }
 0x391   : > { %6973 = vmatmul.mubr.bf16.vlgmr.msra.gmra.mxu1 %v1831_v1  ;;  %v1802_v6 = vmul.f32 %v1659_v2, %v8495_v7 }
 0x392   : > { %v8655_v4 = vpop.f32.mrf.mxu0 }
 0x394   : > { %v1663_v5 = vpop.f32.mrf.mxu0 }
 0x395   : > { %v1803_v10 = vmul.f32 %v1663_v5, %v8498_v9  ;;  %v2458_v9 = vld [vmem:[#allocation4 + $0x10] sm:$0xff] }
 0x396   : > { %v8659_v13 = vpop.f32.mrf.mxu0 }
 0x397   : > { %v1832_v14 = vpack.c.bf16 %v1803_v10, %v1802_v6  ;;  %v1759_v6 = vpop.f32.mrf.mxu1 }
 0x398   : > { %v1669_v18 = vpop.f32.mrf.mxu0 }
 0x399   : > { %6976 = vmatprep.mubr.bf16.mxu1 %v1832_v14  ;;  %v1804_v23 = vmul.f32 %v1669_v18, %v8503_v17  ;;  %v2330_v17 = vld [vmem:[#allocation3 + $0x78] sm:$0xff] }
 0x39a   : > { %v8661_v21 = vpop.f32.mrf.mxu0 }
 0x39c   : > { %v1673_v22 = vpop.f32.mrf.mxu0 }
 0x39d   : > { %v1805_v25 = vmul.f32 %v1673_v22, %v8506_v20 }
 0x39e   : > { %v8665_v26 = vpop.f32.mrf.mxu0 }
 0x39f   : > { %v1833_v29 = vpack.c.bf16 %v1805_v25, %v1804_v23  ;;  %v8685_v23 = vpop.f32.mrf.mxu1 }
 0x3a0   : > { %v1679_v50 = vpop.f32.mrf.mxu0 }
 0x3a1   : > { %6977 = vmatmul.mubr.bf16.gmra.mxu1 %v1833_v29  ;;  %v1806_v36 = vmul.f32 %v1679_v50, %v8511_v30 }
 0x3a2   : > { %v8667_v34 = vpop.f32.mrf.mxu0 }
 0x3a4   : > { %v1683_v35 = vpop.f32.mrf.mxu0 }
 0x3a5   : > { %v1807_v37 = vmul.f32 %v1683_v35, %v8514_v33  ;;  %v1763_v35 = vpop.f32.mrf.mxu1 }
 0x3a6   : > { %v8671_v39 = vpop.f32.mrf.mxu0 }
 0x3a7   : > { %v1834_v41 = vpack.c.bf16 %v1807_v37, %v1806_v36 }
 0x3a8   : > { %v1689_v45 = vpop.f32.mrf.mxu0 }
 0x3a9   : > { %6980 = vmatprep.mubr.bf16.mxu1 %v1834_v41  ;;  %v1808_v54 = vmul.f32 %v1689_v45, %v8519_v43 }
 0x3aa   : > { %v8673_v49 = vpop.f32.mrf.mxu0 }
 0x3ac   : > { %v1693_v51 = vpop.f32.mrf.mxu0 }
 0x3ad   : > { %v1809_v24 = vmul.f32 %v1693_v51, %v8522_v46  ;;  %v8693_v51 = vpop.f32.mrf.mxu1 }
 0x3ae   : > { %v8677_v57 = vpop.f32.mrf.mxu0 }
 0x3af   : > { %v1835_v1 = vpack.c.bf16 %v1809_v24, %v1808_v54 }
 0x3b0   : > { %v1699_v2 = vpop.f32.mrf.mxu0 }
 0x3b1   : > { %6981 = vmatmul.mubr.bf16.gmra.mxu1 %v1835_v1  ;;  %v1810_v14 = vmul.f32 %v1699_v2, %v8527_v59  ;;  %v1769_v2 = vpop.f32.mrf.mxu1 }
 0x3b2   : > { %v8679_v5 = vpop.f32.mrf.mxu0 }
 0x3b4   : > { %v1703_v10 = vpop.f32.mrf.mxu0 }
 0x3b5   : > { %v1811_v18 = vmul.f32 %v1703_v10, %v8530_v63 }
 0x3b6   : > { %v8683_v22 = vpop.f32.mrf.mxu0 }
 0x3b7   : > { %v1836_v25 = vpack.c.bf16 %v1811_v18, %v1810_v14 }
 0x3b8   : > { %v1709_v29 = vpop.f32.mrf.mxu0 }
 0x3b9   : > { %6984 = vmatprep.mubr.bf16.mxu1 %v1836_v25  ;;  %v1812_v37 = vmul.f32 %v1709_v29, %v8535_v12  ;;  %v8701_v29 = vpop.f32.mrf.mxu1 }
 0x3ba   : > { %v8687_v50 = vpop.f32.mrf.mxu0 }
 0x3bc   : > { %v1713_v36 = vpop.f32.mrf.mxu0 }
 0x3bd   : > { %v1813_v41 = vmul.f32 %v1713_v36, %v8538_v15 }
 0x3be   : > { %v8691_v45 = vpop.f32.mrf.mxu0 }
 0x3bf   : > { %v1837_v54 = vpack.c.bf16 %v1813_v41, %v1812_v37  ;;  %v1773_v37 = vpop.f32.mrf.mxu1 }
 0x3c0   : > { %v1719_v24 = vpop.f32.mrf.mxu0 }
 0x3c1   : > { %6985 = vmatmul.mubr.bf16.gmra.mxu1 %v1837_v54  ;;  %v1814_v14 = vmul.f32 %v1719_v24, %v8543_v27  ;;  %v8709_v24 = vpop.f32.mrf.mxu1 }
 0x3c2   : > { %v8695_v1 = vpop.f32.mrf.mxu0 }
 0x3c4   : > { %v1723_v10 = vpop.f32.mrf.mxu0 }
 0x3c5   : > { %v1815_v18 = vmul.f32 %v1723_v10, %v8546_v31 }
 0x3c6   : > { %v8699_v25 = vpop.f32.mrf.mxu0 }
 0x3c7   : > { %v1838_v36 = vpack.c.bf16 %v1815_v18, %v1814_v14  ;;  %v1779_v14 = vpop.f32.mrf.mxu1 }
 0x3c8   : > { %v1729_v15 = vpop.f32.mrf.mxu0 }
 0x3c9   : > { %6988 = vmatprep.mubr.bf16.mxu1 %v1838_v36  ;;  %v1816_v54 = vmul.f32 %v1729_v15, %v8551_v42  ;;  %v8717_v15 = vpop.f32.mrf.mxu1 }
 0x3ca   : > { %v8703_v12 = vpop.f32.mrf.mxu0 }
 0x3cc   : > { %v1733_v41 = vpop.f32.mrf.mxu0 }
 0x3cd   : > { %v1817_v63 = vmul.f32 %v1733_v41, %v8554_v47 }
 0x3ce   : > { %v8707_v59 = vpop.f32.mrf.mxu0 }
 0x3cf   : > { %v1839_v10 = vpack.c.bf16 %v1817_v63, %v1816_v54  ;;  %v1783_v63 = vpop.f32.mrf.mxu1  ;;  %v1822_v54 = vmul.f32 %v1759_v6, %v8575_v28  ;;  %v1826_v6 = vmul.f32 %v1779_v14, %v8591_v56  ;;  %v2071_v14 = vld [vmem:[#allocation2 + $0xb0] sm:$0xff] }
 0x3d0   : > { %v1739_v31 = vpop.f32.mrf.mxu0 }
 0x3d1   : > { %6989 = vmatmul.mubr.bf16.gmra.mxu1 %v1839_v10  ;;  %v1818_v36 = vmul.f32 %v1739_v31, %v8559_v61  ;;  %v1823_v10 = vmul.f32 %v1763_v35, %v8578_v32  ;;  %v1827_v35 = vmul.f32 %v1783_v63, %v8594_v58 }
 0x3d2   : > { %v8711_v27 = vpop.f32.mrf.mxu0 }
 0x3d3   : > { %v1842_v61 = vpack.c.bf16 %v1823_v10, %v1822_v54 }
 0x3d4   : > { %v1743_v18 = vpop.f32.mrf.mxu0 }
 0x3d5   : > { %v1819_v46 = vmul.f32 %v1743_v18, %v8562_v3  ;;  %v8725_v18 = vpop.f32.mrf.mxu1 }
 0x3d6   : > { %v8715_v43 = vpop.f32.mrf.mxu0 }
 0x3d7   : > { %v1840_v41 = vpack.c.bf16 %v1819_v46, %v1818_v36  ;;  %v1789_v46 = vpop.f32.mrf.mxu1  ;;  %v1824_v36 = vmul.f32 %v1769_v2, %v8583_v40 }
 0x3d8   : > { %v1749_v47 = vpop.f32.mrf.mxu0 }
 0x3d9   : > { %6992 = vmatprep.mubr.bf16.mxu1 %v1840_v41  ;;  %v1820_v30 = vmul.f32 %v1749_v47, %v8567_v16  ;;  %v1825_v41 = vmul.f32 %v1773_v37, %v8586_v44  ;;  %v8731_v32 = vpop.f32.mrf.mxu1  ;;  %v1844_v16 = vpack.c.bf16 %v1827_v35, %v1826_v6  ;;  %v2073_v37 = vld [vmem:[#allocation2 + $0xd8] sm:$0xff] }
 0x3da   : > { %v8719_v42 = vpop.f32.mrf.mxu0 }
 0x3db   : > { %v1843_v47 = vpack.c.bf16 %v1825_v41, %v1824_v36  ;;  %v2074_v41 = vld [vmem:[#allocation2 + $0x18] sm:$0xff] }
 0x3dc   : > { %v1753_v33 = vpop.f32.mrf.mxu0 }
 0x3dd   : > { %v1821_v31 = vmul.f32 %v1753_v33, %v8570_v19  ;;  %v1793_v33 = vpop.f32.mrf.mxu1 }
 0x3df   : > { %v1841_v3 = vpack.c.bf16 %v1821_v31, %v1820_v30  ;;  %v1828_v30 = vmul.f32 %v1789_v46, %v8599_v8  ;;  %v8735_v2 = vpop.f32.mrf.mxu1 }
 0x3e1   : > { %6993 = vmatmul.mubr.bf16.gmra.mxu1 %v1841_v3  ;;  %v1829_v3 = vmul.f32 %v1793_v33, %v8602_v11 }
 0x3e2   : > { %6996 = vmatprep.mubr.bf16.mxu1 %v1842_v61 }
 0x3e3   : > { %v1845_v61 = vpack.c.bf16 %v1829_v3, %v1828_v30 }
 0x3e9   : > { %6997 = vmatmul.mubr.bf16.gmra.mxu1 %v1843_v47 }
 0x3ea   : > { %7000 = vmatprep.mubr.bf16.mxu1 %v1844_v16  ;;  %v2072_v16 = vld [vmem:[#allocation2] sm:$0xff] }
 0x3f1   : > { %7001 = vmatmul.mubr.bf16.gmra.mxu1 %v1845_v61 }
 0x451   : > { %v6974_v54 = vpop.f32.mrf.mxu1 }
 0x452   : > { %v2105_v10 = vmax.f32 %v2073_v37, %v6974_v54 }
 0x453   : > { %v1944_v63 = vpop.f32.mrf.mxu1 }
 0x454   : > { %v2137_v31 = vsub.f32 %v2073_v37, %v2105_v10  ;;  %v2233_v58 = vsub.f32 %v6974_v54, %v2105_v10  ;;  %2617 = vst [vmem:[#allocation2 + $0xd8] sm:$0xff] %v2105_v10  ;;  %v2103_v36 = vmax.f32 %v2071_v14, %v1944_v63 }
 0x455   : > { %v6975_v6 = vpop.f32.mrf.mxu1 }
 0x456   : > { %v2171_v35 = vmul.f32 1.442695, %v2137_v31  ;;  %v2267_v46 = vmul.f32 1.442695, %v2233_v58  ;;  %v2135_v47 = vsub.f32 %v2071_v14, %v2103_v36  ;;  %v2231_v33 = vsub.f32 %v1944_v63, %v2103_v36  ;;  %2615 = vst [vmem:[#allocation2 + $0xb0] sm:$0xff] %v2103_v36  ;;  %v2077_v36 = vld [vmem:[#allocation2 + $0x30] sm:$0xff] }
 0x457   : > { %v2106_v30 = vmax.f32 %v2074_v41, %v6975_v6  ;;  %v1947_v3 = vpop.f32.mrf.mxu1 }
 0x458   : > { %7467 = vpow2.f32 %v2171_v35  ;;  %v2167_v61 = vmul.f32 1.442695, %v2135_v47  ;;  %v2263_v11 = vmul.f32 1.442695, %v2231_v33  ;;  %v2104_v8 = vmax.f32 %v2072_v16, %v1947_v3  ;;  %v2075_v47 = vld [vmem:[#allocation2 + $0x50] sm:$0xff] }
 0x459   : > { %7469 = vpow2.f32 %v2267_v46  ;;  %v2138_v56 = vsub.f32 %v2074_v41, %v2106_v30  ;;  %v2234_v37 = vsub.f32 %v6975_v6, %v2106_v30  ;;  %2618 = vst [vmem:[#allocation2 + $0x18] sm:$0xff] %v2106_v30  ;;  %v2329_v41 = vld [vmem:[#allocation3 + $0xe8] sm:$0xff]  ;;  %v2457_v6 = vld [vmem:[#allocation4 + $0xc0] sm:$0xff] }
 0x45a   : > { %7471 = vpow2.f32 %v2167_v61  ;;  %v2136_v54 = vsub.f32 %v2072_v16, %v2104_v8  ;;  %v2232_v10 = vsub.f32 %v1947_v3, %v2104_v8  ;;  %2616 = vst [vmem:[#allocation2] sm:$0xff] %v2104_v8  ;;  %v2327_v3 = vld [vmem:[#allocation3 + $0x80] sm:$0xff]  ;;  %v2455_v61 = vld [vmem:[#allocation4 + $0xb0] sm:$0xff] }
 0x45b   : > { %7473 = vpow2.f32 %v2263_v11  ;;  %v2173_v31 = vmul.f32 1.442695, %v2138_v56  ;;  %v2269_v58 = vmul.f32 1.442695, %v2234_v37  ;;  %v2078_v11 = vld [vmem:[#allocation2 + $0x48] sm:$0xff] }
 0x45c   : > { %v2169_v14 = vmul.f32 1.442695, %v2136_v54  ;;  %v2265_v63 = vmul.f32 1.442695, %v2232_v10 }
 0x45d   : > { %7475 = vpow2.f32 %v2173_v31 }
 0x45e   : > { %7477 = vpow2.f32 %v2269_v58 }
 0x45f   : > { %7479 = vpow2.f32 %v2169_v14 }
 0x460   : > { %7481 = vpow2.f32 %v2265_v63 }
 0x461   : > { %v6978_v35 = vpop.f32.mrf.mxu1 }
 0x462   : > { %v2109_v46 = vmax.f32 %v2077_v36, %v6978_v35 }
 0x463   : > { %v1960_v33 = vpop.f32.mrf.mxu1 }
 0x464   : > { %v2141_v30 = vsub.f32 %v2077_v36, %v2109_v46  ;;  %v2237_v16 = vsub.f32 %v6978_v35, %v2109_v46  ;;  %2621 = vst [vmem:[#allocation2 + $0x30] sm:$0xff] %v2109_v46  ;;  %v2107_v8 = vmax.f32 %v2075_v47, %v1960_v33 }
 0x465   : > { %v7468_v56 = vpop.eup %7467  ;;  %v6979_v37 = vpop.f32.mrf.mxu1 }
 0x466   : > { %v7470_v54 = vpop.eup %7469  ;;  %v2361_v10 = vmul.f32 %v7468_v56, %v2329_v41  ;;  %v2489_v31 = vmul.f32 %v7468_v56, %v2457_v6  ;;  %v2179_v58 = vmul.f32 1.442695, %v2141_v30  ;;  %v2275_v14 = vmul.f32 1.442695, %v2237_v16  ;;  %2619 = vst [vmem:[#allocation2 + $0x50] sm:$0xff] %v2107_v8 }
 0x467   : > { %v7472_v63 = vpop.eup %7471  ;;  %v2521_v44 = vmul.f32 %v7470_v54, %v8649_v52  ;;  %v2139_v40 = vsub.f32 %v2075_v47, %v2107_v8  ;;  %v2235_v19 = vsub.f32 %v1960_v33, %v2107_v8  ;;  %v2110_v36 = vmax.f32 %v2078_v11, %v6979_v37  ;;  %v2328_v52 = vld [vmem:[#allocation3 + $0xc8] sm:$0xff]  ;;  %v2456_v47 = vld [vmem:[#allocation4 + $0xb8] sm:$0xff] }
 0x468   : > { %v7474_v35 = vpop.eup %7473  ;;  %v2393_v46 = vadd.f32 %v7470_v54, %v2361_v10  ;;  %v2359_v28 = vmul.f32 %v7472_v63, %v2327_v3  ;;  %v2487_v20 = vmul.f32 %v7472_v63, %v2455_v61  ;;  %7483 = vpow2.f32 %v2179_v58  ;;  %v1963_v54 = vpop.f32.mrf.mxu1  ;;  %v2076_v3 = vld [vmem:[#allocation2 + $0x68] sm:$0xff] }
 0x469   : > { %v2553_v7 = vadd.f32 %v2521_v44, %v2489_v31  ;;  %v2519_v41 = vmul.f32 %v7474_v35, %v8643_v38  ;;  %7485 = vpow2.f32 %v2275_v14  ;;  %v2175_v6 = vmul.f32 1.442695, %v2139_v40  ;;  %2622 = vst [vmem:[#allocation2 + $0x48] sm:$0xff] %v2110_v36 }
 0x46a   : > { %v7476_v30 = vpop.eup %7475  ;;  %2425 = vst [vmem:[#allocation3 + $0xe8] sm:$0xff] %v2393_v46  ;;  %v2391_v16 = vadd.f32 %v7474_v35, %v2359_v28  ;;  %v2271_v33 = vmul.f32 1.442695, %v2235_v19  ;;  %v2142_v8 = vsub.f32 %v2078_v11, %v2110_v36  ;;  %v2238_v56 = vsub.f32 %v6979_v37, %v2110_v36 }
 0x46b   : > { %v7478_v61 = vpop.eup %7477  ;;  %2585 = vst [vmem:[#allocation4 + $0xc0] sm:$0xff] %v2553_v7  ;;  %v2551_v10 = vadd.f32 %v2519_v41, %v2487_v20  ;;  %v2362_v58 = vmul.f32 %v7476_v30, %v2330_v17  ;;  %v2490_v44 = vmul.f32 %v7476_v30, %v2458_v9  ;;  %7487 = vpow2.f32 %v2175_v6  ;;  %v2079_v30 = vld [vmem:[#allocation2 + $0x80] sm:$0xff] }
 0x46c   : > { %v7480_v38 = vpop.eup %7479  ;;  %2423 = vst [vmem:[#allocation3 + $0x80] sm:$0xff] %v2391_v16  ;;  %v2522_v40 = vmul.f32 %v7478_v61, %v8653_v60  ;;  %7489 = vpow2.f32 %v2271_v33  ;;  %v2181_v31 = vmul.f32 1.442695, %v2142_v8  ;;  %v2277_v28 = vmul.f32 1.442695, %v2238_v56  ;;  %v2081_v60 = vld [vmem:[#allocation2 + $0xe8] sm:$0xff] }
 0x46d   : > { %v7482_v14 = vpop.eup %7481  ;;  %2583 = vst [vmem:[#allocation4 + $0xb0] sm:$0xff] %v2551_v10  ;;  %v2394_v19 = vadd.f32 %v7478_v61, %v2362_v58  ;;  %v2360_v11 = vmul.f32 %v7480_v38, %v2328_v52  ;;  %v2488_v37 = vmul.f32 %v7480_v38, %v2456_v47  ;;  %v2108_v63 = vmax.f32 %v2076_v3, %v1963_v54  ;;  %v2333_v52 = vld [vmem:[#allocation3 + $0x58] sm:$0xff]  ;;  %v2461_v47 = vld [vmem:[#allocation4 + $0xd0] sm:$0xff]  ;;  %v2080_v10 = vld [vmem:[#allocation2 + $0x88] sm:$0xff] }
 0x46e   : > { %v2554_v36 = vadd.f32 %v2522_v40, %v2490_v44  ;;  %v2520_v7 = vmul.f32 %v7482_v14, %v8647_v48  ;;  %7491 = vpow2.f32 %v2181_v31  ;;  %v2331_v40 = vld [vmem:[#allocation3 + $0x8] sm:$0xff] }
 0x46f   : > { %2426 = vst [vmem:[#allocation3 + $0x78] sm:$0xff] %v2394_v19  ;;  %v2392_v9 = vadd.f32 %v7482_v14, %v2360_v11  ;;  %7493 = vpow2.f32 %v2277_v28  ;;  %v2140_v17 = vsub.f32 %v2076_v3, %v2108_v63  ;;  %v2236_v20 = vsub.f32 %v1963_v54, %v2108_v63  ;;  %2620 = vst [vmem:[#allocation2 + $0x68] sm:$0xff] %v2108_v63  ;;  %v2082_v54 = vld [vmem:[#allocation2 + $0xb8] sm:$0xff]  ;;  %v2459_v31 = vld [vmem:[#allocation4 + $0x28] sm:$0xff] }
 0x470   : > { %2586 = vst [vmem:[#allocation4 + $0x10] sm:$0xff] %v2554_v36  ;;  %v2552_v35 = vadd.f32 %v2520_v7, %v2488_v37 }
 0x471   : > { %2424 = vst [vmem:[#allocation3 + $0xc8] sm:$0xff] %v2392_v9  ;;  %v2177_v46 = vmul.f32 1.442695, %v2140_v17  ;;  %v2273_v41 = vmul.f32 1.442695, %v2236_v20  ;;  %v6982_v6 = vpop.f32.mrf.mxu1 }
 0x472   : > { %2584 = vst [vmem:[#allocation4 + $0xb8] sm:$0xff] %v2552_v35  ;;  %v2113_v16 = vmax.f32 %v2081_v60, %v6982_v6 }
 0x473   : > { %7495 = vpow2.f32 %v2177_v46  ;;  %v1976_v48 = vpop.f32.mrf.mxu1 }
 0x474   : > { %7497 = vpow2.f32 %v2273_v41  ;;  %v2145_v33 = vsub.f32 %v2081_v60, %v2113_v16  ;;  %v2241_v8 = vsub.f32 %v6982_v6, %v2113_v16  ;;  %2625 = vst [vmem:[#allocation2 + $0xe8] sm:$0xff] %v2113_v16  ;;  %v2111_v56 = vmax.f32 %v2079_v30, %v1976_v48  ;;  %v2334_v41 = vld [vmem:[#allocation3 + $0xa8] sm:$0xff] }
 0x475   : > { %v7484_v3 = vpop.eup %7483  ;;  %v6983_v61 = vpop.f32.mrf.mxu1  ;;  %v2462_v6 = vld [vmem:[#allocation4 + $0x68] sm:$0xff] }
 0x476   : > { %v7486_v58 = vpop.eup %7485  ;;  %v2365_v44 = vmul.f32 %v7484_v3, %v2333_v52  ;;  %v2493_v38 = vmul.f32 %v7484_v3, %v2461_v47  ;;  %v2187_v28 = vmul.f32 1.442695, %v2145_v33  ;;  %v2283_v14 = vmul.f32 1.442695, %v2241_v8  ;;  %2623 = vst [vmem:[#allocation2 + $0x80] sm:$0xff] %v2111_v56 }
 0x477   : > { %v2525_v19 = vmul.f32 %v7486_v58, %v8661_v21  ;;  %v2143_v11 = vsub.f32 %v2079_v30, %v2111_v56  ;;  %v2239_v37 = vsub.f32 %v1976_v48, %v2111_v56  ;;  %v2114_v63 = vmax.f32 %v2082_v54, %v6983_v61  ;;  %v1979_v36 = vpop.f32.mrf.mxu1 }
 0x478   : > { %v7488_v7 = vpop.eup %7487  ;;  %v2397_v9 = vadd.f32 %v7486_v58, %v2365_v44  ;;  %7499 = vpow2.f32 %v2187_v28  ;;  %v2112_v17 = vmax.f32 %v2080_v10, %v1979_v36  ;;  %v2332_v28 = vld [vmem:[#allocation3 + $0x90] sm:$0xff] }
 0x479   : > { %v7490_v20 = vpop.eup %7489  ;;  %v2557_v60 = vadd.f32 %v2525_v19, %v2493_v38  ;;  %v2363_v35 = vmul.f32 %v7488_v7, %v2331_v40  ;;  %v2491_v46 = vmul.f32 %v7488_v7, %v2459_v31  ;;  %7501 = vpow2.f32 %v2283_v14  ;;  %2626 = vst [vmem:[#allocation2 + $0xb8] sm:$0xff] %v2114_v63  ;;  %v2460_v14 = vld [vmem:[#allocation4 + $0x30] sm:$0xff] }
 0x47a   : > { %2429 = vst [vmem:[#allocation3 + $0x58] sm:$0xff] %v2397_v9  ;;  %v2523_v16 = vmul.f32 %v7490_v20, %v8655_v4  ;;  %v2183_v21 = vmul.f32 1.442695, %v2143_v11  ;;  %v2279_v30 = vmul.f32 1.442695, %v2239_v37  ;;  %v2146_v52 = vsub.f32 %v2082_v54, %v2114_v63  ;;  %2624 = vst [vmem:[#allocation2 + $0x88] sm:$0xff] %v2112_v17 }
 0x47b   : > { %v7492_v47 = vpop.eup %7491  ;;  %2589 = vst [vmem:[#allocation4 + $0xd0] sm:$0xff] %v2557_v60  ;;  %v2395_v48 = vadd.f32 %v7490_v20, %v2363_v35  ;;  %v2242_v33 = vsub.f32 %v6983_v61, %v2114_v63  ;;  %v2144_v8 = vsub.f32 %v2080_v10, %v2112_v17  ;;  %v2240_v56 = vsub.f32 %v1979_v36, %v2112_v17  ;;  %v2085_v10 = vld [vmem:[#allocation2 + $0x8] sm:$0xff]  ;;  %v2083_v9 = vld [vmem:[#allocation2 + $0x60] sm:$0xff]  ;;  %v2337_v35 = vld [vmem:[#allocation3 + $0x38] sm:$0xff] }
 0x47c   : > { %v7494_v3 = vpop.eup %7493  ;;  %v2555_v58 = vadd.f32 %v2523_v16, %v2491_v46  ;;  %v2366_v44 = vmul.f32 %v7492_v47, %v2334_v41  ;;  %v2494_v38 = vmul.f32 %v7492_v47, %v2462_v6  ;;  %7503 = vpow2.f32 %v2183_v21  ;;  %v2465_v46 = vld [vmem:[#allocation4 + $0x48] sm:$0xff] }
 0x47d   : > { %2427 = vst [vmem:[#allocation3 + $0x8] sm:$0xff] %v2395_v48  ;;  %v2526_v40 = vmul.f32 %v7494_v3, %v8665_v26  ;;  %7505 = vpow2.f32 %v2279_v30  ;;  %v2189_v4 = vmul.f32 1.442695, %v2146_v52  ;;  %v2285_v31 = vmul.f32 1.442695, %v2242_v33  ;;  %v2086_v52 = vld [vmem:[#allocation2 + $0x78] sm:$0xff] }
 0x47e   : > { %2587 = vst [vmem:[#allocation4 + $0x28] sm:$0xff] %v2555_v58  ;;  %v2398_v54 = vadd.f32 %v7494_v3, %v2366_v44  ;;  %v2185_v19 = vmul.f32 1.442695, %v2144_v8  ;;  %v2281_v11 = vmul.f32 1.442695, %v2240_v56  ;;  %v2084_v33 = vld [vmem:[#allocation2 + $0xf0] sm:$0xff] }
 0x47f   : > { %v2558_v61 = vadd.f32 %v2526_v40, %v2494_v38  ;;  %7507 = vpow2.f32 %v2189_v4  ;;  %v2335_v38 = vld [vmem:[#allocation3 + $0xd0] sm:$0xff]  ;;  %v2463_v40 = vld [vmem:[#allocation4 + $0x58] sm:$0xff] }
 0x480   : > { %v7496_v37 = vpop.eup %7495  ;;  %2430 = vst [vmem:[#allocation3 + $0xa8] sm:$0xff] %v2398_v54  ;;  %7509 = vpow2.f32 %v2285_v31 }
 0x481   : > { %v7498_v63 = vpop.eup %7497  ;;  %2590 = vst [vmem:[#allocation4 + $0x68] sm:$0xff] %v2558_v61  ;;  %v2364_v36 = vmul.f32 %v7496_v37, %v2332_v28  ;;  %v2492_v7 = vmul.f32 %v7496_v37, %v2460_v14  ;;  %7511 = vpow2.f32 %v2185_v19  ;;  %v6986_v26 = vpop.f32.mrf.mxu1 }
 0x482   : > { %v2524_v17 = vmul.f32 %v7498_v63, %v8659_v13  ;;  %7513 = vpow2.f32 %v2281_v11  ;;  %v2117_v20 = vmax.f32 %v2085_v10, %v6986_v26 }
 0x483   : > { %v2396_v60 = vadd.f32 %v7498_v63, %v2364_v36  ;;  %v1992_v41 = vpop.f32.mrf.mxu1 }
 0x484   : > { %v2556_v6 = vadd.f32 %v2524_v17, %v2492_v7  ;;  %v2149_v16 = vsub.f32 %v2085_v10, %v2117_v20  ;;  %v2245_v21 = vsub.f32 %v6986_v26, %v2117_v20  ;;  %2629 = vst [vmem:[#allocation2 + $0x8] sm:$0xff] %v2117_v20  ;;  %v2115_v30 = vmax.f32 %v2083_v9, %v1992_v41  ;;  %v2466_v26 = vld [vmem:[#allocation4 + $0x40] sm:$0xff] }
 0x485   : > { %v7500_v47 = vpop.eup %7499  ;;  %2428 = vst [vmem:[#allocation3 + $0x90] sm:$0xff] %v2396_v60  ;;  %v6987_v48 = vpop.f32.mrf.mxu1 }
 0x486   : > { %v7502_v8 = vpop.eup %7501  ;;  %2588 = vst [vmem:[#allocation4 + $0x30] sm:$0xff] %v2556_v6  ;;  %v2369_v56 = vmul.f32 %v7500_v47, %v2337_v35  ;;  %v2497_v13 = vmul.f32 %v7500_v47, %v2465_v46  ;;  %v2195_v3 = vmul.f32 1.442695, %v2149_v16  ;;  %v2291_v58 = vmul.f32 1.442695, %v2245_v21  ;;  %2627 = vst [vmem:[#allocation2 + $0x60] sm:$0xff] %v2115_v30 }
 0x487   : > { %v2529_v44 = vmul.f32 %v7502_v8, %v8673_v49  ;;  %v2147_v4 = vsub.f32 %v2083_v9, %v2115_v30  ;;  %v2243_v31 = vsub.f32 %v1992_v41, %v2115_v30  ;;  %v2118_v54 = vmax.f32 %v2086_v52, %v6987_v48  ;;  %v1995_v28 = vpop.f32.mrf.mxu1  ;;  %v2338_v49 = vld [vmem:[#allocation3 + $0x40] sm:$0xff]  ;;  %v2336_v6 = vld [vmem:[#allocation3 + $0xb0] sm:$0xff] }
 0x488   : > { %v2401_v14 = vadd.f32 %v7502_v8, %v2369_v56  ;;  %7515 = vpow2.f32 %v2195_v3  ;;  %v2116_v19 = vmax.f32 %v2084_v33, %v1995_v28  ;;  %v2464_v16 = vld [vmem:[#allocation4] sm:$0xff] }
 0x489   : > { %v7504_v11 = vpop.eup %7503  ;;  %v2561_v61 = vadd.f32 %v2529_v44, %v2497_v13  ;;  %7517 = vpow2.f32 %v2291_v58  ;;  %v2191_v10 = vmul.f32 1.442695, %v2147_v4  ;;  %v2287_v37 = vmul.f32 1.442695, %v2243_v31  ;;  %2630 = vst [vmem:[#allocation2 + $0x78] sm:$0xff] %v2118_v54 }
 0x48a   : > { %v7506_v63 = vpop.eup %7505  ;;  %2433 = vst [vmem:[#allocation3 + $0x38] sm:$0xff] %v2401_v14  ;;  %v2367_v36 = vmul.f32 %v7504_v11, %v2335_v38  ;;  %v2495_v7 = vmul.f32 %v7504_v11, %v2463_v40  ;;  %v2150_v17 = vsub.f32 %v2086_v52, %v2118_v54  ;;  %v2246_v9 = vsub.f32 %v6987_v48, %v2118_v54  ;;  %v2089_v40 = vld [vmem:[#allocation2 + $0x40] sm:$0xff]  ;;  %v2087_v14 = vld [vmem:[#allocation2 + $0x38] sm:$0xff] }
 0x48b   : > { %2628 = vst [vmem:[#allocation2 + $0xf0] sm:$0xff] %v2116_v19  ;;  %2593 = vst [vmem:[#allocation4 + $0x48] sm:$0xff] %v2561_v61  ;;  %v2527_v20 = vmul.f32 %v7506_v63, %v8667_v34  ;;  %7519 = vpow2.f32 %v2191_v10  ;;  %v2148_v60 = vsub.f32 %v2084_v33, %v2116_v19  ;;  %v2244_v35 = vsub.f32 %v1995_v28, %v2116_v19  ;;  %v2341_v11 = vld [vmem:[#allocation3 + $0x18] sm:$0xff]  ;;  %v2469_v61 = vld [vmem:[#allocation4 + $0xe0] sm:$0xff] }
 0x48c   : > { %v7508_v46 = vpop.eup %7507  ;;  %v2399_v41 = vadd.f32 %v7506_v63, %v2367_v36  ;;  %7521 = vpow2.f32 %v2287_v37  ;;  %v2197_v21 = vmul.f32 1.442695, %v2150_v17  ;;  %v2293_v30 = vmul.f32 1.442695, %v2246_v9 }
 0x48d   : > { %v7510_v47 = vpop.eup %7509  ;;  %v2559_v8 = vadd.f32 %v2527_v20, %v2495_v7  ;;  %v2370_v56 = vmul.f32 %v7508_v46, %v2338_v49  ;;  %v2498_v13 = vmul.f32 %v7508_v46, %v2466_v26  ;;  %v2193_v52 = vmul.f32 1.442695, %v2148_v60  ;;  %v2090_v7 = vld [vmem:[#allocation2 + $0xc8] sm:$0xff]  ;;  %v2088_v26 = vld [vmem:[#allocation2 + $0x58] sm:$0xff]  ;;  %v2339_v60 = vld [vmem:[#allocation3 + $0xe0] sm:$0xff] }
 0x48e   : > { %v7512_v48 = vpop.eup %7511  ;;  %2431 = vst [vmem:[#allocation3 + $0xd0] sm:$0xff] %v2399_v41  ;;  %v2530_v3 = vmul.f32 %v7510_v47, %v8677_v57  ;;  %7523 = vpow2.f32 %v2197_v21  ;;  %v2289_v34 = vmul.f32 1.442695, %v2244_v35  ;;  %v2467_v35 = vld [vmem:[#allocation4 + $0x78] sm:$0xff] }
 0x48f   : > { %v7514_v33 = vpop.eup %7513  ;;  %2591 = vst [vmem:[#allocation4 + $0x58] sm:$0xff] %v2559_v8  ;;  %v2402_v58 = vadd.f32 %v7510_v47, %v2370_v56  ;;  %v2368_v44 = vmul.f32 %v7512_v48, %v2336_v6  ;;  %v2496_v38 = vmul.f32 %v7512_v48, %v2464_v16  ;;  %7525 = vpow2.f32 %v2293_v30 }
 0x490   : > { %v2562_v4 = vadd.f32 %v2530_v3, %v2498_v13  ;;  %v2528_v31 = vmul.f32 %v7514_v33, %v8671_v39  ;;  %7527 = vpow2.f32 %v2193_v52 }
 0x491   : > { %2434 = vst [vmem:[#allocation3 + $0x40] sm:$0xff] %v2402_v58  ;;  %v2400_v54 = vadd.f32 %v7514_v33, %v2368_v44  ;;  %7529 = vpow2.f32 %v2289_v34  ;;  %v6990_v28 = vpop.f32.mrf.mxu1  ;;  %v2342_v33 = vld [vmem:[#allocation3 + $0x68] sm:$0xff]  ;;  %v2470_v58 = vld [vmem:[#allocation4 + $0x80] sm:$0xff] }
 0x492   : > { %2594 = vst [vmem:[#allocation4 + $0x40] sm:$0xff] %v2562_v4  ;;  %v2560_v57 = vadd.f32 %v2528_v31, %v2496_v38  ;;  %v2121_v19 = vmax.f32 %v2089_v40, %v6990_v28 }
 0x493   : > { %2432 = vst [vmem:[#allocation3 + $0xb0] sm:$0xff] %v2400_v54  ;;  %v2008_v10 = vpop.f32.mrf.mxu1  ;;  %v2340_v54 = vld [vmem:[#allocation3 + $0x60] sm:$0xff] }
 0x494   : > { %2592 = vst [vmem:[#allocation4] sm:$0xff] %v2560_v57  ;;  %v2153_v37 = vsub.f32 %v2089_v40, %v2121_v19  ;;  %v2249_v63 = vsub.f32 %v6990_v28, %v2121_v19  ;;  %2633 = vst [vmem:[#allocation2 + $0x40] sm:$0xff] %v2121_v19  ;;  %v2119_v36 = vmax.f32 %v2087_v14, %v2008_v10  ;;  %v2468_v28 = vld [vmem:[#allocation4 + $0xd8] sm:$0xff] }
 0x495   : > { %v7516_v39 = vpop.eup %7515  ;;  %v6991_v49 = vpop.f32.mrf.mxu1 }
 0x496   : > { %v7518_v17 = vpop.eup %7517  ;;  %v2373_v9 = vmul.f32 %v7516_v39, %v2341_v11  ;;  %v2501_v20 = vmul.f32 %v7516_v39, %v2469_v61  ;;  %v2203_v46 = vmul.f32 1.442695, %v2153_v37  ;;  %v2299_v41 = vmul.f32 1.442695, %v2249_v63  ;;  %2631 = vst [vmem:[#allocation2 + $0x38] sm:$0xff] %v2119_v36 }
 0x497   : > { %v2533_v6 = vmul.f32 %v7518_v17, %v8687_v50  ;;  %v2151_v16 = vsub.f32 %v2087_v14, %v2119_v36  ;;  %v2247_v21 = vsub.f32 %v2008_v10, %v2119_v36  ;;  %v2122_v30 = vmax.f32 %v2090_v7, %v6991_v49  ;;  %v2011_v47 = vpop.f32.mrf.mxu1 }
 0x498   : > { %v7520_v8 = vpop.eup %7519  ;;  %v2405_v56 = vadd.f32 %v7518_v17, %v2373_v9  ;;  %7531 = vpow2.f32 %v2203_v46  ;;  %v2120_v13 = vmax.f32 %v2088_v26, %v2011_v47  ;;  %v2093_v46 = vld [vmem:[#allocation2 + $0x70] sm:$0xff] }
 0x499   : > { %v7522_v52 = vpop.eup %7521  ;;  %v2565_v48 = vadd.f32 %v2533_v6, %v2501_v20  ;;  %v2371_v3 = vmul.f32 %v7520_v8, %v2339_v60  ;;  %v2499_v34 = vmul.f32 %v7520_v8, %v2467_v35  ;;  %7533 = vpow2.f32 %v2299_v41  ;;  %2634 = vst [vmem:[#allocation2 + $0xc8] sm:$0xff] %v2122_v30 }
 0x49a   : > { %2437 = vst [vmem:[#allocation3 + $0x18] sm:$0xff] %v2405_v56  ;;  %v2531_v44 = vmul.f32 %v7522_v52, %v8679_v5  ;;  %v2199_v50 = vmul.f32 1.442695, %v2151_v16  ;;  %v2295_v38 = vmul.f32 1.442695, %v2247_v21  ;;  %v2154_v40 = vsub.f32 %v2090_v7, %v2122_v30  ;;  %2632 = vst [vmem:[#allocation2 + $0x58] sm:$0xff] %v2120_v13 }
 0x49b   : > { %v7524_v4 = vpop.eup %7523  ;;  %2597 = vst [vmem:[#allocation4 + $0xe0] sm:$0xff] %v2565_v48  ;;  %v2403_v31 = vadd.f32 %v7522_v52, %v2371_v3  ;;  %v2250_v14 = vsub.f32 %v6991_v49, %v2122_v30  ;;  %v2152_v57 = vsub.f32 %v2088_v26, %v2120_v13  ;;  %v2248_v19 = vsub.f32 %v2011_v47, %v2120_v13  ;;  %v2091_v16 = vld [vmem:[#allocation2 + $0xe0] sm:$0xff]  ;;  %v2345_v30 = vld [vmem:[#allocation3 + $0x50] sm:$0xff]  ;;  %v2473_v47 = vld [vmem:[#allocation4 + $0xf8] sm:$0xff] }
 0x49c   : > { %v7526_v11 = vpop.eup %7525  ;;  %v2563_v61 = vadd.f32 %v2531_v44, %v2499_v34  ;;  %v2374_v10 = vmul.f32 %v7524_v4, %v2342_v33  ;;  %v2502_v37 = vmul.f32 %v7524_v4, %v2470_v58  ;;  %7535 = vpow2.f32 %v2199_v50  ;;  %v2094_v52 = vld [vmem:[#allocation2 + $0xc0] sm:$0xff]  ;;  %v2092_v34 = vld [vmem:[#allocation2 + $0x90] sm:$0xff] }
 0x49d   : > { %v7528_v63 = vpop.eup %7527  ;;  %2435 = vst [vmem:[#allocation3 + $0xe0] sm:$0xff] %v2403_v31  ;;  %v2534_v5 = vmul.f32 %v7526_v11, %v8691_v45  ;;  %7537 = vpow2.f32 %v2295_v38  ;;  %v2205_v36 = vmul.f32 1.442695, %v2154_v40  ;;  %v2301_v7 = vmul.f32 1.442695, %v2250_v14  ;;  %v2343_v4 = vld [vmem:[#allocation3 + $0x10] sm:$0xff] }
 0x49e   : > { %v7530_v39 = vpop.eup %7529  ;;  %2595 = vst [vmem:[#allocation4 + $0x78] sm:$0xff] %v2563_v61  ;;  %v2406_v17 = vadd.f32 %v7526_v11, %v2374_v10  ;;  %v2372_v9 = vmul.f32 %v7528_v63, %v2340_v54  ;;  %v2500_v20 = vmul.f32 %v7528_v63, %v2468_v28  ;;  %v2201_v49 = vmul.f32 1.442695, %v2152_v57  ;;  %v2471_v31 = vld [vmem:[#allocation4 + $0xa0] sm:$0xff] }
 0x49f   : > { %v2566_v26 = vadd.f32 %v2534_v5, %v2502_v37  ;;  %v2532_v60 = vmul.f32 %v7530_v39, %v8683_v22  ;;  %7539 = vpow2.f32 %v2205_v36  ;;  %v2297_v35 = vmul.f32 1.442695, %v2248_v19 }
 0x4a0   : > { %2438 = vst [vmem:[#allocation3 + $0x68] sm:$0xff] %v2406_v17  ;;  %v2404_v41 = vadd.f32 %v7530_v39, %v2372_v9  ;;  %7541 = vpow2.f32 %v2301_v7  ;;  %v2346_v39 = vld [vmem:[#allocation3 + $0xa0] sm:$0xff]  ;;  %v2474_v17 = vld [vmem:[#allocation4 + $0xe8] sm:$0xff] }
 0x4a1   : > { %2598 = vst [vmem:[#allocation4 + $0x80] sm:$0xff] %v2566_v26  ;;  %v2564_v45 = vadd.f32 %v2532_v60, %v2500_v20  ;;  %7543 = vpow2.f32 %v2201_v49  ;;  %v6994_v6 = vpop.f32.mrf.mxu1 }
 0x4a2   : > { %2436 = vst [vmem:[#allocation3 + $0x60] sm:$0xff] %v2404_v41  ;;  %7545 = vpow2.f32 %v2297_v35  ;;  %v2125_v21 = vmax.f32 %v2093_v46, %v6994_v6  ;;  %v2097_v35 = vld [vmem:[#allocation2 + $0x10] sm:$0xff] }
 0x4a3   : > { %2596 = vst [vmem:[#allocation4 + $0xd8] sm:$0xff] %v2564_v45  ;;  %v2024_v8 = vpop.f32.mrf.mxu1 }
 0x4a4   : > { %v2157_v56 = vsub.f32 %v2093_v46, %v2125_v21  ;;  %v2253_v22 = vsub.f32 %v6994_v6, %v2125_v21  ;;  %2637 = vst [vmem:[#allocation2 + $0x70] sm:$0xff] %v2125_v21  ;;  %v2123_v13 = vmax.f32 %v2091_v16, %v2024_v8  ;;  %v2344_v6 = vld [vmem:[#allocation3 + $0x70] sm:$0xff] }
 0x4a5   : > { %v7532_v48 = vpop.eup %7531  ;;  %v6995_v3 = vpop.f32.mrf.mxu1 }
 0x4a6   : > { %v7534_v33 = vpop.eup %7533  ;;  %v2377_v58 = vmul.f32 %v7532_v48, %v2345_v30  ;;  %v2505_v44 = vmul.f32 %v7532_v48, %v2473_v47  ;;  %v2211_v50 = vmul.f32 1.442695, %v2157_v56  ;;  %v2307_v38 = vmul.f32 1.442695, %v2253_v22  ;;  %2635 = vst [vmem:[#allocation2 + $0xe0] sm:$0xff] %v2123_v13 }
 0x4a7   : > { %v2537_v40 = vmul.f32 %v7534_v33, %v8703_v12  ;;  %v2155_v54 = vsub.f32 %v2091_v16, %v2123_v13  ;;  %v2251_v28 = vsub.f32 %v2024_v8, %v2123_v13  ;;  %v2126_v14 = vmax.f32 %v2094_v52, %v6995_v3  ;;  %v2027_v57 = vpop.f32.mrf.mxu1  ;;  %v2472_v16 = vld [vmem:[#allocation4 + $0x18] sm:$0xff] }
 0x4a8   : > { %v2409_v19 = vadd.f32 %v7534_v33, %v2377_v58  ;;  %7547 = vpow2.f32 %v2211_v50  ;;  %v2124_v11 = vmax.f32 %v2092_v34, %v2027_v57  ;;  %v2095_v33 = vld [vmem:[#allocation2 + $0xa8] sm:$0xff] }
 0x4a9   : > { %v7536_v61 = vpop.eup %7535  ;;  %v2569_v10 = vadd.f32 %v2537_v40, %v2505_v44  ;;  %7549 = vpow2.f32 %v2307_v38  ;;  %v2207_v37 = vmul.f32 1.442695, %v2155_v54  ;;  %v2303_v63 = vmul.f32 1.442695, %v2251_v28  ;;  %2638 = vst [vmem:[#allocation2 + $0xc0] sm:$0xff] %v2126_v14  ;;  %v8754_v5 = vpop.f32.mrf.mxu1  ;;  %v2098_v40 = vld [vmem:[#allocation2 + $0x28] sm:$0xff] }
 0x4aa   : > { %v7538_v36 = vpop.eup %7537  ;;  %2441 = vst [vmem:[#allocation3 + $0x50] sm:$0xff] %v2409_v19  ;;  %v2375_v12 = vmul.f32 %v7536_v61, %v2343_v4  ;;  %v2503_v7 = vmul.f32 %v7536_v61, %v2471_v31  ;;  %v2158_v9 = vsub.f32 %v2094_v52, %v2126_v14  ;;  %v2254_v20 = vsub.f32 %v6995_v3, %v2126_v14  ;;  %v2096_v31 = vld [vmem:[#allocation2 + $0xd0] sm:$0xff] }
 0x4ab   : > { %2636 = vst [vmem:[#allocation2 + $0x90] sm:$0xff] %v2124_v11  ;;  %2601 = vst [vmem:[#allocation4 + $0xf8] sm:$0xff] %v2569_v10  ;;  %v2535_v49 = vmul.f32 %v7538_v36, %v8695_v1  ;;  %7551 = vpow2.f32 %v2207_v37  ;;  %v2156_v26 = vsub.f32 %v2092_v34, %v2124_v11  ;;  %v2252_v60 = vsub.f32 %v2027_v57, %v2124_v11  ;;  %v8757_v46 = vpop.f32.mrf.mxu1 }
 0x4ac   : > { %v7540_v41 = vpop.eup %7539  ;;  %v2407_v45 = vadd.f32 %v7538_v36, %v2375_v12  ;;  %7553 = vpow2.f32 %v2303_v63  ;;  %v2213_v21 = vmul.f32 1.442695, %v2158_v9  ;;  %v2309_v30 = vmul.f32 1.442695, %v2254_v20  ;;  %v2477_v12 = vld [vmem:[#allocation4 + $0x38] sm:$0xff] }
 0x4ad   : > { %v7542_v47 = vpop.eup %7541  ;;  %v2567_v8 = vadd.f32 %v2535_v49, %v2503_v7  ;;  %v2378_v56 = vmul.f32 %v7540_v41, %v2346_v39  ;;  %v2506_v22 = vmul.f32 %v7540_v41, %v2474_v17  ;;  %v2209_v13 = vmul.f32 1.442695, %v2156_v26  ;;  %v6999_v52 = vpop.f32.mrf.mxu1 }
 0x4ae   : > { %v7544_v1 = vpop.eup %7543  ;;  %2439 = vst [vmem:[#allocation3 + $0x10] sm:$0xff] %v2407_v45  ;;  %v2538_v48 = vmul.f32 %v7542_v47, %v8707_v59  ;;  %7555 = vpow2.f32 %v2213_v21  ;;  %v2305_v3 = vmul.f32 1.442695, %v2252_v60  ;;  %v2129_v34 = vmax.f32 %v2097_v35, %v8754_v5  ;;  %v8762_v59 = vld [vmem:[#allocation2 + $0x20] sm:$0xff]  ;;  %v2347_v21 = vld [vmem:[#allocation3 + $0xd8] sm:$0xff] }
 0x4af   : > { %v7546_v58 = vpop.eup %7545  ;;  %2599 = vst [vmem:[#allocation4 + $0xa0] sm:$0xff] %v2567_v8  ;;  %v2410_v44 = vadd.f32 %v7542_v47, %v2378_v56  ;;  %v2376_v50 = vmul.f32 %v7544_v1, %v2344_v6  ;;  %v2504_v38 = vmul.f32 %v7544_v1, %v2472_v16  ;;  %7557 = vpow2.f32 %v2309_v30  ;;  %v2043_v4 = vpop.f32.mrf.mxu1  ;;  %v2475_v30 = vld [vmem:[#allocation4 + $0x90] sm:$0xff] }
 0x4b0   : > { %v2570_v54 = vadd.f32 %v2538_v48, %v2506_v22  ;;  %v2536_v28 = vmul.f32 %v7546_v58, %v8699_v25  ;;  %7559 = vpow2.f32 %v2209_v13  ;;  %v2161_v14 = vsub.f32 %v2097_v35, %v2129_v34  ;;  %2641 = vst [vmem:[#allocation2 + $0x10] sm:$0xff] %v2129_v34  ;;  %v2349_v25 = vld [vmem:[#allocation3 + $0x20] sm:$0xff] }
 0x4b1   : > { %2442 = vst [vmem:[#allocation3 + $0xa0] sm:$0xff] %v2410_v44  ;;  %v2408_v57 = vadd.f32 %v7546_v58, %v2376_v50  ;;  %7561 = vpow2.f32 %v2305_v3  ;;  %v2257_v19 = vsub.f32 %v8754_v5, %v2129_v34  ;;  %v2127_v11 = vmax.f32 %v2095_v33, %v8757_v46  ;;  %v7002_v61 = vpop.f32.mrf.mxu1  ;;  %v2099_v34 = vld [vmem:[#allocation2 + $0xa0] sm:$0xff]  ;;  %v8774_v58 = vld [vmem:[#allocation2 + $0x98] sm:$0xff] }
 0x4b2   : > { %2602 = vst [vmem:[#allocation4 + $0xe8] sm:$0xff] %v2570_v54  ;;  %v2568_v10 = vadd.f32 %v2536_v28, %v2504_v38  ;;  %v2219_v37 = vmul.f32 1.442695, %v2161_v14  ;;  %v2130_v63 = vmax.f32 %v2098_v40, %v6999_v52  ;;  %v2128_v36 = vmax.f32 %v2096_v31, %v2043_v4 }
 0x4b3   : > { %2440 = vst [vmem:[#allocation3 + $0x70] sm:$0xff] %v2408_v57  ;;  %v2315_v7 = vmul.f32 1.442695, %v2257_v19  ;;  %v2159_v39 = vsub.f32 %v2095_v33, %v2127_v11  ;;  %v2255_v17 = vsub.f32 %v8757_v46, %v2127_v11  ;;  %2639 = vst [vmem:[#allocation2 + $0xa8] sm:$0xff] %v2127_v11  ;;  %v2133_v9 = vmax.f32 %v8762_v59, %v7002_v61  ;;  %v8768_v26 = vpop.f32.mrf.mxu1  ;;  %v2348_v57 = vld [vmem:[#allocation3 + $0x30] sm:$0xff]  ;;  %v2476_v19 = vld [vmem:[#allocation4 + $0x20] sm:$0xff] }
 0x4b4   : > { %2600 = vst [vmem:[#allocation4 + $0x18] sm:$0xff] %v2568_v10  ;;  %7563 = vpow2.f32 %v2219_v37  ;;  %v2162_v5 = vsub.f32 %v2098_v40, %v2130_v63  ;;  %v2258_v20 = vsub.f32 %v6999_v52, %v2130_v63  ;;  %2642 = vst [vmem:[#allocation2 + $0x28] sm:$0xff] %v2130_v63  ;;  %v2160_v49 = vsub.f32 %v2096_v31, %v2128_v36  ;;  %v1755_v37 = vpop.f32.mrf.mxu0 }
 0x4b5   : > { %2640 = vst [vmem:[#allocation2 + $0xd0] sm:$0xff] %v2128_v36  ;;  %v7548_v60 = vpop.eup %7547  ;;  %7565 = vpow2.f32 %v2315_v7  ;;  %v2215_v35 = vmul.f32 1.442695, %v2159_v39  ;;  %v2311_v41 = vmul.f32 1.442695, %v2255_v17  ;;  %v2256_v45 = vsub.f32 %v2043_v4, %v2128_v36  ;;  %2645 = vst [vmem:[#allocation2 + $0x20] sm:$0xff] %v2133_v9  ;;  %v8772_v33 = vpop.f32.mrf.mxu1 }
 0x4b6   : > { %v7550_v6 = vpop.eup %7549  ;;  %v2381_v46 = vmul.f32 %v7548_v60, %v2349_v25  ;;  %v2509_v16 = vmul.f32 %v7548_v60, %v2477_v12  ;;  %v2221_v47 = vmul.f32 1.442695, %v2162_v5  ;;  %v2317_v8 = vmul.f32 1.442695, %v2258_v20  ;;  %v2350_v4 = vld [vmem:[#allocation3 + $0xf0] sm:$0xff] }
 0x4b7   : > { %v2541_v56 = vmul.f32 %v7550_v6, %v8719_v42  ;;  %7567 = vpow2.f32 %v2215_v35  ;;  %v2217_v22 = vmul.f32 1.442695, %v2160_v49  ;;  %v2313_v13 = vmul.f32 1.442695, %v2256_v45  ;;  %v2478_v42 = vld [vmem:[#allocation4 + $0x70] sm:$0xff]  ;;  %v2059_v17 = vpop.f32.mrf.mxu1  ;;  %v2353_v45 = vld [vmem:[#allocation3 + $0xf8] sm:$0xff] }
 0x4b8   : > { %v7552_v52 = vpop.eup %7551  ;;  %v2413_v1 = vadd.f32 %v7550_v6, %v2381_v46  ;;  %7569 = vpow2.f32 %v2311_v41  ;;  %v2165_v48 = vsub.f32 %v8762_v59, %v2133_v9  ;;  %v2261_v3 = vsub.f32 %v7002_v61, %v2133_v9  ;;  %v2100_v9 = vld [vmem:[#allocation2 + $0xf8] sm:$0xff]  ;;  %v2481_v6 = vld [vmem:[#allocation4 + $0x50] sm:$0xff] }
 0x4b9   : > { %v7554_v44 = vpop.eup %7553  ;;  %v2573_v50 = vadd.f32 %v2541_v56, %v2509_v16  ;;  %v2379_v38 = vmul.f32 %v7552_v52, %v2347_v21  ;;  %v2507_v40 = vmul.f32 %v7552_v52, %v2475_v30  ;;  %7571 = vpow2.f32 %v2221_v47 }
 0x4ba   : > { %2445 = vst [vmem:[#allocation3 + $0x20] sm:$0xff] %v2413_v1  ;;  %v2539_v31 = vmul.f32 %v7554_v44, %v8711_v27  ;;  %7573 = vpow2.f32 %v2317_v8  ;;  %v2227_v54 = vmul.f32 1.442695, %v2165_v48  ;;  %v2323_v28 = vmul.f32 1.442695, %v2261_v3  ;;  %v2479_v1 = vld [vmem:[#allocation4 + $0xa8] sm:$0xff] }
 0x4bb   : > { %v7556_v14 = vpop.eup %7555  ;;  %2605 = vst [vmem:[#allocation4 + $0x38] sm:$0xff] %v2573_v50  ;;  %v2411_v59 = vadd.f32 %v7554_v44, %v2379_v38  ;;  %7575 = vpow2.f32 %v2217_v22  ;;  %v2131_v11 = vmax.f32 %v2099_v34, %v8768_v26  ;;  %v2134_v61 = vmax.f32 %v8774_v58, %v8772_v33  ;;  %v2354_v38 = vld [vmem:[#allocation3 + $0xc0] sm:$0xff] }
 0x4bc   : > { %v7558_v10 = vpop.eup %7557  ;;  %v2571_v63 = vadd.f32 %v2539_v31, %v2507_v40  ;;  %v2382_v36 = vmul.f32 %v7556_v14, %v2350_v4  ;;  %v2510_v25 = vmul.f32 %v7556_v14, %v2478_v42  ;;  %7577 = vpow2.f32 %v2313_v13  ;;  %v2482_v40 = vld [vmem:[#allocation4 + $0x88] sm:$0xff] }
 0x4bd   : > { %v7560_v27 = vpop.eup %7559  ;;  %2443 = vst [vmem:[#allocation3 + $0xd8] sm:$0xff] %v2411_v59  ;;  %v2542_v12 = vmul.f32 %v7558_v10, %v1755_v37  ;;  %7579 = vpow2.f32 %v2227_v54  ;;  %v2163_v7 = vsub.f32 %v2099_v34, %v2131_v11  ;;  %v2259_v39 = vsub.f32 %v8768_v26, %v2131_v11  ;;  %2643 = vst [vmem:[#allocation2 + $0xa0] sm:$0xff] %v2131_v11  ;;  %v2352_v59 = vld [vmem:[#allocation3 + $0x48] sm:$0xff] }
 0x4be   : > { %2646 = vst [vmem:[#allocation2 + $0x98] sm:$0xff] %v2134_v61  ;;  %v7562_v5 = vpop.eup %7561  ;;  %2603 = vst [vmem:[#allocation4 + $0x90] sm:$0xff] %v2571_v63  ;;  %v2414_v20 = vadd.f32 %v7558_v10, %v2382_v36  ;;  %v2380_v49 = vmul.f32 %v7560_v27, %v2348_v57  ;;  %v2508_v60 = vmul.f32 %v7560_v27, %v2476_v19  ;;  %7581 = vpow2.f32 %v2323_v28  ;;  %v2480_v57 = vld [vmem:[#allocation4 + $0xf0] sm:$0xff]  ;;  %v2357_v27 = vld [vmem:[#allocation3 + $0x28] sm:$0xff] }
 0x4bf   : > { %v2574_v35 = vadd.f32 %v2542_v12, %v2510_v25  ;;  %v2540_v41 = vmul.f32 %v7562_v5, %v8715_v43  ;;  %v2223_v46 = vmul.f32 1.442695, %v2163_v7  ;;  %v2319_v16 = vmul.f32 1.442695, %v2259_v39  ;;  %v2351_v43 = vld [vmem:[#allocation3 + $0x88] sm:$0xff]  ;;  %v2485_v12 = vld [vmem:[#allocation4 + $0x60] sm:$0xff] }
 0x4c0   : > { %2446 = vst [vmem:[#allocation3 + $0xf0] sm:$0xff] %v2414_v20  ;;  %v2412_v21 = vadd.f32 %v7562_v5, %v2380_v49  ;;  %v2166_v26 = vsub.f32 %v8774_v58, %v2134_v61  ;;  %v2262_v30 = vsub.f32 %v8772_v33, %v2134_v61  ;;  %v2132_v47 = vmax.f32 %v2100_v9, %v2059_v17 }
 0x4c1   : > { %v7564_v8 = vpop.eup %7563  ;;  %2606 = vst [vmem:[#allocation4 + $0x70] sm:$0xff] %v2574_v35  ;;  %v2572_v56 = vadd.f32 %v2540_v41, %v2508_v60  ;;  %7583 = vpow2.f32 %v2223_v46  ;;  %v2483_v46 = vld [vmem:[#allocation4 + $0xc8] sm:$0xff] }
 0x4c2   : > { %v7566_v22 = vpop.eup %7565  ;;  %2444 = vst [vmem:[#allocation3 + $0x30] sm:$0xff] %v2412_v21  ;;  %v2385_v13 = vmul.f32 %v7564_v8, %v2353_v45  ;;  %v2513_v52 = vmul.f32 %v7564_v8, %v2481_v6  ;;  %7585 = vpow2.f32 %v2319_v16  ;;  %v2229_v48 = vmul.f32 1.442695, %v2166_v26  ;;  %2644 = vst [vmem:[#allocation2 + $0xf8] sm:$0xff] %v2132_v47  ;;  %v2355_v6 = vld [vmem:[#allocation3 + $0xb8] sm:$0xff] }
 0x4c3   : > { %2604 = vst [vmem:[#allocation4 + $0x20] sm:$0xff] %v2572_v56  ;;  %v2545_v3 = vmul.f32 %v7566_v22, %v8701_v29  ;;  %v2325_v34 = vmul.f32 1.442695, %v2262_v30  ;;  %v2164_v58 = vsub.f32 %v2100_v9, %v2132_v47  ;;  %v2260_v33 = vsub.f32 %v2059_v17, %v2132_v47  ;;  %v2358_v8 = vld [vmem:[#allocation3 + $0x98] sm:$0xff]  ;;  %v2486_v56 = vld [vmem:[#allocation4 + $0x8] sm:$0xff] }
 0x4c4   : > { %v7568_v44 = vpop.eup %7567  ;;  %v2417_v50 = vadd.f32 %v7566_v22, %v2385_v13  ;;  %7587 = vpow2.f32 %v2229_v48 }
 0x4c5   : > { %v7570_v4 = vpop.eup %7569  ;;  %v2577_v42 = vadd.f32 %v2545_v3, %v2513_v52  ;;  %v2383_v31 = vmul.f32 %v7568_v44, %v2351_v43  ;;  %v2511_v54 = vmul.f32 %v7568_v44, %v2479_v1  ;;  %7589 = vpow2.f32 %v2325_v34  ;;  %v2356_v34 = vld [vmem:[#allocation3] sm:$0xff] }
 0x4c6   : > { %v7572_v28 = vpop.eup %7571  ;;  %2449 = vst [vmem:[#allocation3 + $0xf8] sm:$0xff] %v2417_v50  ;;  %v2543_v14 = vmul.f32 %v7570_v4, %v8685_v23  ;;  %v2225_v29 = vmul.f32 1.442695, %v2164_v58  ;;  %v2321_v19 = vmul.f32 1.442695, %v2260_v33  ;;  %v2484_v58 = vld [vmem:[#allocation4 + $0x98] sm:$0xff] }
 0x4c7   : > { %v7574_v11 = vpop.eup %7573  ;;  %2609 = vst [vmem:[#allocation4 + $0x50] sm:$0xff] %v2577_v42  ;;  %v2415_v61 = vadd.f32 %v7570_v4, %v2383_v31  ;;  %v2386_v10 = vmul.f32 %v7572_v28, %v2354_v38  ;;  %v2514_v37 = vmul.f32 %v7572_v28, %v2482_v40 }
 0x4c8   : > { %v7576_v63 = vpop.eup %7575  ;;  %v2575_v36 = vadd.f32 %v2543_v14, %v2511_v54  ;;  %v2546_v25 = vmul.f32 %v7574_v11, %v8709_v24  ;;  %7591 = vpow2.f32 %v2225_v29 }
 0x4c9   : > { %v7578_v7 = vpop.eup %7577  ;;  %2447 = vst [vmem:[#allocation3 + $0x88] sm:$0xff] %v2415_v61  ;;  %v2418_v39 = vadd.f32 %v7574_v11, %v2386_v10  ;;  %v2384_v23 = vmul.f32 %v7576_v63, %v2352_v59  ;;  %v2512_v17 = vmul.f32 %v7576_v63, %v2480_v57  ;;  %7593 = vpow2.f32 %v2321_v19 }
 0x4ca   : > { %v7580_v9 = vpop.eup %7579  ;;  %2607 = vst [vmem:[#allocation4 + $0xa8] sm:$0xff] %v2575_v36  ;;  %v2578_v5 = vadd.f32 %v2546_v25, %v2514_v37  ;;  %v2544_v20 = vmul.f32 %v7578_v7, %v8693_v51 }
 0x4cb   : > { %v7582_v49 = vpop.eup %7581  ;;  %2450 = vst [vmem:[#allocation3 + $0xc0] sm:$0xff] %v2418_v39  ;;  %v2416_v60 = vadd.f32 %v7578_v7, %v2384_v23  ;;  %v2389_v35 = vmul.f32 %v7580_v9, %v2357_v27  ;;  %v2517_v41 = vmul.f32 %v7580_v9, %v2485_v12 }
 0x4cc   : > { %2610 = vst [vmem:[#allocation4 + $0x88] sm:$0xff] %v2578_v5  ;;  %v2576_v24 = vadd.f32 %v2544_v20, %v2512_v17  ;;  %v2549_v45 = vmul.f32 %v7582_v49, %v8731_v32 }
 0x4cd   : > { %2448 = vst [vmem:[#allocation3 + $0x48] sm:$0xff] %v2416_v60  ;;  %v2421_v16 = vadd.f32 %v7582_v49, %v2389_v35 }
 0x4ce   : > { %v7584_v21 = vpop.eup %7583  ;;  %2608 = vst [vmem:[#allocation4 + $0xf0] sm:$0xff] %v2576_v24  ;;  %v2581_v26 = vadd.f32 %v2549_v45, %v2517_v41 }
 0x4cf   : > { %v7586_v30 = vpop.eup %7585  ;;  %2453 = vst [vmem:[#allocation3 + $0x28] sm:$0xff] %v2421_v16  ;;  %v2387_v47 = vmul.f32 %v7584_v21, %v2355_v6  ;;  %v2515_v51 = vmul.f32 %v7584_v21, %v2483_v46 }
 0x4d0   : > { %2613 = vst [vmem:[#allocation4 + $0x60] sm:$0xff] %v2581_v26  ;;  %v2547_v22 = vmul.f32 %v7586_v30, %v8717_v15 }
 0x4d1   : > { %v7588_v13 = vpop.eup %7587  ;;  %v2419_v52 = vadd.f32 %v7586_v30, %v2387_v47 }
 0x4d2   : > { %v7590_v43 = vpop.eup %7589  ;;  %v2579_v32 = vadd.f32 %v2547_v22, %v2515_v51  ;;  %v2390_v1 = vmul.f32 %v7588_v13, %v2358_v8  ;;  %v2518_v48 = vmul.f32 %v7588_v13, %v2486_v56 }
 0x4d3   : > { %2451 = vst [vmem:[#allocation3 + $0xb8] sm:$0xff] %v2419_v52  ;;  %v2550_v3 = vmul.f32 %v7590_v43, %v8735_v2 }
 0x4d4   : > { %2611 = vst [vmem:[#allocation4 + $0xc8] sm:$0xff] %v2579_v32  ;;  %v2422_v33 = vadd.f32 %v7590_v43, %v2390_v1 }
 0x4d5   : > { %v7592_v44 = vpop.eup %7591  ;;  %v2582_v50 = vadd.f32 %v2550_v3, %v2518_v48 }
 0x4d6   : > { %v7594_v38 = vpop.eup %7593  ;;  %2454 = vst [vmem:[#allocation3 + $0x98] sm:$0xff] %v2422_v33  ;;  %v2388_v40 = vmul.f32 %v7592_v44, %v2356_v34  ;;  %v2516_v4 = vmul.f32 %v7592_v44, %v2484_v58 }
 0x4d7   : > { %2614 = vst [vmem:[#allocation4 + $0x8] sm:$0xff] %v2582_v50  ;;  %v2548_v15 = vmul.f32 %v7594_v38, %v8725_v18 }
 0x4d8   : > { %v2420_v42 = vadd.f32 %v7594_v38, %v2388_v40 }
 0x4d9   : > { %v2580_v31 = vadd.f32 %v2548_v15, %v2516_v4 }
 0x4da   : > { %2452 = vst [vmem:[#allocation3] sm:$0xff] %v2420_v42 }
 0x4db   : > { %2612 = vst [vmem:[#allocation4 + $0x98] sm:$0xff] %v2580_v31 }
 0x4dc PF: > { %p6342_p4 = scmp.le.s32.totalorder %s8442_s30, 2 }
 0x4de   : > { %2650 = sbr.rel (%p6342_p4) target bundleno = 1825 (0x721), region = 68 }
 0x4e3   : > { %v7595_v2 = vld [vmem:[#allocation10 + $0xb0] ss:$12 sps:$4 sm:$0xff]   ;;  %v7597_v54 = vld [vmem:[#allocation10 + $0xac] ss:$12 sps:$4 sm:$0xff]   ;;  %v8235_v28 = vmov 0   ;;  %v7619_v7 = vld [vmem:[%s8426_s23 + $0x100] sm:$0xff]  }
 0x4e4   : > { %2908 = vmatprep.mubr.bf16.mxu0 %v8235_v28  ;;  %3028 = vmatprep.mubr.bf16.mxu1 %v8235_v28  ;;  %v7598_v14 = vld [vmem:[#allocation10 + $0x98] ss:$12 sps:$4 sm:$0xff]   ;;  %v7600_v18 = vld [vmem:[#allocation10 + $0x94] ss:$12 sps:$4 sm:$0xff]   ;;  %v7603_v57 = vld [vmem:[#allocation10 + $0x7c] ss:$12 sps:$4 sm:$0xff]  }
 0x4e5   : > { %2876 = vmatprep.subr.bf16.mxu0 %v7595_v2  ;;  %7212 = vmatprep.subr.bf16.mxu1 %v7595_v2  ;;  %v7601_v59 = vld [vmem:[#allocation10 + $0x80] ss:$12 sps:$4 sm:$0xff]   ;;  %v7604_v29 = vld [vmem:[#allocation10 + $0x68] ss:$12 sps:$4 sm:$0xff]   ;;  %v7606_v19 = vld [vmem:[#allocation10 + $0x64] ss:$12 sps:$4 sm:$0xff]  }
 0x4e6   : > { %2877 = vmatpush1.bf16.msra.mxu0 %v7597_v54  ;;  %7220 = vmatpush1.bf16.msra.mxu1 %v7597_v54  ;;  %v7607_v11 = vld [vmem:[#allocation10 + $0x50] ss:$12 sps:$4 sm:$0xff]   ;;  %v7609_v61 = vld [vmem:[#allocation10 + $0x4c] ss:$12 sps:$4 sm:$0xff]   ;;  %v7612_v37 = vld [vmem:[#allocation10 + $0x34] ss:$12 sps:$4 sm:$0xff]  }
 0x4e7   : > { %2878 = vmatprep.subr.bf16.mxu0 %v7598_v14  ;;  %7213 = vmatprep.subr.bf16.mxu1 %v7598_v14  ;;  %v7610_v10 = vld [vmem:[#allocation10 + $0x38] ss:$12 sps:$4 sm:$0xff]   ;;  %v7613_v63 = vld [vmem:[#allocation10 + $0x20] ss:$12 sps:$4 sm:$0xff]   ;;  %v7615_v36 = vld [vmem:[#allocation10 + $0x1c] ss:$12 sps:$4 sm:$0xff]  }
 0x4e8   : > { %v7616_v25 = vld [vmem:[#allocation10 + $0x8] ss:$12 sps:$4 sm:$0xff]   ;;  %v7618_v27 = vld [vmem:[#allocation10 + $0x4] ss:$12 sps:$4 sm:$0xff]   ;;  %v7635_v12 = vld [vmem:[#allocation12 + $0x38] sm:$0xff]  }
 0x4e9   : > { %v7629_v39 = vld [vmem:[%s8426_s23 + $0x160] sm:$0xff]   ;;  %v7636_v23 = vld [vmem:[#allocation12 + $0x30] sm:$0xff]   ;;  %v7637_v17 = vld [vmem:[#allocation12 + $0x28] sm:$0xff]  }
 0x4ea   : > { %2879 = vmatpush1.bf16.msra.mxu0 %v7600_v18  ;;  %7221 = vmatpush1.bf16.msra.mxu1 %v7600_v18  ;;  %v7620_v9 = vld [vmem:[%s8426_s23 + $0x108] sm:$0xff]   ;;  %v7638_v20 = vld [vmem:[#allocation12 + $0x20] sm:$0xff]   ;;  %v7621_v49 = vld [vmem:[%s8426_s23 + $0x110] sm:$0xff]  }
 0x4eb   : > { %2880 = vmatprep.subr.bf16.mxu0 %v7601_v59  ;;  %7214 = vmatprep.subr.bf16.mxu1 %v7601_v59  ;;  %v7631_v5 = vld [vmem:[%s8426_s23 + $0x168] sm:$0xff]   ;;  %v7633_v60 = vld [vmem:[%s8426_s23 + $0x170] sm:$0xff]   ;;  %v7622_v35 = vld [vmem:[%s8426_s23 + $0x118] sm:$0xff]  }
 0x4ec   : > { %v7634_v41 = vld [vmem:[%s8426_s23 + $0x178] sm:$0xff]   ;;  %v7623_v24 = vld [vmem:[%s8426_s23 + $0x120] sm:$0xff]   ;;  %v7624_v45 = vld [vmem:[%s8426_s23 + $0x128] sm:$0xff]  }
 0x4ed   : > { %v7625_v6 = vld [vmem:[%s8426_s23 + $0x130] sm:$0xff]   ;;  %v7626_v46 = vld [vmem:[%s8426_s23 + $0x138] sm:$0xff]   ;;  %v7627_v16 = vld [vmem:[%s8426_s23 + $0x140] sm:$0xff]  }
 0x4ee   : > { %2881 = vmatpush1.bf16.msra.mxu0 %v7603_v57  ;;  %7222 = vmatpush1.bf16.msra.mxu1 %v7603_v57  ;;  %v7639_v21 = vld [vmem:[#allocation12 + $0x18] sm:$0xff]   ;;  %v7640_v26 = vld [vmem:[#allocation12 + $0x10] sm:$0xff]   ;;  %v7628_v30 = vld [vmem:[%s8426_s23 + $0x148] sm:$0xff]  }
 0x4ef   : > { %2882 = vmatprep.subr.bf16.mxu0 %v7604_v29  ;;  %7215 = vmatprep.subr.bf16.mxu1 %v7604_v29  ;;  %v7641_v47 = vld [vmem:[#allocation12 + $0x8] sm:$0xff]   ;;  %v7642_v51 = vld [vmem:[#allocation12] sm:$0xff]   ;;  %v7630_v8 = vld [vmem:[%s8426_s23 + $0x150] sm:$0xff]  }
 0x4f0   : > { %v7632_v56 = vld [vmem:[%s8426_s23 + $0x158] sm:$0xff]   ;;  %v10187_v4 = vld [vmem:[#allocation22_spill] sm:$0xff]  ;;  %v10189_v14 = vld [vmem:[#allocation24_spill] sm:$0xff] }
 0x4f1   : > { %v10188_v42 = vld [vmem:[#allocation23_spill] sm:$0xff]  ;;  %v10190_v59 = vld [vmem:[#allocation25_spill] sm:$0xff] }
 0x4f2   : > { %2883 = vmatpush1.bf16.msra.mxu0 %v7606_v19  ;;  %7223 = vmatpush1.bf16.msra.mxu1 %v7606_v19 }
 0x4f3   : > { %2884 = vmatprep.subr.bf16.mxu0 %v7607_v11  ;;  %7216 = vmatprep.subr.bf16.mxu1 %v7607_v11 }
 0x4f6   : > { %2885 = vmatpush1.bf16.msra.mxu0 %v7609_v61  ;;  %7224 = vmatpush1.bf16.msra.mxu1 %v7609_v61 }
 0x4f7   : > { %2886 = vmatprep.subr.bf16.mxu0 %v7610_v10  ;;  %7217 = vmatprep.subr.bf16.mxu1 %v7610_v10 }
 0x4fa   : > { %2887 = vmatpush1.bf16.msra.mxu0 %v7612_v37  ;;  %7225 = vmatpush1.bf16.msra.mxu1 %v7612_v37  ;;  %v10191_v37 = vld [vmem:[#allocation26_spill] sm:$0xff] }
 0x4fb   : > { %2888 = vmatprep.subr.bf16.mxu0 %v7613_v63  ;;  %7218 = vmatprep.subr.bf16.mxu1 %v7613_v63 }
 0x4fe   : > { %2889 = vmatpush1.bf16.msra.mxu0 %v7615_v36  ;;  %7226 = vmatpush1.bf16.msra.mxu1 %v7615_v36  ;;  %v10192_v36 = vld [vmem:[#allocation27_spill] sm:$0xff] }
 0x4ff   : > { %2890 = vmatprep.subr.bf16.mxu0 %v7616_v25  ;;  %7219 = vmatprep.subr.bf16.mxu1 %v7616_v25 }
 0x502   : > { %2891 = vmatpush1.bf16.msra.mxu0 %v7618_v27  ;;  %7227 = vmatpush1.bf16.msra.mxu1 %v7618_v27 }
 0x503   : > { %7004 = vmatprep.subr.bf16.mxu1 %v7635_v12 }
 0x505   : > { %2909 = vmatmul.mubr.bf16.vlgmr.msra.gmra.mxu0 %v7619_v7  ;;  %3029 = vmatmul.mubr.bf16.vlgmr.msra.gmra.mxu1 %v7629_v39 }
 0x506   : > { %2918 = vmatprep.mubr.bf16.mxu0 %v8235_v28  ;;  %3038 = vmatprep.mubr.bf16.mxu1 %v8235_v28 }
 0x507   : > { %7005 = vmatpush3.bf16.msra.mxu1 %v7635_v12 }
 0x508   : > { %7006 = vmatprep.subr.bf16.mxu1 %v7636_v23 }
 0x50b   : > { %7007 = vmatpush3.bf16.msra.mxu1 %v7636_v23 }
 0x50c   : > { %7008 = vmatprep.subr.bf16.mxu1 %v7637_v17 }
 0x50d   : > { %2919 = vmatmul.mubr.bf16.gmra.mxu0 %v7620_v9  ;;  %3039 = vmatmul.mubr.bf16.gmra.mxu1 %v7631_v5  ;;  %v10194_v5 = vld [vmem:[#allocation29_spill] sm:$0xff] }
 0x50e   : > { %2928 = vmatprep.mubr.bf16.mxu0 %v8235_v28  ;;  %3048 = vmatprep.mubr.bf16.mxu1 %v8235_v28 }
 0x50f   : > { %7009 = vmatpush3.bf16.msra.mxu1 %v7637_v17  ;;  %v10193_v17 = vld [vmem:[#allocation28_spill] sm:$0xff] }
 0x510   : > { %7010 = vmatprep.subr.bf16.mxu1 %v7638_v20 }
 0x513   : > { %7011 = vmatpush3.bf16.msra.mxu1 %v7638_v20 }
 0x514   : > { %7012 = vmatprep.subr.bf16.mxu1 %v7639_v21 }
 0x515   : > { %2929 = vmatmul.mubr.bf16.gmra.mxu0 %v7621_v49  ;;  %3049 = vmatmul.mubr.bf16.gmra.mxu1 %v7633_v60 }
 0x516   : > { %2938 = vmatprep.mubr.bf16.mxu0 %v8235_v28  ;;  %3058 = vmatprep.mubr.bf16.mxu1 %v8235_v28 }
 0x517   : > { %7013 = vmatpush3.bf16.msra.mxu1 %v7639_v21 }
 0x518   : > { %7014 = vmatprep.subr.bf16.mxu1 %v7640_v26 }
 0x51b   : > { %7015 = vmatpush3.bf16.msra.mxu1 %v7640_v26 }
 0x51c   : > { %7016 = vmatprep.subr.bf16.mxu1 %v7641_v47 }
 0x51d   : > { %2939 = vmatmul.mubr.bf16.gmra.mxu0 %v7622_v35  ;;  %3059 = vmatmul.mubr.bf16.gmra.mxu1 %v7634_v41 }
 0x51e   : > { %2948 = vmatprep.mubr.bf16.mxu0 %v8235_v28 }
 0x51f   : > { %7017 = vmatpush3.bf16.msra.mxu1 %v7641_v47 }
 0x520   : > { %7018 = vmatprep.subr.bf16.mxu1 %v7642_v51 }
 0x523   : > { %7019 = vmatpush3.bf16.msra.mxu1 %v7642_v51 }
 0x525   : > { %2949 = vmatmul.mubr.bf16.gmra.mxu0 %v7623_v24 }
 0x526   : > { %2958 = vmatprep.mubr.bf16.mxu0 %v8235_v28 }
 0x52d   : > { %2959 = vmatmul.mubr.bf16.gmra.mxu0 %v7624_v45 }
 0x52e   : > { %2968 = vmatprep.mubr.bf16.mxu0 %v8235_v28 }
 0x535   : > { %2969 = vmatmul.mubr.bf16.gmra.mxu0 %v7625_v6  ;;  %v10195_v6 = vld [vmem:[#allocation30_spill] sm:$0xff] }
 0x536   : > { %2978 = vmatprep.mubr.bf16.mxu0 %v8235_v28 }
 0x53d   : > { %2979 = vmatmul.mubr.bf16.gmra.mxu0 %v7626_v46 }
 0x53e   : > { %2988 = vmatprep.mubr.bf16.mxu0 %v8235_v28 }
 0x545   : > { %2989 = vmatmul.mubr.bf16.gmra.mxu0 %v7627_v16  ;;  %v10196_v16 = vld [vmem:[#allocation31_spill] sm:$0xff] }
 0x546   : > { %2998 = vmatprep.mubr.bf16.mxu0 %v8235_v28 }
 0x54d   : > { %2999 = vmatmul.mubr.bf16.gmra.mxu0 %v7628_v30 }
 0x54e   : > { %3008 = vmatprep.mubr.bf16.mxu0 %v8235_v28 }
 0x555   : > { %3009 = vmatmul.mubr.bf16.gmra.mxu0 %v7630_v8 }
 0x556   : > { %3018 = vmatprep.mubr.bf16.mxu0 %v8235_v28 }
 0x55d   : > { %3019 = vmatmul.mubr.bf16.gmra.mxu0 %v7632_v56 }
 0x5c5   : > { %v2910_v22 = vpop.f32.mrf.mxu0  ;;  %v3030_v24 = vpop.f32.mrf.mxu1 }
 0x5c6   : > { %v3069_v43 = vmul.f32 %v2910_v22, %v8479_v53 }
 0x5c7   : > { %v8825_v13 = vpop.f32.mrf.mxu0  ;;  %v8867_v30 = vpop.f32.mrf.mxu1 }
 0x5c9   : > { %v2914_v52 = vpop.f32.mrf.mxu0  ;;  %v3034_v56 = vpop.f32.mrf.mxu1 }
 0x5ca   : > { %v3070_v32 = vmul.f32 %v2914_v52, %v8482_v55  ;;  %v10197_v52 = vld [vmem:[#allocation32_spill] sm:$0xff] }
 0x5cb   : > { %v8829_v1 = vpop.f32.mrf.mxu0 }
 0x5cc   : > { %v3101_v48 = vpack.c.bf16 %v3070_v32, %v3069_v43  ;;  %v10198_v32 = vld [vmem:[#allocation33_spill] sm:$0xff] }
 0x5cd   : > { %v2920_v3 = vpop.f32.mrf.mxu0 }
 0x5ce   : > { %7020 = vmatprep.mubr.bf16.mxu1 %v3101_v48  ;;  %v3071_v33 = vmul.f32 %v2920_v3, %v8487_v62 }
 0x5cf   : > { %v8831_v34 = vpop.f32.mrf.mxu0 }
 0x5d1   : > { %v2924_v58 = vpop.f32.mrf.mxu0 }
 0x5d2   : > { %v3072_v44 = vmul.f32 %v2924_v58, %v8490_v0  ;;  %v8875_v58 = vpop.f32.mrf.mxu1 }
 0x5d3   : > { %v8835_v50 = vpop.f32.mrf.mxu0 }
 0x5d4   : > { %v3102_v38 = vpack.c.bf16 %v3072_v44, %v3071_v33 }
 0x5d5   : > { %v2930_v40 = vpop.f32.mrf.mxu0 }
 0x5d6   : > { %7021 = vmatmul.mubr.bf16.vlgmr.msra.gmra.mxu1 %v3102_v38  ;;  %v3073_v15 = vmul.f32 %v2930_v40, %v10187_v4  ;;  %v3040_v40 = vpop.f32.mrf.mxu1  ;;  %v10199_v4 = vld [vmem:[#allocation34_spill] sm:$0xff] }
 0x5d7   : > { %v8837_v53 = vpop.f32.mrf.mxu0 }
 0x5d9   : > { %v2934_v55 = vpop.f32.mrf.mxu0 }
 0x5da   : > { %v3074_v31 = vmul.f32 %v2934_v55, %v10188_v42  ;;  %v10200_v42 = vld [vmem:[#allocation35_spill] sm:$0xff] }
 0x5db   : > { %v8841_v2 = vpop.f32.mrf.mxu0 }
 0x5dc   : > { %v3103_v54 = vpack.c.bf16 %v3074_v31, %v3073_v15 }
 0x5dd   : > { %v2940_v28 = vpop.f32.mrf.mxu0 }
 0x5de   : > { %7024 = vmatprep.mubr.bf16.mxu1 %v3103_v54  ;;  %v3075_v18 = vmul.f32 %v2940_v28, %v10189_v14  ;;  %v8883_v28 = vpop.f32.mrf.mxu1 }
 0x5df   : > { %v8843_v62 = vpop.f32.mrf.mxu0 }
 0x5e1   : > { %v2944_v0 = vpop.f32.mrf.mxu0 }
 0x5e2   : > { %v3076_v57 = vmul.f32 %v2944_v0, %v10190_v59  ;;  %v3044_v59 = vpop.f32.mrf.mxu1 }
 0x5e3   : > { %v8847_v29 = vpop.f32.mrf.mxu0 }
 0x5e4   : > { %v3104_v19 = vpack.c.bf16 %v3076_v57, %v3075_v18 }
 0x5e5   : > { %v2950_v11 = vpop.f32.mrf.mxu0 }
 0x5e6   : > { %7025 = vmatmul.mubr.bf16.gmra.mxu1 %v3104_v19  ;;  %v3077_v63 = vmul.f32 %v2950_v11, %v10191_v37  ;;  %v10201_v19 = vld [vmem:[#allocation36_spill] sm:$0xff] }
 0x5e7   : > { %v8849_v61 = vpop.f32.mrf.mxu0 }
 0x5e9   : > { %v2954_v10 = vpop.f32.mrf.mxu0 }
 0x5ea   : > { %v3078_v25 = vmul.f32 %v2954_v10, %v10192_v36  ;;  %v10202_v10 = vld [vmem:[#allocation37_spill] sm:$0xff]  ;;  %v8891_v36 = vpop.f32.mrf.mxu1 }
 0x5eb   : > { %v8853_v27 = vpop.f32.mrf.mxu0 }
 0x5ec   : > { %v3105_v12 = vpack.c.bf16 %v3078_v25, %v3077_v63 }
 0x5ed   : > { %v2960_v7 = vpop.f32.mrf.mxu0 }
 0x5ee   : > { %7028 = vmatprep.mubr.bf16.mxu1 %v3105_v12  ;;  %v3079_v9 = vmul.f32 %v2960_v7, %v10193_v17 }
 0x5ef   : > { %v8855_v39 = vpop.f32.mrf.mxu0 }
 0x5f1   : > { %v2964_v23 = vpop.f32.mrf.mxu0 }
 0x5f2   : > { %v3080_v20 = vmul.f32 %v2964_v23, %v10194_v5  ;;  %v3050_v23 = vpop.f32.mrf.mxu1 }
 0x5f3   : > { %v8859_v49 = vpop.f32.mrf.mxu0 }
 0x5f4   : > { %v3106_v60 = vpack.c.bf16 %v3080_v20, %v3079_v9  ;;  %v10203_v9 = vld [vmem:[#allocation38_spill] sm:$0xff]  ;;  %v10204_v20 = vld [vmem:[#allocation39_spill] sm:$0xff] }
 0x5f5   : > { %v2970_v35 = vpop.f32.mrf.mxu0 }
 0x5f6   : > { %7029 = vmatmul.mubr.bf16.gmra.mxu1 %v3106_v60  ;;  %v3081_v46 = vmul.f32 %v2970_v35, %v10195_v6 }
 0x5f7   : > { %v8861_v41 = vpop.f32.mrf.mxu0 }
 0x5f9   : > { %v2974_v45 = vpop.f32.mrf.mxu0 }
 0x5fa   : > { %v3082_v21 = vmul.f32 %v2974_v45, %v10196_v16  ;;  %v8899_v45 = vpop.f32.mrf.mxu1 }
 0x5fb   : > { %v8865_v26 = vpop.f32.mrf.mxu0 }
 0x5fc   : > { %v3107_v47 = vpack.c.bf16 %v3082_v21, %v3081_v46  ;;  %v3054_v21 = vpop.f32.mrf.mxu1 }
 0x5fd   : > { %v2980_v51 = vpop.f32.mrf.mxu0 }
 0x5fe   : > { %7032 = vmatprep.mubr.bf16.mxu1 %v3107_v47  ;;  %v3083_v43 = vmul.f32 %v2980_v51, %v10197_v52  ;;  %v10205_v47 = vld [vmem:[#allocation42_spill] sm:$0xff] }
 0x5ff   : > { %v8869_v8 = vpop.f32.mrf.mxu0  ;;  %v3093_v51 = vmul.f32 %v3030_v24, %v10205_v47 }
 0x601   : > { %v2984_v22 = vpop.f32.mrf.mxu0 }
 0x602   : > { %v3084_v48 = vmul.f32 %v2984_v22, %v10198_v32  ;;  %v10206_v22 = vld [vmem:[#allocation43_spill] sm:$0xff]  ;;  %v10207_v32 = vld [vmem:[#allocation40_spill] sm:$0xff] }
 0x603   : > { %v8873_v3 = vpop.f32.mrf.mxu0  ;;  %v3094_v52 = vmul.f32 %v3034_v56, %v10206_v22 }
 0x604   : > { %v3108_v33 = vpack.c.bf16 %v3084_v48, %v3083_v43 }
 0x605   : > { %v2990_v44 = vpop.f32.mrf.mxu0 }
 0x606   : > { %7033 = vmatmul.mubr.bf16.gmra.mxu1 %v3108_v33  ;;  %v3085_v15 = vmul.f32 %v2990_v44, %v10199_v4  ;;  %v10208_v33 = vld [vmem:[#allocation41_spill] sm:$0xff] }
 0x607   : > { %v8877_v38 = vpop.f32.mrf.mxu0 }
 0x609   : > { %v2994_v55 = vpop.f32.mrf.mxu0 }
 0x60a   : > { %v3086_v31 = vmul.f32 %v2994_v55, %v10200_v42  ;;  %v8907_v55 = vpop.f32.mrf.mxu1 }
 0x60b   : > { %v8881_v54 = vpop.f32.mrf.mxu0 }
 0x60c   : > { %v3109_v0 = vpack.c.bf16 %v3086_v31, %v3085_v15  ;;  %v3113_v15 = vpack.c.bf16 %v3094_v52, %v3093_v51  ;;  %v3060_v42 = vpop.f32.mrf.mxu1  ;;  %v10209_v31 = vld [vmem:[#allocation44_spill] sm:$0xff]  ;;  %v3345_v52 = vld [vmem:[#allocation2 + $0x18] sm:$0xff] }
 0x60d   : > { %v3000_v14 = vpop.f32.mrf.mxu0 }
 0x60e   : > { %7036 = vmatprep.mubr.bf16.mxu1 %v3109_v0  ;;  %v3087_v11 = vmul.f32 %v3000_v14, %v10201_v19  ;;  %v3095_v0 = vmul.f32 %v3040_v40, %v10209_v31  ;;  %v10210_v14 = vld [vmem:[#allocation45_spill] sm:$0xff]  ;;  %v10211_v19 = vld [vmem:[#allocation46_spill] sm:$0xff] }
 0x60f   : > { %v8885_v18 = vpop.f32.mrf.mxu0  ;;  %v3097_v24 = vmul.f32 %v3050_v23, %v10211_v19  ;;  %v3342_v23 = vld [vmem:[#allocation2 + $0xb0] sm:$0xff] }
 0x611   : > { %v3004_v57 = vpop.f32.mrf.mxu0 }
 0x612   : > { %v3088_v37 = vmul.f32 %v3004_v57, %v10202_v10  ;;  %v3096_v57 = vmul.f32 %v3044_v59, %v10210_v14  ;;  %v8913_v10 = vpop.f32.mrf.mxu1  ;;  %v3344_v59 = vld [vmem:[#allocation2 + $0xd8] sm:$0xff] }
 0x613   : > { %v8889_v63 = vpop.f32.mrf.mxu0 }
 0x614   : > { %v3110_v25 = vpack.c.bf16 %v3088_v37, %v3087_v11  ;;  %v10212_v11 = vld [vmem:[#allocation47_spill] sm:$0xff]  ;;  %v3114_v37 = vpack.c.bf16 %v3096_v57, %v3095_v0 }
 0x615   : > { %v3010_v12 = vpop.f32.mrf.mxu0  ;;  %v3098_v56 = vmul.f32 %v3054_v21, %v10212_v11 }
 0x616   : > { %7037 = vmatmul.mubr.bf16.gmra.mxu1 %v3110_v25  ;;  %v3089_v5 = vmul.f32 %v3010_v12, %v10203_v9  ;;  %v3064_v12 = vpop.f32.mrf.mxu1 }
 0x617   : > { %v8893_v7 = vpop.f32.mrf.mxu0  ;;  %v3115_v25 = vpack.c.bf16 %v3098_v56, %v3097_v24 }
 0x618   : > { %v8917_v40 = vpop.f32.mrf.mxu1 }
 0x619   : > { %v3014_v17 = vpop.f32.mrf.mxu0 }
 0x61a   : > { %v3090_v60 = vmul.f32 %v3014_v17, %v10204_v20  ;;  %v10213_v17 = vld [vmem:[#allocation48_spill] sm:$0xff] }
 0x61b   : > { %v8897_v35 = vpop.f32.mrf.mxu0  ;;  %v3099_v9 = vmul.f32 %v3060_v42, %v10213_v17  ;;  %v3348_v17 = vld [vmem:[#allocation2 + $0x30] sm:$0xff] }
 0x61c   : > { %v3111_v6 = vpack.c.bf16 %v3090_v60, %v3089_v5  ;;  %v10214_v5 = vld [vmem:[#allocation49_spill] sm:$0xff] }
 0x61d   : > { %v3020_v46 = vpop.f32.mrf.mxu0  ;;  %v3100_v20 = vmul.f32 %v3064_v12, %v10214_v5  ;;  %v3346_v5 = vld [vmem:[#allocation2 + $0x50] sm:$0xff] }
 0x61e   : > { %7040 = vmatprep.mubr.bf16.mxu1 %v3111_v6  ;;  %v3091_v48 = vmul.f32 %v3020_v46, %v10207_v32  ;;  %v3343_v32 = vld [vmem:[#allocation2] sm:$0xff] }
 0x61f   : > { %v8901_v16 = vpop.f32.mrf.mxu0  ;;  %v3116_v60 = vpack.c.bf16 %v3100_v20, %v3099_v9 }
 0x621   : > { %v3024_v43 = vpop.f32.mrf.mxu0 }
 0x622   : > { %v3092_v44 = vmul.f32 %v3024_v43, %v10208_v33 }
 0x624   : > { %v3112_v4 = vpack.c.bf16 %v3092_v44, %v3091_v48 }
 0x626   : > { %7041 = vmatmul.mubr.bf16.gmra.mxu1 %v3112_v4 }
 0x627   : > { %7044 = vmatprep.mubr.bf16.mxu1 %v3113_v15 }
 0x62e   : > { %7045 = vmatmul.mubr.bf16.gmra.mxu1 %v3114_v37 }
 0x62f   : > { %7048 = vmatprep.mubr.bf16.mxu1 %v3115_v25 }
 0x636   : > { %7049 = vmatmul.mubr.bf16.gmra.mxu1 %v3116_v60  ;;  %v3600_v60 = vld [vmem:[#allocation3 + $0xe8] sm:$0xff] }
 0x696   : > { %v7022_v6 = vpop.f32.mrf.mxu1 }
 0x697   : > { %v3376_v46 = vmax.f32 %v3344_v59, %v7022_v6 }
 0x698   : > { %v3215_v21 = vpop.f32.mrf.mxu1 }
 0x699   : > { %v3408_v47 = vsub.f32 %v3344_v59, %v3376_v46  ;;  %v3504_v51 = vsub.f32 %v7022_v6, %v3376_v46  ;;  %3888 = vst [vmem:[#allocation2 + $0xd8] sm:$0xff] %v3376_v46  ;;  %v3374_v22 = vmax.f32 %v3342_v23, %v3215_v21  ;;  %v3728_v59 = vld [vmem:[#allocation4 + $0xc0] sm:$0xff] }
 0x69a   : > { %v7023_v43 = vpop.f32.mrf.mxu1 }
 0x69b   : > { %v3442_v48 = vmul.f32 1.442695, %v3408_v47  ;;  %v3538_v33 = vmul.f32 1.442695, %v3504_v51  ;;  %v3406_v44 = vsub.f32 %v3342_v23, %v3374_v22  ;;  %v3502_v4 = vsub.f32 %v3215_v21, %v3374_v22  ;;  %3886 = vst [vmem:[#allocation2 + $0xb0] sm:$0xff] %v3374_v22  ;;  %v3349_v47 = vld [vmem:[#allocation2 + $0x48] sm:$0xff] }
 0x69c   : > { %v3377_v15 = vmax.f32 %v3345_v52, %v7023_v43  ;;  %v3218_v42 = vpop.f32.mrf.mxu1  ;;  %v3598_v22 = vld [vmem:[#allocation3 + $0x80] sm:$0xff] }
 0x69d   : > { %7643 = vpow2.f32 %v3442_v48  ;;  %v3438_v31 = vmul.f32 1.442695, %v3406_v44  ;;  %v3534_v0 = vmul.f32 1.442695, %v3502_v4  ;;  %v3375_v14 = vmax.f32 %v3343_v32, %v3218_v42 }
 0x69e   : > { %7645 = vpow2.f32 %v3538_v33  ;;  %v3409_v57 = vsub.f32 %v3345_v52, %v3377_v15  ;;  %v3505_v19 = vsub.f32 %v7023_v43, %v3377_v15  ;;  %3889 = vst [vmem:[#allocation2 + $0x18] sm:$0xff] %v3377_v15  ;;  %v3726_v52 = vld [vmem:[#allocation4 + $0xb0] sm:$0xff] }
 0x69f   : > { %7647 = vpow2.f32 %v3438_v31  ;;  %v3407_v24 = vsub.f32 %v3343_v32, %v3375_v14  ;;  %v3503_v11 = vsub.f32 %v3218_v42, %v3375_v14  ;;  %3887 = vst [vmem:[#allocation2] sm:$0xff] %v3375_v14 }
 0x6a0   : > { %7649 = vpow2.f32 %v3534_v0  ;;  %v3444_v56 = vmul.f32 1.442695, %v3409_v57  ;;  %v3540_v37 = vmul.f32 1.442695, %v3505_v19 }
 0x6a1   : > { %v3440_v25 = vmul.f32 1.442695, %v3407_v24  ;;  %v3536_v12 = vmul.f32 1.442695, %v3503_v11 }
 0x6a2   : > { %7651 = vpow2.f32 %v3444_v56  ;;  %v3601_v56 = vld [vmem:[#allocation3 + $0x78] sm:$0xff] }
 0x6a3   : > { %7653 = vpow2.f32 %v3540_v37  ;;  %v3729_v37 = vld [vmem:[#allocation4 + $0x10] sm:$0xff] }
 0x6a4   : > { %7655 = vpow2.f32 %v3440_v25 }
 0x6a5   : > { %7657 = vpow2.f32 %v3536_v12 }
 0x6a6   : > { %v7026_v9 = vpop.f32.mrf.mxu1 }
 0x6a7   : > { %v3380_v20 = vmax.f32 %v3348_v17, %v7026_v9 }
 0x6a8   : > { %v3231_v6 = vpop.f32.mrf.mxu1 }
 0x6a9   : > { %v3412_v23 = vsub.f32 %v3348_v17, %v3380_v20  ;;  %v3508_v46 = vsub.f32 %v7026_v9, %v3380_v20  ;;  %3892 = vst [vmem:[#allocation2 + $0x30] sm:$0xff] %v3380_v20  ;;  %v3378_v21 = vmax.f32 %v3346_v5, %v3231_v6 }
 0x6aa   : > { %v7644_v51 = vpop.eup %7643  ;;  %v7027_v43 = vpop.f32.mrf.mxu1 }
 0x6ab   : > { %v7646_v32 = vpop.eup %7645  ;;  %v3632_v48 = vmul.f32 %v7644_v51, %v3600_v60  ;;  %v3760_v33 = vmul.f32 %v7644_v51, %v3728_v59  ;;  %v3450_v44 = vmul.f32 1.442695, %v3412_v23  ;;  %v3546_v4 = vmul.f32 1.442695, %v3508_v46  ;;  %3890 = vst [vmem:[#allocation2 + $0x50] sm:$0xff] %v3378_v21  ;;  %v3347_v46 = vld [vmem:[#allocation2 + $0x68] sm:$0xff] }
 0x6ac   : > { %v7648_v15 = vpop.eup %7647  ;;  %v3792_v42 = vmul.f32 %v7646_v32, %v8831_v34  ;;  %v3410_v31 = vsub.f32 %v3346_v5, %v3378_v21  ;;  %v3506_v0 = vsub.f32 %v3231_v6, %v3378_v21  ;;  %v3381_v14 = vmax.f32 %v3349_v47, %v7027_v43  ;;  %v3599_v34 = vld [vmem:[#allocation3 + $0xc8] sm:$0xff]  ;;  %v3727_v5 = vld [vmem:[#allocation4 + $0xb8] sm:$0xff]  ;;  %v3234_v23 = vpop.f32.mrf.mxu1 }
 0x6ad   : > { %v7650_v57 = vpop.eup %7649  ;;  %v3664_v19 = vadd.f32 %v7646_v32, %v3632_v48  ;;  %v3630_v24 = vmul.f32 %v7648_v15, %v3598_v22  ;;  %v3758_v11 = vmul.f32 %v7648_v15, %v3726_v52  ;;  %7659 = vpow2.f32 %v3450_v44 }
 0x6ae   : > { %v3824_v25 = vadd.f32 %v3792_v42, %v3760_v33  ;;  %v3790_v12 = vmul.f32 %v7650_v57, %v8825_v13  ;;  %7661 = vpow2.f32 %v3546_v4  ;;  %v3446_v17 = vmul.f32 1.442695, %v3410_v31  ;;  %3893 = vst [vmem:[#allocation2 + $0x48] sm:$0xff] %v3381_v14 }
 0x6af   : > { %v7652_v9 = vpop.eup %7651  ;;  %3696 = vst [vmem:[#allocation3 + $0xe8] sm:$0xff] %v3664_v19  ;;  %v3662_v20 = vadd.f32 %v7650_v57, %v3630_v24  ;;  %v3542_v60 = vmul.f32 1.442695, %v3506_v0  ;;  %v3413_v59 = vsub.f32 %v3349_v47, %v3381_v14  ;;  %v3509_v6 = vsub.f32 %v7027_v43, %v3381_v14 }
 0x6b0   : > { %v7654_v21 = vpop.eup %7653  ;;  %3856 = vst [vmem:[#allocation4 + $0xc0] sm:$0xff] %v3824_v25  ;;  %v3822_v51 = vadd.f32 %v3790_v12, %v3758_v11  ;;  %v3633_v22 = vmul.f32 %v7652_v9, %v3601_v56  ;;  %v3761_v52 = vmul.f32 %v7652_v9, %v3729_v37  ;;  %7663 = vpow2.f32 %v3446_v17  ;;  %v3350_v37 = vld [vmem:[#allocation2 + $0x80] sm:$0xff]  ;;  %v3604_v12 = vld [vmem:[#allocation3 + $0x58] sm:$0xff]  ;;  %v3732_v17 = vld [vmem:[#allocation4 + $0xd0] sm:$0xff] }
 0x6b1   : > { %v7656_v13 = vpop.eup %7655  ;;  %3694 = vst [vmem:[#allocation3 + $0x80] sm:$0xff] %v3662_v20  ;;  %v3793_v32 = vmul.f32 %v7654_v21, %v8835_v50  ;;  %7665 = vpow2.f32 %v3542_v60  ;;  %v3452_v48 = vmul.f32 1.442695, %v3413_v59  ;;  %v3548_v33 = vmul.f32 1.442695, %v3509_v6  ;;  %v3352_v50 = vld [vmem:[#allocation2 + $0xe8] sm:$0xff] }
 0x6b2   : > { %v7658_v44 = vpop.eup %7657  ;;  %3854 = vst [vmem:[#allocation4 + $0xb0] sm:$0xff] %v3822_v51  ;;  %v3665_v4 = vadd.f32 %v7654_v21, %v3633_v22  ;;  %v3631_v47 = vmul.f32 %v7656_v13, %v3599_v34  ;;  %v3759_v43 = vmul.f32 %v7656_v13, %v3727_v5  ;;  %v3379_v15 = vmax.f32 %v3347_v46, %v3234_v23  ;;  %v3353_v5 = vld [vmem:[#allocation2 + $0xb8] sm:$0xff]  ;;  %v3351_v6 = vld [vmem:[#allocation2 + $0x88] sm:$0xff] }
 0x6b3   : > { %v3825_v42 = vadd.f32 %v3793_v32, %v3761_v52  ;;  %v3791_v31 = vmul.f32 %v7658_v44, %v8829_v1  ;;  %7667 = vpow2.f32 %v3452_v48  ;;  %v3602_v51 = vld [vmem:[#allocation3 + $0x8] sm:$0xff] }
 0x6b4   : > { %3697 = vst [vmem:[#allocation3 + $0x78] sm:$0xff] %v3665_v4  ;;  %v3663_v0 = vadd.f32 %v7658_v44, %v3631_v47  ;;  %7669 = vpow2.f32 %v3548_v33  ;;  %v3411_v14 = vsub.f32 %v3347_v46, %v3379_v15  ;;  %v3507_v57 = vsub.f32 %v3234_v23, %v3379_v15  ;;  %3891 = vst [vmem:[#allocation2 + $0x68] sm:$0xff] %v3379_v15  ;;  %v3730_v22 = vld [vmem:[#allocation4 + $0x28] sm:$0xff] }
 0x6b5   : > { %3857 = vst [vmem:[#allocation4 + $0x10] sm:$0xff] %v3825_v42  ;;  %v3823_v19 = vadd.f32 %v3791_v31, %v3759_v43 }
 0x6b6   : > { %3695 = vst [vmem:[#allocation3 + $0xc8] sm:$0xff] %v3663_v0  ;;  %v3448_v24 = vmul.f32 1.442695, %v3411_v14  ;;  %v3544_v11 = vmul.f32 1.442695, %v3507_v57  ;;  %v7030_v56 = vpop.f32.mrf.mxu1  ;;  %v3605_v57 = vld [vmem:[#allocation3 + $0xa8] sm:$0xff] }
 0x6b7   : > { %3855 = vst [vmem:[#allocation4 + $0xb8] sm:$0xff] %v3823_v19  ;;  %v3384_v25 = vmax.f32 %v3352_v50, %v7030_v56 }
 0x6b8   : > { %7671 = vpow2.f32 %v3448_v24  ;;  %v3247_v1 = vpop.f32.mrf.mxu1 }
 0x6b9   : > { %7673 = vpow2.f32 %v3544_v11  ;;  %v3416_v9 = vsub.f32 %v3352_v50, %v3384_v25  ;;  %v3512_v20 = vsub.f32 %v7030_v56, %v3384_v25  ;;  %3896 = vst [vmem:[#allocation2 + $0xe8] sm:$0xff] %v3384_v25  ;;  %v3382_v34 = vmax.f32 %v3350_v37, %v3247_v1  ;;  %v3733_v50 = vld [vmem:[#allocation4 + $0x68] sm:$0xff] }
 0x6ba   : > { %v7660_v60 = vpop.eup %7659  ;;  %v7031_v59 = vpop.f32.mrf.mxu1 }
 0x6bb   : > { %v7662_v23 = vpop.eup %7661  ;;  %v3636_v46 = vmul.f32 %v7660_v60, %v3604_v12  ;;  %v3764_v21 = vmul.f32 %v7660_v60, %v3732_v17  ;;  %v3458_v52 = vmul.f32 1.442695, %v3416_v9  ;;  %v3554_v13 = vmul.f32 1.442695, %v3512_v20  ;;  %3894 = vst [vmem:[#allocation2 + $0x80] sm:$0xff] %v3382_v34 }
 0x6bc   : > { %v3796_v32 = vmul.f32 %v7662_v23, %v8843_v62  ;;  %v3414_v48 = vsub.f32 %v3350_v37, %v3382_v34  ;;  %v3510_v33 = vsub.f32 %v3247_v1, %v3382_v34  ;;  %v3385_v44 = vmax.f32 %v3353_v5, %v7031_v59  ;;  %v3250_v4 = vpop.f32.mrf.mxu1 }
 0x6bd   : > { %v7664_v47 = vpop.eup %7663  ;;  %v3668_v43 = vadd.f32 %v7662_v23, %v3636_v46  ;;  %7675 = vpow2.f32 %v3458_v52  ;;  %v3383_v15 = vmax.f32 %v3351_v6, %v3250_v4  ;;  %v3603_v46 = vld [vmem:[#allocation3 + $0x90] sm:$0xff] }
 0x6be   : > { %v7666_v42 = vpop.eup %7665  ;;  %v3828_v31 = vadd.f32 %v3796_v32, %v3764_v21  ;;  %v3634_v0 = vmul.f32 %v7664_v47, %v3602_v51  ;;  %v3762_v14 = vmul.f32 %v7664_v47, %v3730_v22  ;;  %7677 = vpow2.f32 %v3554_v13  ;;  %3897 = vst [vmem:[#allocation2 + $0xb8] sm:$0xff] %v3385_v44  ;;  %v3731_v21 = vld [vmem:[#allocation4 + $0x30] sm:$0xff] }
 0x6bf   : > { %3700 = vst [vmem:[#allocation3 + $0x58] sm:$0xff] %v3668_v43  ;;  %v3794_v19 = vmul.f32 %v7666_v42, %v8837_v53  ;;  %v3454_v62 = vmul.f32 1.442695, %v3414_v48  ;;  %v3550_v24 = vmul.f32 1.442695, %v3510_v33  ;;  %v3417_v11 = vsub.f32 %v3353_v5, %v3385_v44  ;;  %3895 = vst [vmem:[#allocation2 + $0x88] sm:$0xff] %v3383_v15 }
 0x6c0   : > { %v7668_v56 = vpop.eup %7667  ;;  %3860 = vst [vmem:[#allocation4 + $0xd0] sm:$0xff] %v3828_v31  ;;  %v3666_v37 = vadd.f32 %v7666_v42, %v3634_v0  ;;  %v3513_v25 = vsub.f32 %v7031_v59, %v3385_v44  ;;  %v3415_v12 = vsub.f32 %v3351_v6, %v3383_v15  ;;  %v3511_v17 = vsub.f32 %v3250_v4, %v3383_v15  ;;  %v3356_v6 = vld [vmem:[#allocation2 + $0x8] sm:$0xff]  ;;  %v3354_v33 = vld [vmem:[#allocation2 + $0x60] sm:$0xff]  ;;  %v3608_v43 = vld [vmem:[#allocation3 + $0x38] sm:$0xff] }
 0x6c1   : > { %v7670_v1 = vpop.eup %7669  ;;  %v3826_v9 = vadd.f32 %v3794_v19, %v3762_v14  ;;  %v3637_v20 = vmul.f32 %v7668_v56, %v3605_v57  ;;  %v3765_v34 = vmul.f32 %v7668_v56, %v3733_v50  ;;  %7679 = vpow2.f32 %v3454_v62  ;;  %v3736_v15 = vld [vmem:[#allocation4 + $0x48] sm:$0xff]  ;;  %v3357_v50 = vld [vmem:[#allocation2 + $0x78] sm:$0xff] }
 0x6c2   : > { %3698 = vst [vmem:[#allocation3 + $0x8] sm:$0xff] %v3666_v37  ;;  %v3797_v60 = vmul.f32 %v7670_v1, %v8847_v29  ;;  %7681 = vpow2.f32 %v3550_v24  ;;  %v3460_v53 = vmul.f32 1.442695, %v3417_v11  ;;  %v3556_v23 = vmul.f32 1.442695, %v3513_v25  ;;  %v3355_v24 = vld [vmem:[#allocation2 + $0xf0] sm:$0xff] }
 0x6c3   : > { %3858 = vst [vmem:[#allocation4 + $0x28] sm:$0xff] %v3826_v9  ;;  %v3669_v5 = vadd.f32 %v7670_v1, %v3637_v20  ;;  %v3456_v51 = vmul.f32 1.442695, %v3415_v12  ;;  %v3552_v22 = vmul.f32 1.442695, %v3511_v17  ;;  %v3606_v17 = vld [vmem:[#allocation3 + $0xd0] sm:$0xff] }
 0x6c4   : > { %v3829_v59 = vadd.f32 %v3797_v60, %v3765_v34  ;;  %7683 = vpow2.f32 %v3460_v53  ;;  %v3734_v1 = vld [vmem:[#allocation4 + $0x58] sm:$0xff] }
 0x6c5   : > { %v7672_v52 = vpop.eup %7671  ;;  %3701 = vst [vmem:[#allocation3 + $0xa8] sm:$0xff] %v3669_v5  ;;  %7685 = vpow2.f32 %v3556_v23 }
 0x6c6   : > { %v7674_v13 = vpop.eup %7673  ;;  %3861 = vst [vmem:[#allocation4 + $0x68] sm:$0xff] %v3829_v59  ;;  %v3635_v32 = vmul.f32 %v7672_v52, %v3603_v46  ;;  %v3763_v48 = vmul.f32 %v7672_v52, %v3731_v21  ;;  %7687 = vpow2.f32 %v3456_v51  ;;  %v7034_v29 = vpop.f32.mrf.mxu1  ;;  %v3737_v52 = vld [vmem:[#allocation4 + $0x40] sm:$0xff] }
 0x6c7   : > { %v3795_v44 = vmul.f32 %v7674_v13, %v8841_v2  ;;  %7689 = vpow2.f32 %v3552_v22  ;;  %v3388_v4 = vmax.f32 %v3356_v6, %v7034_v29 }
 0x6c8   : > { %v3667_v47 = vadd.f32 %v7674_v13, %v3635_v32  ;;  %v3263_v42 = vpop.f32.mrf.mxu1 }
 0x6c9   : > { %v3827_v31 = vadd.f32 %v3795_v44, %v3763_v48  ;;  %v3420_v0 = vsub.f32 %v3356_v6, %v3388_v4  ;;  %v3516_v14 = vsub.f32 %v7034_v29, %v3388_v4  ;;  %3900 = vst [vmem:[#allocation2 + $0x8] sm:$0xff] %v3388_v4  ;;  %v3386_v57 = vmax.f32 %v3354_v33, %v3263_v42 }
 0x6ca   : > { %v7676_v19 = vpop.eup %7675  ;;  %3699 = vst [vmem:[#allocation3 + $0x90] sm:$0xff] %v3667_v47  ;;  %v7035_v62 = vpop.f32.mrf.mxu1  ;;  %v3607_v47 = vld [vmem:[#allocation3 + $0xb0] sm:$0xff] }
 0x6cb   : > { %v7678_v11 = vpop.eup %7677  ;;  %3859 = vst [vmem:[#allocation4 + $0x30] sm:$0xff] %v3827_v31  ;;  %v3640_v56 = vmul.f32 %v7676_v19, %v3608_v43  ;;  %v3768_v2 = vmul.f32 %v7676_v19, %v3736_v15  ;;  %v3466_v37 = vmul.f32 1.442695, %v3420_v0  ;;  %v3562_v25 = vmul.f32 1.442695, %v3516_v14  ;;  %3898 = vst [vmem:[#allocation2 + $0x60] sm:$0xff] %v3386_v57 }
 0x6cc   : > { %v3800_v12 = vmul.f32 %v7678_v11, %v8855_v39  ;;  %v3418_v9 = vsub.f32 %v3354_v33, %v3386_v57  ;;  %v3514_v20 = vsub.f32 %v3263_v42, %v3386_v57  ;;  %v3389_v34 = vmax.f32 %v3357_v50, %v7035_v62  ;;  %v3266_v60 = vpop.f32.mrf.mxu1  ;;  %v3609_v39 = vld [vmem:[#allocation3 + $0x40] sm:$0xff] }
 0x6cd   : > { %v3672_v53 = vadd.f32 %v7678_v11, %v3640_v56  ;;  %7691 = vpow2.f32 %v3466_v37  ;;  %v3387_v23 = vmax.f32 %v3355_v24, %v3266_v60  ;;  %v3735_v43 = vld [vmem:[#allocation4] sm:$0xff] }
 0x6ce   : > { %v7680_v5 = vpop.eup %7679  ;;  %v3832_v46 = vadd.f32 %v3800_v12, %v3768_v2  ;;  %7693 = vpow2.f32 %v3562_v25  ;;  %v3462_v21 = vmul.f32 1.442695, %v3418_v9  ;;  %v3558_v51 = vmul.f32 1.442695, %v3514_v20  ;;  %3901 = vst [vmem:[#allocation2 + $0x78] sm:$0xff] %v3389_v34  ;;  %v3360_v37 = vld [vmem:[#allocation2 + $0x40] sm:$0xff] }
 0x6cf   : > { %v7682_v22 = vpop.eup %7681  ;;  %3704 = vst [vmem:[#allocation3 + $0x38] sm:$0xff] %v3672_v53  ;;  %v3638_v59 = vmul.f32 %v7680_v5, %v3606_v17  ;;  %v3766_v6 = vmul.f32 %v7680_v5, %v3734_v1  ;;  %v3421_v13 = vsub.f32 %v3357_v50, %v3389_v34  ;;  %v3517_v32 = vsub.f32 %v7035_v62, %v3389_v34  ;;  %v3358_v9 = vld [vmem:[#allocation2 + $0x38] sm:$0xff] }
 0x6d0   : > { %3899 = vst [vmem:[#allocation2 + $0xf0] sm:$0xff] %v3387_v23  ;;  %3864 = vst [vmem:[#allocation4 + $0x48] sm:$0xff] %v3832_v46  ;;  %v3798_v48 = vmul.f32 %v7682_v22, %v8849_v61  ;;  %7695 = vpow2.f32 %v3462_v21  ;;  %v3419_v29 = vsub.f32 %v3355_v24, %v3387_v23  ;;  %v3515_v33 = vsub.f32 %v3266_v60, %v3387_v23  ;;  %v3612_v34 = vld [vmem:[#allocation3 + $0x18] sm:$0xff]  ;;  %v3740_v60 = vld [vmem:[#allocation4 + $0xe0] sm:$0xff] }
 0x6d1   : > { %v7684_v44 = vpop.eup %7683  ;;  %v3670_v4 = vadd.f32 %v7682_v22, %v3638_v59  ;;  %7697 = vpow2.f32 %v3558_v51  ;;  %v3468_v15 = vmul.f32 1.442695, %v3421_v13  ;;  %v3564_v42 = vmul.f32 1.442695, %v3517_v32  ;;  %v3361_v21 = vld [vmem:[#allocation2 + $0xc8] sm:$0xff]  ;;  %v3359_v22 = vld [vmem:[#allocation2 + $0x58] sm:$0xff] }
 0x6d2   : > { %v7686_v31 = vpop.eup %7685  ;;  %v3830_v0 = vadd.f32 %v3798_v48, %v3766_v6  ;;  %v3641_v14 = vmul.f32 %v7684_v44, %v3609_v39  ;;  %v3769_v57 = vmul.f32 %v7684_v44, %v3737_v52  ;;  %v3464_v50 = vmul.f32 1.442695, %v3419_v29  ;;  %v3610_v52 = vld [vmem:[#allocation3 + $0xe0] sm:$0xff]  ;;  %v3738_v13 = vld [vmem:[#allocation4 + $0x78] sm:$0xff] }
 0x6d3   : > { %v7688_v19 = vpop.eup %7687  ;;  %3702 = vst [vmem:[#allocation3 + $0xd0] sm:$0xff] %v3670_v4  ;;  %v3801_v62 = vmul.f32 %v7686_v31, %v8859_v49  ;;  %7699 = vpow2.f32 %v3468_v15  ;;  %v3560_v61 = vmul.f32 1.442695, %v3515_v33 }
 0x6d4   : > { %v7690_v24 = vpop.eup %7689  ;;  %3862 = vst [vmem:[#allocation4 + $0x58] sm:$0xff] %v3830_v0  ;;  %v3673_v11 = vadd.f32 %v7686_v31, %v3641_v14  ;;  %v3639_v56 = vmul.f32 %v7688_v19, %v3607_v47  ;;  %v3767_v2 = vmul.f32 %v7688_v19, %v3735_v43  ;;  %7701 = vpow2.f32 %v3564_v42  ;;  %v3741_v19 = vld [vmem:[#allocation4 + $0x80] sm:$0xff] }
 0x6d5   : > { %v3833_v25 = vadd.f32 %v3801_v62, %v3769_v57  ;;  %v3799_v12 = vmul.f32 %v7690_v24, %v8853_v27  ;;  %7703 = vpow2.f32 %v3464_v50  ;;  %v3613_v50 = vld [vmem:[#allocation3 + $0x68] sm:$0xff] }
 0x6d6   : > { %3705 = vst [vmem:[#allocation3 + $0x40] sm:$0xff] %v3673_v11  ;;  %v3671_v17 = vadd.f32 %v7690_v24, %v3639_v56  ;;  %7705 = vpow2.f32 %v3560_v61  ;;  %v7038_v1 = vpop.f32.mrf.mxu1 }
 0x6d7   : > { %3865 = vst [vmem:[#allocation4 + $0x40] sm:$0xff] %v3833_v25  ;;  %v3831_v49 = vadd.f32 %v3799_v12, %v3767_v2  ;;  %v3392_v20 = vmax.f32 %v3360_v37, %v7038_v1  ;;  %v3611_v2 = vld [vmem:[#allocation3 + $0x60] sm:$0xff] }
 0x6d8   : > { %3703 = vst [vmem:[#allocation3 + $0xb0] sm:$0xff] %v3671_v17  ;;  %v3279_v53 = vpop.f32.mrf.mxu1 }
 0x6d9   : > { %3863 = vst [vmem:[#allocation4] sm:$0xff] %v3831_v49  ;;  %v3424_v23 = vsub.f32 %v3360_v37, %v3392_v20  ;;  %v3520_v5 = vsub.f32 %v7038_v1, %v3392_v20  ;;  %3904 = vst [vmem:[#allocation2 + $0x40] sm:$0xff] %v3392_v20  ;;  %v3390_v46 = vmax.f32 %v3358_v9, %v3279_v53  ;;  %v3739_v37 = vld [vmem:[#allocation4 + $0xd8] sm:$0xff] }
 0x6da   : > { %v7692_v27 = vpop.eup %7691  ;;  %v7039_v51 = vpop.f32.mrf.mxu1 }
 0x6db   : > { %v7694_v59 = vpop.eup %7693  ;;  %v3644_v6 = vmul.f32 %v7692_v27, %v3612_v34  ;;  %v3772_v39 = vmul.f32 %v7692_v27, %v3740_v60  ;;  %v3474_v32 = vmul.f32 1.442695, %v3424_v23  ;;  %v3570_v48 = vmul.f32 1.442695, %v3520_v5  ;;  %3902 = vst [vmem:[#allocation2 + $0x38] sm:$0xff] %v3390_v46 }
 0x6dc   : > { %v3804_v29 = vmul.f32 %v7694_v59, %v8869_v8  ;;  %v3422_v33 = vsub.f32 %v3358_v9, %v3390_v46  ;;  %v3518_v44 = vsub.f32 %v3279_v53, %v3390_v46  ;;  %v3393_v4 = vmax.f32 %v3361_v21, %v7039_v51  ;;  %v3282_v47 = vpop.f32.mrf.mxu1 }
 0x6dd   : > { %v7696_v43 = vpop.eup %7695  ;;  %v3676_v15 = vadd.f32 %v7694_v59, %v3644_v6  ;;  %7707 = vpow2.f32 %v3474_v32  ;;  %v3391_v42 = vmax.f32 %v3359_v22, %v3282_v47  ;;  %v3364_v6 = vld [vmem:[#allocation2 + $0x70] sm:$0xff] }
 0x6de   : > { %v7698_v31 = vpop.eup %7697  ;;  %v3836_v0 = vadd.f32 %v3804_v29, %v3772_v39  ;;  %v3642_v14 = vmul.f32 %v7696_v43, %v3610_v52  ;;  %v3770_v57 = vmul.f32 %v7696_v43, %v3738_v13  ;;  %7709 = vpow2.f32 %v3570_v48  ;;  %3905 = vst [vmem:[#allocation2 + $0xc8] sm:$0xff] %v3393_v4  ;;  %v3362_v13 = vld [vmem:[#allocation2 + $0xe0] sm:$0xff]  ;;  %v3616_v48 = vld [vmem:[#allocation3 + $0x50] sm:$0xff]  ;;  %v3744_v29 = vld [vmem:[#allocation4 + $0xf8] sm:$0xff] }
 0x6df   : > { %3708 = vst [vmem:[#allocation3 + $0x18] sm:$0xff] %v3676_v15  ;;  %v3802_v62 = vmul.f32 %v7698_v31, %v8861_v41  ;;  %v3470_v8 = vmul.f32 1.442695, %v3422_v33  ;;  %v3566_v61 = vmul.f32 1.442695, %v3518_v44  ;;  %v3425_v24 = vsub.f32 %v3361_v21, %v3393_v4  ;;  %3903 = vst [vmem:[#allocation2 + $0x58] sm:$0xff] %v3391_v42 }
 0x6e0   : > { %v7700_v11 = vpop.eup %7699  ;;  %3868 = vst [vmem:[#allocation4 + $0xe0] sm:$0xff] %v3836_v0  ;;  %v3674_v56 = vadd.f32 %v7698_v31, %v3642_v14  ;;  %v3521_v25 = vsub.f32 %v7039_v51, %v3393_v4  ;;  %v3423_v12 = vsub.f32 %v3359_v22, %v3391_v42  ;;  %v3519_v17 = vsub.f32 %v3282_v47, %v3391_v42  ;;  %v3365_v47 = vld [vmem:[#allocation2 + $0xc0] sm:$0xff]  ;;  %v3363_v42 = vld [vmem:[#allocation2 + $0x90] sm:$0xff] }
 0x6e1   : > { %v7702_v1 = vpop.eup %7701  ;;  %v3834_v9 = vadd.f32 %v3802_v62, %v3770_v57  ;;  %v3645_v49 = vmul.f32 %v7700_v11, %v3613_v50  ;;  %v3773_v20 = vmul.f32 %v7700_v11, %v3741_v19  ;;  %7711 = vpow2.f32 %v3470_v8  ;;  %v3614_v62 = vld [vmem:[#allocation3 + $0x10] sm:$0xff]  ;;  %v3742_v8 = vld [vmem:[#allocation4 + $0xa0] sm:$0xff] }
 0x6e2   : > { %v7704_v34 = vpop.eup %7703  ;;  %3706 = vst [vmem:[#allocation3 + $0xe0] sm:$0xff] %v3674_v56  ;;  %v3805_v41 = vmul.f32 %v7702_v1, %v8873_v3  ;;  %7713 = vpow2.f32 %v3566_v61  ;;  %v3476_v60 = vmul.f32 1.442695, %v3425_v24  ;;  %v3572_v53 = vmul.f32 1.442695, %v3521_v25 }
 0x6e3   : > { %v7706_v23 = vpop.eup %7705  ;;  %3866 = vst [vmem:[#allocation4 + $0x78] sm:$0xff] %v3834_v9  ;;  %v3677_v5 = vadd.f32 %v7702_v1, %v3645_v49  ;;  %v3643_v46 = vmul.f32 %v7704_v34, %v3611_v2  ;;  %v3771_v21 = vmul.f32 %v7704_v34, %v3739_v37  ;;  %v3472_v27 = vmul.f32 1.442695, %v3423_v12  ;;  %v3617_v34 = vld [vmem:[#allocation3 + $0xa0] sm:$0xff] }
 0x6e4   : > { %v3837_v51 = vadd.f32 %v3805_v41, %v3773_v20  ;;  %v3803_v22 = vmul.f32 %v7706_v23, %v8865_v26  ;;  %7715 = vpow2.f32 %v3476_v60  ;;  %v3568_v59 = vmul.f32 1.442695, %v3519_v17  ;;  %v3745_v41 = vld [vmem:[#allocation4 + $0xe8] sm:$0xff] }
 0x6e5   : > { %3709 = vst [vmem:[#allocation3 + $0x68] sm:$0xff] %v3677_v5  ;;  %v3675_v39 = vadd.f32 %v7706_v23, %v3643_v46  ;;  %7717 = vpow2.f32 %v3572_v53 }
 0x6e6   : > { %3869 = vst [vmem:[#allocation4 + $0x80] sm:$0xff] %v3837_v51  ;;  %v3835_v3 = vadd.f32 %v3803_v22, %v3771_v21  ;;  %7719 = vpow2.f32 %v3472_v27  ;;  %v7042_v52 = vpop.f32.mrf.mxu1  ;;  %v3368_v21 = vld [vmem:[#allocation2 + $0x10] sm:$0xff] }
 0x6e7   : > { %3707 = vst [vmem:[#allocation3 + $0x60] sm:$0xff] %v3675_v39  ;;  %7721 = vpow2.f32 %v3568_v59  ;;  %v3396_v32 = vmax.f32 %v3364_v6, %v7042_v52  ;;  %v3615_v59 = vld [vmem:[#allocation3 + $0x70] sm:$0xff] }
 0x6e8   : > { %3867 = vst [vmem:[#allocation4 + $0xd8] sm:$0xff] %v3835_v3  ;;  %v3295_v33 = vpop.f32.mrf.mxu1 }
 0x6e9   : > { %v3428_v44 = vsub.f32 %v3364_v6, %v3396_v32  ;;  %v3524_v26 = vsub.f32 %v7042_v52, %v3396_v32  ;;  %3908 = vst [vmem:[#allocation2 + $0x70] sm:$0xff] %v3396_v32  ;;  %v3394_v4 = vmax.f32 %v3362_v13, %v3295_v33  ;;  %v3743_v6 = vld [vmem:[#allocation4 + $0x18] sm:$0xff] }
 0x6ea   : > { %v7708_v43 = vpop.eup %7707  ;;  %v7043_v15 = vpop.f32.mrf.mxu1 }
 0x6eb   : > { %v7710_v31 = vpop.eup %7709  ;;  %v3648_v0 = vmul.f32 %v7708_v43, %v3616_v48  ;;  %v3776_v14 = vmul.f32 %v7708_v43, %v3744_v29  ;;  %v3482_v57 = vmul.f32 1.442695, %v3428_v44  ;;  %v3578_v50 = vmul.f32 1.442695, %v3524_v26  ;;  %3906 = vst [vmem:[#allocation2 + $0xe0] sm:$0xff] %v3394_v4 }
 0x6ec   : > { %v3808_v19 = vmul.f32 %v7710_v31, %v8885_v18  ;;  %v3426_v61 = vsub.f32 %v3362_v13, %v3394_v4  ;;  %v3522_v24 = vsub.f32 %v3295_v33, %v3394_v4  ;;  %v3397_v11 = vmax.f32 %v3365_v47, %v7043_v15  ;;  %v3298_v56 = vpop.f32.mrf.mxu1 }
 0x6ed   : > { %v3680_v2 = vadd.f32 %v7710_v31, %v3648_v0  ;;  %7723 = vpow2.f32 %v3482_v57  ;;  %v3395_v37 = vmax.f32 %v3363_v42, %v3298_v56  ;;  %v3369_v0 = vld [vmem:[#allocation2 + $0x28] sm:$0xff]  ;;  %v3367_v57 = vld [vmem:[#allocation2 + $0xd0] sm:$0xff] }
 0x6ee   : > { %v7712_v25 = vpop.eup %7711  ;;  %v3840_v12 = vadd.f32 %v3808_v19, %v3776_v14  ;;  %7725 = vpow2.f32 %v3578_v50  ;;  %v3478_v17 = vmul.f32 1.442695, %v3426_v61  ;;  %v3574_v1 = vmul.f32 1.442695, %v3522_v24  ;;  %3909 = vst [vmem:[#allocation2 + $0xc0] sm:$0xff] %v3397_v11  ;;  %v8936_v9 = vpop.f32.mrf.mxu1 }
 0x6ef   : > { %v7714_v49 = vpop.eup %7713  ;;  %3712 = vst [vmem:[#allocation3 + $0x50] sm:$0xff] %v3680_v2  ;;  %v3646_v18 = vmul.f32 %v7712_v25, %v3614_v62  ;;  %v3774_v20 = vmul.f32 %v7712_v25, %v3742_v8  ;;  %v3429_v60 = vsub.f32 %v3365_v47, %v3397_v11  ;;  %v3525_v53 = vsub.f32 %v7043_v15, %v3397_v11  ;;  %v3366_v47 = vld [vmem:[#allocation2 + $0xa8] sm:$0xff] }
 0x6f0   : > { %3907 = vst [vmem:[#allocation2 + $0x90] sm:$0xff] %v3395_v37  ;;  %3872 = vst [vmem:[#allocation4 + $0xf8] sm:$0xff] %v3840_v12  ;;  %v3806_v23 = vmul.f32 %v7714_v49, %v8877_v38  ;;  %7727 = vpow2.f32 %v3478_v17  ;;  %v3427_v5 = vsub.f32 %v3363_v42, %v3395_v37  ;;  %v3523_v46 = vsub.f32 %v3298_v56, %v3395_v37  ;;  %v8939_v27 = vpop.f32.mrf.mxu1  ;;  %v3748_v12 = vld [vmem:[#allocation4 + $0x38] sm:$0xff] }
 0x6f1   : > { %v7716_v51 = vpop.eup %7715  ;;  %v3678_v22 = vadd.f32 %v7714_v49, %v3646_v18  ;;  %7729 = vpow2.f32 %v3574_v1  ;;  %v3484_v39 = vmul.f32 1.442695, %v3429_v60  ;;  %v3580_v3 = vmul.f32 1.442695, %v3525_v53 }
 0x6f2   : > { %v7718_v52 = vpop.eup %7717  ;;  %v3838_v13 = vadd.f32 %v3806_v23, %v3774_v20  ;;  %v3649_v32 = vmul.f32 %v7716_v51, %v3617_v34  ;;  %v3777_v48 = vmul.f32 %v7716_v51, %v3745_v41  ;;  %v3480_v29 = vmul.f32 1.442695, %v3427_v5  ;;  %v7047_v33 = vpop.f32.mrf.mxu1  ;;  %v3618_v51 = vld [vmem:[#allocation3 + $0xd8] sm:$0xff] }
 0x6f3   : > { %v7720_v38 = vpop.eup %7719  ;;  %3710 = vst [vmem:[#allocation3 + $0x10] sm:$0xff] %v3678_v22  ;;  %v3809_v44 = vmul.f32 %v7718_v52, %v8889_v63  ;;  %7731 = vpow2.f32 %v3484_v39  ;;  %v3576_v26 = vmul.f32 1.442695, %v3523_v46  ;;  %v3400_v4 = vmax.f32 %v3368_v21, %v8936_v9  ;;  %v8944_v63 = vld [vmem:[#allocation2 + $0x20] sm:$0xff]  ;;  %v3746_v22 = vld [vmem:[#allocation4 + $0x90] sm:$0xff] }
 0x6f4   : > { %v7722_v43 = vpop.eup %7721  ;;  %3870 = vst [vmem:[#allocation4 + $0xa0] sm:$0xff] %v3838_v13  ;;  %v3681_v15 = vadd.f32 %v7718_v52, %v3649_v32  ;;  %v3647_v42 = vmul.f32 %v7720_v38, %v3615_v59  ;;  %v3775_v31 = vmul.f32 %v7720_v38, %v3743_v6  ;;  %7733 = vpow2.f32 %v3580_v3  ;;  %v3314_v14 = vpop.f32.mrf.mxu1 }
 0x6f5   : > { %v3841_v50 = vadd.f32 %v3809_v44, %v3777_v48  ;;  %v3807_v19 = vmul.f32 %v7722_v43, %v8881_v54  ;;  %7735 = vpow2.f32 %v3480_v29  ;;  %v3432_v62 = vsub.f32 %v3368_v21, %v3400_v4  ;;  %3912 = vst [vmem:[#allocation2 + $0x10] sm:$0xff] %v3400_v4  ;;  %v3620_v54 = vld [vmem:[#allocation3 + $0x20] sm:$0xff]  ;;  %v8956_v44 = vld [vmem:[#allocation2 + $0x98] sm:$0xff] }
 0x6f6   : > { %3713 = vst [vmem:[#allocation3 + $0xa0] sm:$0xff] %v3681_v15  ;;  %v3679_v8 = vadd.f32 %v7722_v43, %v3647_v42  ;;  %7737 = vpow2.f32 %v3576_v26  ;;  %v3528_v61 = vsub.f32 %v8936_v9, %v3400_v4  ;;  %v3398_v24 = vmax.f32 %v3366_v47, %v8939_v27  ;;  %v7050_v11 = vpop.f32.mrf.mxu1  ;;  %v3621_v15 = vld [vmem:[#allocation3 + $0xf0] sm:$0xff] }
 0x6f7   : > { %3873 = vst [vmem:[#allocation4 + $0xe8] sm:$0xff] %v3841_v50  ;;  %v3839_v56 = vadd.f32 %v3807_v19, %v3775_v31  ;;  %v3490_v2 = vmul.f32 1.442695, %v3432_v62  ;;  %v3401_v37 = vmax.f32 %v3369_v0, %v7047_v33  ;;  %v3399_v25 = vmax.f32 %v3367_v57, %v3314_v14  ;;  %v3619_v50 = vld [vmem:[#allocation3 + $0x30] sm:$0xff]  ;;  %v3747_v19 = vld [vmem:[#allocation4 + $0x20] sm:$0xff] }
 0x6f8   : > { %3711 = vst [vmem:[#allocation3 + $0x70] sm:$0xff] %v3679_v8  ;;  %v3586_v17 = vmul.f32 1.442695, %v3528_v61  ;;  %v3430_v1 = vsub.f32 %v3366_v47, %v3398_v24  ;;  %v3526_v49 = vsub.f32 %v8939_v27, %v3398_v24  ;;  %3910 = vst [vmem:[#allocation2 + $0xa8] sm:$0xff] %v3398_v24  ;;  %v3404_v18 = vmax.f32 %v8944_v63, %v7050_v11  ;;  %v8950_v41 = vpop.f32.mrf.mxu1  ;;  %v3026_v61 = vpop.f32.mrf.mxu0 }
 0x6f9   : > { %3871 = vst [vmem:[#allocation4 + $0x18] sm:$0xff] %v3839_v56  ;;  %7739 = vpow2.f32 %v3490_v2  ;;  %v3433_v9 = vsub.f32 %v3369_v0, %v3401_v37  ;;  %v3529_v20 = vsub.f32 %v7047_v33, %v3401_v37  ;;  %3913 = vst [vmem:[#allocation2 + $0x28] sm:$0xff] %v3401_v37  ;;  %v3431_v34 = vsub.f32 %v3367_v57, %v3399_v25  ;;  %v3370_v33 = vld [vmem:[#allocation2 + $0xa0] sm:$0xff] }
 0x6fa   : > { %3911 = vst [vmem:[#allocation2 + $0xd0] sm:$0xff] %v3399_v25  ;;  %v7724_v60 = vpop.eup %7723  ;;  %7741 = vpow2.f32 %v3586_v17  ;;  %v3486_v53 = vmul.f32 1.442695, %v3430_v1  ;;  %v3582_v23 = vmul.f32 1.442695, %v3526_v49  ;;  %v3527_v5 = vsub.f32 %v3314_v14, %v3399_v25  ;;  %3916 = vst [vmem:[#allocation2 + $0x20] sm:$0xff] %v3404_v18  ;;  %v8954_v38 = vpop.f32.mrf.mxu1 }
 0x6fb   : > { %v7726_v46 = vpop.eup %7725  ;;  %v3652_v21 = vmul.f32 %v7724_v60, %v3620_v54  ;;  %v3780_v27 = vmul.f32 %v7724_v60, %v3748_v12  ;;  %v3492_v59 = vmul.f32 1.442695, %v3433_v9  ;;  %v3588_v6 = vmul.f32 1.442695, %v3529_v20  ;;  %v3371_v12 = vld [vmem:[#allocation2 + $0xf8] sm:$0xff]  ;;  %v3752_v60 = vld [vmem:[#allocation4 + $0x50] sm:$0xff] }
 0x6fc   : > { %v3812_v39 = vmul.f32 %v7726_v46, %v8901_v16  ;;  %7743 = vpow2.f32 %v3486_v53  ;;  %v3488_v3 = vmul.f32 1.442695, %v3431_v34  ;;  %v3584_v52 = vmul.f32 1.442695, %v3527_v5  ;;  %v3749_v16 = vld [vmem:[#allocation4 + $0x70] sm:$0xff]  ;;  %v3330_v54 = vpop.f32.mrf.mxu1  ;;  %v3624_v34 = vld [vmem:[#allocation3 + $0xf8] sm:$0xff] }
 0x6fd   : > { %v7728_v13 = vpop.eup %7727  ;;  %v3684_v32 = vadd.f32 %v7726_v46, %v3652_v21  ;;  %7745 = vpow2.f32 %v3582_v23  ;;  %v3436_v48 = vsub.f32 %v8944_v63, %v3404_v18  ;;  %v3532_v29 = vsub.f32 %v7050_v11, %v3404_v18 }
 0x6fe   : > { %v7730_v26 = vpop.eup %7729  ;;  %v3844_v4 = vadd.f32 %v3812_v39, %v3780_v27  ;;  %v3650_v47 = vmul.f32 %v7728_v13, %v3618_v51  ;;  %v3778_v43 = vmul.f32 %v7728_v13, %v3746_v22  ;;  %7747 = vpow2.f32 %v3492_v59  ;;  %v3750_v39 = vld [vmem:[#allocation4 + $0xa8] sm:$0xff] }
 0x6ff   : > { %3716 = vst [vmem:[#allocation3 + $0x20] sm:$0xff] %v3684_v32  ;;  %v3810_v42 = vmul.f32 %v7730_v26, %v8893_v7  ;;  %7749 = vpow2.f32 %v3588_v6  ;;  %v3498_v31 = vmul.f32 1.442695, %v3436_v48  ;;  %v3594_v0 = vmul.f32 1.442695, %v3532_v29 }
 0x700   : > { %v7732_v14 = vpop.eup %7731  ;;  %3876 = vst [vmem:[#allocation4 + $0x38] sm:$0xff] %v3844_v4  ;;  %v3682_v57 = vadd.f32 %v7730_v26, %v3650_v47  ;;  %7751 = vpow2.f32 %v3488_v3  ;;  %v3402_v62 = vmax.f32 %v3370_v33, %v8950_v41  ;;  %v3405_v63 = vmax.f32 %v8956_v44, %v8954_v38 }
 0x701   : > { %v7734_v8 = vpop.eup %7733  ;;  %v3842_v24 = vadd.f32 %v3810_v42, %v3778_v43  ;;  %v3653_v11 = vmul.f32 %v7732_v14, %v3621_v15  ;;  %v3781_v56 = vmul.f32 %v7732_v14, %v3749_v16  ;;  %7753 = vpow2.f32 %v3584_v52  ;;  %v3623_v42 = vld [vmem:[#allocation3 + $0x48] sm:$0xff] }
 0x702   : > { %v7736_v7 = vpop.eup %7735  ;;  %3714 = vst [vmem:[#allocation3 + $0xd8] sm:$0xff] %v3682_v57  ;;  %v3813_v2 = vmul.f32 %v7734_v8, %v3026_v61  ;;  %7755 = vpow2.f32 %v3498_v31  ;;  %v3434_v37 = vsub.f32 %v3370_v33, %v3402_v62  ;;  %v3530_v25 = vsub.f32 %v8950_v41, %v3402_v62  ;;  %3914 = vst [vmem:[#allocation2 + $0xa0] sm:$0xff] %v3402_v62  ;;  %v3751_v31 = vld [vmem:[#allocation4 + $0xf0] sm:$0xff]  ;;  %v3628_v61 = vld [vmem:[#allocation3 + $0x28] sm:$0xff] }
 0x703   : > { %3917 = vst [vmem:[#allocation2 + $0x98] sm:$0xff] %v3405_v63  ;;  %v7738_v17 = vpop.eup %7737  ;;  %3874 = vst [vmem:[#allocation4 + $0x90] sm:$0xff] %v3842_v24  ;;  %v3685_v1 = vadd.f32 %v7734_v8, %v3653_v11  ;;  %v3651_v49 = vmul.f32 %v7736_v7, %v3619_v50  ;;  %v3779_v18 = vmul.f32 %v7736_v7, %v3747_v19  ;;  %7757 = vpow2.f32 %v3594_v0  ;;  %v3756_v24 = vld [vmem:[#allocation4 + $0x60] sm:$0xff] }
 0x704   : > { %v3845_v9 = vadd.f32 %v3813_v2, %v3781_v56  ;;  %v3811_v20 = vmul.f32 %v7738_v17, %v8897_v35  ;;  %v3494_v53 = vmul.f32 1.442695, %v3434_v37  ;;  %v3590_v23 = vmul.f32 1.442695, %v3530_v25  ;;  %v3622_v35 = vld [vmem:[#allocation3 + $0x88] sm:$0xff] }
 0x705   : > { %3717 = vst [vmem:[#allocation3 + $0xf0] sm:$0xff] %v3685_v1  ;;  %v3683_v5 = vadd.f32 %v7738_v17, %v3651_v49  ;;  %v3437_v41 = vsub.f32 %v8956_v44, %v3405_v63  ;;  %v3533_v46 = vsub.f32 %v8954_v38, %v3405_v63  ;;  %v3403_v21 = vmax.f32 %v3371_v12, %v3330_v54  ;;  %v3625_v38 = vld [vmem:[#allocation3 + $0xc0] sm:$0xff]  ;;  %v3753_v44 = vld [vmem:[#allocation4 + $0x88] sm:$0xff] }
 0x706   : > { %v7740_v27 = vpop.eup %7739  ;;  %3877 = vst [vmem:[#allocation4 + $0x70] sm:$0xff] %v3845_v9  ;;  %v3843_v51 = vadd.f32 %v3811_v20, %v3779_v18  ;;  %7759 = vpow2.f32 %v3494_v53  ;;  %v3626_v18 = vld [vmem:[#allocation3 + $0xb8] sm:$0xff]  ;;  %v3754_v9 = vld [vmem:[#allocation4 + $0xc8] sm:$0xff] }
 0x707   : > { %v7742_v22 = vpop.eup %7741  ;;  %3715 = vst [vmem:[#allocation3 + $0x30] sm:$0xff] %v3683_v5  ;;  %v3656_v59 = vmul.f32 %v7740_v27, %v3624_v34  ;;  %v3784_v6 = vmul.f32 %v7740_v27, %v3752_v60  ;;  %7761 = vpow2.f32 %v3590_v23  ;;  %v3500_v3 = vmul.f32 1.442695, %v3437_v41  ;;  %3915 = vst [vmem:[#allocation2 + $0xf8] sm:$0xff] %v3403_v21  ;;  %v3629_v5 = vld [vmem:[#allocation3 + $0x98] sm:$0xff]  ;;  %v3757_v41 = vld [vmem:[#allocation4 + $0x8] sm:$0xff] }
 0x708   : > { %3875 = vst [vmem:[#allocation4 + $0x20] sm:$0xff] %v3843_v51  ;;  %v3816_v52 = vmul.f32 %v7742_v22, %v8883_v28  ;;  %v3596_v13 = vmul.f32 1.442695, %v3533_v46  ;;  %v3435_v32 = vsub.f32 %v3371_v12, %v3403_v21  ;;  %v3531_v48 = vsub.f32 %v3330_v54, %v3403_v21 }
 0x709   : > { %v7744_v29 = vpop.eup %7743  ;;  %v3688_v33 = vadd.f32 %v7742_v22, %v3656_v59  ;;  %7763 = vpow2.f32 %v3500_v3 }
 0x70a   : > { %v7746_v26 = vpop.eup %7745  ;;  %v3848_v4 = vadd.f32 %v3816_v52, %v3784_v6  ;;  %v3654_v47 = vmul.f32 %v7744_v29, %v3622_v35  ;;  %v3782_v43 = vmul.f32 %v7744_v29, %v3750_v39  ;;  %7765 = vpow2.f32 %v3596_v13  ;;  %v3627_v35 = vld [vmem:[#allocation3] sm:$0xff]  ;;  %v3755_v39 = vld [vmem:[#allocation4 + $0x98] sm:$0xff] }
 0x70b   : > { %v7748_v15 = vpop.eup %7747  ;;  %3720 = vst [vmem:[#allocation3 + $0xf8] sm:$0xff] %v3688_v33  ;;  %v3814_v16 = vmul.f32 %v7746_v26, %v8867_v30  ;;  %v3496_v28 = vmul.f32 1.442695, %v3435_v32  ;;  %v3592_v0 = vmul.f32 1.442695, %v3531_v48 }
 0x70c   : > { %v7750_v14 = vpop.eup %7749  ;;  %3880 = vst [vmem:[#allocation4 + $0x50] sm:$0xff] %v3848_v4  ;;  %v3686_v57 = vadd.f32 %v7746_v26, %v3654_v47  ;;  %v3657_v50 = vmul.f32 %v7748_v15, %v3625_v38  ;;  %v3785_v19 = vmul.f32 %v7748_v15, %v3753_v44 }
 0x70d   : > { %v7752_v62 = vpop.eup %7751  ;;  %v3846_v63 = vadd.f32 %v3814_v16, %v3782_v43  ;;  %v3817_v8 = vmul.f32 %v7750_v14, %v8891_v36  ;;  %7767 = vpow2.f32 %v3496_v28 }
 0x70e   : > { %v7754_v11 = vpop.eup %7753  ;;  %3718 = vst [vmem:[#allocation3 + $0x88] sm:$0xff] %v3686_v57  ;;  %v3689_v56 = vadd.f32 %v7750_v14, %v3657_v50  ;;  %v3655_v30 = vmul.f32 %v7752_v62, %v3623_v42  ;;  %v3783_v7 = vmul.f32 %v7752_v62, %v3751_v31  ;;  %7769 = vpow2.f32 %v3592_v0 }
 0x70f   : > { %v7756_v2 = vpop.eup %7755  ;;  %3878 = vst [vmem:[#allocation4 + $0xa8] sm:$0xff] %v3846_v63  ;;  %v3849_v37 = vadd.f32 %v3817_v8, %v3785_v19  ;;  %v3815_v25 = vmul.f32 %v7754_v11, %v8875_v58 }
 0x710   : > { %v7758_v54 = vpop.eup %7757  ;;  %3721 = vst [vmem:[#allocation3 + $0xc0] sm:$0xff] %v3689_v56  ;;  %v3687_v12 = vadd.f32 %v7754_v11, %v3655_v30  ;;  %v3660_v17 = vmul.f32 %v7756_v2, %v3628_v61  ;;  %v3788_v1 = vmul.f32 %v7756_v2, %v3756_v24 }
 0x711   : > { %3881 = vst [vmem:[#allocation4 + $0x88] sm:$0xff] %v3849_v37  ;;  %v3847_v36 = vadd.f32 %v3815_v25, %v3783_v7  ;;  %v3820_v49 = vmul.f32 %v7758_v54, %v8913_v10 }
 0x712   : > { %3719 = vst [vmem:[#allocation3 + $0x48] sm:$0xff] %v3687_v12  ;;  %v3692_v20 = vadd.f32 %v7758_v54, %v3660_v17 }
 0x713   : > { %v7760_v34 = vpop.eup %7759  ;;  %3879 = vst [vmem:[#allocation4 + $0xf0] sm:$0xff] %v3847_v36  ;;  %v3852_v60 = vadd.f32 %v3820_v49, %v3788_v1 }
 0x714   : > { %v7762_v53 = vpop.eup %7761  ;;  %3724 = vst [vmem:[#allocation3 + $0x28] sm:$0xff] %v3692_v20  ;;  %v3658_v23 = vmul.f32 %v7760_v34, %v3626_v18  ;;  %v3786_v58 = vmul.f32 %v7760_v34, %v3754_v9 }
 0x715   : > { %3884 = vst [vmem:[#allocation4 + $0x60] sm:$0xff] %v3852_v60  ;;  %v3818_v46 = vmul.f32 %v7762_v53, %v8899_v45 }
 0x716   : > { %v7764_v21 = vpop.eup %7763  ;;  %v3690_v27 = vadd.f32 %v7762_v53, %v3658_v23 }
 0x717   : > { %v7766_v51 = vpop.eup %7765  ;;  %v3850_v10 = vadd.f32 %v3818_v46, %v3786_v58  ;;  %v3661_v22 = vmul.f32 %v7764_v21, %v3629_v5  ;;  %v3789_v59 = vmul.f32 %v7764_v21, %v3757_v41 }
 0x718   : > { %3722 = vst [vmem:[#allocation3 + $0xb8] sm:$0xff] %v3690_v27  ;;  %v3821_v6 = vmul.f32 %v7766_v51, %v8917_v40 }
 0x719   : > { %3882 = vst [vmem:[#allocation4 + $0xc8] sm:$0xff] %v3850_v10  ;;  %v3693_v3 = vadd.f32 %v7766_v51, %v3661_v22 }
 0x71a   : > { %v7768_v52 = vpop.eup %7767  ;;  %v3853_v13 = vadd.f32 %v3821_v6, %v3789_v59 }
 0x71b   : > { %v7770_v32 = vpop.eup %7769  ;;  %3725 = vst [vmem:[#allocation3 + $0x98] sm:$0xff] %v3693_v3  ;;  %v3659_v48 = vmul.f32 %v7768_v52, %v3627_v35  ;;  %v3787_v29 = vmul.f32 %v7768_v52, %v3755_v39 }
 0x71c   : > { %3885 = vst [vmem:[#allocation4 + $0x8] sm:$0xff] %v3853_v13  ;;  %v3819_v45 = vmul.f32 %v7770_v32, %v8907_v55 }
 0x71d   : > { %v3691_v33 = vadd.f32 %v7770_v32, %v3659_v48 }
 0x71e   : > { %v3851_v38 = vadd.f32 %v3819_v45, %v3787_v29 }
 0x71f   : > { %3723 = vst [vmem:[#allocation3] sm:$0xff] %v3691_v33 }
 0x720   : > { %3883 = vst [vmem:[#allocation4 + $0x98] sm:$0xff] %v3851_v38 }
 0x721 PF: > { %v7771_v44 = vld [vmem:[#allocation13 + $0x38] sm:$0xff]   ;;  %v7772_v40 = vld [vmem:[#allocation13 + $0x30] sm:$0xff]   ;;  %v7773_v26 = vld [vmem:[#allocation13 + $0x28] sm:$0xff]   ;;  %s6517_s9 = sshll.u32 %s8210_s27, 11  ;;  %s6080_s12 = sshll.u32 %s8608_s7, 4  ;;  %s10059_s12 = int_to_ptr.vmem [resolvable:$true] %s6080_s12 }
 0x722   : > { %7052 = vmatprep.subr.bf16.mxu0 %v7771_v44  ;;  %7228 = vmatprep.subr.bf16.mxu1 %v7771_v44  ;;  %v7774_v4 = vld [vmem:[#allocation13 + $0x20] sm:$0xff]   ;;  %v3960_v47 = vld [vmem:[#allocation3 + $0xc8] sm:$0xff]  ;;  %v3962_v15 = vld [vmem:[#allocation3 + $0x78] sm:$0xff]  ;;  %s10057_s13 = scalar_lea.hbm %s10114_s6, %s6517_s9  ;;  %s6065_s8 = scalar_lea.sflag [#allocation9], %s8422_s19 }
 0x723   : > { %7053 = vmatpush3.bf16.msra.mxu0 %v7771_v44  ;;  %7236 = vmatpush3.bf16.msra.mxu1 %v7771_v44  ;;  %v3959_v55 = vld [vmem:[#allocation3 + $0x80] sm:$0xff]  ;;  %v3961_v43 = vld [vmem:[#allocation3 + $0xe8] sm:$0xff]  ;;  %v7775_v42 = vld [vmem:[#allocation13 + $0x18] sm:$0xff]   ;;  %s8128_s27 = scalar_lea.vmem %s10059_s12, 2048  ;;  %s8236_s14 = smov [#allocation16]  }
 0x724   : > { %7054 = vmatprep.subr.bf16.mxu0 %v7772_v40  ;;  %7229 = vmatprep.subr.bf16.mxu1 %v7772_v40  ;;  %7795 = vrcp.f32 %v3959_v55  ;;  %v3963_v16 = vld [vmem:[#allocation3 + $0x8] sm:$0xff]  ;;  %v3964_v31 = vld [vmem:[#allocation3 + $0x90] sm:$0xff]  ;;  %v3965_v28 = vld [vmem:[#allocation3 + $0x58] sm:$0xff]  ;;  %p8129_p8 = scmp.ne.s32.totalorder %s10059_s12, %s8128_s27  ;;  %s8132_s17 = sshll.u32 %s8236_s14, 4  ;;  %s8133_s17 = int_to_ptr.vmem [resolvable:$false] %s8132_s17 }
 0x725   : > { %7797 = vrcp.f32 %v3960_v47  ;;  %v3966_v0 = vld [vmem:[#allocation3 + $0xa8] sm:$0xff]  ;;  %v3967_v14 = vld [vmem:[#allocation3 + $0xd0] sm:$0xff]  ;;  %v3969_v19 = vld [vmem:[#allocation3 + $0x38] sm:$0xff]  ;;  %s8134_s16 = scalar_lea.vmem %s8133_s17, 4096  ;;  %p8135_p2 = scmp.lt.s32.totalorder %s10059_s12, %s8133_s17 }
 0x726   : > { %7799 = vrcp.f32 %v3961_v43  ;;  %v7776_v57 = vld [vmem:[#allocation13 + $0x10] sm:$0xff]   ;;  %v3970_v62 = vld [vmem:[#allocation3 + $0x40] sm:$0xff]  ;;  %v7777_v8 = vld [vmem:[#allocation13 + $0x8] sm:$0xff]   ;;  %p8130_p0 = pnand %p8129_p8, %p8394_p13  ;;  %p8136_p10 = scmp.lt.s32.totalorder %s8134_s16, %s8128_s27 }
 0x727   : > { %7055 = vmatpush3.bf16.msra.mxu0 %v7772_v40  ;;  %7237 = vmatpush3.bf16.msra.mxu1 %v7772_v40  ;;  %7801 = vrcp.f32 %v3962_v15  ;;  %v3968_v50 = vld [vmem:[#allocation3 + $0xb0] sm:$0xff]  ;;  %v3971_v63 = vld [vmem:[#allocation3 + $0xe0] sm:$0xff]  ;;  %v3973_v11 = vld [vmem:[#allocation3 + $0x18] sm:$0xff] }
 0x728   : > { %7056 = vmatprep.subr.bf16.mxu0 %v7773_v26  ;;  %7230 = vmatprep.subr.bf16.mxu1 %v7773_v26  ;;  %7803 = vrcp.f32 %v3963_v16  ;;  %v3972_v61 = vld [vmem:[#allocation3 + $0x60] sm:$0xff]  ;;  %v3927_v24 = vld [vmem:[#allocation4 + $0xb0] sm:$0xff]  ;;  %v3928_v56 = vld [vmem:[#allocation4 + $0xb8] sm:$0xff]  ;;  %p8131_p11 = pneg %p8130_p0  ;;  %p8137_p6 = por %p8136_p10, %p8135_p2 }
 0x729   : > { %7805 = vrcp.f32 %v3964_v31  ;;  %v3974_v30 = vld [vmem:[#allocation3 + $0x68] sm:$0xff]  ;;  %v3929_v37 = vld [vmem:[#allocation4 + $0xc0] sm:$0xff]  ;;  %v3975_v25 = vld [vmem:[#allocation3 + $0x10] sm:$0xff] }
 0x72a   : > { %7807 = vrcp.f32 %v3965_v28  ;;  %v8974_v2 = vld [vmem:[#allocation15 + $0x9] ss:$0 sm:$0xff]  ;;  %v7778_v12 = vld [vmem:[#allocation13] sm:$0xff]   ;;  %v3930_v1 = vld [vmem:[#allocation4 + $0x10] sm:$0xff]  ;;  %p8138_p12 = pnand %p8137_p6, %p8131_p11 }
 0x72b   : > { %7057 = vmatpush3.bf16.msra.mxu0 %v7773_v26  ;;  %7238 = vmatpush3.bf16.msra.mxu1 %v7773_v26  ;;  %7809 = vrcp.f32 %v3966_v0  ;;  %v3976_v36 = vld [vmem:[#allocation3 + $0x70] sm:$0xff]  ;;  %v3931_v9 = vld [vmem:[#allocation4 + $0x28] sm:$0xff]  ;;  %v3978_v5 = vld [vmem:[#allocation3 + $0xa0] sm:$0xff] }
 0x72c   : > { %7058 = vmatprep.subr.bf16.mxu0 %v7774_v4  ;;  %7231 = vmatprep.subr.bf16.mxu1 %v7774_v4  ;;  %7811 = vrcp.f32 %v3967_v14  ;;  %v3977_v20 = vld [vmem:[#allocation3 + $0x50] sm:$0xff]  ;;  %v3934_v27 = vld [vmem:[#allocation4 + $0x68] sm:$0xff]  ;;  %v3935_v51 = vld [vmem:[#allocation4 + $0x58] sm:$0xff] }
 0x72d   : > { %7813 = vrcp.f32 %v3968_v50  ;;  %v3932_v23 = vld [vmem:[#allocation4 + $0x30] sm:$0xff]  ;;  %v3979_v10 = vld [vmem:[#allocation3 + $0xd8] sm:$0xff]  ;;  %v3936_v35 = vld [vmem:[#allocation4] sm:$0xff] }
 0x72e   : > { %7815 = vrcp.f32 %v3969_v19  ;;  %v3933_v58 = vld [vmem:[#allocation4 + $0xd0] sm:$0xff]  ;;  %v3981_v3 = vld [vmem:[#allocation3 + $0x20] sm:$0xff]  ;;  %v3983_v45 = vld [vmem:[#allocation3 + $0x88] sm:$0xff] }
 0x72f   : > { %7059 = vmatpush3.bf16.msra.mxu0 %v7774_v4  ;;  %7239 = vmatpush3.bf16.msra.mxu1 %v7774_v4  ;;  %7817 = vrcp.f32 %v3970_v62  ;;  %v3980_v39 = vld [vmem:[#allocation3 + $0x30] sm:$0xff]  ;;  %v3984_v40 = vld [vmem:[#allocation3 + $0x48] sm:$0xff]  ;;  %v3985_v43 = vld [vmem:[#allocation3 + $0xf8] sm:$0xff] }
 0x730   : > { %7060 = vmatprep.subr.bf16.mxu0 %v7775_v42  ;;  %7232 = vmatprep.subr.bf16.mxu1 %v7775_v42  ;;  %7819 = vrcp.f32 %v3971_v63  ;;  %v3982_v29 = vld [vmem:[#allocation3 + $0xf0] sm:$0xff]  ;;  %v3937_v14 = vld [vmem:[#allocation4 + $0x48] sm:$0xff]  ;;  %v3987_v50 = vld [vmem:[#allocation3 + $0xb8] sm:$0xff] }
 0x731   : > { %v7796_v7 = vpop.eup %7795  ;;  %7821 = vrcp.f32 %v3972_v61  ;;  %v3940_v61 = vld [vmem:[#allocation4 + $0xd8] sm:$0xff] }
 0x732   : > { %v7798_v54 = vpop.eup %7797  ;;  %v3992_v17 = vmul.f32 %v7796_v7, %v3927_v24  ;;  %7823 = vrcp.f32 %v3973_v11  ;;  %v3988_v24 = vld [vmem:[#allocation3] sm:$0xff] }
 0x733   : > { %7061 = vmatpush3.bf16.msra.mxu0 %v7775_v42  ;;  %7240 = vmatpush3.bf16.msra.mxu1 %v7775_v42  ;;  %v7800_v49 = vpop.eup %7799  ;;  %v3994_v18 = vmul.f32 %v7798_v54, %v3928_v56  ;;  %7825 = vrcp.f32 %v3974_v30  ;;  %v3986_v42 = vld [vmem:[#allocation3 + $0xc0] sm:$0xff] }
 0x734   : > { %7062 = vmatprep.subr.bf16.mxu0 %v7776_v57  ;;  %7233 = vmatprep.subr.bf16.mxu1 %v7776_v57  ;;  %v7802_v34 = vpop.eup %7801  ;;  %v4059_v60 = vadd.f32 %v8974_v2, %v3992_v17  ;;  %v3996_v53 = vmul.f32 %v7800_v49, %v3929_v37  ;;  %7827 = vrcp.f32 %v3975_v25  ;;  %v3943_v7 = vld [vmem:[#allocation4 + $0xa0] sm:$0xff]  ;;  %v3944_v25 = vld [vmem:[#allocation4 + $0x18] sm:$0xff] }
 0x735   : > { %v7804_v41 = vpop.eup %7803  ;;  %v4060_v46 = vadd.f32 %v8974_v2, %v3994_v18  ;;  %v3998_v21 = vmul.f32 %v7802_v34, %v3930_v1  ;;  %7829 = vrcp.f32 %v3976_v36 }
 0x736   : > { %v7806_v22 = vpop.eup %7805  ;;  %v4061_v59 = vadd.f32 %v8974_v2, %v3996_v53  ;;  %v4000_v6 = vmul.f32 %v7804_v41, %v3931_v9  ;;  %7831 = vrcp.f32 %v3977_v20 }
 0x737   : > { %7063 = vmatpush3.bf16.msra.mxu0 %v7776_v57  ;;  %7241 = vmatpush3.bf16.msra.mxu1 %v7776_v57  ;;  %v7808_v52 = vpop.eup %7807  ;;  %v4091_v13 = vpack.c.bf16 %v4060_v46, %v4059_v60  ;;  %v4062_v32 = vadd.f32 %v8974_v2, %v3998_v21  ;;  %v4002_v48 = vmul.f32 %v7806_v22, %v3932_v23  ;;  %7833 = vrcp.f32 %v3978_v5  ;;  %v3938_v57 = vld [vmem:[#allocation4 + $0x40] sm:$0xff]  ;;  %v3946_v23 = vld [vmem:[#allocation4 + $0xe8] sm:$0xff]  ;;  %v3947_v46 = vld [vmem:[#allocation4 + $0x90] sm:$0xff] }
 0x738   : > { %7064 = vmatprep.subr.bf16.mxu0 %v7777_v8  ;;  %7234 = vmatprep.subr.bf16.mxu1 %v7777_v8  ;;  %v7810_v33 = vpop.eup %7809  ;;  %v4063_v38 = vadd.f32 %v8974_v2, %v4000_v6  ;;  %v4004_v44 = vmul.f32 %v7808_v52, %v3933_v58  ;;  %7835 = vrcp.f32 %v3979_v10  ;;  %v3941_v5 = vld [vmem:[#allocation4 + $0xe0] sm:$0xff]  ;;  %v3989_v21 = vld [vmem:[#allocation3 + $0x28] sm:$0xff] }
 0x739   : > { %v7812_v26 = vpop.eup %7811  ;;  %7068 = vmatprep.mubr.bf16.mxu0 %v4091_v13  ;;  %v4092_v4 = vpack.c.bf16 %v4062_v32, %v4061_v59  ;;  %v4064_v55 = vadd.f32 %v8974_v2, %v4002_v48  ;;  %v4006_v47 = vmul.f32 %v7810_v33, %v3934_v27  ;;  %7837 = vrcp.f32 %v3980_v39  ;;  %v3948_v6 = vld [vmem:[#allocation4 + $0x20] sm:$0xff] }
 0x73a   : > { %v7814_v15 = vpop.eup %7813  ;;  %v4008_v16 = vmul.f32 %v7812_v26, %v3935_v51  ;;  %7839 = vrcp.f32 %v3981_v3  ;;  %v4065_v62 = vadd.f32 %v8974_v2, %v4004_v44  ;;  %v3942_v13 = vld [vmem:[#allocation4 + $0x80] sm:$0xff] }
 0x73b   : > { %7065 = vmatpush3.bf16.msra.mxu0 %v7777_v8  ;;  %7242 = vmatpush3.bf16.msra.mxu1 %v7777_v8  ;;  %v7816_v31 = vpop.eup %7815  ;;  %v4093_v28 = vpack.c.bf16 %v4064_v55, %v4063_v38  ;;  %v4010_v0 = vmul.f32 %v7814_v15, %v3936_v35  ;;  %7841 = vrcp.f32 %v3982_v29  ;;  %v4066_v63 = vadd.f32 %v8974_v2, %v4006_v47  ;;  %v3939_v8 = vld [vmem:[#allocation4 + $0x78] sm:$0xff] }
 0x73c   : > { %7066 = vmatprep.subr.bf16.mxu0 %v7778_v12  ;;  %7235 = vmatprep.subr.bf16.mxu1 %v7778_v12  ;;  %v7818_v19 = vpop.eup %7817  ;;  %7843 = vrcp.f32 %v3983_v45  ;;  %v4067_v56 = vadd.f32 %v8974_v2, %v4008_v16  ;;  %v4012_v36 = vmul.f32 %v7816_v31, %v3937_v14  ;;  %v3990_v35 = vld [vmem:[#allocation3 + $0x98] sm:$0xff] }
 0x73d   : > { %v7820_v11 = vpop.eup %7819  ;;  %v4068_v30 = vadd.f32 %v8974_v2, %v4010_v0  ;;  %7845 = vrcp.f32 %v3984_v40  ;;  %v4094_v1 = vpack.c.bf16 %v4066_v63, %v4065_v62  ;;  %v4014_v49 = vmul.f32 %v7818_v19, %v3938_v57  ;;  %v3949_v29 = vld [vmem:[#allocation4 + $0x38] sm:$0xff]  ;;  %v3950_v40 = vld [vmem:[#allocation4 + $0x70] sm:$0xff] }
 0x73e   : > { %v7822_v37 = vpop.eup %7821  ;;  %7847 = vrcp.f32 %v3985_v43  ;;  %v4016_v20 = vmul.f32 %v7820_v11, %v3939_v8  ;;  %v4069_v51 = vadd.f32 %v8974_v2, %v4012_v36  ;;  %v3951_v43 = vld [vmem:[#allocation4 + $0xa8] sm:$0xff]  ;;  %v3952_v0 = vld [vmem:[#allocation4 + $0xf0] sm:$0xff] }
 0x73f   : > { %7067 = vmatpush3.bf16.msra.mxu0 %v7778_v12  ;;  %7243 = vmatpush3.bf16.msra.mxu1 %v7778_v12  ;;  %v7824_v54 = vpop.eup %7823  ;;  %v3945_v12 = vld [vmem:[#allocation4 + $0xf8] sm:$0xff]  ;;  %7849 = vrcp.f32 %v3986_v42  ;;  %v4095_v9 = vpack.c.bf16 %v4068_v30, %v4067_v56  ;;  %v4018_v34 = vmul.f32 %v7822_v37, %v3940_v61  ;;  %v4070_v10 = vadd.f32 %v8974_v2, %v4014_v49  ;;  %v3955_v49 = vld [vmem:[#allocation4 + $0xc8] sm:$0xff] }
 0x740   : > { %v7826_v17 = vpop.eup %7825  ;;  %7851 = vrcp.f32 %v3987_v50  ;;  %v4071_v3 = vadd.f32 %v8974_v2, %v4016_v20  ;;  %v4020_v33 = vmul.f32 %v7824_v54, %v3941_v5 }
 0x741   : > { %v7828_v18 = vpop.eup %7827  ;;  %7853 = vrcp.f32 %v3988_v24  ;;  %v4072_v52 = vadd.f32 %v8974_v2, %v4018_v34  ;;  %v4096_v16 = vpack.c.bf16 %v4070_v10, %v4069_v51  ;;  %v4022_v42 = vmul.f32 %v7826_v17, %v3942_v13  ;;  %v3954_v17 = vld [vmem:[#allocation4 + $0x88] sm:$0xff] }
 0x742   : > { %7069 = vmatmul.mubr.bf16.vlgmr.msra.gmra.mxu0 %v4092_v4  ;;  %v7830_v60 = vpop.eup %7829  ;;  %v4024_v53 = vmul.f32 %v7828_v18, %v3943_v7  ;;  %7855 = vrcp.f32 %v3989_v21  ;;  %v4073_v37 = vadd.f32 %v8974_v2, %v4020_v33  ;;  %v3956_v18 = vld [vmem:[#allocation4 + $0x98] sm:$0xff] }
 0x743   : > { %7072 = vmatprep.mubr.bf16.mxu0 %v4093_v28  ;;  %v7832_v58 = vpop.eup %7831  ;;  %v4026_v41 = vmul.f32 %v7830_v60, %v3944_v25  ;;  %7857 = vrcp.f32 %v3990_v35  ;;  %v4097_v57 = vpack.c.bf16 %v4072_v52, %v4071_v3  ;;  %v4074_v25 = vadd.f32 %v8974_v2, %v4022_v42 }
 0x744   : > { %v7834_v27 = vpop.eup %7833  ;;  %v4075_v22 = vadd.f32 %v8974_v2, %v4024_v53  ;;  %v4028_v59 = vmul.f32 %v7832_v58, %v3945_v12  ;;  %v3953_v12 = vld [vmem:[#allocation4 + $0x50] sm:$0xff] }
 0x745   : > { %v7836_v39 = vpop.eup %7835  ;;  %v4076_v32 = vadd.f32 %v8974_v2, %v4026_v41  ;;  %v4030_v48 = vmul.f32 %v7834_v27, %v3946_v23  ;;  %v4098_v53 = vpack.c.bf16 %v4074_v25, %v4073_v37 }
 0x746   : > { %v7838_v45 = vpop.eup %7837  ;;  %v4077_v38 = vadd.f32 %v8974_v2, %v4028_v59  ;;  %v4032_v44 = vmul.f32 %v7836_v39, %v3947_v46  ;;  %v3958_v59 = vld [vmem:[#allocation4 + $0x8] sm:$0xff] }
 0x747   : > { %v7840_v26 = vpop.eup %7839  ;;  %v4099_v4 = vpack.c.bf16 %v4076_v32, %v4075_v22  ;;  %v4078_v55 = vadd.f32 %v8974_v2, %v4030_v48  ;;  %v4034_v47 = vmul.f32 %v7838_v45, %v3948_v6  ;;  %v3957_v22 = vld [vmem:[#allocation4 + $0x60] sm:$0xff]  ;;  %v6662_v48 = vld [vmem:[%s8426_s23 + $0x8] sm:$0xff]  }
 0x748   : > { %v7842_v15 = vpop.eup %7841  ;;  %v4079_v31 = vadd.f32 %v8974_v2, %v4032_v44  ;;  %v4036_v28 = vmul.f32 %v7840_v26, %v3949_v29  ;;  %v9009_v29 = vld [vmem:[#allocation15 + $0x1] ss:$0 sm:$0xff]  ;;  %v6524_v33 = vunpack.c.l.bf16 %v6662_v48 }
 0x749   : > { %v7844_v14 = vpop.eup %7843  ;;  %7084 = vmatprep.mubr.bf16.mxu1 %v4099_v4  ;;  %v4100_v50 = vpack.c.bf16 %v4078_v55, %v4077_v38  ;;  %v4080_v19 = vadd.f32 %v8974_v2, %v4034_v47  ;;  %v4038_v62 = vmul.f32 %v7842_v15, %v3950_v40  ;;  %v6519_v45 = vld [vmem:[%s8426_s23] sm:$0xff]   ;;  %v6525_v47 = vunpack.c.h.bf16 %v6662_v48 }
 0x74a   : > { %7073 = vmatmul.mubr.bf16.gmra.mxu0 %v4094_v1  ;;  %v7846_v63 = vpop.eup %7845  ;;  %v4040_v8 = vmul.f32 %v7844_v14, %v3951_v43  ;;  %v4081_v11 = vadd.f32 %v8974_v2, %v4036_v28  ;;  %v6520_v40 = vunpack.c.l.bf16 %v6519_v45 }
 0x74b   : > { %7076 = vmatprep.mubr.bf16.mxu0 %v4095_v9  ;;  %v7848_v61 = vpop.eup %7847  ;;  %7085 = vmatmul.mubr.bf16.vlgmr.msra.gmra.mxu1 %v4100_v50  ;;  %v4101_v24 = vpack.c.bf16 %v4080_v19, %v4079_v31  ;;  %v4082_v56 = vadd.f32 %v8974_v2, %v4038_v62  ;;  %v4042_v30 = vmul.f32 %v7846_v63, %v3952_v0  ;;  %v6663_v31 = vld [vmem:[%s8426_s23 + $0x10] sm:$0xff]   ;;  %v6664_v62 = vld [vmem:[%s8426_s23 + $0x18] sm:$0xff]  }
 0x74c   : > { %v7850_v7 = vpop.eup %7849  ;;  %v4083_v54 = vadd.f32 %v8974_v2, %v4040_v8  ;;  %v4044_v34 = vmul.f32 %v7848_v61, %v3953_v12  ;;  %v6528_v50 = vunpack.c.l.bf16 %v6663_v31  ;;  %v6533_v12 = vunpack.c.h.bf16 %v6664_v62 }
 0x74d   : > { %v7852_v1 = vpop.eup %7851  ;;  %7088 = vmatprep.mubr.bf16.mxu1 %v4101_v24  ;;  %v4084_v36 = vadd.f32 %v8974_v2, %v4042_v30  ;;  %v4102_v20 = vpack.c.bf16 %v4082_v56, %v4081_v11  ;;  %v4046_v60 = vmul.f32 %v7850_v7, %v3954_v17  ;;  %v6529_v11 = vunpack.c.h.bf16 %v6663_v31  ;;  %v6665_v7 = vld [vmem:[%s8426_s23 + $0x20] sm:$0xff]  }
 0x74e   : > { %v7854_v9 = vpop.eup %7853  ;;  %v4048_v58 = vmul.f32 %v7852_v1, %v3955_v49  ;;  %v4085_v46 = vadd.f32 %v8974_v2, %v4044_v34  ;;  %v6532_v56 = vunpack.c.l.bf16 %v6664_v62  ;;  %v6536_v49 = vunpack.c.l.bf16 %v6665_v7 }
 0x74f   : > { %v4103_v23 = vpack.c.bf16 %v4084_v36, %v4083_v54  ;;  %v4050_v5 = vmul.f32 %v7854_v9, %v3956_v18  ;;  %v7856_v41 = vpop.eup %7855  ;;  %v4086_v21 = vadd.f32 %v8974_v2, %v4046_v60  ;;  %v6666_v18 = vld [vmem:[%s8426_s23 + $0x28] sm:$0xff]  }
 0x750   : > { %v7858_v27 = vpop.eup %7857  ;;  %v4087_v51 = vadd.f32 %v8974_v2, %v4048_v58  ;;  %v4052_v35 = vmul.f32 %v7856_v41, %v3957_v22 }
 0x751   : > { %v4088_v10 = vadd.f32 %v8974_v2, %v4050_v5  ;;  %v4104_v6 = vpack.c.bf16 %v4086_v21, %v4085_v46  ;;  %v4054_v39 = vmul.f32 %v7858_v27, %v3958_v59  ;;  %v6537_v46 = vunpack.c.h.bf16 %v6665_v7 }
 0x752   : > { %7077 = vmatmul.mubr.bf16.gmra.mxu0 %v4096_v16  ;;  %v4089_v52 = vadd.f32 %v8974_v2, %v4052_v35  ;;  %v6521_v16 = vunpack.c.h.bf16 %v6519_v45 }
 0x753   : > { %7080 = vmatprep.mubr.bf16.mxu0 %v4097_v57  ;;  %7089 = vmatmul.mubr.bf16.gmra.mxu1 %v4102_v20  ;;  %v4105_v3 = vpack.c.bf16 %v4088_v10, %v4087_v51  ;;  %v4090_v13 = vadd.f32 %v8974_v2, %v4054_v39  ;;  %v6667_v51 = vld [vmem:[%s8426_s23 + $0x30] sm:$0xff]  }
 0x754   : > { %7092 = vmatprep.mubr.bf16.mxu1 %v4103_v23  ;;  %v6540_v23 = vunpack.c.l.bf16 %v6666_v18 }
 0x755   : > { %v4106_v32 = vpack.c.bf16 %v4090_v13, %v4089_v52  ;;  %v6544_v52 = vunpack.c.l.bf16 %v6667_v51  ;;  %v6668_v13 = vld [vmem:[%s8426_s23 + $0x38] sm:$0xff]  }
 0x75a   : > { %7081 = vmatmul.mubr.bf16.gmra.mxu0 %v4098_v53 }
 0x75b   : > { %7093 = vmatmul.mubr.bf16.gmra.mxu1 %v4104_v6  ;;  %v6541_v6 = vunpack.c.h.bf16 %v6666_v18 }
 0x75c   : > { %7096 = vmatprep.mubr.bf16.mxu1 %v4105_v3 }
 0x763   : > { %7097 = vmatmul.mubr.bf16.gmra.mxu1 %v4106_v32 }
 0x802   : > { %v7070_v38 = vpop.f32.mrf.mxu0 }
 0x803   : > { %v4218_v44 = vadd.f32 %v7070_v38, %v9009_v29 }
 0x804   : > { %v4209_v26 = vpop.f32.mrf.mxu0 }
 0x805   : > { %v4210_v4 = vadd.f32 %v9009_v29, %v4209_v26  ;;  %v9014_v55 = vadd.f32 %v6524_v33, %v4218_v44  ;;  %v6548_v44 = vunpack.c.l.bf16 %v6668_v13 }
 0x806   : > { %v7071_v2 = vpop.f32.mrf.mxu0 }
 0x807   : > { %v4221_v43 = vadd.f32 %v7071_v2, %v9009_v29  ;;  %4436 = vadd.xlane.f32.xlu1 %v9014_v55  ;;  %v9018_v15 = vadd.f32 %v6520_v40, %v4210_v4  ;;  %v6669_v2 = vld [vmem:[%s8426_s23 + $0x40] sm:$0xff]  }
 0x808   : > { %v4212_v42 = vpop.f32.mrf.mxu0 }
 0x809   : > { %v4213_v28 = vadd.f32 %v9009_v29, %v4212_v42  ;;  %4432 = vadd.xlane.f32.xlu0 %v9018_v15  ;;  %v9023_v0 = vadd.f32 %v6525_v47, %v4221_v43  ;;  %v6545_v47 = vunpack.c.h.bf16 %v6667_v51 }
 0x80a   : > { %v7074_v14 = vpop.f32.mrf.mxu0 }
 0x80b   : > { %4438 = vadd.xlane.f32.xlu1 %v9023_v0  ;;  %v9026_v57 = vadd.f32 %v6521_v16, %v4213_v28  ;;  %v4234_v61 = vadd.f32 %v7074_v14, %v9009_v29  ;;  %v9037_v25 = vpop.f32.mrf.mxu1  ;;  %v6549_v28 = vunpack.c.h.bf16 %v6668_v13  ;;  %v6552_v14 = vunpack.c.l.bf16 %v6669_v2 }
 0x80c   : > { %v4225_v19 = vpop.f32.mrf.mxu0 }
 0x80d   : > { %v4226_v63 = vadd.f32 %v9009_v29, %v4225_v19  ;;  %4434 = vadd.xlane.f32.xlu0 %v9026_v57  ;;  %v9042_v36 = vadd.f32 %v6532_v56, %v4234_v61  ;;  %v4273_v9 = vpop.f32.mrf.mxu1 }
 0x80e   : > { %v7075_v8 = vpop.f32.mrf.mxu0  ;;  %v4274_v19 = vadd.f32 %v9009_v29, %v4273_v9 }
 0x80f   : > { %v9032_v24 = vadd.f32 %v6528_v50, %v4226_v63  ;;  %v4237_v17 = vadd.f32 %v7075_v8, %v9009_v29  ;;  %v7087_v60 = vpop.f32.mrf.mxu1  ;;  %v6670_v8 = vld [vmem:[%s8426_s23 + $0x48] sm:$0xff]  }
 0x810   : > { %v4228_v30 = vpop.f32.mrf.mxu0  ;;  %v6556_v56 = vunpack.c.l.bf16 %v6670_v8  ;;  %v4285_v9 = vadd.f32 %v7087_v60, %v9009_v29 }
 0x811   : > { %v4229_v37 = vadd.f32 %v9009_v29, %v4228_v30  ;;  %4440 = vadd.xlane.f32.xlu0 %v9032_v24  ;;  %v9049_v5 = vadd.f32 %v6533_v12, %v4237_v17  ;;  %v4276_v21 = vpop.f32.mrf.mxu1  ;;  %v4282_v30 = vadd.f32 %v9037_v25, %v9009_v29  ;;  %v6671_v12 = vld [vmem:[%s8426_s23 + $0x50] sm:$0xff]  }
 0x812   : > { %v7078_v54 = vpop.f32.mrf.mxu0  ;;  %v4277_v7 = vadd.f32 %v9009_v29, %v4276_v21  ;;  %v6560_v18 = vunpack.c.l.bf16 %v6671_v12 }
 0x813   : > { %v9040_v1 = vadd.f32 %v6529_v11, %v4229_v37  ;;  %v4250_v58 = vadd.f32 %v7078_v54, %v9009_v29  ;;  %v7090_v22 = vpop.f32.mrf.mxu1  ;;  %v6553_v11 = vunpack.c.h.bf16 %v6669_v2  ;;  %v9089_v54 = vadd.f32 %v6552_v14, %v4274_v19 }
 0x814   : > { %v4241_v20 = vpop.f32.mrf.mxu0  ;;  %v4298_v21 = vadd.f32 %v7090_v22, %v9009_v29 }
 0x815   : > { %v4242_v34 = vadd.f32 %v9009_v29, %v4241_v20  ;;  %4442 = vadd.xlane.f32.xlu1 %v9040_v1  ;;  %4444 = vadd.xlane.f32.xlu0 %v9042_v36  ;;  %v9060_v3 = vadd.f32 %v6540_v23, %v4250_v58  ;;  %v4289_v32 = vpop.f32.mrf.mxu1  ;;  %v9096_v25 = vadd.f32 %v6553_v11, %v4277_v7  ;;  %v6561_v58 = vunpack.c.h.bf16 %v6671_v12 }
 0x816   : > { %v7079_v53 = vpop.f32.mrf.mxu0  ;;  %v4290_v20 = vadd.f32 %v9009_v29, %v4289_v32 }
 0x817   : > { %v9051_v41 = vadd.f32 %v6536_v49, %v4242_v34  ;;  %v4253_v35 = vadd.f32 %v7079_v53, %v9009_v29  ;;  %v7091_v33 = vpop.f32.mrf.mxu1  ;;  %v6557_v49 = vunpack.c.h.bf16 %v6670_v8  ;;  %v9098_v34 = vadd.f32 %v6556_v56, %v4282_v30  ;;  %v6672_v53 = vld [vmem:[%s8426_s23 + $0x58] sm:$0xff]  }
 0x818   : > { %v4244_v27 = vpop.f32.mrf.mxu0  ;;  %v9107_v51 = vadd.f32 %v6560_v18, %v4290_v20  ;;  %v6676_v8 = vld [vmem:[%s8426_s23 + $0x78] sm:$0xff]  }
 0x819   : > { %v4245_v10 = vadd.f32 %v9009_v29, %v4244_v27  ;;  %4446 = vadd.xlane.f32.xlu1 %v9049_v5  ;;  %4448 = vadd.xlane.f32.xlu0 %v9051_v41  ;;  %v9067_v26 = vadd.f32 %v6541_v6, %v4253_v35  ;;  %v4292_v43 = vpop.f32.mrf.mxu1  ;;  %v9105_v60 = vadd.f32 %v6557_v49, %v4285_v9  ;;  %v6565_v6 = vunpack.c.h.bf16 %v6672_v53 }
 0x81a   : > { %v7082_v59 = vpop.f32.mrf.mxu0  ;;  %v4293_v27 = vadd.f32 %v9009_v29, %v4292_v43  ;;  %v6675_v43 = vld [vmem:[%s8426_s23 + $0x70] sm:$0xff]   ;;  %v6580_v56 = vunpack.c.l.bf16 %v6676_v8  ;;  %v6581_v20 = vunpack.c.h.bf16 %v6676_v8 }
 0x81b   : > { %v9058_v39 = vadd.f32 %v6537_v46, %v4245_v10  ;;  %v4266_v40 = vadd.f32 %v7082_v59, %v9009_v29  ;;  %v7094_v31 = vpop.f32.mrf.mxu1  ;;  %v6564_v46 = vunpack.c.l.bf16 %v6672_v53  ;;  %v6673_v10 = vld [vmem:[%s8426_s23 + $0x60] sm:$0xff]   ;;  %v6577_v11 = vunpack.c.h.bf16 %v6675_v43 }
 0x81c   : > { %v4257_v48 = vpop.f32.mrf.mxu0  ;;  %v6568_v35 = vunpack.c.l.bf16 %v6673_v10  ;;  %v9114_v22 = vadd.f32 %v6561_v58, %v4293_v27 }
 0x81d   : > { %v4258_v45 = vadd.f32 %v9009_v29, %v4257_v48  ;;  %4450 = vadd.xlane.f32.xlu1 %v9058_v39  ;;  %4452 = vadd.xlane.f32.xlu0 %v9060_v3  ;;  %v9079_v63 = vadd.f32 %v6548_v44, %v4266_v40  ;;  %v4305_v61 = vpop.f32.mrf.mxu1  ;;  %v9116_v32 = vadd.f32 %v6564_v46, %v4298_v21  ;;  %v6674_v48 = vld [vmem:[%s8426_s23 + $0x68] sm:$0xff]  }
 0x81e   : > { %v7083_v38 = vpop.f32.mrf.mxu0  ;;  %v4306_v13 = vadd.f32 %v9009_v29, %v4305_v61  ;;  %v6572_v44 = vunpack.c.l.bf16 %v6674_v48  ;;  %v4314_v40 = vadd.f32 %v7094_v31, %v9009_v29 }
 0x81f   : > { %v9069_v4 = vadd.f32 %v6544_v52, %v4258_v45  ;;  %v4269_v50 = vadd.f32 %v7083_v38, %v9009_v29  ;;  %v7095_v17 = vpop.f32.mrf.mxu1  ;;  %v4301_v52 = vadd.f32 %v7091_v33, %v9009_v29  ;;  %v6569_v38 = vunpack.c.h.bf16 %v6673_v10 }
 0x820   : > { %v4260_v16 = vpop.f32.mrf.mxu0  ;;  %v9125_v2 = vadd.f32 %v6568_v35, %v4306_v13  ;;  %v4317_v14 = vadd.f32 %v7095_v17, %v9009_v29  ;;  %v9134_v31 = vadd.f32 %v6572_v44, %v4314_v40  ;;  %v9159_v35 = vld [vmem:[#allocation15 + $0x8] ss:$0 sm:$0xff] }
 0x821   : > { %v4261_v42 = vadd.f32 %v9009_v29, %v4260_v16  ;;  %4454 = vadd.xlane.f32.xlu1 %v9067_v26  ;;  %4456 = vadd.xlane.f32.xlu0 %v9069_v4  ;;  %v9087_v37 = vadd.f32 %v6549_v28, %v4269_v50  ;;  %v4308_v23 = vpop.f32.mrf.mxu1  ;;  %v9123_v33 = vadd.f32 %v6565_v6, %v4301_v52  ;;  %v6576_v28 = vunpack.c.l.bf16 %v6675_v43 }
 0x823   : > { %v9077_v62 = vadd.f32 %v6545_v47, %v4261_v42  ;;  %v7098_v59 = vpop.f32.mrf.mxu1  ;;  %v4309_v47 = vadd.f32 %v9009_v29, %v4308_v23  ;;  %v6573_v42 = vunpack.c.h.bf16 %v6674_v48 }
 0x824   : > { %v4330_v30 = vadd.f32 %v7098_v59, %v9009_v29 }
 0x825   : > { %4458 = vadd.xlane.f32.xlu1 %v9077_v62  ;;  %4460 = vadd.xlane.f32.xlu0 %v9079_v63  ;;  %v4321_v45 = vpop.f32.mrf.mxu1  ;;  %v9132_v19 = vadd.f32 %v6569_v38, %v4309_v47  ;;  %v9141_v12 = vadd.f32 %v6573_v42, %v4317_v14 }
 0x826   : > { %v4322_v50 = vadd.f32 %v9009_v29, %v4321_v45  ;;  %v9150_v9 = vadd.f32 %v6580_v56, %v4330_v30 }
 0x827   : > { %v7099_v16 = vpop.f32.mrf.mxu1 }
 0x828   : > { %v9143_v17 = vadd.f32 %v6576_v28, %v4322_v50  ;;  %v4333_v49 = vadd.f32 %v7099_v16, %v9009_v29 }
 0x829   : > { %4462 = vadd.xlane.f32.xlu1 %v9087_v37  ;;  %4464 = vadd.xlane.f32.xlu0 %v9089_v54  ;;  %v4324_v61 = vpop.f32.mrf.mxu1 }
 0x82a   : > { %v4325_v7 = vadd.f32 %v9009_v29, %v4324_v61  ;;  %v9154_v53 = vadd.f32 %v6581_v20, %v4333_v49 }
 0x82c   : > { %v9148_v18 = vadd.f32 %v6577_v11, %v4325_v7 }
 0x82d   : > { %4466 = vadd.xlane.f32.xlu1 %v9096_v25  ;;  %4468 = vadd.xlane.f32.xlu0 %v9098_v34 }
 0x831   : > { %4470 = vadd.xlane.f32.xlu1 %v9105_v60  ;;  %4472 = vadd.xlane.f32.xlu0 %v9107_v51 }
 0x835   : > { %4474 = vadd.xlane.f32.xlu1 %v9114_v22  ;;  %4476 = vadd.xlane.f32.xlu0 %v9116_v32 }
 0x839   : > { %4478 = vadd.xlane.f32.xlu1 %v9123_v33  ;;  %4480 = vadd.xlane.f32.xlu0 %v9125_v2 }
 0x83d   : > { %4482 = vadd.xlane.f32.xlu1 %v9132_v19  ;;  %4484 = vadd.xlane.f32.xlu0 %v9134_v31 }
 0x841   : > { %4486 = vadd.xlane.f32.xlu1 %v9141_v12  ;;  %4488 = vadd.xlane.f32.xlu0 %v9143_v17 }
 0x845   : > { %4490 = vadd.xlane.f32.xlu1 %v9148_v18  ;;  %4492 = vadd.xlane.f32.xlu0 %v9150_v9 }
 0x849   : > { %4494 = vadd.xlane.f32.xlu1 %v9154_v53 }
 0x890   : > { %v4437_v23 = vpop.xlane.xlu1 %4436 }
 0x891   : > { %v4498_v58 = vmul.f32 0.03125, %v4437_v23 }
 0x892   : > { %v4433_v46 = vpop.xlane.xlu0 %4432 }
 0x893   : > { %v4496_v21 = vmul.f32 0.03125, %v4433_v46  ;;  %v4530_v29 = vsub.f32 %v9014_v55, %v4498_v58 }
 0x894   : > { %v4439_v27 = vpop.xlane.xlu1 %4438 }
 0x895   : > { %v4528_v10 = vsub.f32 %v9018_v15, %v4496_v21  ;;  %v4499_v59 = vmul.f32 0.03125, %v4439_v27  ;;  %v9169_v44 = vmul.f32 %v9159_v35, %v4530_v29  ;;  %v7779_v21 = vld [vmem:[#allocation13 + $0x78] sm:$0xff]  }
 0x896   : > { %v4435_v6 = vpop.xlane.xlu0 %4434  ;;  %7100 = vmatprep.subr.bf16.mxu1 %v7779_v21 }
 0x897   : > { %v4497_v52 = vmul.f32 0.03125, %v4435_v6  ;;  %v9162_v13 = vmul.f32 %v9159_v35, %v4528_v10  ;;  %v4531_v48 = vsub.f32 %v9023_v0, %v4499_v59  ;;  %v4598_v0 = vmul.f32 %v9169_v44, %v9169_v44  ;;  %7101 = vmatpush3.bf16.msra.mxu1 %v7779_v21 }
 0x899   : > { %v4529_v45 = vsub.f32 %v9026_v57, %v4497_v52  ;;  %v4596_v38 = vmul.f32 %v9162_v13, %v9162_v13  ;;  %v9180_v57 = vmul.f32 %v9159_v35, %v4531_v48 }
 0x89a   : > { %v4441_v55 = vpop.xlane.xlu0 %4440 }
 0x89b   : > { %v4500_v15 = vmul.f32 0.03125, %v4441_v55  ;;  %4628 = vadd.xlane.f32.xlu0 %v4596_v38  ;;  %v9172_v40 = vmul.f32 %v9159_v35, %v4529_v45  ;;  %v4599_v61 = vmul.f32 %v9180_v57, %v9180_v57 }
 0x89d   : > { %v4532_v47 = vsub.f32 %v9032_v24, %v4500_v15  ;;  %v4597_v43 = vmul.f32 %v9172_v40, %v9172_v40  ;;  %v7780_v15 = vld [vmem:[#allocation13 + $0x70] sm:$0xff]  }
 0x89e   : > { %v4443_v16 = vpop.xlane.xlu1 %4442  ;;  %v4445_v42 = vpop.xlane.xlu0 %4444  ;;  %7102 = vmatprep.subr.bf16.mxu1 %v7780_v15 }
 0x89f   : > { %v4501_v28 = vmul.f32 0.03125, %v4443_v16  ;;  %v4502_v14 = vmul.f32 0.03125, %v4445_v42  ;;  %4630 = vadd.xlane.f32.xlu1 %v4597_v43  ;;  %4632 = vadd.xlane.f32.xlu0 %v4598_v0  ;;  %v9183_v50 = vmul.f32 %v9159_v35, %v4532_v47 }
 0x8a0   : > { %7103 = vmatpush3.bf16.msra.mxu1 %v7780_v15 }
 0x8a1   : > { %v4533_v24 = vsub.f32 %v9040_v1, %v4501_v28  ;;  %v4534_v8 = vsub.f32 %v9042_v36, %v4502_v14  ;;  %v4600_v11 = vmul.f32 %v9183_v50, %v9183_v50 }
 0x8a2   : > { %v4447_v56 = vpop.xlane.xlu1 %4446  ;;  %v4449_v30 = vpop.xlane.xlu0 %4448 }
 0x8a3   : > { %v4503_v7 = vmul.f32 0.03125, %v4447_v56  ;;  %v4504_v49 = vmul.f32 0.03125, %v4449_v30  ;;  %4634 = vadd.xlane.f32.xlu1 %v4599_v61  ;;  %4636 = vadd.xlane.f32.xlu0 %v4600_v11  ;;  %v9192_v20 = vmul.f32 %v9159_v35, %v4533_v24  ;;  %v9195_v23 = vmul.f32 %v9159_v35, %v4534_v8  ;;  %v7781_v8 = vld [vmem:[#allocation13 + $0x68] sm:$0xff]  }
 0x8a4   : > { %7104 = vmatprep.subr.bf16.mxu1 %v7781_v8 }
 0x8a5   : > { %v4535_v1 = vsub.f32 %v9049_v5, %v4503_v7  ;;  %v4536_v36 = vsub.f32 %v9051_v41, %v4504_v49  ;;  %v4601_v58 = vmul.f32 %v9192_v20, %v9192_v20  ;;  %v4602_v46 = vmul.f32 %v9195_v23, %v9195_v23  ;;  %7105 = vmatpush3.bf16.msra.mxu1 %v7781_v8 }
 0x8a6   : > { %v4451_v27 = vpop.xlane.xlu1 %4450  ;;  %v4453_v29 = vpop.xlane.xlu0 %4452 }
 0x8a7   : > { %v4505_v10 = vmul.f32 0.03125, %v4451_v27  ;;  %v4506_v59 = vmul.f32 0.03125, %v4453_v29  ;;  %4638 = vadd.xlane.f32.xlu1 %v4601_v58  ;;  %4640 = vadd.xlane.f32.xlu0 %v4602_v46  ;;  %v9204_v6 = vmul.f32 %v9159_v35, %v4535_v1  ;;  %v9207_v5 = vmul.f32 %v9159_v35, %v4536_v36  ;;  %v7782_v58 = vld [vmem:[#allocation13 + $0x60] sm:$0xff]  }
 0x8a8   : > { %7106 = vmatprep.subr.bf16.mxu1 %v7782_v58 }
 0x8a9   : > { %v4537_v41 = vsub.f32 %v9058_v39, %v4505_v10  ;;  %v4538_v52 = vsub.f32 %v9060_v3, %v4506_v59  ;;  %v4603_v48 = vmul.f32 %v9204_v6, %v9204_v6  ;;  %v4604_v45 = vmul.f32 %v9207_v5, %v9207_v5  ;;  %7107 = vmatpush3.bf16.msra.mxu1 %v7782_v58 }
 0x8aa   : > { %v4455_v38 = vpop.xlane.xlu1 %4454  ;;  %v4457_v55 = vpop.xlane.xlu0 %4456 }
 0x8ab   : > { %v4507_v47 = vmul.f32 0.03125, %v4455_v38  ;;  %v4508_v43 = vmul.f32 0.03125, %v4457_v55  ;;  %4642 = vadd.xlane.f32.xlu1 %v4603_v48  ;;  %4644 = vadd.xlane.f32.xlu0 %v4604_v45  ;;  %v9216_v0 = vmul.f32 %v9159_v35, %v4537_v41  ;;  %v9219_v39 = vmul.f32 %v9159_v35, %v4538_v52  ;;  %v7783_v48 = vld [vmem:[#allocation13 + $0x58] sm:$0xff]  }
 0x8ac   : > { %7108 = vmatprep.subr.bf16.mxu1 %v7783_v48 }
 0x8ad   : > { %v4539_v3 = vsub.f32 %v9067_v26, %v4507_v47  ;;  %v4540_v16 = vsub.f32 %v9069_v4, %v4508_v43  ;;  %v4605_v42 = vmul.f32 %v9216_v0, %v9216_v0  ;;  %v4606_v28 = vmul.f32 %v9219_v39, %v9219_v39  ;;  %7109 = vmatpush3.bf16.msra.mxu1 %v7783_v48 }
 0x8ae   : > { %v4459_v14 = vpop.xlane.xlu1 %4458  ;;  %v4461_v24 = vpop.xlane.xlu0 %4460 }
 0x8af   : > { %v4509_v61 = vmul.f32 0.03125, %v4459_v14  ;;  %v4510_v11 = vmul.f32 0.03125, %v4461_v24  ;;  %4646 = vadd.xlane.f32.xlu1 %v4605_v42  ;;  %4648 = vadd.xlane.f32.xlu0 %v4606_v28  ;;  %v9228_v56 = vmul.f32 %v9159_v35, %v4539_v3  ;;  %v9231_v26 = vmul.f32 %v9159_v35, %v4540_v16  ;;  %v7784_v42 = vld [vmem:[#allocation13 + $0x50] sm:$0xff]  }
 0x8b0   : > { %7110 = vmatprep.subr.bf16.mxu1 %v7784_v42 }
 0x8b1   : > { %v4541_v4 = vsub.f32 %v9077_v62, %v4509_v61  ;;  %v4542_v30 = vsub.f32 %v9079_v63, %v4510_v11  ;;  %v4607_v7 = vmul.f32 %v9228_v56, %v9228_v56  ;;  %v4608_v49 = vmul.f32 %v9231_v26, %v9231_v26  ;;  %7111 = vmatpush3.bf16.msra.mxu1 %v7784_v42 }
 0x8b2   : > { %v4463_v1 = vpop.xlane.xlu1 %4462  ;;  %v4465_v36 = vpop.xlane.xlu0 %4464 }
 0x8b3   : > { %v4511_v46 = vmul.f32 0.03125, %v4463_v1  ;;  %v4512_v21 = vmul.f32 0.03125, %v4465_v36  ;;  %4650 = vadd.xlane.f32.xlu1 %v4607_v7  ;;  %4652 = vadd.xlane.f32.xlu0 %v4608_v49  ;;  %v9240_v27 = vmul.f32 %v9159_v35, %v4541_v4  ;;  %v9243_v62 = vmul.f32 %v9159_v35, %v4542_v30  ;;  %v7785_v7 = vld [vmem:[#allocation13 + $0x48] sm:$0xff]  }
 0x8b4   : > { %7112 = vmatprep.subr.bf16.mxu1 %v7785_v7 }
 0x8b5   : > { %v4543_v63 = vsub.f32 %v9087_v37, %v4511_v46  ;;  %v4544_v29 = vsub.f32 %v9089_v54, %v4512_v21  ;;  %v4609_v10 = vmul.f32 %v9240_v27, %v9240_v27  ;;  %v4610_v59 = vmul.f32 %v9243_v62, %v9243_v62  ;;  %7113 = vmatpush3.bf16.msra.mxu1 %v7785_v7 }
 0x8b6   : > { %v4467_v41 = vpop.xlane.xlu1 %4466  ;;  %v4469_v52 = vpop.xlane.xlu0 %4468 }
 0x8b7   : > { %v4513_v45 = vmul.f32 0.03125, %v4467_v41  ;;  %v4514_v38 = vmul.f32 0.03125, %v4469_v52  ;;  %4654 = vadd.xlane.f32.xlu1 %v4609_v10  ;;  %4656 = vadd.xlane.f32.xlu0 %v4610_v59  ;;  %v9252_v55 = vmul.f32 %v9159_v35, %v4543_v63  ;;  %v9255_v37 = vmul.f32 %v9159_v35, %v4544_v29  ;;  %v7786_v10 = vld [vmem:[#allocation13 + $0x40] sm:$0xff]  }
 0x8b8   : > { %7114 = vmatprep.subr.bf16.mxu1 %v7786_v10 }
 0x8b9   : > { %v4545_v54 = vsub.f32 %v9096_v25, %v4513_v45  ;;  %v4546_v15 = vsub.f32 %v9098_v34, %v4514_v38  ;;  %v4611_v47 = vmul.f32 %v9252_v55, %v9252_v55  ;;  %v4612_v43 = vmul.f32 %v9255_v37, %v9255_v37  ;;  %7115 = vmatpush3.bf16.msra.mxu1 %v7786_v10 }
 0x8ba   : > { %v4471_v3 = vpop.xlane.xlu1 %4470  ;;  %v4473_v16 = vpop.xlane.xlu0 %4472 }
 0x8bb   : > { %v4515_v28 = vmul.f32 0.03125, %v4471_v3  ;;  %v4516_v14 = vmul.f32 0.03125, %v4473_v16  ;;  %4658 = vadd.xlane.f32.xlu1 %v4611_v47  ;;  %4660 = vadd.xlane.f32.xlu0 %v4612_v43  ;;  %v9264_v24 = vmul.f32 %v9159_v35, %v4545_v54  ;;  %v9267_v25 = vmul.f32 %v9159_v35, %v4546_v15 }
 0x8bd   : > { %v4547_v34 = vsub.f32 %v9105_v60, %v4515_v28  ;;  %v4548_v8 = vsub.f32 %v9107_v51, %v4516_v14  ;;  %v4613_v61 = vmul.f32 %v9264_v24, %v9264_v24  ;;  %v4614_v11 = vmul.f32 %v9267_v25, %v9267_v25 }
 0x8be   : > { %v4475_v4 = vpop.xlane.xlu1 %4474  ;;  %v4477_v30 = vpop.xlane.xlu0 %4476 }
 0x8bf   : > { %v4517_v49 = vmul.f32 0.03125, %v4475_v4  ;;  %v4518_v1 = vmul.f32 0.03125, %v4477_v30  ;;  %4662 = vadd.xlane.f32.xlu1 %v4613_v61  ;;  %4664 = vadd.xlane.f32.xlu0 %v4614_v11  ;;  %v9276_v36 = vmul.f32 %v9159_v35, %v4547_v34  ;;  %v9279_v60 = vmul.f32 %v9159_v35, %v4548_v8 }
 0x8c1   : > { %v4549_v51 = vsub.f32 %v9114_v22, %v4517_v49  ;;  %v4550_v58 = vsub.f32 %v9116_v32, %v4518_v1  ;;  %v4615_v46 = vmul.f32 %v9276_v36, %v9276_v36  ;;  %v4616_v21 = vmul.f32 %v9279_v60, %v9279_v60 }
 0x8c2   : > { %v4479_v63 = vpop.xlane.xlu1 %4478  ;;  %v4481_v29 = vpop.xlane.xlu0 %4480 }
 0x8c3   : > { %v4519_v59 = vmul.f32 0.03125, %v4479_v63  ;;  %v4520_v41 = vmul.f32 0.03125, %v4481_v29  ;;  %4666 = vadd.xlane.f32.xlu1 %v4615_v46  ;;  %4668 = vadd.xlane.f32.xlu0 %v4616_v21  ;;  %v9288_v52 = vmul.f32 %v9159_v35, %v4549_v51  ;;  %v9291_v22 = vmul.f32 %v9159_v35, %v4550_v58 }
 0x8c5   : > { %v4551_v32 = vsub.f32 %v9123_v33, %v4519_v59  ;;  %v4552_v48 = vsub.f32 %v9125_v2, %v4520_v41  ;;  %v4617_v45 = vmul.f32 %v9288_v52, %v9288_v52  ;;  %v4618_v38 = vmul.f32 %v9291_v22, %v9291_v22 }
 0x8c6   : > { %v4483_v54 = vpop.xlane.xlu1 %4482  ;;  %v4485_v15 = vpop.xlane.xlu0 %4484 }
 0x8c7   : > { %v4521_v47 = vmul.f32 0.03125, %v4483_v54  ;;  %v4522_v43 = vmul.f32 0.03125, %v4485_v15  ;;  %4670 = vadd.xlane.f32.xlu1 %v4617_v45  ;;  %4672 = vadd.xlane.f32.xlu0 %v4618_v38  ;;  %v9300_v3 = vmul.f32 %v9159_v35, %v4551_v32  ;;  %v9303_v33 = vmul.f32 %v9159_v35, %v4552_v48  ;;  %v7787_v54 = vld [vmem:[#allocation13 + $0xb8] sm:$0xff]   ;;  %v7788_v15 = vld [vmem:[#allocation13 + $0xb0] sm:$0xff]  }
 0x8c8   : > { %7148 = vmatprep.subr.bf16.mxu0 %v7787_v54 }
 0x8c9   : > { %v4553_v2 = vsub.f32 %v9132_v19, %v4521_v47  ;;  %v4554_v16 = vsub.f32 %v9134_v31, %v4522_v43  ;;  %v4619_v42 = vmul.f32 %v9300_v3, %v9300_v3  ;;  %v4620_v28 = vmul.f32 %v9303_v33, %v9303_v33  ;;  %7149 = vmatpush3.bf16.msra.mxu0 %v7787_v54  ;;  %v7790_v47 = vld [vmem:[#allocation13 + $0xa0] sm:$0xff]   ;;  %v7791_v43 = vld [vmem:[#allocation13 + $0x98] sm:$0xff]  }
 0x8ca   : > { %v4487_v14 = vpop.xlane.xlu1 %4486  ;;  %v4489_v34 = vpop.xlane.xlu0 %4488  ;;  %7150 = vmatprep.subr.bf16.mxu0 %v7788_v15 }
 0x8cb   : > { %v4523_v8 = vmul.f32 0.03125, %v4487_v14  ;;  %v4524_v61 = vmul.f32 0.03125, %v4489_v34  ;;  %4674 = vadd.xlane.f32.xlu1 %v4619_v42  ;;  %4676 = vadd.xlane.f32.xlu0 %v4620_v28  ;;  %v9312_v11 = vmul.f32 %v9159_v35, %v4553_v2  ;;  %v9315_v4 = vmul.f32 %v9159_v35, %v4554_v16 }
 0x8cd   : > { %v4555_v19 = vsub.f32 %v9141_v12, %v4523_v8  ;;  %v4556_v31 = vsub.f32 %v9143_v17, %v4524_v61  ;;  %v4621_v30 = vmul.f32 %v9312_v11, %v9312_v11  ;;  %v4622_v7 = vmul.f32 %v9315_v4, %v9315_v4  ;;  %7151 = vmatpush3.bf16.msra.mxu0 %v7788_v15  ;;  %v9351_v15 = vld [vmem:[#allocation15 + $0x4] ss:$0 sm:$0xff] }
 0x8ce   : > { %v4491_v49 = vpop.xlane.xlu1 %4490  ;;  %v4493_v1 = vpop.xlane.xlu0 %4492 }
 0x8cf   : > { %v4525_v51 = vmul.f32 0.03125, %v4491_v49  ;;  %v4526_v58 = vmul.f32 0.03125, %v4493_v1  ;;  %4678 = vadd.xlane.f32.xlu1 %v4621_v30  ;;  %4680 = vadd.xlane.f32.xlu0 %v4622_v7  ;;  %v9324_v46 = vmul.f32 %v9159_v35, %v4555_v19  ;;  %v9327_v21 = vmul.f32 %v9159_v35, %v4556_v31 }
 0x8d1   : > { %v4557_v12 = vsub.f32 %v9148_v18, %v4525_v51  ;;  %v4558_v17 = vsub.f32 %v9150_v9, %v4526_v58  ;;  %v4623_v63 = vmul.f32 %v9324_v46, %v9324_v46  ;;  %v4624_v29 = vmul.f32 %v9327_v21, %v9327_v21 }
 0x8d2   : > { %v4495_v10 = vpop.xlane.xlu1 %4494 }
 0x8d3   : > { %v4527_v59 = vmul.f32 0.03125, %v4495_v10  ;;  %4682 = vadd.xlane.f32.xlu1 %v4623_v63  ;;  %4684 = vadd.xlane.f32.xlu0 %v4624_v29  ;;  %v9336_v41 = vmul.f32 %v9159_v35, %v4557_v12  ;;  %v9339_v32 = vmul.f32 %v9159_v35, %v4558_v17 }
 0x8d5   : > { %v4559_v18 = vsub.f32 %v9154_v53, %v4527_v59  ;;  %v4625_v9 = vmul.f32 %v9336_v41, %v9336_v41  ;;  %v4626_v48 = vmul.f32 %v9339_v32, %v9339_v32  ;;  %v7789_v53 = vld [vmem:[#allocation13 + $0xa8] sm:$0xff]  }
 0x8d6   : > { %7152 = vmatprep.subr.bf16.mxu0 %v7789_v53 }
 0x8d7   : > { %4686 = vadd.xlane.f32.xlu1 %v4625_v9  ;;  %4688 = vadd.xlane.f32.xlu0 %v4626_v48  ;;  %v9347_v45 = vmul.f32 %v9159_v35, %v4559_v18 }
 0x8d8   : > { %7153 = vmatpush3.bf16.msra.mxu0 %v7789_v53 }
 0x8d9   : > { %v4627_v38 = vmul.f32 %v9347_v45, %v9347_v45  ;;  %7154 = vmatprep.subr.bf16.mxu0 %v7790_v47 }
 0x8db   : > { %4690 = vadd.xlane.f32.xlu1 %v4627_v38 }
 0x8dc   : > { %7155 = vmatpush3.bf16.msra.mxu0 %v7790_v47 }
 0x8dd   : > { %7156 = vmatprep.subr.bf16.mxu0 %v7791_v43 }
 0x8e0   : > { %7157 = vmatpush3.bf16.msra.mxu0 %v7791_v43 }
 0x924   : > { %v4629_v35 = vpop.xlane.xlu0 %4628 }
 0x925   : > { %v4692_v2 = vmul.f32 0.03125, %v4629_v35 }
 0x927   : > { %v4724_v16 = vadd.f32 1e-05, %v4692_v2 }
 0x928   : > { %v4631_v42 = vpop.xlane.xlu1 %4630  ;;  %v4633_v28 = vpop.xlane.xlu0 %4632 }
 0x929   : > { %7859 = vrsqrt.f32 %v4724_v16  ;;  %v4693_v14 = vmul.f32 0.03125, %v4631_v42  ;;  %v4694_v34 = vmul.f32 0.03125, %v4633_v28 }
 0x92b   : > { %v4725_v8 = vadd.f32 1e-05, %v4693_v14  ;;  %v4726_v61 = vadd.f32 1e-05, %v4694_v34 }
 0x92c   : > { %v4635_v19 = vpop.xlane.xlu1 %4634  ;;  %v4637_v31 = vpop.xlane.xlu0 %4636 }
 0x92d   : > { %7861 = vrsqrt.f32 %v4725_v8  ;;  %v4695_v30 = vmul.f32 0.03125, %v4635_v19  ;;  %v4696_v7 = vmul.f32 0.03125, %v4637_v31  ;;  %v9355_v8 = vld [vmem:[#allocation15 + $0x5] ss:$0 sm:$0xff] }
 0x92e   : > { %7863 = vrsqrt.f32 %v4726_v61 }
 0x92f   : > { %v4727_v49 = vadd.f32 1e-05, %v4695_v30  ;;  %v4728_v1 = vadd.f32 1e-05, %v4696_v7 }
 0x930   : > { %v4639_v51 = vpop.xlane.xlu1 %4638  ;;  %v4641_v58 = vpop.xlane.xlu0 %4640 }
 0x931   : > { %7865 = vrsqrt.f32 %v4727_v49  ;;  %v4697_v12 = vmul.f32 0.03125, %v4639_v51  ;;  %v4698_v17 = vmul.f32 0.03125, %v4641_v58 }
 0x932   : > { %7867 = vrsqrt.f32 %v4728_v1 }
 0x933   : > { %v4729_v63 = vadd.f32 1e-05, %v4697_v12  ;;  %v4730_v29 = vadd.f32 1e-05, %v4698_v17 }
 0x934   : > { %v4643_v10 = vpop.xlane.xlu1 %4642  ;;  %v4645_v59 = vpop.xlane.xlu0 %4644 }
 0x935   : > { %7869 = vrsqrt.f32 %v4729_v63  ;;  %v4699_v18 = vmul.f32 0.03125, %v4643_v10  ;;  %v4700_v9 = vmul.f32 0.03125, %v4645_v59 }
 0x936   : > { %v7860_v48 = vpop.eup %7859  ;;  %7871 = vrsqrt.f32 %v4730_v29 }
 0x937   : > { %v4731_v38 = vadd.f32 1e-05, %v4699_v18  ;;  %v4732_v54 = vadd.f32 1e-05, %v4700_v9  ;;  %v4788_v53 = vmul.f32 %v7860_v48, %v9162_v13 }
 0x938   : > { %v4647_v47 = vpop.xlane.xlu1 %4646  ;;  %v4649_v43 = vpop.xlane.xlu0 %4648 }
 0x939   : > { %7873 = vrsqrt.f32 %v4731_v38  ;;  %v4701_v35 = vmul.f32 0.03125, %v4647_v47  ;;  %v4702_v2 = vmul.f32 0.03125, %v4649_v43  ;;  %v4824_v42 = vmul.f32 %v9351_v15, %v4788_v53 }
 0x93a   : > { %v7862_v16 = vpop.eup %7861  ;;  %7875 = vrsqrt.f32 %v4732_v54 }
 0x93b   : > { %v7864_v28 = vpop.eup %7863  ;;  %v4733_v14 = vadd.f32 1e-05, %v4701_v35  ;;  %v4734_v34 = vadd.f32 1e-05, %v4702_v2  ;;  %v4789_v61 = vmul.f32 %v7862_v16, %v9172_v40  ;;  %v9361_v51 = vadd.f32 %v9355_v8, %v4824_v42 }
 0x93c   : > { %v4790_v19 = vmul.f32 %v7864_v28, %v9169_v44  ;;  %v4651_v31 = vpop.xlane.xlu1 %4650  ;;  %v4653_v13 = vpop.xlane.xlu0 %4652 }
 0x93d   : > { %7877 = vrsqrt.f32 %v4733_v14  ;;  %v4703_v30 = vmul.f32 0.03125, %v4651_v31  ;;  %v4704_v7 = vmul.f32 0.03125, %v4653_v13  ;;  %v4825_v49 = vmul.f32 %v9351_v15, %v4789_v61 }
 0x93e   : > { %v7866_v1 = vpop.eup %7865  ;;  %7879 = vrsqrt.f32 %v4734_v34  ;;  %v4826_v10 = vmul.f32 %v9351_v15, %v4790_v19 }
 0x93f   : > { %v7868_v58 = vpop.eup %7867  ;;  %v4791_v12 = vmul.f32 %v7866_v1, %v9180_v57  ;;  %v4735_v17 = vadd.f32 1e-05, %v4703_v30  ;;  %v4736_v63 = vadd.f32 1e-05, %v4704_v7  ;;  %v9365_v40 = vadd.f32 %v9355_v8, %v4825_v49 }
 0x940   : > { %v4655_v44 = vpop.xlane.xlu1 %4654  ;;  %v4657_v29 = vpop.xlane.xlu0 %4656  ;;  %v4792_v59 = vmul.f32 %v7868_v58, %v9183_v50  ;;  %v9375_v16 = vadd.f32 %v9355_v8, %v4826_v10 }
 0x941   : > { %7881 = vrsqrt.f32 %v4735_v17  ;;  %v4705_v18 = vmul.f32 0.03125, %v4655_v44  ;;  %v4706_v9 = vmul.f32 0.03125, %v4657_v29  ;;  %v4892_v48 = vpack.c.bf16 %v9365_v40, %v9361_v51 }
 0x942   : > { %v7870_v38 = vpop.eup %7869  ;;  %7883 = vrsqrt.f32 %v4736_v63  ;;  %v4827_v57 = vmul.f32 %v9351_v15, %v4791_v12  ;;  %v4828_v54 = vmul.f32 %v9351_v15, %v4792_v59 }
 0x943   : > { %v7872_v53 = vpop.eup %7871  ;;  %v4737_v47 = vadd.f32 1e-05, %v4705_v18  ;;  %v4738_v43 = vadd.f32 1e-05, %v4706_v9  ;;  %7116 = vmatprep.mubr.bf16.mxu1 %v4892_v48  ;;  %v4793_v35 = vmul.f32 %v7870_v38, %v9192_v20 }
 0x944   : > { %v4659_v2 = vpop.xlane.xlu1 %4658  ;;  %v4661_v50 = vpop.xlane.xlu0 %4660  ;;  %v9378_v42 = vadd.f32 %v9355_v8, %v4827_v57  ;;  %v4794_v28 = vmul.f32 %v7872_v53, %v9195_v23  ;;  %v9385_v31 = vadd.f32 %v9355_v8, %v4828_v54 }
 0x945   : > { %7885 = vrsqrt.f32 %v4737_v47  ;;  %v4707_v14 = vmul.f32 0.03125, %v4659_v2  ;;  %v4708_v34 = vmul.f32 0.03125, %v4661_v50  ;;  %v4829_v61 = vmul.f32 %v9351_v15, %v4793_v35 }
 0x946   : > { %v7874_v19 = vpop.eup %7873  ;;  %7887 = vrsqrt.f32 %v4738_v43  ;;  %v4893_v20 = vpack.c.bf16 %v9378_v42, %v9375_v16  ;;  %v4830_v12 = vmul.f32 %v9351_v15, %v4794_v28 }
 0x947   : > { %v7876_v13 = vpop.eup %7875  ;;  %v4739_v30 = vadd.f32 1e-05, %v4707_v14  ;;  %v4740_v7 = vadd.f32 1e-05, %v4708_v34  ;;  %v9388_v49 = vadd.f32 %v9355_v8, %v4829_v61  ;;  %v4795_v23 = vmul.f32 %v7874_v19, %v9204_v6 }
 0x948   : > { %7117 = vmatmul.mubr.bf16.vlgmr.msra.gmra.mxu1 %v4893_v20  ;;  %v4663_v1 = vpop.xlane.xlu1 %4662  ;;  %v4665_v58 = vpop.xlane.xlu0 %4664  ;;  %v4796_v17 = vmul.f32 %v7876_v13, %v9207_v5  ;;  %v9399_v54 = vadd.f32 %v9355_v8, %v4830_v12 }
 0x949   : > { %7889 = vrsqrt.f32 %v4739_v30  ;;  %v4709_v63 = vmul.f32 0.03125, %v4663_v1  ;;  %v4710_v44 = vmul.f32 0.03125, %v4665_v58  ;;  %v4894_v29 = vpack.c.bf16 %v9388_v49, %v9385_v31 }
 0x94a   : > { %v7878_v10 = vpop.eup %7877  ;;  %7891 = vrsqrt.f32 %v4740_v7  ;;  %v4831_v59 = vmul.f32 %v9351_v15, %v4795_v23  ;;  %v4832_v18 = vmul.f32 %v9351_v15, %v4796_v17 }
 0x94b   : > { %v7880_v6 = vpop.eup %7879  ;;  %v4741_v9 = vadd.f32 1e-05, %v4709_v63  ;;  %v4742_v48 = vadd.f32 1e-05, %v4710_v44  ;;  %7120 = vmatprep.mubr.bf16.mxu1 %v4894_v29  ;;  %v4797_v38 = vmul.f32 %v7878_v10, %v9216_v0 }
 0x94c   : > { %v4667_v57 = vpop.xlane.xlu1 %4666  ;;  %v4669_v5 = vpop.xlane.xlu0 %4668  ;;  %v9402_v53 = vadd.f32 %v9355_v8, %v4831_v59  ;;  %v4798_v47 = vmul.f32 %v7880_v6, %v9219_v39  ;;  %v9409_v28 = vadd.f32 %v9355_v8, %v4832_v18 }
 0x94d   : > { %7893 = vrsqrt.f32 %v4741_v9  ;;  %v4711_v43 = vmul.f32 0.03125, %v4667_v57  ;;  %v4712_v35 = vmul.f32 0.03125, %v4669_v5  ;;  %v4833_v2 = vmul.f32 %v9351_v15, %v4797_v38 }
 0x94e   : > { %v7882_v50 = vpop.eup %7881  ;;  %7895 = vrsqrt.f32 %v4742_v48  ;;  %v4895_v0 = vpack.c.bf16 %v9402_v53, %v9399_v54  ;;  %v4834_v30 = vmul.f32 %v9351_v15, %v4798_v47 }
 0x94f   : > { %v7884_v14 = vpop.eup %7883  ;;  %v4743_v34 = vadd.f32 1e-05, %v4711_v43  ;;  %v4744_v61 = vadd.f32 1e-05, %v4712_v35  ;;  %v9412_v19 = vadd.f32 %v9355_v8, %v4833_v2  ;;  %v4799_v39 = vmul.f32 %v7882_v50, %v9228_v56 }
 0x950   : > { %7121 = vmatmul.mubr.bf16.gmra.mxu1 %v4895_v0  ;;  %v4671_v20 = vpop.xlane.xlu1 %4670  ;;  %v4673_v13 = vpop.xlane.xlu0 %4672  ;;  %v4800_v7 = vmul.f32 %v7884_v14, %v9231_v26  ;;  %v9423_v18 = vadd.f32 %v9355_v8, %v4834_v30 }
 0x951   : > { %7897 = vrsqrt.f32 %v4743_v34  ;;  %v4713_v23 = vmul.f32 0.03125, %v4671_v20  ;;  %v4714_v1 = vmul.f32 0.03125, %v4673_v13  ;;  %v4896_v58 = vpack.c.bf16 %v9412_v19, %v9409_v28 }
 0x952   : > { %v7886_v12 = vpop.eup %7885  ;;  %7899 = vrsqrt.f32 %v4744_v61  ;;  %v4835_v17 = vmul.f32 %v9351_v15, %v4799_v39  ;;  %v4836_v63 = vmul.f32 %v9351_v15, %v4800_v7 }
 0x953   : > { %v7888_v56 = vpop.eup %7887  ;;  %v4745_v44 = vadd.f32 1e-05, %v4713_v23  ;;  %v4746_v29 = vadd.f32 1e-05, %v4714_v1  ;;  %7124 = vmatprep.mubr.bf16.mxu1 %v4896_v58  ;;  %v4801_v10 = vmul.f32 %v7886_v12, %v9240_v27 }
 0x954   : > { %v4675_v59 = vpop.xlane.xlu1 %4674  ;;  %v4677_v26 = vpop.xlane.xlu0 %4676  ;;  %v9426_v6 = vadd.f32 %v9355_v8, %v4835_v17  ;;  %v4802_v9 = vmul.f32 %v7888_v56, %v9243_v62  ;;  %v9433_v47 = vadd.f32 %v9355_v8, %v4836_v63 }
 0x955   : > { %7901 = vrsqrt.f32 %v4745_v44  ;;  %v4715_v48 = vmul.f32 0.03125, %v4675_v59  ;;  %v4716_v38 = vmul.f32 0.03125, %v4677_v26  ;;  %v4837_v57 = vmul.f32 %v9351_v15, %v4801_v10 }
 0x956   : > { %v7890_v5 = vpop.eup %7889  ;;  %7903 = vrsqrt.f32 %v4746_v29  ;;  %v4897_v27 = vpack.c.bf16 %v9426_v6, %v9423_v18  ;;  %v4838_v34 = vmul.f32 %v9351_v15, %v4802_v9 }
 0x957   : > { %v7892_v43 = vpop.eup %7891  ;;  %v4747_v35 = vadd.f32 1e-05, %v4715_v48  ;;  %v4748_v2 = vadd.f32 1e-05, %v4716_v38  ;;  %v9436_v50 = vadd.f32 %v9355_v8, %v4837_v57  ;;  %v4803_v62 = vmul.f32 %v7890_v5, %v9252_v55 }
 0x958   : > { %7125 = vmatmul.mubr.bf16.gmra.mxu1 %v4897_v27  ;;  %v4679_v0 = vpop.xlane.xlu1 %4678  ;;  %v4681_v14 = vpop.xlane.xlu0 %4680  ;;  %v4804_v61 = vmul.f32 %v7892_v43, %v9255_v37  ;;  %v9447_v63 = vadd.f32 %v9355_v8, %v4838_v34 }
 0x959   : > { %7905 = vrsqrt.f32 %v4747_v35  ;;  %v4717_v39 = vmul.f32 0.03125, %v4679_v0  ;;  %v4718_v20 = vmul.f32 0.03125, %v4681_v14  ;;  %v4898_v13 = vpack.c.bf16 %v9436_v50, %v9433_v47 }
 0x95a   : > { %v7894_v30 = vpop.eup %7893  ;;  %7907 = vrsqrt.f32 %v4748_v2  ;;  %v4839_v7 = vmul.f32 %v9351_v15, %v4803_v62  ;;  %v4840_v23 = vmul.f32 %v9351_v15, %v4804_v61 }
 0x95b   : > { %v7896_v55 = vpop.eup %7895  ;;  %v4749_v1 = vadd.f32 1e-05, %v4717_v39  ;;  %v4750_v58 = vadd.f32 1e-05, %v4718_v20  ;;  %7128 = vmatprep.mubr.bf16.mxu1 %v4898_v13  ;;  %v4805_v12 = vmul.f32 %v7894_v30, %v9264_v24 }
 0x95c   : > { %v4683_v17 = vpop.xlane.xlu1 %4682  ;;  %v4685_v37 = vpop.xlane.xlu0 %4684  ;;  %v9450_v56 = vadd.f32 %v9355_v8, %v4839_v7  ;;  %v4806_v44 = vmul.f32 %v7896_v55, %v9267_v25  ;;  %v9457_v9 = vadd.f32 %v9355_v8, %v4840_v23 }
 0x95d   : > { %7909 = vrsqrt.f32 %v4749_v1  ;;  %v4719_v29 = vmul.f32 0.03125, %v4683_v17  ;;  %v4720_v10 = vmul.f32 0.03125, %v4685_v37  ;;  %v4841_v59 = vmul.f32 %v9351_v15, %v4805_v12 }
 0x95e   : > { %v7898_v26 = vpop.eup %7897  ;;  %7911 = vrsqrt.f32 %v4750_v58  ;;  %v4899_v24 = vpack.c.bf16 %v9450_v56, %v9447_v63  ;;  %v4842_v35 = vmul.f32 %v9351_v15, %v4806_v44 }
 0x95f   : > { %v7900_v48 = vpop.eup %7899  ;;  %v4751_v38 = vadd.f32 1e-05, %v4719_v29  ;;  %v4752_v57 = vadd.f32 1e-05, %v4720_v10  ;;  %v9460_v5 = vadd.f32 %v9355_v8, %v4841_v59  ;;  %v4807_v25 = vmul.f32 %v7898_v26, %v9276_v36 }
 0x960   : > { %7129 = vmatmul.mubr.bf16.gmra.mxu1 %v4899_v24  ;;  %v4687_v27 = vpop.xlane.xlu1 %4686  ;;  %v4689_v43 = vpop.xlane.xlu0 %4688  ;;  %v4808_v2 = vmul.f32 %v7900_v48, %v9279_v60  ;;  %v9471_v60 = vadd.f32 %v9355_v8, %v4842_v35 }
 0x961   : > { %7913 = vrsqrt.f32 %v4751_v38  ;;  %v4721_v62 = vmul.f32 0.03125, %v4687_v27  ;;  %v4722_v0 = vmul.f32 0.03125, %v4689_v43  ;;  %v4900_v14 = vpack.c.bf16 %v9460_v5, %v9457_v9 }
 0x962   : > { %v7902_v34 = vpop.eup %7901  ;;  %7915 = vrsqrt.f32 %v4752_v57  ;;  %v4843_v61 = vmul.f32 %v9351_v15, %v4807_v25  ;;  %v4844_v39 = vmul.f32 %v9351_v15, %v4808_v2 }
 0x963   : > { %v7904_v36 = vpop.eup %7903  ;;  %v4753_v20 = vadd.f32 1e-05, %v4721_v62  ;;  %v4754_v13 = vadd.f32 1e-05, %v4722_v0  ;;  %7132 = vmatprep.mubr.bf16.mxu1 %v4900_v14  ;;  %v4809_v30 = vmul.f32 %v7902_v34, %v9288_v52 }
 0x964   : > { %v4691_v7 = vpop.xlane.xlu1 %4690  ;;  %v9474_v23 = vadd.f32 %v9355_v8, %v4843_v61  ;;  %v4810_v55 = vmul.f32 %v7904_v36, %v9291_v22  ;;  %v9481_v52 = vadd.f32 %v9355_v8, %v4844_v39 }
 0x965   : > { %7917 = vrsqrt.f32 %v4753_v20  ;;  %v4723_v1 = vmul.f32 0.03125, %v4691_v7  ;;  %v4845_v58 = vmul.f32 %v9351_v15, %v4809_v30 }
 0x966   : > { %v7906_v12 = vpop.eup %7905  ;;  %7919 = vrsqrt.f32 %v4754_v13  ;;  %v4901_v17 = vpack.c.bf16 %v9474_v23, %v9471_v60  ;;  %v4846_v22 = vmul.f32 %v9351_v15, %v4810_v55 }
 0x967   : > { %v7908_v37 = vpop.eup %7907  ;;  %v4755_v44 = vadd.f32 1e-05, %v4723_v1  ;;  %v9484_v29 = vadd.f32 %v9355_v8, %v4845_v58  ;;  %v4811_v10 = vmul.f32 %v7906_v12, %v9300_v3 }
 0x968   : > { %7133 = vmatmul.mubr.bf16.gmra.mxu1 %v4901_v17  ;;  %v4812_v59 = vmul.f32 %v7908_v37, %v9303_v33  ;;  %v9493_v57 = vadd.f32 %v9355_v8, %v4846_v22 }
 0x969   : > { %7921 = vrsqrt.f32 %v4755_v44  ;;  %v4902_v26 = vpack.c.bf16 %v9484_v29, %v9481_v52  ;;  %v4847_v24 = vmul.f32 %v9351_v15, %v4811_v10 }
 0x96a   : > { %v7910_v48 = vpop.eup %7909  ;;  %v4848_v27 = vmul.f32 %v9351_v15, %v4812_v59 }
 0x96b   : > { %v7912_v38 = vpop.eup %7911  ;;  %7136 = vmatprep.mubr.bf16.mxu1 %v4902_v26  ;;  %v9496_v25 = vadd.f32 %v9355_v8, %v4847_v24  ;;  %v4813_v3 = vmul.f32 %v7910_v48, %v9312_v11  ;;  %v7793_v26 = vld [vmem:[#allocation13 + $0x88] sm:$0xff]   ;;  %v7794_v24 = vld [vmem:[#allocation13 + $0x80] sm:$0xff]  }
 0x96c   : > { %v4814_v33 = vmul.f32 %v7912_v38, %v9315_v4  ;;  %v9505_v0 = vadd.f32 %v9355_v8, %v4848_v27  ;;  %v9547_v38 = vld [vmem:[#allocation15 + $0x2] ss:$0 sm:$0xff] }
 0x96d   : > { %v4903_v43 = vpack.c.bf16 %v9496_v25, %v9493_v57  ;;  %v4849_v35 = vmul.f32 %v9351_v15, %v4813_v3 }
 0x96e   : > { %v7914_v2 = vpop.eup %7913  ;;  %v4850_v11 = vmul.f32 %v9351_v15, %v4814_v33 }
 0x96f   : > { %v7916_v62 = vpop.eup %7915  ;;  %v9508_v14 = vadd.f32 %v9355_v8, %v4849_v35  ;;  %v4815_v34 = vmul.f32 %v7914_v2, %v9324_v46 }
 0x970   : > { %7137 = vmatmul.mubr.bf16.gmra.mxu1 %v4903_v43  ;;  %v4816_v4 = vmul.f32 %v7916_v62, %v9327_v21  ;;  %v9517_v13 = vadd.f32 %v9355_v8, %v4850_v11 }
 0x971   : > { %v4904_v61 = vpack.c.bf16 %v9508_v14, %v9505_v0  ;;  %v4851_v39 = vmul.f32 %v9351_v15, %v4815_v34 }
 0x972   : > { %v7918_v36 = vpop.eup %7917  ;;  %v4852_v7 = vmul.f32 %v9351_v15, %v4816_v4 }
 0x973   : > { %v7920_v20 = vpop.eup %7919  ;;  %7140 = vmatprep.mubr.bf16.mxu1 %v4904_v61  ;;  %v9520_v30 = vadd.f32 %v9355_v8, %v4851_v39  ;;  %v4817_v46 = vmul.f32 %v7918_v36, %v9336_v41 }
 0x974   : > { %v4818_v21 = vmul.f32 %v7920_v20, %v9339_v32  ;;  %v9529_v12 = vadd.f32 %v9355_v8, %v4852_v7 }
 0x975   : > { %v4905_v55 = vpack.c.bf16 %v9520_v30, %v9517_v13  ;;  %v4853_v1 = vmul.f32 %v9351_v15, %v4817_v46 }
 0x976   : > { %v7922_v58 = vpop.eup %7921  ;;  %v4854_v41 = vmul.f32 %v9351_v15, %v4818_v21 }
 0x977   : > { %v9532_v17 = vadd.f32 %v9355_v8, %v4853_v1  ;;  %v4819_v37 = vmul.f32 %v7922_v58, %v9347_v45  ;;  %v7792_v45 = vld [vmem:[#allocation13 + $0x90] sm:$0xff]  }
 0x978   : > { %7141 = vmatmul.mubr.bf16.gmra.mxu1 %v4905_v55  ;;  %v9540_v10 = vadd.f32 %v9355_v8, %v4854_v41  ;;  %7158 = vmatprep.subr.bf16.mxu0 %v7792_v45 }
 0x979   : > { %v4906_v32 = vpack.c.bf16 %v9532_v17, %v9529_v12  ;;  %v4855_v44 = vmul.f32 %v9351_v15, %v4819_v37  ;;  %7159 = vmatpush3.bf16.msra.mxu0 %v7792_v45 }
 0x97a   : > { %7160 = vmatprep.subr.bf16.mxu0 %v7793_v26 }
 0x97b   : > { %7144 = vmatprep.mubr.bf16.mxu1 %v4906_v32  ;;  %v9543_v22 = vadd.f32 %v9355_v8, %v4855_v44 }
 0x97d   : > { %v4907_v59 = vpack.c.bf16 %v9543_v22, %v9540_v10  ;;  %7161 = vmatpush3.bf16.msra.mxu0 %v7793_v26 }
 0x97e   : > { %7162 = vmatprep.subr.bf16.mxu0 %v7794_v24 }
 0x980   : > { %7145 = vmatmul.mubr.bf16.gmra.mxu1 %v4907_v59 }
 0x981   : > { %7163 = vmatpush3.bf16.msra.mxu0 %v7794_v24 }
 0xa08   : > { %v7118_v15 = vpop.f32.mrf.mxu1 }
 0xa09   : > { %v5020_v33 = vadd.f32 %v7118_v15, %v9547_v38 }
 0xa0a   : > { %v5011_v48 = vpop.f32.mrf.mxu1 }
 0xa0b   : > { %v5012_v8 = vadd.f32 %v9547_v38, %v5011_v48  ;;  %v5140_v4 = vmax.f32 %v5020_v33, 0.0 }
 0xa0c   : > { %v7119_v3 = vpop.f32.mrf.mxu1 }
 0xa0d   : > { %v5023_v27 = vadd.f32 %v7119_v3, %v9547_v38  ;;  %v5138_v34 = vmax.f32 %v5012_v8, 0.0 }
 0xa0e   : > { %v5014_v43 = vpop.f32.mrf.mxu1 }
 0xa0f   : > { %v5015_v35 = vadd.f32 %v9547_v38, %v5014_v43  ;;  %v5141_v2 = vmax.f32 %v5023_v27, 0.0 }
 0xa10   : > { %v7122_v62 = vpop.f32.mrf.mxu1 }
 0xa11   : > { %v5139_v11 = vmax.f32 %v5015_v35, 0.0  ;;  %v5171_v36 = vpack.c.bf16 %v5141_v2, %v5140_v4  ;;  %v5036_v21 = vadd.f32 %v7122_v62, %v9547_v38 }
 0xa12   : > { %v5027_v61 = vpop.f32.mrf.mxu1 }
 0xa13   : > { %v5170_v39 = vpack.c.bf16 %v5139_v11, %v5138_v34  ;;  %v5028_v46 = vadd.f32 %v9547_v38, %v5027_v61  ;;  %v5144_v44 = vmax.f32 %v5036_v21, 0.0 }
 0xa14   : > { %v7123_v20 = vpop.f32.mrf.mxu1 }
 0xa15   : > { %v5039_v7 = vadd.f32 %v7123_v20, %v9547_v38  ;;  %7164 = vmatprep.mubr.bf16.mxu0 %v5170_v39  ;;  %v5142_v41 = vmax.f32 %v5028_v46, 0.0 }
 0xa16   : > { %v5030_v55 = vpop.f32.mrf.mxu1  ;;  %7165 = vmatmul.mubr.bf16.vlgmr.msra.gmra.mxu0 %v5171_v36 }
 0xa17   : > { %v5031_v1 = vadd.f32 %v9547_v38, %v5030_v55  ;;  %v5145_v58 = vmax.f32 %v5039_v7, 0.0 }
 0xa18   : > { %v7126_v37 = vpop.f32.mrf.mxu1 }
 0xa19   : > { %v5143_v32 = vmax.f32 %v5031_v1, 0.0  ;;  %v5173_v26 = vpack.c.bf16 %v5145_v58, %v5144_v44  ;;  %v5052_v3 = vadd.f32 %v7126_v37, %v9547_v38 }
 0xa1a   : > { %v5043_v59 = vpop.f32.mrf.mxu1 }
 0xa1b   : > { %v5172_v45 = vpack.c.bf16 %v5143_v32, %v5142_v41  ;;  %v5044_v15 = vadd.f32 %v9547_v38, %v5043_v59  ;;  %v5148_v62 = vmax.f32 %v5052_v3, 0.0 }
 0xa1c   : > { %v7127_v24 = vpop.f32.mrf.mxu1 }
 0xa1d   : > { %v5055_v48 = vadd.f32 %v7127_v24, %v9547_v38  ;;  %7168 = vmatprep.mubr.bf16.mxu0 %v5172_v45  ;;  %v5146_v35 = vmax.f32 %v5044_v15, 0.0 }
 0xa1e   : > { %v5046_v8 = vpop.f32.mrf.mxu1  ;;  %7169 = vmatmul.mubr.bf16.gmra.mxu0 %v5173_v26 }
 0xa1f   : > { %v5047_v27 = vadd.f32 %v9547_v38, %v5046_v8  ;;  %v5149_v33 = vmax.f32 %v5055_v48, 0.0 }
 0xa20   : > { %v7130_v43 = vpop.f32.mrf.mxu1 }
 0xa21   : > { %v5147_v2 = vmax.f32 %v5047_v27, 0.0  ;;  %v5175_v4 = vpack.c.bf16 %v5149_v33, %v5148_v62  ;;  %v5068_v20 = vadd.f32 %v7130_v43, %v9547_v38 }
 0xa22   : > { %v5059_v34 = vpop.f32.mrf.mxu1 }
 0xa23   : > { %v5174_v11 = vpack.c.bf16 %v5147_v2, %v5146_v35  ;;  %v5060_v39 = vadd.f32 %v9547_v38, %v5059_v34  ;;  %v5152_v37 = vmax.f32 %v5068_v20, 0.0 }
 0xa24   : > { %v7131_v61 = vpop.f32.mrf.mxu1 }
 0xa25   : > { %v5071_v36 = vadd.f32 %v7131_v61, %v9547_v38  ;;  %7172 = vmatprep.mubr.bf16.mxu0 %v5174_v11  ;;  %v5150_v1 = vmax.f32 %v5060_v39, 0.0 }
 0xa26   : > { %v5062_v46 = vpop.f32.mrf.mxu1  ;;  %7173 = vmatmul.mubr.bf16.gmra.mxu0 %v5175_v4 }
 0xa27   : > { %v5063_v7 = vadd.f32 %v9547_v38, %v5062_v46  ;;  %v5153_v21 = vmax.f32 %v5071_v36, 0.0 }
 0xa28   : > { %v7134_v55 = vpop.f32.mrf.mxu1 }
 0xa29   : > { %v5151_v58 = vmax.f32 %v5063_v7, 0.0  ;;  %v5177_v44 = vpack.c.bf16 %v5153_v21, %v5152_v37  ;;  %v5084_v24 = vadd.f32 %v7134_v55, %v9547_v38 }
 0xa2a   : > { %v5075_v41 = vpop.f32.mrf.mxu1 }
 0xa2b   : > { %v5176_v32 = vpack.c.bf16 %v5151_v58, %v5150_v1  ;;  %v5076_v45 = vadd.f32 %v9547_v38, %v5075_v41  ;;  %v5156_v43 = vmax.f32 %v5084_v24, 0.0 }
 0xa2c   : > { %v7135_v59 = vpop.f32.mrf.mxu1 }
 0xa2d   : > { %v5087_v26 = vadd.f32 %v7135_v59, %v9547_v38  ;;  %7176 = vmatprep.mubr.bf16.mxu0 %v5176_v32  ;;  %v5154_v27 = vmax.f32 %v5076_v45, 0.0 }
 0xa2e   : > { %v5078_v15 = vpop.f32.mrf.mxu1  ;;  %7177 = vmatmul.mubr.bf16.gmra.mxu0 %v5177_v44 }
 0xa2f   : > { %v5079_v48 = vadd.f32 %v9547_v38, %v5078_v15  ;;  %v5157_v3 = vmax.f32 %v5087_v26, 0.0 }
 0xa30   : > { %v7138_v8 = vpop.f32.mrf.mxu1 }
 0xa31   : > { %v5155_v33 = vmax.f32 %v5079_v48, 0.0  ;;  %v5179_v62 = vpack.c.bf16 %v5157_v3, %v5156_v43  ;;  %v5100_v61 = vadd.f32 %v7138_v8, %v9547_v38 }
 0xa32   : > { %v5091_v35 = vpop.f32.mrf.mxu1 }
 0xa33   : > { %v5178_v2 = vpack.c.bf16 %v5155_v33, %v5154_v27  ;;  %v5092_v11 = vadd.f32 %v9547_v38, %v5091_v35  ;;  %v5160_v55 = vmax.f32 %v5100_v61, 0.0 }
 0xa34   : > { %v7139_v34 = vpop.f32.mrf.mxu1 }
 0xa35   : > { %v5103_v4 = vadd.f32 %v7139_v34, %v9547_v38  ;;  %7180 = vmatprep.mubr.bf16.mxu0 %v5178_v2  ;;  %v5158_v7 = vmax.f32 %v5092_v11, 0.0 }
 0xa36   : > { %v5094_v39 = vpop.f32.mrf.mxu1  ;;  %7181 = vmatmul.mubr.bf16.gmra.mxu0 %v5179_v62 }
 0xa37   : > { %v5095_v36 = vadd.f32 %v9547_v38, %v5094_v39  ;;  %v5161_v20 = vmax.f32 %v5103_v4, 0.0 }
 0xa38   : > { %v7142_v46 = vpop.f32.mrf.mxu1 }
 0xa39   : > { %v5159_v21 = vmax.f32 %v5095_v36, 0.0  ;;  %v5181_v37 = vpack.c.bf16 %v5161_v20, %v5160_v55  ;;  %v5116_v59 = vadd.f32 %v7142_v46, %v9547_v38 }
 0xa3a   : > { %v5107_v1 = vpop.f32.mrf.mxu1 }
 0xa3b   : > { %v5180_v58 = vpack.c.bf16 %v5159_v21, %v5158_v7  ;;  %v5108_v32 = vadd.f32 %v9547_v38, %v5107_v1  ;;  %v5164_v8 = vmax.f32 %v5116_v59, 0.0  ;;  %v9581_v21 = vld [vmem:[#allocation15 + $0x3] ss:$0 sm:$0xff] }
 0xa3c   : > { %v7143_v41 = vpop.f32.mrf.mxu1 }
 0xa3d   : > { %v5119_v44 = vadd.f32 %v7143_v41, %v9547_v38  ;;  %7184 = vmatprep.mubr.bf16.mxu0 %v5180_v58  ;;  %v5162_v48 = vmax.f32 %v5108_v32, 0.0 }
 0xa3e   : > { %v5110_v45 = vpop.f32.mrf.mxu1  ;;  %7185 = vmatmul.mubr.bf16.gmra.mxu0 %v5181_v37 }
 0xa3f   : > { %v5111_v26 = vadd.f32 %v9547_v38, %v5110_v45  ;;  %v5165_v24 = vmax.f32 %v5119_v44, 0.0 }
 0xa40   : > { %v7146_v15 = vpop.f32.mrf.mxu1 }
 0xa41   : > { %v5163_v3 = vmax.f32 %v5111_v26, 0.0  ;;  %v5183_v43 = vpack.c.bf16 %v5165_v24, %v5164_v8  ;;  %v5132_v34 = vadd.f32 %v7146_v15, %v9547_v38 }
 0xa42   : > { %v5123_v27 = vpop.f32.mrf.mxu1 }
 0xa43   : > { %v5182_v33 = vpack.c.bf16 %v5163_v3, %v5162_v48  ;;  %v5124_v2 = vadd.f32 %v9547_v38, %v5123_v27  ;;  %v5168_v20 = vmax.f32 %v5132_v34, 0.0 }
 0xa44   : > { %v7147_v35 = vpop.f32.mrf.mxu1 }
 0xa45   : > { %v5135_v62 = vadd.f32 %v7147_v35, %v9547_v38  ;;  %7188 = vmatprep.mubr.bf16.mxu0 %v5182_v33  ;;  %v5166_v39 = vmax.f32 %v5124_v2, 0.0 }
 0xa46   : > { %v5126_v11 = vpop.f32.mrf.mxu1  ;;  %7189 = vmatmul.mubr.bf16.gmra.mxu0 %v5183_v43 }
 0xa47   : > { %v5127_v4 = vadd.f32 %v9547_v38, %v5126_v11  ;;  %v5169_v61 = vmax.f32 %v5135_v62, 0.0 }
 0xa49   : > { %v5167_v36 = vmax.f32 %v5127_v4, 0.0  ;;  %v5185_v7 = vpack.c.bf16 %v5169_v61, %v5168_v20 }
 0xa4b   : > { %v5184_v46 = vpack.c.bf16 %v5167_v36, %v5166_v39 }
 0xa4d   : > { %7192 = vmatprep.mubr.bf16.mxu0 %v5184_v46 }
 0xa4e   : > { %7193 = vmatmul.mubr.bf16.gmra.mxu0 %v5185_v7 }
 0xad6   : > { %v7166_v55 = vpop.f32.mrf.mxu0 }
 0xad7   : > { %v5298_v1 = vadd.f32 %v7166_v55, %v9581_v21 }
 0xad8   : > { %v5289_v58 = vpop.f32.mrf.mxu0 }
 0xad9   : > { %v5290_v37 = vadd.f32 %v9581_v21, %v5289_v58  ;;  %v9586_v41 = vadd.f32 %v5298_v1, %v9375_v16 }
 0xada   : > { %v7167_v38 = vpop.f32.mrf.mxu0 }
 0xadb   : > { %v5301_v32 = vadd.f32 %v7167_v38, %v9581_v21  ;;  %5452 = vadd.xlane.f32.xlu0 %v9586_v41  ;;  %v9595_v26 = vadd.f32 %v5290_v37, %v9361_v51 }
 0xadc   : > { %v5292_v44 = vpop.f32.mrf.mxu0 }
 0xadd   : > { %v5293_v59 = vadd.f32 %v9581_v21, %v5292_v44  ;;  %v9592_v45 = vadd.f32 %v5301_v32, %v9378_v42 }
 0xade   : > { %v7170_v24 = vpop.f32.mrf.mxu0 }
 0xadf   : > { %v5314_v15 = vadd.f32 %v7170_v24, %v9581_v21  ;;  %5454 = vadd.xlane.f32.xlu1 %v9592_v45  ;;  %5448 = vadd.xlane.f32.xlu0 %v9595_v26  ;;  %v9602_v3 = vadd.f32 %v5293_v59, %v9365_v40 }
 0xae0   : > { %v5305_v16 = vpop.f32.mrf.mxu0 }
 0xae1   : > { %v5306_v48 = vadd.f32 %v9581_v21, %v5305_v16  ;;  %v9605_v8 = vadd.f32 %v5314_v15, %v9399_v54 }
 0xae2   : > { %v7171_v42 = vpop.f32.mrf.mxu0 }
 0xae3   : > { %v5317_v51 = vadd.f32 %v7171_v42, %v9581_v21  ;;  %5450 = vadd.xlane.f32.xlu1 %v9602_v3  ;;  %5460 = vadd.xlane.f32.xlu0 %v9605_v8  ;;  %v9615_v35 = vadd.f32 %v5306_v48, %v9385_v31 }
 0xae4   : > { %v5308_v27 = vpop.f32.mrf.mxu0 }
 0xae5   : > { %v5309_v33 = vadd.f32 %v9581_v21, %v5308_v27  ;;  %v9612_v43 = vadd.f32 %v5317_v51, %v9402_v53 }
 0xae6   : > { %v7174_v40 = vpop.f32.mrf.mxu0 }
 0xae7   : > { %v5330_v54 = vadd.f32 %v7174_v40, %v9581_v21  ;;  %5462 = vadd.xlane.f32.xlu1 %v9612_v43  ;;  %5456 = vadd.xlane.f32.xlu0 %v9615_v35  ;;  %v9622_v34 = vadd.f32 %v5309_v33, %v9388_v49 }
 0xae8   : > { %v5321_v2 = vpop.f32.mrf.mxu0 }
 0xae9   : > { %v5322_v62 = vadd.f32 %v9581_v21, %v5321_v2  ;;  %v9625_v11 = vadd.f32 %v5330_v54, %v9423_v18 }
 0xaea   : > { %v7175_v53 = vpop.f32.mrf.mxu0 }
 0xaeb   : > { %v5333_v31 = vadd.f32 %v7175_v53, %v9581_v21  ;;  %5458 = vadd.xlane.f32.xlu1 %v9622_v34  ;;  %5468 = vadd.xlane.f32.xlu0 %v9625_v11  ;;  %v9635_v36 = vadd.f32 %v5322_v62, %v9409_v28 }
 0xaec   : > { %v5324_v4 = vpop.f32.mrf.mxu0 }
 0xaed   : > { %v5325_v61 = vadd.f32 %v9581_v21, %v5324_v4  ;;  %v9632_v39 = vadd.f32 %v5333_v31, %v9426_v6 }
 0xaee   : > { %v7178_v49 = vpop.f32.mrf.mxu0 }
 0xaef   : > { %v5346_v18 = vadd.f32 %v7178_v49, %v9581_v21  ;;  %5470 = vadd.xlane.f32.xlu1 %v9632_v39  ;;  %5464 = vadd.xlane.f32.xlu0 %v9635_v36  ;;  %v9642_v7 = vadd.f32 %v5325_v61, %v9412_v19 }
 0xaf0   : > { %v5337_v20 = vpop.f32.mrf.mxu0 }
 0xaf1   : > { %v5338_v46 = vadd.f32 %v9581_v21, %v5337_v20  ;;  %v9645_v55 = vadd.f32 %v5346_v18, %v9447_v63 }
 0xaf2   : > { %v7179_v6 = vpop.f32.mrf.mxu0 }
 0xaf3   : > { %v5349_v28 = vadd.f32 %v7179_v6, %v9581_v21  ;;  %5466 = vadd.xlane.f32.xlu1 %v9642_v7  ;;  %5476 = vadd.xlane.f32.xlu0 %v9645_v55  ;;  %v9655_v38 = vadd.f32 %v5338_v46, %v9433_v47 }
 0xaf4   : > { %v5340_v1 = vpop.f32.mrf.mxu0 }
 0xaf5   : > { %v5341_v58 = vadd.f32 %v9581_v21, %v5340_v1  ;;  %v9652_v37 = vadd.f32 %v5349_v28, %v9450_v56 }
 0xaf6   : > { %v7182_v19 = vpop.f32.mrf.mxu0 }
 0xaf7   : > { %v5362_v63 = vadd.f32 %v7182_v19, %v9581_v21  ;;  %5478 = vadd.xlane.f32.xlu1 %v9652_v37  ;;  %5472 = vadd.xlane.f32.xlu0 %v9655_v38  ;;  %v9662_v59 = vadd.f32 %v5341_v58, %v9436_v50 }
 0xaf8   : > { %v5353_v32 = vpop.f32.mrf.mxu0 }
 0xaf9   : > { %v5354_v44 = vadd.f32 %v9581_v21, %v5353_v32  ;;  %v9665_v24 = vadd.f32 %v5362_v63, %v9471_v60 }
 0xafa   : > { %v7183_v56 = vpop.f32.mrf.mxu0 }
 0xafb   : > { %v5365_v47 = vadd.f32 %v7183_v56, %v9581_v21  ;;  %5474 = vadd.xlane.f32.xlu1 %v9662_v59  ;;  %5484 = vadd.xlane.f32.xlu0 %v9665_v24  ;;  %v9675_v42 = vadd.f32 %v5354_v44, %v9457_v9 }
 0xafc   : > { %v5356_v15 = vpop.f32.mrf.mxu0 }
 0xafd   : > { %v5357_v16 = vadd.f32 %v9581_v21, %v5356_v15  ;;  %v9672_v48 = vadd.f32 %v5365_v47, %v9474_v23 }
 0xafe   : > { %v7186_v50 = vpop.f32.mrf.mxu0 }
 0xaff   : > { %v5378_v60 = vadd.f32 %v7186_v50, %v9581_v21  ;;  %5486 = vadd.xlane.f32.xlu1 %v9672_v48  ;;  %5480 = vadd.xlane.f32.xlu0 %v9675_v42  ;;  %v9682_v33 = vadd.f32 %v5357_v16, %v9460_v5 }
 0xb00   : > { %v5369_v51 = vpop.f32.mrf.mxu0 }
 0xb01   : > { %v5370_v27 = vadd.f32 %v9581_v21, %v5369_v51  ;;  %v9685_v40 = vadd.f32 %v5378_v60, %v9493_v57  ;;  %v9744_v60 = vld [vmem:[#allocation15 + $0x8] ss:$0 sm:$0xff] }
 0xb02   : > { %v7187_v23 = vpop.f32.mrf.mxu0 }
 0xb03   : > { %v5381_v9 = vadd.f32 %v7187_v23, %v9581_v21  ;;  %5482 = vadd.xlane.f32.xlu1 %v9682_v33  ;;  %5492 = vadd.xlane.f32.xlu0 %v9685_v40  ;;  %v9695_v53 = vadd.f32 %v5370_v27, %v9481_v52 }
 0xb04   : > { %v5372_v54 = vpop.f32.mrf.mxu0 }
 0xb05   : > { %v5373_v2 = vadd.f32 %v9581_v21, %v5372_v54  ;;  %v9692_v62 = vadd.f32 %v5381_v9, %v9496_v25 }
 0xb06   : > { %v7190_v5 = vpop.f32.mrf.mxu0 }
 0xb07   : > { %v5394_v57 = vadd.f32 %v7190_v5, %v9581_v21  ;;  %5494 = vadd.xlane.f32.xlu1 %v9692_v62  ;;  %5488 = vadd.xlane.f32.xlu0 %v9695_v53  ;;  %v9702_v61 = vadd.f32 %v5373_v2, %v9484_v29 }
 0xb08   : > { %v5385_v31 = vpop.f32.mrf.mxu0 }
 0xb09   : > { %v5386_v4 = vadd.f32 %v9581_v21, %v5385_v31  ;;  %v9705_v49 = vadd.f32 %v5394_v57, %v9517_v13 }
 0xb0a   : > { %v7191_v25 = vpop.f32.mrf.mxu0 }
 0xb0b   : > { %v5397_v52 = vadd.f32 %v7191_v25, %v9581_v21  ;;  %5490 = vadd.xlane.f32.xlu1 %v9702_v61  ;;  %5500 = vadd.xlane.f32.xlu0 %v9705_v49  ;;  %v9715_v6 = vadd.f32 %v5386_v4, %v9505_v0 }
 0xb0c   : > { %v5388_v18 = vpop.f32.mrf.mxu0 }
 0xb0d   : > { %v5389_v20 = vadd.f32 %v9581_v21, %v5388_v18  ;;  %v9712_v46 = vadd.f32 %v5397_v52, %v9520_v30 }
 0xb0e   : > { %v7194_v29 = vpop.f32.mrf.mxu0 }
 0xb0f   : > { %5502 = vadd.xlane.f32.xlu1 %v9712_v46  ;;  %5496 = vadd.xlane.f32.xlu0 %v9715_v6  ;;  %v9721_v1 = vadd.f32 %v5389_v20, %v9508_v14  ;;  %v5410_v19 = vadd.f32 %v7194_v29, %v9581_v21 }
 0xb10   : > { %v5401_v13 = vpop.f32.mrf.mxu0 }
 0xb11   : > { %v5402_v28 = vadd.f32 %v9581_v21, %v5401_v13  ;;  %v9735_v14 = vadd.f32 %v5410_v19, %v9540_v10 }
 0xb12   : > { %v7195_v58 = vpop.f32.mrf.mxu0 }
 0xb13   : > { %5498 = vadd.xlane.f32.xlu1 %v9721_v1  ;;  %v9726_v30 = vadd.f32 %v5402_v28, %v9529_v12  ;;  %v5413_v32 = vadd.f32 %v7195_v58, %v9581_v21 }
 0xb14   : > { %v5404_v0 = vpop.f32.mrf.mxu0 }
 0xb15   : > { %v5405_v63 = vadd.f32 %v9581_v21, %v5404_v0  ;;  %5504 = vadd.xlane.f32.xlu0 %v9726_v30  ;;  %v9740_v12 = vadd.f32 %v5413_v32, %v9543_v22 }
 0xb17   : > { %v9732_v44 = vadd.f32 %v5405_v63, %v9532_v17 }
 0xb19   : > { %5506 = vadd.xlane.f32.xlu1 %v9732_v44  ;;  %5508 = vadd.xlane.f32.xlu0 %v9735_v14 }
 0xb1d   : > { %5510 = vadd.xlane.f32.xlu1 %v9740_v12 }
 0xb64   : > { %v5453_v56 = vpop.xlane.xlu0 %5452 }
 0xb65   : > { %v5514_v47 = vmul.f32 0.03125, %v5453_v56 }
 0xb67   : > { %v5546_v15 = vsub.f32 %v9586_v41, %v5514_v47 }
 0xb68   : > { %v5455_v21 = vpop.xlane.xlu1 %5454  ;;  %v5449_v16 = vpop.xlane.xlu0 %5448 }
 0xb69   : > { %v5515_v17 = vmul.f32 0.03125, %v5455_v21  ;;  %v5512_v50 = vmul.f32 0.03125, %v5449_v16  ;;  %v9747_v10 = vmul.f32 %v9744_v60, %v5546_v15 }
 0xb6b   : > { %v5547_v51 = vsub.f32 %v9592_v45, %v5515_v17  ;;  %v5544_v22 = vsub.f32 %v9595_v26, %v5512_v50  ;;  %v5610_v27 = vmul.f32 %v9747_v10, %v9747_v10 }
 0xb6c   : > { %v5451_v23 = vpop.xlane.xlu1 %5450  ;;  %v5461_v9 = vpop.xlane.xlu0 %5460 }
 0xb6d   : > { %v9754_v41 = vmul.f32 %v9744_v60, %v5544_v22  ;;  %v5513_v54 = vmul.f32 0.03125, %v5451_v23  ;;  %v5518_v2 = vmul.f32 0.03125, %v5461_v9  ;;  %5644 = vadd.xlane.f32.xlu0 %v5610_v27  ;;  %v9757_v5 = vmul.f32 %v9744_v60, %v5547_v51 }
 0xb6f   : > { %v5545_v57 = vsub.f32 %v9602_v3, %v5513_v54  ;;  %v5550_v45 = vsub.f32 %v9605_v8, %v5518_v2  ;;  %v5611_v26 = vmul.f32 %v9757_v5, %v9757_v5  ;;  %v5608_v31 = vmul.f32 %v9754_v41, %v9754_v41 }
 0xb70   : > { %v5463_v4 = vpop.xlane.xlu1 %5462  ;;  %v5457_v25 = vpop.xlane.xlu0 %5456 }
 0xb71   : > { %v9766_v52 = vmul.f32 %v9744_v60, %v5545_v57  ;;  %v9769_v18 = vmul.f32 %v9744_v60, %v5550_v45  ;;  %v5519_v20 = vmul.f32 0.03125, %v5463_v4  ;;  %v5516_v29 = vmul.f32 0.03125, %v5457_v25  ;;  %5646 = vadd.xlane.f32.xlu1 %v5611_v26  ;;  %5640 = vadd.xlane.f32.xlu0 %v5608_v31 }
 0xb73   : > { %v5551_v3 = vsub.f32 %v9612_v43, %v5519_v20  ;;  %v5548_v8 = vsub.f32 %v9615_v35, %v5516_v29  ;;  %v5609_v13 = vmul.f32 %v9766_v52, %v9766_v52  ;;  %v5614_v28 = vmul.f32 %v9769_v18, %v9769_v18 }
 0xb74   : > { %v5459_v58 = vpop.xlane.xlu1 %5458  ;;  %v5469_v19 = vpop.xlane.xlu0 %5468 }
 0xb75   : > { %v9778_v0 = vmul.f32 %v9744_v60, %v5551_v3  ;;  %v9781_v63 = vmul.f32 %v9744_v60, %v5548_v8  ;;  %v5517_v32 = vmul.f32 0.03125, %v5459_v58  ;;  %v5522_v56 = vmul.f32 0.03125, %v5469_v19  ;;  %5642 = vadd.xlane.f32.xlu1 %v5609_v13  ;;  %5652 = vadd.xlane.f32.xlu0 %v5614_v28 }
 0xb77   : > { %v5549_v43 = vsub.f32 %v9622_v34, %v5517_v32  ;;  %v5554_v35 = vsub.f32 %v9625_v11, %v5522_v56  ;;  %v5615_v47 = vmul.f32 %v9778_v0, %v9778_v0  ;;  %v5612_v15 = vmul.f32 %v9781_v63, %v9781_v63 }
 0xb78   : > { %v5471_v21 = vpop.xlane.xlu1 %5470  ;;  %v5465_v16 = vpop.xlane.xlu0 %5464 }
 0xb79   : > { %v9790_v17 = vmul.f32 %v9744_v60, %v5549_v43  ;;  %v9793_v50 = vmul.f32 %v9744_v60, %v5554_v35  ;;  %v5523_v51 = vmul.f32 0.03125, %v5471_v21  ;;  %v5520_v22 = vmul.f32 0.03125, %v5465_v16  ;;  %5654 = vadd.xlane.f32.xlu1 %v5615_v47  ;;  %5648 = vadd.xlane.f32.xlu0 %v5612_v15 }
 0xb7b   : > { %v5555_v34 = vsub.f32 %v9632_v39, %v5523_v51  ;;  %v5552_v11 = vsub.f32 %v9635_v36, %v5520_v22  ;;  %v5613_v27 = vmul.f32 %v9790_v17, %v9790_v17  ;;  %v5618_v23 = vmul.f32 %v9793_v50, %v9793_v50 }
 0xb7c   : > { %v5467_v9 = vpop.xlane.xlu1 %5466  ;;  %v5477_v54 = vpop.xlane.xlu0 %5476 }
 0xb7d   : > { %v9802_v2 = vmul.f32 %v9744_v60, %v5555_v34  ;;  %v9805_v57 = vmul.f32 %v9744_v60, %v5552_v11  ;;  %v5521_v45 = vmul.f32 0.03125, %v5467_v9  ;;  %v5526_v26 = vmul.f32 0.03125, %v5477_v54  ;;  %5650 = vadd.xlane.f32.xlu1 %v5613_v27  ;;  %5660 = vadd.xlane.f32.xlu0 %v5618_v23 }
 0xb7f   : > { %v5553_v39 = vsub.f32 %v9642_v7, %v5521_v45  ;;  %v5558_v36 = vsub.f32 %v9645_v55, %v5526_v26  ;;  %v5619_v31 = vmul.f32 %v9802_v2, %v9802_v2  ;;  %v5616_v4 = vmul.f32 %v9805_v57, %v9805_v57 }
 0xb80   : > { %v5479_v25 = vpop.xlane.xlu1 %5478  ;;  %v5473_v20 = vpop.xlane.xlu0 %5472 }
 0xb81   : > { %v9814_v29 = vmul.f32 %v9744_v60, %v5553_v39  ;;  %v9817_v3 = vmul.f32 %v9744_v60, %v5558_v36  ;;  %v5527_v8 = vmul.f32 0.03125, %v5479_v25  ;;  %v5524_v13 = vmul.f32 0.03125, %v5473_v20  ;;  %5662 = vadd.xlane.f32.xlu1 %v5619_v31  ;;  %5656 = vadd.xlane.f32.xlu0 %v5616_v4 }
 0xb83   : > { %v5559_v7 = vsub.f32 %v9652_v37, %v5527_v8  ;;  %v5556_v55 = vsub.f32 %v9655_v38, %v5524_v13  ;;  %v5617_v28 = vmul.f32 %v9814_v29, %v9814_v29  ;;  %v5622_v58 = vmul.f32 %v9817_v3, %v9817_v3 }
 0xb84   : > { %v5475_v19 = vpop.xlane.xlu1 %5474  ;;  %v5485_v32 = vpop.xlane.xlu0 %5484 }
 0xb85   : > { %v9826_v56 = vmul.f32 %v9744_v60, %v5559_v7  ;;  %v9829_v43 = vmul.f32 %v9744_v60, %v5556_v55  ;;  %v5525_v35 = vmul.f32 0.03125, %v5475_v19  ;;  %v5530_v47 = vmul.f32 0.03125, %v5485_v32  ;;  %5658 = vadd.xlane.f32.xlu1 %v5617_v28  ;;  %5668 = vadd.xlane.f32.xlu0 %v5622_v58 }
 0xb87   : > { %v5557_v37 = vsub.f32 %v9662_v59, %v5525_v35  ;;  %v5562_v38 = vsub.f32 %v9665_v24, %v5530_v47  ;;  %v5623_v15 = vmul.f32 %v9826_v56, %v9826_v56  ;;  %v5620_v21 = vmul.f32 %v9829_v43, %v9829_v43 }
 0xb88   : > { %v5487_v16 = vpop.xlane.xlu1 %5486  ;;  %v5481_v51 = vpop.xlane.xlu0 %5480 }
 0xb89   : > { %v9838_v22 = vmul.f32 %v9744_v60, %v5557_v37  ;;  %v9841_v34 = vmul.f32 %v9744_v60, %v5562_v38  ;;  %v5531_v11 = vmul.f32 0.03125, %v5487_v16  ;;  %v5528_v27 = vmul.f32 0.03125, %v5481_v51  ;;  %5670 = vadd.xlane.f32.xlu1 %v5623_v15  ;;  %5664 = vadd.xlane.f32.xlu0 %v5620_v21 }
 0xb8b   : > { %v5563_v59 = vsub.f32 %v9672_v48, %v5531_v11  ;;  %v5560_v24 = vsub.f32 %v9675_v42, %v5528_v27  ;;  %v5621_v23 = vmul.f32 %v9838_v22, %v9838_v22  ;;  %v5626_v9 = vmul.f32 %v9841_v34, %v9841_v34 }
 0xb8c   : > { %v5483_v54 = vpop.xlane.xlu1 %5482  ;;  %v5493_v45 = vpop.xlane.xlu0 %5492 }
 0xb8d   : > { %v9850_v26 = vmul.f32 %v9744_v60, %v5563_v59  ;;  %v9853_v39 = vmul.f32 %v9744_v60, %v5560_v24  ;;  %v5529_v36 = vmul.f32 0.03125, %v5483_v54  ;;  %v5534_v31 = vmul.f32 0.03125, %v5493_v45  ;;  %5666 = vadd.xlane.f32.xlu1 %v5621_v23  ;;  %5676 = vadd.xlane.f32.xlu0 %v5626_v9 }
 0xb8f   : > { %v5561_v48 = vsub.f32 %v9682_v33, %v5529_v36  ;;  %v5566_v42 = vsub.f32 %v9685_v40, %v5534_v31  ;;  %v5627_v4 = vmul.f32 %v9850_v26, %v9850_v26  ;;  %v5624_v25 = vmul.f32 %v9853_v39, %v9853_v39 }
 0xb90   : > { %v5495_v20 = vpop.xlane.xlu1 %5494  ;;  %v5489_v8 = vpop.xlane.xlu0 %5488 }
 0xb91   : > { %v9862_v13 = vmul.f32 %v9744_v60, %v5561_v48  ;;  %v9865_v7 = vmul.f32 %v9744_v60, %v5566_v42  ;;  %v5535_v55 = vmul.f32 0.03125, %v5495_v20  ;;  %v5532_v28 = vmul.f32 0.03125, %v5489_v8  ;;  %5678 = vadd.xlane.f32.xlu1 %v5627_v4  ;;  %5672 = vadd.xlane.f32.xlu0 %v5624_v25 }
 0xb93   : > { %v5567_v33 = vsub.f32 %v9692_v62, %v5535_v55  ;;  %v5564_v40 = vsub.f32 %v9695_v53, %v5532_v28  ;;  %v5625_v58 = vmul.f32 %v9862_v13, %v9862_v13  ;;  %v5630_v19 = vmul.f32 %v9865_v7, %v9865_v7 }
 0xb94   : > { %v5491_v32 = vpop.xlane.xlu1 %5490  ;;  %v5501_v35 = vpop.xlane.xlu0 %5500 }
 0xb95   : > { %v9874_v47 = vmul.f32 %v9744_v60, %v5567_v33  ;;  %v9877_v37 = vmul.f32 %v9744_v60, %v5564_v40  ;;  %v5533_v38 = vmul.f32 0.03125, %v5491_v32  ;;  %v5538_v15 = vmul.f32 0.03125, %v5501_v35  ;;  %5674 = vadd.xlane.f32.xlu1 %v5625_v58  ;;  %5684 = vadd.xlane.f32.xlu0 %v5630_v19 }
 0xb97   : > { %v5565_v62 = vsub.f32 %v9702_v61, %v5533_v38  ;;  %v5570_v53 = vsub.f32 %v9705_v49, %v5538_v15  ;;  %v5631_v21 = vmul.f32 %v9874_v47, %v9874_v47  ;;  %v5628_v16 = vmul.f32 %v9877_v37, %v9877_v37 }
 0xb98   : > { %v5503_v51 = vpop.xlane.xlu1 %5502  ;;  %v5497_v11 = vpop.xlane.xlu0 %5496 }
 0xb99   : > { %v9886_v27 = vmul.f32 %v9744_v60, %v5565_v62  ;;  %v9889_v59 = vmul.f32 %v9744_v60, %v5570_v53  ;;  %v5539_v24 = vmul.f32 0.03125, %v5503_v51  ;;  %v5536_v23 = vmul.f32 0.03125, %v5497_v11  ;;  %5686 = vadd.xlane.f32.xlu1 %v5631_v21  ;;  %5680 = vadd.xlane.f32.xlu0 %v5628_v16 }
 0xb9b   : > { %v5571_v61 = vsub.f32 %v9712_v46, %v5539_v24  ;;  %v5568_v49 = vsub.f32 %v9715_v6, %v5536_v23  ;;  %v5629_v9 = vmul.f32 %v9886_v27, %v9886_v27  ;;  %v5634_v54 = vmul.f32 %v9889_v59, %v9889_v59 }
 0xb9c   : > { %v5499_v45 = vpop.xlane.xlu1 %5498 }
 0xb9d   : > { %v9898_v36 = vmul.f32 %v9744_v60, %v5571_v61  ;;  %v9901_v31 = vmul.f32 %v9744_v60, %v5568_v49  ;;  %v5537_v48 = vmul.f32 0.03125, %v5499_v45  ;;  %5682 = vadd.xlane.f32.xlu1 %v5629_v9  ;;  %5692 = vadd.xlane.f32.xlu0 %v5634_v54 }
 0xb9e   : > { %v5505_v42 = vpop.xlane.xlu0 %5504 }
 0xb9f   : > { %v5569_v46 = vsub.f32 %v9721_v1, %v5537_v48  ;;  %v5540_v6 = vmul.f32 0.03125, %v5505_v42  ;;  %v5635_v4 = vmul.f32 %v9898_v36, %v9898_v36  ;;  %v5632_v25 = vmul.f32 %v9901_v31, %v9901_v31 }
 0xba1   : > { %v9909_v20 = vmul.f32 %v9744_v60, %v5569_v46  ;;  %v5572_v8 = vsub.f32 %v9726_v30, %v5540_v6  ;;  %5694 = vadd.xlane.f32.xlu1 %v5635_v4  ;;  %5688 = vadd.xlane.f32.xlu0 %v5632_v25 }
 0xba2   : > { %v5507_v55 = vpop.xlane.xlu1 %5506  ;;  %v5509_v28 = vpop.xlane.xlu0 %5508 }
 0xba3   : > { %v9913_v33 = vmul.f32 %v9744_v60, %v5572_v8  ;;  %v5541_v1 = vmul.f32 0.03125, %v5507_v55  ;;  %v5542_v40 = vmul.f32 0.03125, %v5509_v28  ;;  %v5633_v58 = vmul.f32 %v9909_v20, %v9909_v20 }
 0xba5   : > { %v5573_v19 = vsub.f32 %v9732_v44, %v5541_v1  ;;  %v5574_v32 = vsub.f32 %v9735_v14, %v5542_v40  ;;  %5690 = vadd.xlane.f32.xlu1 %v5633_v58  ;;  %v5636_v30 = vmul.f32 %v9913_v33, %v9913_v33 }
 0xba6   : > { %v5511_v35 = vpop.xlane.xlu1 %5510 }
 0xba7   : > { %v9922_v38 = vmul.f32 %v9744_v60, %v5573_v19  ;;  %v9925_v15 = vmul.f32 %v9744_v60, %v5574_v32  ;;  %v5543_v62 = vmul.f32 0.03125, %v5511_v35  ;;  %5696 = vadd.xlane.f32.xlu0 %v5636_v30  ;;  %v9937_v35 = vld [vmem:[#allocation15 + $0x6] ss:$0 sm:$0xff] }
 0xba9   : > { %v5575_v53 = vsub.f32 %v9740_v12, %v5543_v62  ;;  %v5637_v44 = vmul.f32 %v9922_v38, %v9922_v38  ;;  %v5638_v14 = vmul.f32 %v9925_v15, %v9925_v15 }
 0xbab   : > { %v9933_v21 = vmul.f32 %v9744_v60, %v5575_v53  ;;  %5698 = vadd.xlane.f32.xlu1 %v5637_v44  ;;  %5700 = vadd.xlane.f32.xlu0 %v5638_v14 }
 0xbad   : > { %v5639_v16 = vmul.f32 %v9933_v21, %v9933_v21 }
 0xbaf   : > { %5702 = vadd.xlane.f32.xlu1 %v5639_v16 }
 0xbf6   : > { %v5645_v51 = vpop.xlane.xlu0 %5644 }
 0xbf7   : > { %v5706_v11 = vmul.f32 0.03125, %v5645_v51 }
 0xbf9   : > { %v5738_v24 = vadd.f32 1e-05, %v5706_v11 }
 0xbfa   : > { %v5647_v23 = vpop.xlane.xlu1 %5646  ;;  %v5641_v12 = vpop.xlane.xlu0 %5640 }
 0xbfb   : > { %7923 = vrsqrt.f32 %v5738_v24  ;;  %v5707_v61 = vmul.f32 0.03125, %v5647_v23  ;;  %v5704_v49 = vmul.f32 0.03125, %v5641_v12 }
 0xbfd   : > { %v5739_v9 = vadd.f32 1e-05, %v5707_v61  ;;  %v5736_v54 = vadd.f32 1e-05, %v5704_v49  ;;  %v9941_v61 = vld [vmem:[#allocation15 + $0x7] ss:$0 sm:$0xff] }
 0xbfe   : > { %v5643_v45 = vpop.xlane.xlu1 %5642  ;;  %v5653_v48 = vpop.xlane.xlu0 %5652 }
 0xbff   : > { %7925 = vrsqrt.f32 %v5739_v9  ;;  %v5705_v60 = vmul.f32 0.03125, %v5643_v45  ;;  %v5710_v42 = vmul.f32 0.03125, %v5653_v48 }
 0xc00   : > { %7927 = vrsqrt.f32 %v5736_v54 }
 0xc01   : > { %v5737_v46 = vadd.f32 1e-05, %v5705_v60  ;;  %v5742_v6 = vadd.f32 1e-05, %v5710_v42 }
 0xc02   : > { %v5655_v4 = vpop.xlane.xlu1 %5654  ;;  %v5649_v25 = vpop.xlane.xlu0 %5648 }
 0xc03   : > { %7929 = vrsqrt.f32 %v5737_v46  ;;  %v5711_v8 = vmul.f32 0.03125, %v5655_v4  ;;  %v5708_v55 = vmul.f32 0.03125, %v5649_v25 }
 0xc04   : > { %7931 = vrsqrt.f32 %v5742_v6 }
 0xc05   : > { %v5743_v28 = vadd.f32 1e-05, %v5711_v8  ;;  %v5740_v1 = vadd.f32 1e-05, %v5708_v55 }
 0xc06   : > { %v5651_v40 = vpop.xlane.xlu1 %5650  ;;  %v5661_v58 = vpop.xlane.xlu0 %5660 }
 0xc07   : > { %7933 = vrsqrt.f32 %v5743_v28  ;;  %v5709_v19 = vmul.f32 0.03125, %v5651_v40  ;;  %v5714_v32 = vmul.f32 0.03125, %v5661_v58 }
 0xc08   : > { %v7924_v30 = vpop.eup %7923  ;;  %7935 = vrsqrt.f32 %v5740_v1 }
 0xc09   : > { %v5802_v62 = vmul.f32 %v7924_v30, %v9747_v10  ;;  %v5741_v53 = vadd.f32 1e-05, %v5709_v19  ;;  %v5746_v44 = vadd.f32 1e-05, %v5714_v32 }
 0xc0a   : > { %v5663_v14 = vpop.xlane.xlu1 %5662  ;;  %v5657_v16 = vpop.xlane.xlu0 %5656 }
 0xc0b   : > { %7937 = vrsqrt.f32 %v5741_v53  ;;  %v5715_v51 = vmul.f32 0.03125, %v5663_v14  ;;  %v5712_v11 = vmul.f32 0.03125, %v5657_v16  ;;  %v5838_v23 = vmul.f32 %v9937_v35, %v5802_v62 }
 0xc0c   : > { %v7926_v24 = vpop.eup %7925  ;;  %7939 = vrsqrt.f32 %v5746_v44 }
 0xc0d   : > { %v7928_v12 = vpop.eup %7927  ;;  %v5803_v49 = vmul.f32 %v7926_v24, %v9757_v5  ;;  %v5747_v9 = vadd.f32 1e-05, %v5715_v51  ;;  %v5744_v54 = vadd.f32 1e-05, %v5712_v11  ;;  %v5874_v4 = vadd.f32 %v9941_v61, %v5838_v23 }
 0xc0e   : > { %v5800_v10 = vmul.f32 %v7928_v12, %v9754_v41  ;;  %v5659_v45 = vpop.xlane.xlu1 %5658  ;;  %v5669_v48 = vpop.xlane.xlu0 %5668 }
 0xc0f   : > { %v5839_v60 = vmul.f32 %v9937_v35, %v5803_v49  ;;  %7941 = vrsqrt.f32 %v5747_v9  ;;  %v5713_v42 = vmul.f32 0.03125, %v5659_v45  ;;  %v5718_v46 = vmul.f32 0.03125, %v5669_v48 }
 0xc10   : > { %v7930_v6 = vpop.eup %7929  ;;  %v5836_v25 = vmul.f32 %v9937_v35, %v5800_v10  ;;  %7943 = vrsqrt.f32 %v5744_v54 }
 0xc11   : > { %v7932_v8 = vpop.eup %7931  ;;  %v5875_v5 = vadd.f32 %v9941_v61, %v5839_v60  ;;  %v5801_v55 = vmul.f32 %v7930_v6, %v9766_v52  ;;  %v5745_v41 = vadd.f32 1e-05, %v5713_v42  ;;  %v5750_v28 = vadd.f32 1e-05, %v5718_v46 }
 0xc12   : > { %v5806_v1 = vmul.f32 %v7932_v8, %v9769_v18  ;;  %v5671_v40 = vpop.xlane.xlu1 %5670  ;;  %v5665_v58 = vpop.xlane.xlu0 %5664  ;;  %v5872_v52 = vadd.f32 %v9941_v61, %v5836_v25 }
 0xc13   : > { %v6590_v19 = vpack.c.bf16 %v5875_v5, %v5874_v4  ;;  %v5837_v32 = vmul.f32 %v9937_v35, %v5801_v55  ;;  %7945 = vrsqrt.f32 %v5745_v41  ;;  %v5719_v30 = vmul.f32 0.03125, %v5671_v40 }
 0xc14   : > { %v7934_v62 = vpop.eup %7933  ;;  %v5842_v53 = vmul.f32 %v9937_v35, %v5806_v1  ;;  %7947 = vrsqrt.f32 %v5750_v28  ;;  %v5716_v44 = vmul.f32 0.03125, %v5665_v58 }
 0xc15   : > { %v7936_v14 = vpop.eup %7935  ;;  %6677 = vst [vmem:[%s8608_s7 + $0x8] sm:$0xff] %v6590_v19   ;;  %v5873_v16 = vadd.f32 %v9941_v61, %v5837_v32  ;;  %v5807_v18 = vmul.f32 %v7934_v62, %v9778_v0  ;;  %v5751_v51 = vadd.f32 1e-05, %v5719_v30 }
 0xc16   : > { %v5804_v11 = vmul.f32 %v7936_v14, %v9781_v63  ;;  %v5748_v24 = vadd.f32 1e-05, %v5716_v44  ;;  %v5667_v23 = vpop.xlane.xlu1 %5666  ;;  %v5677_v12 = vpop.xlane.xlu0 %5676  ;;  %v5878_v45 = vadd.f32 %v9941_v61, %v5842_v53 }
 0xc17   : > { %v6585_v49 = vpack.c.bf16 %v5873_v16, %v5872_v52  ;;  %v5843_v9 = vmul.f32 %v9937_v35, %v5807_v18  ;;  %7949 = vrsqrt.f32 %v5751_v51  ;;  %v5717_v54 = vmul.f32 0.03125, %v5667_v23 }
 0xc18   : > { %v7938_v10 = vpop.eup %7937  ;;  %7951 = vrsqrt.f32 %v5748_v24  ;;  %v5722_v48 = vmul.f32 0.03125, %v5677_v12  ;;  %v5840_v42 = vmul.f32 %v9937_v35, %v5804_v11 }
 0xc19   : > { %v7940_v60 = vpop.eup %7939  ;;  %6586 = vst [vmem:[%s8608_s7] sm:$0xff] %v6585_v49   ;;  %v5879_v0 = vadd.f32 %v9941_v61, %v5843_v9  ;;  %v5805_v63 = vmul.f32 %v7938_v10, %v9790_v17  ;;  %v5749_v46 = vadd.f32 1e-05, %v5717_v54 }
 0xc1a   : > { %v5810_v6 = vmul.f32 %v7940_v60, %v9793_v50  ;;  %v5754_v4 = vadd.f32 1e-05, %v5722_v48  ;;  %v5679_v25 = vpop.xlane.xlu1 %5678  ;;  %v5673_v8 = vpop.xlane.xlu0 %5672  ;;  %v5876_v17 = vadd.f32 %v9941_v61, %v5840_v42 }
 0xc1b   : > { %v6600_v5 = vpack.c.bf16 %v5879_v0, %v5878_v45  ;;  %v5841_v55 = vmul.f32 %v9937_v35, %v5805_v63  ;;  %7953 = vrsqrt.f32 %v5749_v46  ;;  %v5723_v41 = vmul.f32 0.03125, %v5679_v25 }
 0xc1c   : > { %v7942_v28 = vpop.eup %7941  ;;  %v5846_v1 = vmul.f32 %v9937_v35, %v5810_v6  ;;  %7955 = vrsqrt.f32 %v5754_v4  ;;  %v5720_v40 = vmul.f32 0.03125, %v5673_v8 }
 0xc1d   : > { %v7944_v58 = vpop.eup %7943  ;;  %6679 = vst [vmem:[%s8608_s7 + $0x18] sm:$0xff] %v6600_v5   ;;  %v5877_v19 = vadd.f32 %v9941_v61, %v5841_v55  ;;  %v5811_v50 = vmul.f32 %v7942_v28, %v9802_v2  ;;  %v5755_v32 = vadd.f32 1e-05, %v5723_v41 }
 0xc1e   : > { %v5808_v30 = vmul.f32 %v7944_v58, %v9805_v57  ;;  %v5752_v62 = vadd.f32 1e-05, %v5720_v40  ;;  %v5675_v53 = vpop.xlane.xlu1 %5674  ;;  %v5685_v44 = vpop.xlane.xlu0 %5684  ;;  %v5882_v51 = vadd.f32 %v9941_v61, %v5846_v1 }
 0xc1f   : > { %v6595_v14 = vpack.c.bf16 %v5877_v19, %v5876_v17  ;;  %v5847_v52 = vmul.f32 %v9937_v35, %v5811_v50  ;;  %7957 = vrsqrt.f32 %v5755_v32  ;;  %v5721_v16 = vmul.f32 0.03125, %v5675_v53 }
 0xc20   : > { %v7946_v18 = vpop.eup %7945  ;;  %7959 = vrsqrt.f32 %v5752_v62  ;;  %v5726_v11 = vmul.f32 0.03125, %v5685_v44  ;;  %v5844_v23 = vmul.f32 %v9937_v35, %v5808_v30 }
 0xc21   : > { %v7948_v24 = vpop.eup %7947  ;;  %6678 = vst [vmem:[%s8608_s7 + $0x10] sm:$0xff] %v6595_v14   ;;  %v5883_v2 = vadd.f32 %v9941_v61, %v5847_v52  ;;  %v5809_v57 = vmul.f32 %v7946_v18, %v9814_v29  ;;  %v5753_v12 = vadd.f32 1e-05, %v5721_v16 }
 0xc22   : > { %v5814_v49 = vmul.f32 %v7948_v24, %v9817_v3  ;;  %v5758_v9 = vadd.f32 1e-05, %v5726_v11  ;;  %v5687_v54 = vpop.xlane.xlu1 %5686  ;;  %v5681_v10 = vpop.xlane.xlu0 %5680  ;;  %v5880_v29 = vadd.f32 %v9941_v61, %v5844_v23 }
 0xc23   : > { %v6610_v45 = vpack.c.bf16 %v5883_v2, %v5882_v51  ;;  %v5845_v48 = vmul.f32 %v9937_v35, %v5809_v57  ;;  %7961 = vrsqrt.f32 %v5753_v12  ;;  %v5727_v60 = vmul.f32 0.03125, %v5687_v54 }
 0xc24   : > { %v7950_v0 = vpop.eup %7949  ;;  %v5850_v42 = vmul.f32 %v9937_v35, %v5814_v49  ;;  %7963 = vrsqrt.f32 %v5758_v9  ;;  %v5724_v63 = vmul.f32 0.03125, %v5681_v10 }
 0xc25   : > { %v7952_v46 = vpop.eup %7951  ;;  %6681 = vst [vmem:[%s8608_s7 + $0x28] sm:$0xff] %v6610_v45   ;;  %v5881_v6 = vadd.f32 %v9941_v61, %v5845_v48  ;;  %v5815_v3 = vmul.f32 %v7950_v0, %v9826_v56  ;;  %v5759_v4 = vadd.f32 1e-05, %v5727_v60 }
 0xc26   : > { %v5812_v25 = vmul.f32 %v7952_v46, %v9829_v43  ;;  %v5756_v8 = vadd.f32 1e-05, %v5724_v63  ;;  %v5683_v5 = vpop.xlane.xlu1 %5682  ;;  %v5693_v55 = vpop.xlane.xlu0 %5692  ;;  %v5886_v58 = vadd.f32 %v9941_v61, %v5850_v42 }
 0xc27   : > { %v6605_v41 = vpack.c.bf16 %v5881_v6, %v5880_v29  ;;  %v5851_v28 = vmul.f32 %v9937_v35, %v5815_v3  ;;  %7965 = vrsqrt.f32 %v5759_v4  ;;  %v5725_v1 = vmul.f32 0.03125, %v5683_v5 }
 0xc28   : > { %v7954_v40 = vpop.eup %7953  ;;  %7967 = vrsqrt.f32 %v5756_v8  ;;  %v5730_v17 = vmul.f32 0.03125, %v5693_v55  ;;  %v5848_v50 = vmul.f32 %v9937_v35, %v5812_v25 }
 0xc29   : > { %v7956_v19 = vpop.eup %7955  ;;  %6680 = vst [vmem:[%s8608_s7 + $0x20] sm:$0xff] %v6605_v41   ;;  %v5887_v56 = vadd.f32 %v9941_v61, %v5851_v28  ;;  %v5813_v43 = vmul.f32 %v7954_v40, %v9838_v22  ;;  %v5757_v32 = vadd.f32 1e-05, %v5725_v1 }
 0xc2a   : > { %v5818_v30 = vmul.f32 %v7956_v19, %v9841_v34  ;;  %v5762_v62 = vadd.f32 1e-05, %v5730_v17  ;;  %v5695_v53 = vpop.xlane.xlu1 %5694  ;;  %v5689_v44 = vpop.xlane.xlu0 %5688  ;;  %v5884_v22 = vadd.f32 %v9941_v61, %v5848_v50 }
 0xc2b   : > { %v6620_v14 = vpack.c.bf16 %v5887_v56, %v5886_v58  ;;  %v5849_v52 = vmul.f32 %v9937_v35, %v5813_v43  ;;  %7969 = vrsqrt.f32 %v5757_v32  ;;  %v5731_v16 = vmul.f32 0.03125, %v5695_v53 }
 0xc2c   : > { %v7958_v18 = vpop.eup %7957  ;;  %v5854_v51 = vmul.f32 %v9937_v35, %v5818_v30  ;;  %7971 = vrsqrt.f32 %v5762_v62  ;;  %v5728_v11 = vmul.f32 0.03125, %v5689_v44 }
 0xc2d   : > { %v7960_v24 = vpop.eup %7959  ;;  %6683 = vst [vmem:[%s8608_s7 + $0x38] sm:$0xff] %v6620_v14   ;;  %v5885_v2 = vadd.f32 %v9941_v61, %v5849_v52  ;;  %v5819_v34 = vmul.f32 %v7958_v18, %v9850_v26  ;;  %v5763_v23 = vadd.f32 1e-05, %v5731_v16 }
 0xc2e   : > { %v5816_v57 = vmul.f32 %v7960_v24, %v9853_v39  ;;  %v5760_v12 = vadd.f32 1e-05, %v5728_v11  ;;  %v5691_v49 = vpop.xlane.xlu1 %5690  ;;  %v5890_v48 = vadd.f32 %v9941_v61, %v5854_v51 }
 0xc2f   : > { %v6615_v9 = vpack.c.bf16 %v5885_v2, %v5884_v22  ;;  %v5855_v54 = vmul.f32 %v9937_v35, %v5819_v34  ;;  %7973 = vrsqrt.f32 %v5763_v23  ;;  %v5729_v10 = vmul.f32 0.03125, %v5691_v49 }
 0xc30   : > { %v7962_v45 = vpop.eup %7961  ;;  %v5852_v60 = vmul.f32 %v9937_v35, %v5816_v57  ;;  %7975 = vrsqrt.f32 %v5760_v12  ;;  %v5697_v0 = vpop.xlane.xlu0 %5696 }
 0xc31   : > { %v7964_v42 = vpop.eup %7963  ;;  %6682 = vst [vmem:[%s8608_s7 + $0x30] sm:$0xff] %v6615_v9   ;;  %v5891_v26 = vadd.f32 %v9941_v61, %v5855_v54  ;;  %v5817_v39 = vmul.f32 %v7962_v45, %v9862_v13  ;;  %v5761_v63 = vadd.f32 1e-05, %v5729_v10  ;;  %v5732_v46 = vmul.f32 0.03125, %v5697_v0 }
 0xc32   : > { %v5822_v29 = vmul.f32 %v7964_v42, %v9865_v7  ;;  %v5888_v8 = vadd.f32 %v9941_v61, %v5852_v60 }
 0xc33   : > { %v6630_v6 = vpack.c.bf16 %v5891_v26, %v5890_v48  ;;  %v5853_v3 = vmul.f32 %v9937_v35, %v5817_v39  ;;  %7977 = vrsqrt.f32 %v5761_v63  ;;  %v5764_v4 = vadd.f32 1e-05, %v5732_v46 }
 0xc34   : > { %v7966_v25 = vpop.eup %7965  ;;  %v5858_v5 = vmul.f32 %v9937_v35, %v5822_v29  ;;  %v5699_v55 = vpop.xlane.xlu1 %5698 }
 0xc35   : > { %v5701_v41 = vpop.xlane.xlu0 %5700  ;;  %v7968_v28 = vpop.eup %7967  ;;  %6685 = vst [vmem:[%s8608_s7 + $0x48] sm:$0xff] %v6630_v6   ;;  %v5889_v13 = vadd.f32 %v9941_v61, %v5853_v3  ;;  %v5823_v1 = vmul.f32 %v7966_v25, %v9874_v47  ;;  %7979 = vrsqrt.f32 %v5764_v4  ;;  %v5733_v7 = vmul.f32 0.03125, %v5699_v55 }
 0xc36   : > { %v5820_v40 = vmul.f32 %v7968_v28, %v9877_v37  ;;  %v5734_v58 = vmul.f32 0.03125, %v5701_v41  ;;  %v5894_v43 = vadd.f32 %v9941_v61, %v5858_v5 }
 0xc37   : > { %v6625_v17 = vpack.c.bf16 %v5889_v13, %v5888_v8  ;;  %v5859_v19 = vmul.f32 %v9937_v35, %v5823_v1  ;;  %v5765_v56 = vadd.f32 1e-05, %v5733_v7 }
 0xc38   : > { %v7970_v50 = vpop.eup %7969  ;;  %v5856_v32 = vmul.f32 %v9937_v35, %v5820_v40  ;;  %v5766_v30 = vadd.f32 1e-05, %v5734_v58  ;;  %v5703_v62 = vpop.xlane.xlu1 %5702 }
 0xc39   : > { %v7972_v53 = vpop.eup %7971  ;;  %6684 = vst [vmem:[%s8608_s7 + $0x40] sm:$0xff] %v6625_v17   ;;  %v5895_v47 = vadd.f32 %v9941_v61, %v5859_v19  ;;  %v5821_v44 = vmul.f32 %v7970_v50, %v9886_v27  ;;  %7981 = vrsqrt.f32 %v5765_v56  ;;  %v5735_v37 = vmul.f32 0.03125, %v5703_v62 }
 0xc3a   : > { %v5826_v14 = vmul.f32 %v7972_v53, %v9889_v59  ;;  %7983 = vrsqrt.f32 %v5766_v30  ;;  %v5892_v11 = vadd.f32 %v9941_v61, %v5856_v32 }
 0xc3b   : > { %v6640_v52 = vpack.c.bf16 %v5895_v47, %v5894_v43  ;;  %v5857_v16 = vmul.f32 %v9937_v35, %v5821_v44  ;;  %v5767_v18 = vadd.f32 1e-05, %v5735_v37 }
 0xc3c   : > { %v7974_v51 = vpop.eup %7973  ;;  %v5862_v2 = vmul.f32 %v9937_v35, %v5826_v14 }
 0xc3d   : > { %v7976_v24 = vpop.eup %7975  ;;  %6687 = vst [vmem:[%s8608_s7 + $0x58] sm:$0xff] %v6640_v52   ;;  %v5893_v22 = vadd.f32 %v9941_v61, %v5857_v16  ;;  %v5827_v27 = vmul.f32 %v7974_v51, %v9898_v36  ;;  %7985 = vrsqrt.f32 %v5767_v18 }
 0xc3e   : > { %v5824_v59 = vmul.f32 %v7976_v24, %v9901_v31  ;;  %v5898_v12 = vadd.f32 %v9941_v61, %v5862_v2 }
 0xc3f   : > { %v6635_v34 = vpack.c.bf16 %v5893_v22, %v5892_v11  ;;  %v5863_v23 = vmul.f32 %v9937_v35, %v5827_v27 }
 0xc40   : > { %v7978_v57 = vpop.eup %7977  ;;  %v5860_v9 = vmul.f32 %v9937_v35, %v5824_v59 }
 0xc41   : > { %6686 = vst [vmem:[%s8608_s7 + $0x50] sm:$0xff] %v6635_v34   ;;  %v5899_v49 = vadd.f32 %v9941_v61, %v5863_v23  ;;  %v5825_v54 = vmul.f32 %v7978_v57, %v9909_v20 }
 0xc42   : > { %v7980_v10 = vpop.eup %7979  ;;  %v5896_v48 = vadd.f32 %v9941_v61, %v5860_v9 }
 0xc43   : > { %v6650_v45 = vpack.c.bf16 %v5899_v49, %v5898_v12  ;;  %v5861_v36 = vmul.f32 %v9937_v35, %v5825_v54  ;;  %v5828_v31 = vmul.f32 %v7980_v10, %v9913_v33 }
 0xc45   : > { %6689 = vst [vmem:[%s8608_s7 + $0x68] sm:$0xff] %v6650_v45   ;;  %v5897_v60 = vadd.f32 %v9941_v61, %v5861_v36  ;;  %v5864_v39 = vmul.f32 %v9937_v35, %v5828_v31 }
 0xc46   : > { %v7982_v0 = vpop.eup %7981 }
 0xc47   : > { %v7984_v42 = vpop.eup %7983  ;;  %v6645_v26 = vpack.c.bf16 %v5897_v60, %v5896_v48  ;;  %v5829_v20 = vmul.f32 %v7982_v0, %v9922_v38  ;;  %v5900_v29 = vadd.f32 %v9941_v61, %v5864_v39 }
 0xc48   : > { %v5830_v63 = vmul.f32 %v7984_v42, %v9925_v15 }
 0xc49   : > { %6688 = vst [vmem:[%s8608_s7 + $0x60] sm:$0xff] %v6645_v26   ;;  %v5865_v33 = vmul.f32 %v9937_v35, %v5829_v20 }
 0xc4a   : > { %v7986_v46 = vpop.eup %7985  ;;  %v5866_v3 = vmul.f32 %v9937_v35, %v5830_v63 }
 0xc4b   : > { %v5901_v6 = vadd.f32 %v9941_v61, %v5865_v33  ;;  %v5831_v4 = vmul.f32 %v7986_v46, %v9933_v21 }
 0xc4c   : > { %v5902_v15 = vadd.f32 %v9941_v61, %v5866_v3 }
 0xc4d   : > { %v6655_v25 = vpack.c.bf16 %v5901_v6, %v5900_v29  ;;  %v5867_v38 = vmul.f32 %v9937_v35, %v5831_v4 }
 0xc4f   : > { %6690 = vst [vmem:[%s8608_s7 + $0x70] sm:$0xff] %v6655_v25   ;;  %v5903_v8 = vadd.f32 %v9941_v61, %v5867_v38 }
 0xc51   : > { %v6660_v21 = vpack.c.bf16 %v5903_v8, %v5902_v15 }
 0xc53   : > { %6691 = vst [vmem:[%s8608_s7 + $0x78] sm:$0xff] %v6660_v21  }
 0xc54   : > { %8141 = shalt.err (!%p8138_p12)
}
 0xc55   : > { %s8142_s22 = scalar_lea.hbm %s10057_s13, 2048  ;;  %s8146_s23 = scalar_lea.hbm %s10114_s6, 4096 }
 0xc56   : > { %p8143_p3 = scmp.ne.s32.totalorder %s10057_s13, %s8142_s22  ;;  %p8147_p9 = scmp.lt.s32.totalorder %s10057_s13, %s10114_s6 }
 0xc57   : > { %p8148_p1 = scmp.lt.s32.totalorder %s8146_s23, %s8142_s22 }
 0xc58   : > { %p8144_p5 = pnand %p8143_p3, %p8394_p13 }
 0xc59   : > { %p8149_p4 = por %p8148_p1, %p8147_p9 }
 0xc5a   : > { %p8145_p7 = pneg %p8144_p5 }
 0xc5c   : > { %p8150_p8 = pnand %p8149_p4, %p8145_p7 }
 0xc5e   : > { %8153 = shalt.err (!%p8150_p8)
}
 0xc5f   : > { %s8237_s7 = smov 64   ;;  %s8238_s9 = smov 4  }
 0xc60   : > { %7265 = dma.vmem_to_hbm [thread:$0]  (%p8394_p13), %s10059_s12, 2048, %s10057_s13, %s6065_s8, %s8237_s7, %s8237_s7, %s8238_s9  }
 0xc61 PF: > { %s6095_s20 = sand.u32 1, %s8198_s24   ;;  %p10215_p0 = scmp.ne.s32.totalorder %s10150_s10, 0 }
 0xc62   : > { %p10216_p11 = scmp.ge.s32.totalorder %s8218_s0, 2  ;;  %s6096_s29 = scalar_lea.sflag [#allocation9], %s6095_s20 }
 0xc64   : > { %p7285_p2 = pnand %p10216_p11, %p10215_p0 }
 0xc66   : > { %p7286_p10 = pneg %p7285_p2 }
 0xc68   : > { %8193 = dma.done.wait (%p7286_p10), %s6096_s29, 2048  }
 0xc69   : > { %8195 = vsyncadd (%p7286_p10), %s6096_s29, 4294965248  ;;  %s28_s0 = sadd.s32 1, %s8218_s0   ;;  %s10217_s24 = smov %s8202_s25 }
 0xc6a   : > { %p25_p6 = scmp.ge.s32.totalorder %s28_s0, 4   ;;  %s10218_s25 = smov %s8206_s26 }
 0xc6b   : > { %s10219_s26 = smov %s8406_s21  ;;  %s10220_s27 = smov %s8214_s28 }
 0xc6c   : > { %s10221_s28 = smov %s10223_s15  ;;  %27 = sbr.rel (!%p25_p6) target bundleno = 15 (0xf), region = 113 }
 0xc71   :  { %6101 = vsyncpa [#allocation8], 1 }
 0xc72   :  { %6103 = vsyncpa [#allocation8 + $0x1], 1 }
 0xc73   :  { %6104 = vsyncpa [#allocation11], 1 }
 0xc74   :  { %6105 = vsyncpa [#allocation14], 1 }
 0xc75   :  { %6106 = vsyncpa [#allocation9], 1 }
 0xc76   :  { %6108 = vsyncpa [#allocation9 + $0x1], 1 }

</bundles_post_ra>
